<compile_context>
chip_gen: v7x
topology: tpu7x:2x2x1
jax: 0.10.0
libtpu: 0.0.40
codegen_flags: <defaults>
</compile_context>

<pallas_src>
import functools

import jax
import jax.numpy as jnp
from jax.experimental import pallas as pl
from jax.experimental.pallas import tpu as pltpu

BN_EPS = 1e-5


def _conv_bn_glu_kernel(*refs, N, H, W, glu, has_c, has_res):
    """Fused: zero-pad (+ optional embedding broadcast/concat) -> 3x3 conv as a single
    im2col MXU matmul (bf16 operands, f32 accumulate) -> BatchNorm (batch stats,
    single scale/shift FMA) -> GLU | identity -> optional residual add."""
    it = iter(refs)
    x_ref = next(it)                              # (N, H, W, Cx) f32
    c_ref = next(it) if has_c else None           # (N, 1, 1, emb) f32
    w_ref = next(it)                              # (9*Cin, Cout) bf16
    g_ref = next(it)                              # (1, Cout) f32
    b_ref = next(it)                              # (1, Cout) f32
    r_ref = next(it) if has_res else None         # (N, H, W, out_c) f32
    o_ref = next(it)                              # (N, H, W, out_c) f32

    x = x_ref[...].astype(jnp.float32)
    if has_c:
        emb = c_ref.shape[-1]
        cmap = jnp.broadcast_to(c_ref[...].astype(jnp.float32), (N, H, W, emb))
        x = jnp.concatenate([cmap, x], axis=-1)   # c channels first: torch.cat((c, h), 1)
    C = x.shape[-1]

    # Fused zero padding (pad=1) -- no wrapper-side jnp.pad / HBM round trip.
    zc = jnp.zeros((N, H, 1, C), jnp.float32)
    xp = jnp.concatenate([zc, x, zc], axis=2)     # (N, H,   W+2, C)
    zr = jnp.zeros((N, 1, W + 2, C), jnp.float32)
    xp = jnp.concatenate([zr, xp, zr], axis=1)    # (N, H+2, W+2, C)

    # im2col: one (N*H*W, 9*C) bf16 slab -> a single wide MXU matmul (K = 9*C),
    # replacing the previous 9 narrow per-tap matmuls + zero-init add chain.
    windows = [xp[:, dy:dy + H, dx:dx + W, :].astype(jnp.bfloat16)
               for dy in range(3) for dx in range(3)]
    patches = jnp.concatenate(windows, axis=-1).reshape(N * H * W, 9 * C)

    acc = jnp.dot(patches, w_ref[...], preferred_element_type=jnp.float32)

    # BatchNorm2d, training-mode batch statistics over (N, H, W) per channel:
    # one-pass sum / sum-of-squares, folded with gamma/beta into one FMA pass.
    Cout = acc.shape[-1]
    m = float(N * H * W)
    s = jnp.sum(acc, axis=0, keepdims=True)
    ss = jnp.sum(acc * acc, axis=0, keepdims=True)
    mean = s / m
    var = jnp.maximum(ss / m - mean * mean, 0.0)
    scale = g_ref[...] * jax.lax.rsqrt(var + BN_EPS)
    shift = b_ref[...] - mean * scale
    y = acc * scale + shift

    if glu:                                       # nn.GLU over channel dim
        half = Cout // 2
        y = y[:, :half] * jax.nn.sigmoid(y[:, half:])
        out_c = half
    else:
        out_c = Cout

    y = y.reshape(N, H, W, out_c)
    if has_res:
        y = y + r_ref[...].astype(jnp.float32)
    # TODO(synk): out_c (<128) makes this a masked store; a lane-dense (N*H, W*out_c)
    # layout needs a merge-into-lanes relayout that is not reliably lowered, so the
    # natural NHWC store is kept.
    o_ref[...] = y.astype(o_ref.dtype)


def _prep_w(w):
    """(3, 3, Cin, Cout) f32 -> (9*Cin, Cout) bf16, tap-major to match kernel im2col order."""
    kh, kw, cin, cout = w.shape
    return w.reshape(kh * kw * cin, cout).astype(jnp.bfloat16)


def _vmem_limit_bytes(N, H, W, C, Cout):
    """Size the scoped-VMEM limit from the actual in-kernel buffers (with headroom)."""
    m = N * H * W
    est = (m * C * 4                          # input (incl. fused embedding channels)
           + N * (H + 2) * (W + 2) * C * 4    # in-kernel zero-padded copy (f32)
           + m * 9 * C * 2                    # bf16 im2col slab
           + 9 * C * Cout * 2                 # bf16 weights
           + m * Cout * 4 * 2                 # f32 accumulator + BN/GLU temps
           + m * Cout * 4)                    # output
    # >= default scoped limit, <= ~56 MiB so it still fits v7x's 64 MiB physical VMEM.
    return int(min(max(2 * est, 32 * 1024 * 1024), 56 * 1024 * 1024))


def conv3x3_bn(x, w, gamma, beta, *, glu, c=None, residual=None):
    """x: (N, H, W, Cx) NHWC f32; w: (3, 3, Cin, Cout) f32 (Cin = Cx, or emb+Cx if c given).
    c: optional (N, emb) text embedding, broadcast + concatenated inside the kernel.
    Returns (N, H, W, Cout//2 if glu else Cout) f32."""
    N, H, W, _ = x.shape
    cin = w.shape[-2]
    cout = w.shape[-1]
    out_c = cout // 2 if glu else cout

    args = [x]
    if c is not None:
        args.append(c.reshape(N, 1, 1, c.shape[-1]).astype(jnp.float32))
    args += [_prep_w(w),
             gamma.reshape(1, cout).astype(jnp.float32),
             beta.reshape(1, cout).astype(jnp.float32)]
    if residual is not None:
        args.append(residual)

    kernel = functools.partial(_conv_bn_glu_kernel, N=N, H=H, W=W, glu=glu,
                               has_c=c is not None, has_res=residual is not None)
    vmem = pl.BlockSpec(memory_space=pltpu.MemorySpace.VMEM)
    return pl.pallas_call(
        kernel,
        out_shape=jax.ShapeDtypeStruct((N, H, W, out_c), jnp.float32),
        in_specs=[vmem] * len(args),
        out_specs=vmem,
        compiler_params=pltpu.CompilerParams(
            vmem_limit_bytes=_vmem_limit_bytes(N, H, W, cin, cout)),
    )(*args)


def init_params(key, mul_channel, emb_dim, num_residual, scale=0.05):
    ks = jax.random.split(key, 2 + 2 * num_residual)
    p = {}
    # jointConv = Block3x3_relu(mul + emb, mul): conv -> 2*mul, BN, GLU
    # (Cin ordering of the weight = [emb channels, h channels] to match torch.cat((c,h),1))
    p["joint_w"] = scale * jax.random.normal(
        ks[0], (3, 3, emb_dim + mul_channel, 2 * mul_channel), jnp.float32)
    p["joint_g"] = jnp.ones((2 * mul_channel,), jnp.float32)
    p["joint_b"] = jnp.zeros((2 * mul_channel,), jnp.float32)
    # residual blocks
    p["res"] = []
    for i in range(num_residual):
        blk = {
            "w1": scale * jax.random.normal(
                ks[2 + 2 * i], (3, 3, mul_channel, 2 * mul_channel), jnp.float32),
            "g1": jnp.ones((2 * mul_channel,), jnp.float32),
            "b1": jnp.zeros((2 * mul_channel,), jnp.float32),
            "w2": scale * jax.random.normal(
                ks[3 + 2 * i], (3, 3, mul_channel, mul_channel), jnp.float32),
            "g2": jnp.ones((mul_channel,), jnp.float32),
            "b2": jnp.zeros((mul_channel,), jnp.float32),
        }
        p["res"].append(blk)
    # upBlock(mul, mul//2): upsample x2 -> conv -> 2*(mul//2) == mul, BN, GLU
    p["up_w"] = scale * jax.random.normal(
        ks[1], (3, 3, mul_channel, mul_channel), jnp.float32)
    p["up_g"] = jnp.ones((mul_channel,), jnp.float32)
    p["up_b"] = jnp.zeros((mul_channel,), jnp.float32)
    return p


def gan_middle_forward(params, h_nchw, c):
    """h_nchw: (N, mul_channel, S, S) NCHW; c: (N, emb_dim). Returns NCHW (N, mul//2, 2S, 2S)."""
    h = jnp.transpose(h_nchw, (0, 2, 3, 1)).astype(jnp.float32)   # NCHW -> NHWC

    # jointConv: the spatial broadcast of c and the channel concat are fused into the
    # kernel -- no (N, H, W, emb) map is ever materialized in HBM.
    out = conv3x3_bn(h, params["joint_w"], params["joint_g"], params["joint_b"],
                     glu=True, c=c)

    # residual blocks: conv+BN+GLU, then conv+BN with the residual add fused in-kernel.
    for blk in params["res"]:
        r = out
        t = conv3x3_bn(out, blk["w1"], blk["g1"], blk["b1"], glu=True)
        out = conv3x3_bn(t, blk["w2"], blk["g2"], blk["b2"], glu=False, residual=r)

    # upBlock: nearest 2x upsample, then the fused conv+BN+GLU kernel.
    # TODO(synk): fuse the 2x nearest upsample into the up-conv kernel (needs strided /
    # interleaved sublane writes) to remove one HBM round trip of the 4x-larger tensor.
    up = jnp.repeat(jnp.repeat(out, 2, axis=1), 2, axis=2)
    out = conv3x3_bn(up, params["up_w"], params["up_g"], params["up_b"], glu=True)

    return jnp.transpose(out, (0, 3, 1, 2))                       # NHWC -> NCHW


if __name__ == "__main__":
    MUL_CHANNEL = 16     # cfg-dependent; small for the demo
    EMB_DIM = 8          # cfg.GAN.EMBEDDING_DIM
    NUM_RESIDUAL = 2     # cfg.GAN.R_NUM
    N, S = 2, 8

    key = jax.random.PRNGKey(0)
    kp, kh, kc = jax.random.split(key, 3)
    params = init_params(kp, MUL_CHANNEL, EMB_DIM, NUM_RESIDUAL)
    h = jax.random.normal(kh, (N, MUL_CHANNEL, S, S), jnp.float32)   # NCHW, like PyTorch
    c = jax.random.normal(kc, (N, EMB_DIM), jnp.float32)

    fwd = jax.jit(gan_middle_forward)
    out = fwd(params, h, c)
    out = jax.block_until_ready(out)

    expected = (N, MUL_CHANNEL // 2, 2 * S, 2 * S)
    assert out.shape == expected, (out.shape, expected)
    assert bool(jnp.all(jnp.isfinite(out)))
    print("KERNEL_OK")
</pallas_src>

<mosaic_0001>
module attributes {stable_mosaic.version = 11 : i64} {
  func.func @_conv_bn_glu_kernel(%arg0: memref<2x8x8x16xf32, #tpu.memory_space<vmem>>, %arg1: memref<144x32xbf16, #tpu.memory_space<vmem>>, %arg2: memref<1x32xf32, #tpu.memory_space<vmem>>, %arg3: memref<1x32xf32, #tpu.memory_space<vmem>>, %arg4: memref<2x8x8x16xf32, #tpu.memory_space<vmem>>) attributes {dimension_semantics = [], scalar_prefetch = 0 : i64, scratch_operands = 0 : i64, tpu.core_type = #tpu.core_type<tc>} {
    %c0 = arith.constant 0 : index
    %c0_0 = arith.constant 0 : index
    %c0_1 = arith.constant 0 : index
    %c0_2 = arith.constant 0 : index
    %0 = vector.load %arg0[%c0, %c0_0, %c0_1, %c0_2] : memref<2x8x8x16xf32, #tpu.memory_space<vmem>>, vector<2x8x8x16xf32>
    %cst = arith.constant 0.000000e+00 : f32
    %1 = vector.broadcast %cst : f32 to vector<2x8x1x16xf32>
    %2 = tpu.concatenate %1, %0, %1 in 2 : vector<2x8x1x16xf32>, vector<2x8x8x16xf32>, vector<2x8x1x16xf32> -> vector<2x8x10x16xf32>
    %cst_3 = arith.constant 0.000000e+00 : f32
    %3 = vector.broadcast %cst_3 : f32 to vector<2x1x10x16xf32>
    %4 = tpu.concatenate %3, %2, %3 in 1 : vector<2x1x10x16xf32>, vector<2x8x10x16xf32>, vector<2x1x10x16xf32> -> vector<2x10x10x16xf32>
    %5 = vector.extract_strided_slice %4 {offsets = [0, 0, 0, 0], sizes = [2, 8, 8, 16], strides = [1, 1, 1, 1]} : vector<2x10x10x16xf32> to vector<2x8x8x16xf32>
    %6 = arith.truncf %5 : vector<2x8x8x16xf32> to vector<2x8x8x16xbf16>
    %7 = vector.extract_strided_slice %4 {offsets = [0, 0, 1, 0], sizes = [2, 8, 8, 16], strides = [1, 1, 1, 1]} : vector<2x10x10x16xf32> to vector<2x8x8x16xf32>
    %8 = arith.truncf %7 : vector<2x8x8x16xf32> to vector<2x8x8x16xbf16>
    %9 = vector.extract_strided_slice %4 {offsets = [0, 0, 2, 0], sizes = [2, 8, 8, 16], strides = [1, 1, 1, 1]} : vector<2x10x10x16xf32> to vector<2x8x8x16xf32>
    %10 = arith.truncf %9 : vector<2x8x8x16xf32> to vector<2x8x8x16xbf16>
    %11 = vector.extract_strided_slice %4 {offsets = [0, 1, 0, 0], sizes = [2, 8, 8, 16], strides = [1, 1, 1, 1]} : vector<2x10x10x16xf32> to vector<2x8x8x16xf32>
    %12 = arith.truncf %11 : vector<2x8x8x16xf32> to vector<2x8x8x16xbf16>
    %13 = vector.extract_strided_slice %4 {offsets = [0, 1, 1, 0], sizes = [2, 8, 8, 16], strides = [1, 1, 1, 1]} : vector<2x10x10x16xf32> to vector<2x8x8x16xf32>
    %14 = arith.truncf %13 : vector<2x8x8x16xf32> to vector<2x8x8x16xbf16>
    %15 = vector.extract_strided_slice %4 {offsets = [0, 1, 2, 0], sizes = [2, 8, 8, 16], strides = [1, 1, 1, 1]} : vector<2x10x10x16xf32> to vector<2x8x8x16xf32>
    %16 = arith.truncf %15 : vector<2x8x8x16xf32> to vector<2x8x8x16xbf16>
    %17 = vector.extract_strided_slice %4 {offsets = [0, 2, 0, 0], sizes = [2, 8, 8, 16], strides = [1, 1, 1, 1]} : vector<2x10x10x16xf32> to vector<2x8x8x16xf32>
    %18 = arith.truncf %17 : vector<2x8x8x16xf32> to vector<2x8x8x16xbf16>
    %19 = vector.extract_strided_slice %4 {offsets = [0, 2, 1, 0], sizes = [2, 8, 8, 16], strides = [1, 1, 1, 1]} : vector<2x10x10x16xf32> to vector<2x8x8x16xf32>
    %20 = arith.truncf %19 : vector<2x8x8x16xf32> to vector<2x8x8x16xbf16>
    %21 = vector.extract_strided_slice %4 {offsets = [0, 2, 2, 0], sizes = [2, 8, 8, 16], strides = [1, 1, 1, 1]} : vector<2x10x10x16xf32> to vector<2x8x8x16xf32>
    %22 = arith.truncf %21 : vector<2x8x8x16xf32> to vector<2x8x8x16xbf16>
    %23 = tpu.concatenate %6, %8, %10, %12, %14, %16, %18, %20, %22 in 3 : vector<2x8x8x16xbf16>, vector<2x8x8x16xbf16>, vector<2x8x8x16xbf16>, vector<2x8x8x16xbf16>, vector<2x8x8x16xbf16>, vector<2x8x8x16xbf16>, vector<2x8x8x16xbf16>, vector<2x8x8x16xbf16>, vector<2x8x8x16xbf16> -> vector<2x8x8x144xbf16>
    %24 = vector.shape_cast %23 : vector<2x8x8x144xbf16> to vector<128x144xbf16>
    %c0_4 = arith.constant 0 : index
    %c0_5 = arith.constant 0 : index
    %25 = vector.load %arg1[%c0_4, %c0_5] : memref<144x32xbf16, #tpu.memory_space<vmem>>, vector<144x32xbf16>
    %cst_6 = arith.constant dense<0.000000e+00> : vector<128x32xf32>
    %26 = tpu.matmul %24, %25, %cst_6 {dimension_numbers = #tpu.dot_dimension_numbers<[1], [0], [0], [1], [0, 0, 1, 1], [], []>} : vector<128x144xbf16>, vector<144x32xbf16>, vector<128x32xf32> -> vector<128x32xf32>
    %cst_7 = arith.constant dense<0.000000e+00> : vector<32xf32>
    %27 = vector.multi_reduction <add>, %26, %cst_7 [0] : vector<128x32xf32> to vector<32xf32>
    %28 = vector.shape_cast %27 : vector<32xf32> to vector<1x32xf32>
    %29 = arith.mulf %26, %26 : vector<128x32xf32>
    %cst_8 = arith.constant dense<0.000000e+00> : vector<32xf32>
    %30 = vector.multi_reduction <add>, %29, %cst_8 [0] : vector<128x32xf32> to vector<32xf32>
    %31 = vector.shape_cast %30 : vector<32xf32> to vector<1x32xf32>
    %cst_9 = arith.constant 1.280000e+02 : f32
    %32 = vector.broadcast %cst_9 : f32 to vector<1x32xf32>
    %33 = arith.divf %28, %32 : vector<1x32xf32>
    %cst_10 = arith.constant 1.280000e+02 : f32
    %34 = vector.broadcast %cst_10 : f32 to vector<1x32xf32>
    %35 = arith.divf %31, %34 : vector<1x32xf32>
    %36 = arith.mulf %33, %33 : vector<1x32xf32>
    %37 = arith.subf %35, %36 : vector<1x32xf32>
    %cst_11 = arith.constant 0.000000e+00 : f32
    %38 = vector.broadcast %cst_11 : f32 to vector<1x32xf32>
    %39 = arith.maximumf %37, %38 : vector<1x32xf32>
    %c0_12 = arith.constant 0 : index
    %c0_13 = arith.constant 0 : index
    %40 = vector.load %arg2[%c0_12, %c0_13] : memref<1x32xf32, #tpu.memory_space<vmem>>, vector<1x32xf32>
    %cst_14 = arith.constant 9.99999974E-6 : f32
    %41 = vector.broadcast %cst_14 : f32 to vector<1x32xf32>
    %42 = arith.addf %39, %41 : vector<1x32xf32>
    %43 = math.rsqrt %42 : vector<1x32xf32>
    %44 = arith.mulf %40, %43 : vector<1x32xf32>
    %c0_15 = arith.constant 0 : index
    %c0_16 = arith.constant 0 : index
    %45 = vector.load %arg3[%c0_15, %c0_16] : memref<1x32xf32, #tpu.memory_space<vmem>>, vector<1x32xf32>
    %46 = arith.mulf %33, %44 : vector<1x32xf32>
    %47 = arith.subf %45, %46 : vector<1x32xf32>
    %48 = vector.broadcast %44 : vector<1x32xf32> to vector<128x32xf32>
    %49 = arith.mulf %26, %48 : vector<128x32xf32>
    %50 = vector.broadcast %47 : vector<1x32xf32> to vector<128x32xf32>
    %51 = arith.addf %49, %50 : vector<128x32xf32>
    %52 = vector.extract_strided_slice %51 {offsets = [0, 0], sizes = [128, 16], strides = [1, 1]} : vector<128x32xf32> to vector<128x16xf32>
    %53 = vector.extract_strided_slice %51 {offsets = [0, 16], sizes = [128, 16], strides = [1, 1]} : vector<128x32xf32> to vector<128x16xf32>
    %54 = arith.negf %53 : vector<128x16xf32>
    %55 = math.exp %54 : vector<128x16xf32>
    %cst_17 = arith.constant 1.000000e+00 : f32
    %56 = vector.broadcast %cst_17 : f32 to vector<128x16xf32>
    %57 = arith.addf %56, %55 : vector<128x16xf32>
    %58 = arith.divf %56, %57 : vector<128x16xf32>
    %59 = arith.mulf %52, %58 : vector<128x16xf32>
    %60 = vector.shape_cast %59 : vector<128x16xf32> to vector<2x8x8x16xf32>
    %c0_18 = arith.constant 0 : index
    %c0_19 = arith.constant 0 : index
    %c0_20 = arith.constant 0 : index
    %c0_21 = arith.constant 0 : index
    %61 = vector.load %arg4[%c0_18, %c0_19, %c0_20, %c0_21] : memref<2x8x8x16xf32, #tpu.memory_space<vmem>>, vector<2x8x8x16xf32>
    tpu.vector_store %arg4[%c0_18, %c0_19, %c0_20, %c0_21], %60 {strides = array<i32>} : memref<2x8x8x16xf32, #tpu.memory_space<vmem>>, vector<2x8x8x16xf32>,
    return
  }
}

module attributes {stable_mosaic.version = 11 : i64} {
  func.func @_conv_bn_glu_kernel(%arg0: memref<2x8x8x16xf32, #tpu.memory_space<vmem>>, %arg1: memref<144x16xbf16, #tpu.memory_space<vmem>>, %arg2: memref<1x16xf32, #tpu.memory_space<vmem>>, %arg3: memref<1x16xf32, #tpu.memory_space<vmem>>, %arg4: memref<2x8x8x16xf32, #tpu.memory_space<vmem>>, %arg5: memref<2x8x8x16xf32, #tpu.memory_space<vmem>>) attributes {dimension_semantics = [], scalar_prefetch = 0 : i64, scratch_operands = 0 : i64, tpu.core_type = #tpu.core_type<tc>} {
    %c0 = arith.constant 0 : index
    %c0_0 = arith.constant 0 : index
    %c0_1 = arith.constant 0 : index
    %c0_2 = arith.constant 0 : index
    %0 = vector.load %arg0[%c0, %c0_0, %c0_1, %c0_2] : memref<2x8x8x16xf32, #tpu.memory_space<vmem>>, vector<2x8x8x16xf32>
    %cst = arith.constant 0.000000e+00 : f32
    %1 = vector.broadcast %cst : f32 to vector<2x8x1x16xf32>
    %2 = tpu.concatenate %1, %0, %1 in 2 : vector<2x8x1x16xf32>, vector<2x8x8x16xf32>, vector<2x8x1x16xf32> -> vector<2x8x10x16xf32>
    %cst_3 = arith.constant 0.000000e+00 : f32
    %3 = vector.broadcast %cst_3 : f32 to vector<2x1x10x16xf32>
    %4 = tpu.concatenate %3, %2, %3 in 1 : vector<2x1x10x16xf32>, vector<2x8x10x16xf32>, vector<2x1x10x16xf32> -> vector<2x10x10x16xf32>
    %5 = vector.extract_strided_slice %4 {offsets = [0, 0, 0, 0], sizes = [2, 8, 8, 16], strides = [1, 1, 1, 1]} : vector<2x10x10x16xf32> to vector<2x8x8x16xf32>
    %6 = arith.truncf %5 : vector<2x8x8x16xf32> to vector<2x8x8x16xbf16>
    %7 = vector.extract_strided_slice %4 {offsets = [0, 0, 1, 0], sizes = [2, 8, 8, 16], strides = [1, 1, 1, 1]} : vector<2x10x10x16xf32> to vector<2x8x8x16xf32>
    %8 = arith.truncf %7 : vector<2x8x8x16xf32> to vector<2x8x8x16xbf16>
    %9 = vector.extract_strided_slice %4 {offsets = [0, 0, 2, 0], sizes = [2, 8, 8, 16], strides = [1, 1, 1, 1]} : vector<2x10x10x16xf32> to vector<2x8x8x16xf32>
    %10 = arith.truncf %9 : vector<2x8x8x16xf32> to vector<2x8x8x16xbf16>
    %11 = vector.extract_strided_slice %4 {offsets = [0, 1, 0, 0], sizes = [2, 8, 8, 16], strides = [1, 1, 1, 1]} : vector<2x10x10x16xf32> to vector<2x8x8x16xf32>
    %12 = arith.truncf %11 : vector<2x8x8x16xf32> to vector<2x8x8x16xbf16>
    %13 = vector.extract_strided_slice %4 {offsets = [0, 1, 1, 0], sizes = [2, 8, 8, 16], strides = [1, 1, 1, 1]} : vector<2x10x10x16xf32> to vector<2x8x8x16xf32>
    %14 = arith.truncf %13 : vector<2x8x8x16xf32> to vector<2x8x8x16xbf16>
    %15 = vector.extract_strided_slice %4 {offsets = [0, 1, 2, 0], sizes = [2, 8, 8, 16], strides = [1, 1, 1, 1]} : vector<2x10x10x16xf32> to vector<2x8x8x16xf32>
    %16 = arith.truncf %15 : vector<2x8x8x16xf32> to vector<2x8x8x16xbf16>
    %17 = vector.extract_strided_slice %4 {offsets = [0, 2, 0, 0], sizes = [2, 8, 8, 16], strides = [1, 1, 1, 1]} : vector<2x10x10x16xf32> to vector<2x8x8x16xf32>
    %18 = arith.truncf %17 : vector<2x8x8x16xf32> to vector<2x8x8x16xbf16>
    %19 = vector.extract_strided_slice %4 {offsets = [0, 2, 1, 0], sizes = [2, 8, 8, 16], strides = [1, 1, 1, 1]} : vector<2x10x10x16xf32> to vector<2x8x8x16xf32>
    %20 = arith.truncf %19 : vector<2x8x8x16xf32> to vector<2x8x8x16xbf16>
    %21 = vector.extract_strided_slice %4 {offsets = [0, 2, 2, 0], sizes = [2, 8, 8, 16], strides = [1, 1, 1, 1]} : vector<2x10x10x16xf32> to vector<2x8x8x16xf32>
    %22 = arith.truncf %21 : vector<2x8x8x16xf32> to vector<2x8x8x16xbf16>
    %23 = tpu.concatenate %6, %8, %10, %12, %14, %16, %18, %20, %22 in 3 : vector<2x8x8x16xbf16>, vector<2x8x8x16xbf16>, vector<2x8x8x16xbf16>, vector<2x8x8x16xbf16>, vector<2x8x8x16xbf16>, vector<2x8x8x16xbf16>, vector<2x8x8x16xbf16>, vector<2x8x8x16xbf16>, vector<2x8x8x16xbf16> -> vector<2x8x8x144xbf16>
    %24 = vector.shape_cast %23 : vector<2x8x8x144xbf16> to vector<128x144xbf16>
    %c0_4 = arith.constant 0 : index
    %c0_5 = arith.constant 0 : index
    %25 = vector.load %arg1[%c0_4, %c0_5] : memref<144x16xbf16, #tpu.memory_space<vmem>>, vector<144x16xbf16>
    %cst_6 = arith.constant dense<0.000000e+00> : vector<128x16xf32>
    %26 = tpu.matmul %24, %25, %cst_6 {dimension_numbers = #tpu.dot_dimension_numbers<[1], [0], [0], [1], [0, 0, 1, 1], [], []>} : vector<128x144xbf16>, vector<144x16xbf16>, vector<128x16xf32> -> vector<128x16xf32>
    %cst_7 = arith.constant dense<0.000000e+00> : vector<16xf32>
    %27 = vector.multi_reduction <add>, %26, %cst_7 [0] : vector<128x16xf32> to vector<16xf32>
    %28 = vector.shape_cast %27 : vector<16xf32> to vector<1x16xf32>
    %29 = arith.mulf %26, %26 : vector<128x16xf32>
    %cst_8 = arith.constant dense<0.000000e+00> : vector<16xf32>
    %30 = vector.multi_reduction <add>, %29, %cst_8 [0] : vector<128x16xf32> to vector<16xf32>
    %31 = vector.shape_cast %30 : vector<16xf32> to vector<1x16xf32>
    %cst_9 = arith.constant 1.280000e+02 : f32
    %32 = vector.broadcast %cst_9 : f32 to vector<1x16xf32>
    %33 = arith.divf %28, %32 : vector<1x16xf32>
    %cst_10 = arith.constant 1.280000e+02 : f32
    %34 = vector.broadcast %cst_10 : f32 to vector<1x16xf32>
    %35 = arith.divf %31, %34 : vector<1x16xf32>
    %36 = arith.mulf %33, %33 : vector<1x16xf32>
    %37 = arith.subf %35, %36 : vector<1x16xf32>
    %cst_11 = arith.constant 0.000000e+00 : f32
    %38 = vector.broadcast %cst_11 : f32 to vector<1x16xf32>
    %39 = arith.maximumf %37, %38 : vector<1x16xf32>
    %c0_12 = arith.constant 0 : index
    %c0_13 = arith.constant 0 : index
    %40 = vector.load %arg2[%c0_12, %c0_13] : memref<1x16xf32, #tpu.memory_space<vmem>>, vector<1x16xf32>
    %cst_14 = arith.constant 9.99999974E-6 : f32
    %41 = vector.broadcast %cst_14 : f32 to vector<1x16xf32>
    %42 = arith.addf %39, %41 : vector<1x16xf32>
    %43 = math.rsqrt %42 : vector<1x16xf32>
    %44 = arith.mulf %40, %43 : vector<1x16xf32>
    %c0_15 = arith.constant 0 : index
    %c0_16 = arith.constant 0 : index
    %45 = vector.load %arg3[%c0_15, %c0_16] : memref<1x16xf32, #tpu.memory_space<vmem>>, vector<1x16xf32>
    %46 = arith.mulf %33, %44 : vector<1x16xf32>
    %47 = arith.subf %45, %46 : vector<1x16xf32>
    %48 = vector.broadcast %44 : vector<1x16xf32> to vector<128x16xf32>
    %49 = arith.mulf %26, %48 : vector<128x16xf32>
    %50 = vector.broadcast %47 : vector<1x16xf32> to vector<128x16xf32>
    %51 = arith.addf %49, %50 : vector<128x16xf32>
    %52 = vector.shape_cast %51 : vector<128x16xf32> to vector<2x8x8x16xf32>
    %c0_17 = arith.constant 0 : index
    %c0_18 = arith.constant 0 : index
    %c0_19 = arith.constant 0 : index
    %c0_20 = arith.constant 0 : index
    %53 = vector.load %arg4[%c0_17, %c0_18, %c0_19, %c0_20] : memref<2x8x8x16xf32, #tpu.memory_space<vmem>>, vector<2x8x8x16xf32>
    %54 = arith.addf %52, %53 : vector<2x8x8x16xf32>
    %c0_21 = arith.constant 0 : index
    %c0_22 = arith.constant 0 : index
    %c0_23 = arith.constant 0 : index
    %c0_24 = arith.constant 0 : index
    %55 = vector.load %arg5[%c0_21, %c0_22, %c0_23, %c0_24] : memref<2x8x8x16xf32, #tpu.memory_space<vmem>>, vector<2x8x8x16xf32>
    tpu.vector_store %arg5[%c0_21, %c0_22, %c0_23, %c0_24], %54 {strides = array<i32>} : memref<2x8x8x16xf32, #tpu.memory_space<vmem>>, vector<2x8x8x16xf32>,
    return
  }
}

module attributes {stable_mosaic.version = 11 : i64} {
  func.func @_conv_bn_glu_kernel(%arg0: memref<2x8x8x16xf32, #tpu.memory_space<vmem>>, %arg1: memref<2x1x1x8xf32, #tpu.memory_space<vmem>>, %arg2: memref<216x32xbf16, #tpu.memory_space<vmem>>, %arg3: memref<1x32xf32, #tpu.memory_space<vmem>>, %arg4: memref<1x32xf32, #tpu.memory_space<vmem>>, %arg5: memref<2x8x8x16xf32, #tpu.memory_space<vmem>>) attributes {dimension_semantics = [], scalar_prefetch = 0 : i64, scratch_operands = 0 : i64, tpu.core_type = #tpu.core_type<tc>} {
    %c0 = arith.constant 0 : index
    %c0_0 = arith.constant 0 : index
    %c0_1 = arith.constant 0 : index
    %c0_2 = arith.constant 0 : index
    %0 = vector.load %arg0[%c0, %c0_0, %c0_1, %c0_2] : memref<2x8x8x16xf32, #tpu.memory_space<vmem>>, vector<2x8x8x16xf32>
    %c0_3 = arith.constant 0 : index
    %c0_4 = arith.constant 0 : index
    %c0_5 = arith.constant 0 : index
    %c0_6 = arith.constant 0 : index
    %1 = vector.load %arg1[%c0_3, %c0_4, %c0_5, %c0_6] : memref<2x1x1x8xf32, #tpu.memory_space<vmem>>, vector<2x1x1x8xf32>
    %2 = vector.shape_cast %1 : vector<2x1x1x8xf32> to vector<2x1x1x8xf32>
    %3 = vector.broadcast %2 : vector<2x1x1x8xf32> to vector<2x8x8x8xf32>
    %4 = tpu.concatenate %3, %0 in 3 : vector<2x8x8x8xf32>, vector<2x8x8x16xf32> -> vector<2x8x8x24xf32>
    %cst = arith.constant 0.000000e+00 : f32
    %5 = vector.broadcast %cst : f32 to vector<2x8x1x24xf32>
    %6 = tpu.concatenate %5, %4, %5 in 2 : vector<2x8x1x24xf32>, vector<2x8x8x24xf32>, vector<2x8x1x24xf32> -> vector<2x8x10x24xf32>
    %cst_7 = arith.constant 0.000000e+00 : f32
    %7 = vector.broadcast %cst_7 : f32 to vector<2x1x10x24xf32>
    %8 = tpu.concatenate %7, %6, %7 in 1 : vector<2x1x10x24xf32>, vector<2x8x10x24xf32>, vector<2x1x10x24xf32> -> vector<2x10x10x24xf32>
    %9 = vector.extract_strided_slice %8 {offsets = [0, 0, 0, 0], sizes = [2, 8, 8, 24], strides = [1, 1, 1, 1]} : vector<2x10x10x24xf32> to vector<2x8x8x24xf32>
    %10 = arith.truncf %9 : vector<2x8x8x24xf32> to vector<2x8x8x24xbf16>
    %11 = vector.extract_strided_slice %8 {offsets = [0, 0, 1, 0], sizes = [2, 8, 8, 24], strides = [1, 1, 1, 1]} : vector<2x10x10x24xf32> to vector<2x8x8x24xf32>
    %12 = arith.truncf %11 : vector<2x8x8x24xf32> to vector<2x8x8x24xbf16>
    %13 = vector.extract_strided_slice %8 {offsets = [0, 0, 2, 0], sizes = [2, 8, 8, 24], strides = [1, 1, 1, 1]} : vector<2x10x10x24xf32> to vector<2x8x8x24xf32>
    %14 = arith.truncf %13 : vector<2x8x8x24xf32> to vector<2x8x8x24xbf16>
    %15 = vector.extract_strided_slice %8 {offsets = [0, 1, 0, 0], sizes = [2, 8, 8, 24], strides = [1, 1, 1, 1]} : vector<2x10x10x24xf32> to vector<2x8x8x24xf32>
    %16 = arith.truncf %15 : vector<2x8x8x24xf32> to vector<2x8x8x24xbf16>
    %17 = vector.extract_strided_slice %8 {offsets = [0, 1, 1, 0], sizes = [2, 8, 8, 24], strides = [1, 1, 1, 1]} : vector<2x10x10x24xf32> to vector<2x8x8x24xf32>
    %18 = arith.truncf %17 : vector<2x8x8x24xf32> to vector<2x8x8x24xbf16>
    %19 = vector.extract_strided_slice %8 {offsets = [0, 1, 2, 0], sizes = [2, 8, 8, 24], strides = [1, 1, 1, 1]} : vector<2x10x10x24xf32> to vector<2x8x8x24xf32>
    %20 = arith.truncf %19 : vector<2x8x8x24xf32> to vector<2x8x8x24xbf16>
    %21 = vector.extract_strided_slice %8 {offsets = [0, 2, 0, 0], sizes = [2, 8, 8, 24], strides = [1, 1, 1, 1]} : vector<2x10x10x24xf32> to vector<2x8x8x24xf32>
    %22 = arith.truncf %21 : vector<2x8x8x24xf32> to vector<2x8x8x24xbf16>
    %23 = vector.extract_strided_slice %8 {offsets = [0, 2, 1, 0], sizes = [2, 8, 8, 24], strides = [1, 1, 1, 1]} : vector<2x10x10x24xf32> to vector<2x8x8x24xf32>
    %24 = arith.truncf %23 : vector<2x8x8x24xf32> to vector<2x8x8x24xbf16>
    %25 = vector.extract_strided_slice %8 {offsets = [0, 2, 2, 0], sizes = [2, 8, 8, 24], strides = [1, 1, 1, 1]} : vector<2x10x10x24xf32> to vector<2x8x8x24xf32>
    %26 = arith.truncf %25 : vector<2x8x8x24xf32> to vector<2x8x8x24xbf16>
    %27 = tpu.concatenate %10, %12, %14, %16, %18, %20, %22, %24, %26 in 3 : vector<2x8x8x24xbf16>, vector<2x8x8x24xbf16>, vector<2x8x8x24xbf16>, vector<2x8x8x24xbf16>, vector<2x8x8x24xbf16>, vector<2x8x8x24xbf16>, vector<2x8x8x24xbf16>, vector<2x8x8x24xbf16>, vector<2x8x8x24xbf16> -> vector<2x8x8x216xbf16>
    %28 = vector.shape_cast %27 : vector<2x8x8x216xbf16> to vector<128x216xbf16>
    %c0_8 = arith.constant 0 : index
    %c0_9 = arith.constant 0 : index
    %29 = vector.load %arg2[%c0_8, %c0_9] : memref<216x32xbf16, #tpu.memory_space<vmem>>, vector<216x32xbf16>
    %cst_10 = arith.constant dense<0.000000e+00> : vector<128x32xf32>
    %30 = tpu.matmul %28, %29, %cst_10 {dimension_numbers = #tpu.dot_dimension_numbers<[1], [0], [0], [1], [0, 0, 1, 1], [], []>} : vector<128x216xbf16>, vector<216x32xbf16>, vector<128x32xf32> -> vector<128x32xf32>
    %cst_11 = arith.constant dense<0.000000e+00> : vector<32xf32>
    %31 = vector.multi_reduction <add>, %30, %cst_11 [0] : vector<128x32xf32> to vector<32xf32>
    %32 = vector.shape_cast %31 : vector<32xf32> to vector<1x32xf32>
    %33 = arith.mulf %30, %30 : vector<128x32xf32>
    %cst_12 = arith.constant dense<0.000000e+00> : vector<32xf32>
    %34 = vector.multi_reduction <add>, %33, %cst_12 [0] : vector<128x32xf32> to vector<32xf32>
    %35 = vector.shape_cast %34 : vector<32xf32> to vector<1x32xf32>
    %cst_13 = arith.constant 1.280000e+02 : f32
    %36 = vector.broadcast %cst_13 : f32 to vector<1x32xf32>
    %37 = arith.divf %32, %36 : vector<1x32xf32>
    %cst_14 = arith.constant 1.280000e+02 : f32
    %38 = vector.broadcast %cst_14 : f32 to vector<1x32xf32>
    %39 = arith.divf %35, %38 : vector<1x32xf32>
    %40 = arith.mulf %37, %37 : vector<1x32xf32>
    %41 = arith.subf %39, %40 : vector<1x32xf32>
    %cst_15 = arith.constant 0.000000e+00 : f32
    %42 = vector.broadcast %cst_15 : f32 to vector<1x32xf32>
    %43 = arith.maximumf %41, %42 : vector<1x32xf32>
    %c0_16 = arith.constant 0 : index
    %c0_17 = arith.constant 0 : index
    %44 = vector.load %arg3[%c0_16, %c0_17] : memref<1x32xf32, #tpu.memory_space<vmem>>, vector<1x32xf32>
    %cst_18 = arith.constant 9.99999974E-6 : f32
    %45 = vector.broadcast %cst_18 : f32 to vector<1x32xf32>
    %46 = arith.addf %43, %45 : vector<1x32xf32>
    %47 = math.rsqrt %46 : vector<1x32xf32>
    %48 = arith.mulf %44, %47 : vector<1x32xf32>
    %c0_19 = arith.constant 0 : index
    %c0_20 = arith.constant 0 : index
    %49 = vector.load %arg4[%c0_19, %c0_20] : memref<1x32xf32, #tpu.memory_space<vmem>>, vector<1x32xf32>
    %50 = arith.mulf %37, %48 : vector<1x32xf32>
    %51 = arith.subf %49, %50 : vector<1x32xf32>
    %52 = vector.broadcast %48 : vector<1x32xf32> to vector<128x32xf32>
    %53 = arith.mulf %30, %52 : vector<128x32xf32>
    %54 = vector.broadcast %51 : vector<1x32xf32> to vector<128x32xf32>
    %55 = arith.addf %53, %54 : vector<128x32xf32>
    %56 = vector.extract_strided_slice %55 {offsets = [0, 0], sizes = [128, 16], strides = [1, 1]} : vector<128x32xf32> to vector<128x16xf32>
    %57 = vector.extract_strided_slice %55 {offsets = [0, 16], sizes = [128, 16], strides = [1, 1]} : vector<128x32xf32> to vector<128x16xf32>
    %58 = arith.negf %57 : vector<128x16xf32>
    %59 = math.exp %58 : vector<128x16xf32>
    %cst_21 = arith.constant 1.000000e+00 : f32
    %60 = vector.broadcast %cst_21 : f32 to vector<128x16xf32>
    %61 = arith.addf %60, %59 : vector<128x16xf32>
    %62 = arith.divf %60, %61 : vector<128x16xf32>
    %63 = arith.mulf %56, %62 : vector<128x16xf32>
    %64 = vector.shape_cast %63 : vector<128x16xf32> to vector<2x8x8x16xf32>
    %c0_22 = arith.constant 0 : index
    %c0_23 = arith.constant 0 : index
    %c0_24 = arith.constant 0 : index
    %c0_25 = arith.constant 0 : index
    %65 = vector.load %arg5[%c0_22, %c0_23, %c0_24, %c0_25] : memref<2x8x8x16xf32, #tpu.memory_space<vmem>>, vector<2x8x8x16xf32>
    tpu.vector_store %arg5[%c0_22, %c0_23, %c0_24, %c0_25], %64 {strides = array<i32>} : memref<2x8x8x16xf32, #tpu.memory_space<vmem>>, vector<2x8x8x16xf32>,
    return
  }
}

module attributes {stable_mosaic.version = 11 : i64} {
  func.func @_conv_bn_glu_kernel(%arg0: memref<2x16x16x16xf32, #tpu.memory_space<vmem>>, %arg1: memref<144x16xbf16, #tpu.memory_space<vmem>>, %arg2: memref<1x16xf32, #tpu.memory_space<vmem>>, %arg3: memref<1x16xf32, #tpu.memory_space<vmem>>, %arg4: memref<2x16x16x8xf32, #tpu.memory_space<vmem>>) attributes {dimension_semantics = [], scalar_prefetch = 0 : i64, scratch_operands = 0 : i64, tpu.core_type = #tpu.core_type<tc>} {
    %c0 = arith.constant 0 : index
    %c0_0 = arith.constant 0 : index
    %c0_1 = arith.constant 0 : index
    %c0_2 = arith.constant 0 : index
    %0 = vector.load %arg0[%c0, %c0_0, %c0_1, %c0_2] : memref<2x16x16x16xf32, #tpu.memory_space<vmem>>, vector<2x16x16x16xf32>
    %cst = arith.constant 0.000000e+00 : f32
    %1 = vector.broadcast %cst : f32 to vector<2x16x1x16xf32>
    %2 = tpu.concatenate %1, %0, %1 in 2 : vector<2x16x1x16xf32>, vector<2x16x16x16xf32>, vector<2x16x1x16xf32> -> vector<2x16x18x16xf32>
    %cst_3 = arith.constant 0.000000e+00 : f32
    %3 = vector.broadcast %cst_3 : f32 to vector<2x1x18x16xf32>
    %4 = tpu.concatenate %3, %2, %3 in 1 : vector<2x1x18x16xf32>, vector<2x16x18x16xf32>, vector<2x1x18x16xf32> -> vector<2x18x18x16xf32>
    %5 = vector.extract_strided_slice %4 {offsets = [0, 0, 0, 0], sizes = [2, 16, 16, 16], strides = [1, 1, 1, 1]} : vector<2x18x18x16xf32> to vector<2x16x16x16xf32>
    %6 = arith.truncf %5 : vector<2x16x16x16xf32> to vector<2x16x16x16xbf16>
    %7 = vector.extract_strided_slice %4 {offsets = [0, 0, 1, 0], sizes = [2, 16, 16, 16], strides = [1, 1, 1, 1]} : vector<2x18x18x16xf32> to vector<2x16x16x16xf32>
    %8 = arith.truncf %7 : vector<2x16x16x16xf32> to vector<2x16x16x16xbf16>
    %9 = vector.extract_strided_slice %4 {offsets = [0, 0, 2, 0], sizes = [2, 16, 16, 16], strides = [1, 1, 1, 1]} : vector<2x18x18x16xf32> to vector<2x16x16x16xf32>
    %10 = arith.truncf %9 : vector<2x16x16x16xf32> to vector<2x16x16x16xbf16>
    %11 = vector.extract_strided_slice %4 {offsets = [0, 1, 0, 0], sizes = [2, 16, 16, 16], strides = [1, 1, 1, 1]} : vector<2x18x18x16xf32> to vector<2x16x16x16xf32>
    %12 = arith.truncf %11 : vector<2x16x16x16xf32> to vector<2x16x16x16xbf16>
    %13 = vector.extract_strided_slice %4 {offsets = [0, 1, 1, 0], sizes = [2, 16, 16, 16], strides = [1, 1, 1, 1]} : vector<2x18x18x16xf32> to vector<2x16x16x16xf32>
    %14 = arith.truncf %13 : vector<2x16x16x16xf32> to vector<2x16x16x16xbf16>
    %15 = vector.extract_strided_slice %4 {offsets = [0, 1, 2, 0], sizes = [2, 16, 16, 16], strides = [1, 1, 1, 1]} : vector<2x18x18x16xf32> to vector<2x16x16x16xf32>
    %16 = arith.truncf %15 : vector<2x16x16x16xf32> to vector<2x16x16x16xbf16>
    %17 = vector.extract_strided_slice %4 {offsets = [0, 2, 0, 0], sizes = [2, 16, 16, 16], strides = [1, 1, 1, 1]} : vector<2x18x18x16xf32> to vector<2x16x16x16xf32>
    %18 = arith.truncf %17 : vector<2x16x16x16xf32> to vector<2x16x16x16xbf16>
    %19 = vector.extract_strided_slice %4 {offsets = [0, 2, 1, 0], sizes = [2, 16, 16, 16], strides = [1, 1, 1, 1]} : vector<2x18x18x16xf32> to vector<2x16x16x16xf32>
    %20 = arith.truncf %19 : vector<2x16x16x16xf32> to vector<2x16x16x16xbf16>
    %21 = vector.extract_strided_slice %4 {offsets = [0, 2, 2, 0], sizes = [2, 16, 16, 16], strides = [1, 1, 1, 1]} : vector<2x18x18x16xf32> to vector<2x16x16x16xf32>
    %22 = arith.truncf %21 : vector<2x16x16x16xf32> to vector<2x16x16x16xbf16>
    %23 = tpu.concatenate %6, %8, %10, %12, %14, %16, %18, %20, %22 in 3 : vector<2x16x16x16xbf16>, vector<2x16x16x16xbf16>, vector<2x16x16x16xbf16>, vector<2x16x16x16xbf16>, vector<2x16x16x16xbf16>, vector<2x16x16x16xbf16>, vector<2x16x16x16xbf16>, vector<2x16x16x16xbf16>, vector<2x16x16x16xbf16> -> vector<2x16x16x144xbf16>
    %24 = vector.shape_cast %23 : vector<2x16x16x144xbf16> to vector<512x144xbf16>
    %c0_4 = arith.constant 0 : index
    %c0_5 = arith.constant 0 : index
    %25 = vector.load %arg1[%c0_4, %c0_5] : memref<144x16xbf16, #tpu.memory_space<vmem>>, vector<144x16xbf16>
    %cst_6 = arith.constant dense<0.000000e+00> : vector<512x16xf32>
    %26 = tpu.matmul %24, %25, %cst_6 {dimension_numbers = #tpu.dot_dimension_numbers<[1], [0], [0], [1], [0, 0, 1, 1], [], []>} : vector<512x144xbf16>, vector<144x16xbf16>, vector<512x16xf32> -> vector<512x16xf32>
    %cst_7 = arith.constant dense<0.000000e+00> : vector<16xf32>
    %27 = vector.multi_reduction <add>, %26, %cst_7 [0] : vector<512x16xf32> to vector<16xf32>
    %28 = vector.shape_cast %27 : vector<16xf32> to vector<1x16xf32>
    %29 = arith.mulf %26, %26 : vector<512x16xf32>
    %cst_8 = arith.constant dense<0.000000e+00> : vector<16xf32>
    %30 = vector.multi_reduction <add>, %29, %cst_8 [0] : vector<512x16xf32> to vector<16xf32>
    %31 = vector.shape_cast %30 : vector<16xf32> to vector<1x16xf32>
    %cst_9 = arith.constant 5.120000e+02 : f32
    %32 = vector.broadcast %cst_9 : f32 to vector<1x16xf32>
    %33 = arith.divf %28, %32 : vector<1x16xf32>
    %cst_10 = arith.constant 5.120000e+02 : f32
    %34 = vector.broadcast %cst_10 : f32 to vector<1x16xf32>
    %35 = arith.divf %31, %34 : vector<1x16xf32>
    %36 = arith.mulf %33, %33 : vector<1x16xf32>
    %37 = arith.subf %35, %36 : vector<1x16xf32>
    %cst_11 = arith.constant 0.000000e+00 : f32
    %38 = vector.broadcast %cst_11 : f32 to vector<1x16xf32>
    %39 = arith.maximumf %37, %38 : vector<1x16xf32>
    %c0_12 = arith.constant 0 : index
    %c0_13 = arith.constant 0 : index
    %40 = vector.load %arg2[%c0_12, %c0_13] : memref<1x16xf32, #tpu.memory_space<vmem>>, vector<1x16xf32>
    %cst_14 = arith.constant 9.99999974E-6 : f32
    %41 = vector.broadcast %cst_14 : f32 to vector<1x16xf32>
    %42 = arith.addf %39, %41 : vector<1x16xf32>
    %43 = math.rsqrt %42 : vector<1x16xf32>
    %44 = arith.mulf %40, %43 : vector<1x16xf32>
    %c0_15 = arith.constant 0 : index
    %c0_16 = arith.constant 0 : index
    %45 = vector.load %arg3[%c0_15, %c0_16] : memref<1x16xf32, #tpu.memory_space<vmem>>, vector<1x16xf32>
    %46 = arith.mulf %33, %44 : vector<1x16xf32>
    %47 = arith.subf %45, %46 : vector<1x16xf32>
    %48 = vector.broadcast %44 : vector<1x16xf32> to vector<512x16xf32>
    %49 = arith.mulf %26, %48 : vector<512x16xf32>
    %50 = vector.broadcast %47 : vector<1x16xf32> to vector<512x16xf32>
    %51 = arith.addf %49, %50 : vector<512x16xf32>
    %52 = vector.extract_strided_slice %51 {offsets = [0, 0], sizes = [512, 8], strides = [1, 1]} : vector<512x16xf32> to vector<512x8xf32>
    %53 = vector.extract_strided_slice %51 {offsets = [0, 8], sizes = [512, 8], strides = [1, 1]} : vector<512x16xf32> to vector<512x8xf32>
    %54 = arith.negf %53 : vector<512x8xf32>
    %55 = math.exp %54 : vector<512x8xf32>
    %cst_17 = arith.constant 1.000000e+00 : f32
    %56 = vector.broadcast %cst_17 : f32 to vector<512x8xf32>
    %57 = arith.addf %56, %55 : vector<512x8xf32>
    %58 = arith.divf %56, %57 : vector<512x8xf32>
    %59 = arith.mulf %52, %58 : vector<512x8xf32>
    %60 = vector.shape_cast %59 : vector<512x8xf32> to vector<2x16x16x8xf32>
    %c0_18 = arith.constant 0 : index
    %c0_19 = arith.constant 0 : index
    %c0_20 = arith.constant 0 : index
    %c0_21 = arith.constant 0 : index
    %61 = vector.load %arg4[%c0_18, %c0_19, %c0_20, %c0_21] : memref<2x16x16x8xf32, #tpu.memory_space<vmem>>, vector<2x16x16x8xf32>
    tpu.vector_store %arg4[%c0_18, %c0_19, %c0_20, %c0_21], %60 {strides = array<i32>} : memref<2x16x16x8xf32, #tpu.memory_space<vmem>>, vector<2x16x16x8xf32>,
    return
  }
}

</mosaic_0001>

<bundles_post_ra>
// kernel: gan_middle_forward.8
= control target key start
LH: loop header
LB: loop body
LE: loop exit
PB: predicated region body
PF: predicated region fallthrough
CT: control target
= control target key end

     0   :  { %v1309_v0 = vmov 0.0|0.0   ;;  %v1310_v2 = vmov 0   ;;  %vm85_vm0 = vcmask 1040384   ;;  %s1311_s24 = smov 32   ;;  %s1312_s25 = smov 16   ;;  %vm536_vm1 = vcmask 130048   ;;  %s2123_s0 = inlined_call_operand.vmem [shape: f32[2,8,8,16], index: 0, kind: input, shape index: {}]   ;;  %s2124_s1 = inlined_call_operand.vmem [shape: bf16[144,16], index: 1, kind: input, shape index: {}]   ;;  %s2125_s2 = inlined_call_operand.vmem [shape: f32[1,16], index: 2, kind: input, shape index: {}]   ;;  %s2126_s3 = inlined_call_operand.vmem [shape: f32[1,16], index: 3, kind: input, shape index: {}]   ;;  %s2127_s4 = inlined_call_operand.vmem [shape: f32[2,8,8,16], index: 4, kind: input, shape index: {}]   ;;  %s2128_s5 = inlined_call_operand.vmem [shape: f32[2,8,8,16], index: 5, kind: output, shape index: {}]  }
   0x1   :  { %v1349_v1 = vrot.slane %v1309_v0, 1  ;;  %v1352_v3 = vrot.slane %v1310_v2, 1  ;;  %v22_v4 = vld [vmem:[%s2123_s0 + $0x8] sm:$0xff]  ;;  %v21_v5 = vld [vmem:[%s2123_s0] sm:$0xff]  ;;  %942 = vmatprep.subr.bf16.mxu0 %v1310_v2  ;;  %1271 = vmatprep.subr.bf16.mxu1 %v1310_v2  ;;  %v23_v8 = vld [vmem:[%s2123_s0 + $0x10] sm:$0xff]  ;;  %s1313_s26 = smov 48  }
   0x2   :  { %v54_v6 = vrot.slane %v22_v4, 7  ;;  %v53_v7 = vrot.slane %v21_v5, 7  ;;  %v55_v9 = vrot.slane %v23_v8, 7  ;;  %v1298_v23 = vld [vmem:[%s2124_s1] sm:$0xff]   ;;  %v1299_v27 = vld [vmem:[%s2124_s1 + $0x8] sm:$0xff]   ;;  %v1300_v32 = vld [vmem:[%s2124_s1 + $0x10] sm:$0xff]  }
   0x3   :  { %316 = vrot.lane.b32.xlu1 %v1349_v1, %s1311_s24  ;;  %256 = vrot.lane.b32.xlu0 %v1352_v3, %s1312_s25  ;;  %s1314_s8 = smov 64   ;;  %v24_v35 = vld [vmem:[%s2123_s0 + $0x18] sm:$0xff]  ;;  %s1315_s13 = smov 80   ;;  %v1302_v41 = vld [vmem:[%s2124_s1 + $0x20] sm:$0xff]   ;;  %vm581_vm2 = vcmask 261120   ;;  %vm612_vm3 = vcmask 392192  }
   0x4   :  { %v87_v10 = vsel %vm85_vm0, 0.0, %v54_v6  ;;  %v103_v11 = vsel %vm85_vm0, %v54_v6, 0.0  ;;  %v86_v12 = vsel %vm85_vm0, 0.0, %v53_v7  ;;  %v102_v13 = vsel %vm85_vm0, %v53_v7, 0.0  ;;  %943 = vmatpush1.bf16.msra.mxu0 %v1298_v23  ;;  %1280 = vmatpush1.bf16.msra.mxu1 %v1298_v23  ;;  %v1301_v36 = vld [vmem:[%s2124_s1 + $0x18] sm:$0xff]   ;;  %s1316_s16 = smov 96  }
   0x5   :  { %v1373_v14 = vpack.c.bf16 %v87_v10, %v87_v10  ;;  %v134_v15 = vpack.c.bf16 %v103_v11, %v87_v10  ;;  %v1375_v16 = vpack.c.bf16 %v86_v12, %v86_v12  ;;  %v133_v17 = vpack.c.bf16 %v102_v13, %v86_v12  ;;  %944 = vmatprep.subr.bf16.mxu0 %v1310_v2  ;;  %v1303_v45 = vld [vmem:[%s2124_s1 + $0x28] sm:$0xff]   ;;  %s1317_s19 = smov 112   ;;  %v25_v47 = vld [vmem:[%s2123_s0 + $0x20] sm:$0xff]  ;;  %v1304_v48 = vld [vmem:[%s2124_s1 + $0x30] sm:$0xff]  }
   0x6   :  { %v88_v18 = vsel %vm85_vm0, 0.0, %v55_v9  ;;  %v104_v22 = vsel %vm85_vm0, %v55_v9, 0.0  ;;  %1272 = vmatprep.subr.bf16.mxu1 %v1310_v2  ;;  %v56_v40 = vrot.slane %v24_v35, 7  ;;  %v57_v51 = vrot.slane %v25_v47, 7  ;;  %v1305_v52 = vld [vmem:[%s2124_s1 + $0x38] sm:$0xff]   ;;  %v1306_v59 = vld [vmem:[%s2124_s1 + $0x40] sm:$0xff]  }
   0x7   :  { %364 = vrot.lane.b32.xlu1 %v1373_v14, %s1313_s26  ;;  %362 = vrot.lane.b32.xlu0 %v1375_v16, %s1313_s26  ;;  %v302_v19 = vrot.slane %v133_v17, 1  ;;  %v159_v20 = vshrl.u32 %v133_v17, 16  ;;  %v161_v21 = vshll.u32 %v133_v17, 16  ;;  %v166_v24 = vshrl.u32 %v134_v15, 16  ;;  %v29_v62 = vld [vmem:[%s2123_s0 + $0x40] sm:$0xff]  ;;  %v26_v17 = vld [vmem:[%s2123_s0 + $0x28] sm:$0xff] }
   0x8   :  { %v168_v25 = vshll.u32 %v134_v15, 16  ;;  %v135_v30 = vpack.c.bf16 %v104_v22, %v88_v18  ;;  %945 = vmatpush1.bf16.msra.mxu0 %v1299_v27  ;;  %1281 = vmatpush1.bf16.msra.mxu1 %v1299_v27  ;;  %v303_v33 = vrot.slane %v134_v15, 1  ;;  %v1408_v37 = vpack.c.bf16 %v88_v18, %v88_v18 }
   0x9   :  { %v163_v26 = vrot.slane %v161_v21, 1  ;;  %946 = vmatprep.subr.bf16.mxu0 %v1310_v2  ;;  %1273 = vmatprep.subr.bf16.mxu1 %v1310_v2  ;;  %v89_v43 = vsel %vm85_vm0, 0.0, %v56_v40  ;;  %v105_v44 = vsel %vm85_vm0, %v56_v40, 0.0  ;;  %v90_v57 = vsel %vm85_vm0, 0.0, %v57_v51  ;;  %v30_v21 = vld [vmem:[%s2123_s0 + $0x48] sm:$0xff] }
   0xa   :  { %v170_v28 = vrot.slane %v168_v25, 1  ;;  %v175_v34 = vshll.u32 %v135_v30, 16  ;;  %v173_v38 = vshrl.u32 %v135_v30, 16  ;;  %v136_v46 = vpack.c.bf16 %v105_v44, %v89_v43 }
   0xb   :  { %318 = vrot.lane.b32.xlu1 %v302_v19, %s1311_s24  ;;  %v164_v29 = vor.u32 %v163_v26, %v159_v20  ;;  %v304_v49 = vrot.slane %v135_v30, 1  ;;  %v1445_v54 = vpack.c.bf16 %v89_v43, %v89_v43  ;;  %v106_v58 = vsel %vm85_vm0, %v57_v51, 0.0  ;;  %v27_v43 = vld [vmem:[%s2123_s0 + $0x30] sm:$0xff] }
   0xc   :  { %v171_v31 = vor.u32 %v170_v28, %v166_v24  ;;  %947 = vmatpush1.bf16.msra.mxu0 %v1300_v32  ;;  %1282 = vmatpush1.bf16.msra.mxu1 %v1300_v32  ;;  %v177_v39 = vrot.slane %v175_v34, 1  ;;  %v182_v50 = vshll.u32 %v136_v46, 16  ;;  %v180_v55 = vshrl.u32 %v136_v46, 16 }
   0xd   :  { %258 = vrot.lane.b32.xlu0 %v164_v29, %s1312_s25  ;;  %948 = vmatprep.subr.bf16.mxu0 %v1310_v2  ;;  %v1239_v53 = vcombine.low %v303_v33, %v304_v49  ;;  %v137_v61 = vpack.c.bf16 %v106_v58, %v90_v57  ;;  %v1464_v63 = vrot.slane %v136_v46, 1  ;;  %v61_v4 = vrot.slane %v29_v62, 7  ;;  %v31_v46 = vld [vmem:[%s2123_s0 + $0x50] sm:$0xff] }
   0xe   :  { %1274 = vmatprep.subr.bf16.mxu1 %v1310_v2  ;;  %v178_v42 = vor.u32 %v177_v39, %v173_v38  ;;  %v184_v56 = vrot.slane %v182_v50, 1  ;;  %v1476_v9 = vpack.c.bf16 %v90_v57, %v90_v57  ;;  %v58_v20 = vrot.slane %v26_v17, 7 }
   0xf   :  { %410 = vrot.lane.b32.xlu1 %v171_v31, %s1314_s8  ;;  %1263 = vmatprep.mubr.msk.bf16.mxu0 %vm536_vm1, %v1239_v53  ;;  %v1466_v5 = vrot.slane %v137_v61, 1  ;;  %v189_v6 = vshll.u32 %v137_v61, 16  ;;  %v110_v8 = vsel %vm85_vm0, %v61_v4, 0.0  ;;  %v187_v10 = vshrl.u32 %v137_v61, 16 }
  0x10   :  { %949 = vmatpush1.bf16.msra.mxu0 %v1301_v36  ;;  %1283 = vmatpush1.bf16.msra.mxu1 %v1301_v36  ;;  %v185_v60 = vor.u32 %v184_v56, %v180_v55  ;;  %v107_v22 = vsel %vm85_vm0, %v58_v20, 0.0  ;;  %v91_v24 = vsel %vm85_vm0, 0.0, %v58_v20  ;;  %v62_v25 = vrot.slane %v30_v21, 7 }
  0x11   :  { %408 = vrot.lane.b32.xlu0 %v164_v29, %s1314_s8  ;;  %950 = vmatprep.subr.bf16.mxu0 %v1310_v2  ;;  %v1241_v7 = vcombine.low %v1464_v63, %v1466_v5  ;;  %v191_v11 = vrot.slane %v189_v6, 1  ;;  %v138_v27 = vpack.c.bf16 %v107_v22, %v91_v24  ;;  %v1506_v30 = vpack.c.bf16 %v91_v24, %v91_v24 }
  0x12   :  { %1275 = vmatprep.subr.bf16.mxu1 %v1310_v2  ;;  %v111_v28 = vsel %vm85_vm0, %v62_v25, 0.0  ;;  %v95_v29 = vsel %vm85_vm0, 0.0, %v62_v25  ;;  %v59_v44 = vrot.slane %v27_v43, 7  ;;  %vm645_vm4 = vcmask 523264  }
  0x13   :  { %446 = vrot.lane.b32.xlu1 %v303_v33, %s1315_s13  ;;  %v192_v13 = vor.u32 %v191_v11, %v187_v10  ;;  %v196_v32 = vshll.u32 %v138_v27, 16  ;;  %v194_v34 = vshrl.u32 %v138_v27, 16  ;;  %v28_v11 = vld [vmem:[%s2123_s0 + $0x38] sm:$0xff]  ;;  %vm678_vm5 = vcmask 654336  }
  0x14   :  { %951 = vmatpush1.bf16.msra.mxu0 %v1302_v41  ;;  %1284 = vmatpush1.bf16.msra.mxu1 %v1302_v41  ;;  %v108_v47 = vsel %vm85_vm0, %v59_v44, 0.0  ;;  %vm711_vm6 = vcmask 785408   ;;  %vm743_vm7 = vcmask 916480  }
  0x15   :  { %444 = vrot.lane.b32.xlu0 %v302_v19, %s1315_s13  ;;  %952 = vmatprep.subr.bf16.mxu0 %v1310_v2  ;;  %v198_v35 = vrot.slane %v196_v32, 1 }
  0x16   :  { %1276 = vmatprep.subr.bf16.mxu1 %v1310_v2 }
  0x17   :  { %478 = vrot.lane.b32.xlu1 %v1408_v37, %s1316_s16  ;;  %v199_v39 = vor.u32 %v198_v35, %v194_v34 }
  0x18   :  { %953 = vmatpush1.bf16.msra.mxu0 %v1303_v45  ;;  %1285 = vmatpush1.bf16.msra.mxu1 %v1303_v45  ;;  %v1528_v45 = vrot.slane %v138_v27, 1 }
  0x19   :  { %476 = vrot.lane.b32.xlu0 %v1373_v14, %s1316_s16  ;;  %954 = vmatprep.subr.bf16.mxu0 %v1310_v2 }
  0x1a   :  { %1277 = vmatprep.subr.bf16.mxu1 %v1310_v2 }
  0x1b   :  { %508 = vrot.lane.b32.xlu1 %v178_v42, %s1317_s19 }
  0x1c   :  { %955 = vmatpush1.bf16.msra.mxu0 %v1304_v48  ;;  %1286 = vmatpush1.bf16.msra.mxu1 %v1304_v48  ;;  %v92_v48 = vsel %vm85_vm0, 0.0, %v59_v44 }
  0x1d   :  { %506 = vrot.lane.b32.xlu0 %v171_v31, %s1317_s19  ;;  %956 = vmatprep.subr.bf16.mxu0 %v1310_v2  ;;  %v139_v51 = vpack.c.bf16 %v108_v47, %v92_v48  ;;  %v1543_v55 = vpack.c.bf16 %v92_v48, %v92_v48 }
  0x1e   :  { %1278 = vmatprep.subr.bf16.mxu1 %v1310_v2 }
  0x1f   :  { %262 = vrot.lane.b32.xlu1 %v178_v42, %s1312_s25  ;;  %v203_v57 = vshll.u32 %v139_v51, 16 }
  0x20   :  { %957 = vmatpush1.bf16.msra.mxu0 %v1305_v52  ;;  %1287 = vmatpush1.bf16.msra.mxu1 %v1305_v52 }
  0x21   :  { %260 = vrot.lane.b32.xlu0 %v171_v31, %s1312_s25  ;;  %958 = vmatprep.subr.bf16.mxu0 %v1310_v2  ;;  %v141_v31 = vpack.c.bf16 %v111_v28, %v95_v29  ;;  %v205_v61 = vrot.slane %v203_v57, 1 }
  0x22   :  { %1279 = vmatprep.subr.bf16.mxu1 %v1310_v2  ;;  %v94_v2 = vsel %vm85_vm0, 0.0, %v61_v4 }
  0x23   :  { %322 = vrot.lane.b32.xlu1 %v304_v49, %s1311_s24  ;;  %v1479_v12 = vpack.c.bf16 %v110_v8, %v94_v2  ;;  %v217_v36 = vshll.u32 %v141_v31, 16  ;;  %v1516_v38 = vpack.c.bf16 %v94_v2, %v94_v2  ;;  %v215_v40 = vshrl.u32 %v141_v31, 16 }
  0x24   :  { %959 = vmatpush1.bf16.msra.mxu0 %v1306_v59  ;;  %1288 = vmatpush1.bf16.msra.mxu1 %v1306_v59  ;;  %v310_v50 = vrot.slane %v141_v31, 1 }
  0x25   :  { %320 = vrot.lane.b32.xlu0 %v303_v33, %s1311_s24  ;;  %v210_v15 = vshll.u32 %v1479_v12, 16  ;;  %v208_v18 = vshrl.u32 %v1479_v12, 16  ;;  %v309_v26 = vrot.slane %v1479_v12, 1  ;;  %v1512_v33 = vpack.c.bf16 %v95_v29, %v95_v29 }
  0x26   :  { %v219_v41 = vrot.slane %v217_v36, 1  ;;  %v60_v12 = vrot.slane %v28_v11, 7 }
  0x27   :  { %368 = vrot.lane.b32.xlu1 %v1445_v54, %s1313_s26  ;;  %v212_v19 = vrot.slane %v210_v15, 1  ;;  %v32_v15 = vld [vmem:[%s2123_s0 + $0x58] sm:$0xff] }
  0x28   :  { %v109_v17 = vsel %vm85_vm0, %v60_v12, 0.0  ;;  %v93_v20 = vsel %vm85_vm0, 0.0, %v60_v12  ;;  %v64_v21 = vrot.slane %v32_v15, 7 }
  0x29   :  { %366 = vrot.lane.b32.xlu0 %v1408_v37, %s1313_s26  ;;  %v213_v23 = vor.u32 %v212_v19, %v208_v18  ;;  %v1584_v22 = vpack.c.bf16 %v109_v17, %v93_v20  ;;  %v1592_v27 = vpack.c.bf16 %v93_v20, %v93_v20 }
  0x2a   :  { %v97_v25 = vsel %vm85_vm0, 0.0, %v64_v21 }
  0x2b   :  { %414 = vrot.lane.b32.xlu1 %v185_v60, %s1314_s8  ;;  %v397_v29 = vshll.u32 %v1584_v22, 16  ;;  %v1598_v34 = vpack.c.bf16 %v97_v25, %v97_v25  ;;  %v395_v35 = vshrl.u32 %v1584_v22, 16  ;;  %v442_v57 = vrot.slane %v1584_v22, 1 }
  0x2d   :  { %412 = vrot.lane.b32.xlu0 %v178_v42, %s1314_s8  ;;  %v220_v42 = vor.u32 %v219_v41, %v215_v40  ;;  %v399_v36 = vrot.slane %v397_v29, 1 }
  0x2f   :  { %450 = vrot.lane.b32.xlu1 %v1464_v63, %s1315_s13 }
  0x31   :  { %448 = vrot.lane.b32.xlu0 %v304_v49, %s1315_s13  ;;  %v63_v49 = vrot.slane %v31_v46, 7 }
  0x33   :  { %482 = vrot.lane.b32.xlu1 %v1476_v9, %s1316_s16  ;;  %v112_v52 = vsel %vm85_vm0, %v63_v49, 0.0  ;;  %v96_v53 = vsel %vm85_vm0, 0.0, %v63_v49 }
  0x34   :  { %v142_v56 = vpack.c.bf16 %v112_v52, %v96_v53  ;;  %v1550_v59 = vpack.c.bf16 %v96_v53, %v96_v53 }
  0x35   :  { %480 = vrot.lane.b32.xlu0 %v1445_v54, %s1316_s16 }
  0x36   :  { %v1546_v58 = vrot.slane %v142_v56, 1  ;;  %v224_v62 = vshll.u32 %v142_v56, 16  ;;  %v222_v2 = vshrl.u32 %v142_v56, 16 }
  0x37   :  { %512 = vrot.lane.b32.xlu1 %v192_v13, %s1317_s19 }
  0x38   :  { %v1247_v4 = vcombine.low %v310_v50, %v1546_v58  ;;  %v226_v8 = vrot.slane %v224_v62, 1 }
  0x39   :  { %510 = vrot.lane.b32.xlu0 %v185_v60, %s1317_s19 }
  0x3a   :  { %1267 = vmatprep.mubr.msk.bf16.mxu1 %vm536_vm1, %v1247_v4  ;;  %v1561_v10 = vor.u32 %v226_v8, %v222_v2 }
  0x3b   :  { %266 = vrot.lane.b32.xlu1 %v192_v13, %s1312_s25 }
  0x3d   :  { %264 = vrot.lane.b32.xlu0 %v185_v60, %s1312_s25  ;;  %v201_v60 = vshrl.u32 %v139_v51, 16 }
  0x3f   :  { %324 = vrot.lane.b32.xlu1 %v1464_v63, %s1311_s24  ;;  %v206_v6 = vor.u32 %v205_v61, %v201_v60  ;;  %v33_v60 = vld [vmem:[%s2123_s0 + $0x60] sm:$0xff]  ;;  %v34_v63 = vld [vmem:[%s2123_s0 + $0x68] sm:$0xff] }
  0x40   :  { %v65_v11 = vrot.slane %v33_v60, 7 }
  0x41   :  { %272 = vrot.lane.b32.xlu0 %v213_v23, %s1312_s25 }
  0x42   :  { %v114_v20 = vsel %vm85_vm0, %v65_v11, 0.0 }
  0x43   :  { %332 = vrot.lane.b32.xlu1 %v309_v26, %s1311_s24 }
  0x45   :  { %326 = vrot.lane.b32.xlu0 %v1466_v5, %s1311_s24 }
  0x47   :  { %372 = vrot.lane.b32.xlu1 %v1506_v30, %s1313_s26 }
  0x49   :  { %370 = vrot.lane.b32.xlu0 %v1476_v9, %s1313_s26 }
  0x4b   :  { %380 = vrot.lane.b32.xlu1 %v1512_v33, %s1313_s26 }
  0x4d   :  { %378 = vrot.lane.b32.xlu0 %v1516_v38, %s1313_s26 }
  0x4f   :  { %418 = vrot.lane.b32.xlu1 %v199_v39, %s1314_s8 }
  0x51   :  { %416 = vrot.lane.b32.xlu0 %v192_v13, %s1314_s8  ;;  %v1574_v13 = vrot.slane %v139_v51, 1 }
  0x53   :  { %426 = vrot.lane.b32.xlu1 %v220_v42, %s1314_s8 }
  0x55   :  { %424 = vrot.lane.b32.xlu0 %v213_v23, %s1314_s8  ;;  %v113_v23 = vsel %vm85_vm0, %v64_v21, 0.0 }
  0x56   :  { %v143_v28 = vpack.c.bf16 %v113_v23, %v97_v25 }
  0x57   :  { %454 = vrot.lane.b32.xlu1 %v1528_v45, %s1315_s13 }
  0x58   :  { %v229_v43 = vshrl.u32 %v143_v28, 16 }
  0x59   :  { %452 = vrot.lane.b32.xlu0 %v1466_v5, %s1315_s13 }
  0x5b   :  { %462 = vrot.lane.b32.xlu1 %v310_v50, %s1315_s13 }
  0x5d   :  { %460 = vrot.lane.b32.xlu0 %v309_v26, %s1315_s13 }
  0x5f   :  { %486 = vrot.lane.b32.xlu1 %v1543_v55, %s1316_s16 }
  0x61   :  { %484 = vrot.lane.b32.xlu0 %v1506_v30, %s1316_s16 }
  0x63   :  { %494 = vrot.lane.b32.xlu1 %v1550_v59, %s1316_s16 }
  0x65   :  { %492 = vrot.lane.b32.xlu0 %v1512_v33, %s1316_s16 }
  0x67   :  { %516 = vrot.lane.b32.xlu1 %v206_v6, %s1317_s19 }
  0x69   :  { %514 = vrot.lane.b32.xlu0 %v199_v39, %s1317_s19 }
  0x6b   :  { %524 = vrot.lane.b32.xlu1 %v1561_v10, %s1317_s19 }
  0x6d   :  { %522 = vrot.lane.b32.xlu0 %v220_v42, %s1317_s19 }
  0x6f   :  { %270 = vrot.lane.b32.xlu1 %v206_v6, %s1312_s25 }
  0x71   :  { %268 = vrot.lane.b32.xlu0 %v199_v39, %s1312_s25  ;;  %v231_v39 = vshll.u32 %v143_v28, 16 }
  0x73   :  { %276 = vrot.lane.b32.xlu1 %v1561_v10, %s1312_s25  ;;  %v233_v44 = vrot.slane %v231_v39, 1 }
  0x75   :  { %v317_v18 = vpop.permute.xlu1 %316  ;;  %v257_v19 = vpop.permute.xlu0 %256  ;;  %274 = vrot.lane.b32.xlu0 %v220_v42, %s1312_s25  ;;  %v1605_v42 = vor.u32 %v399_v36, %v395_v35  ;;  %v1615_v51 = vor.u32 %v233_v44, %v229_v43  ;;  %v66_v36 = vrot.slane %v34_v63, 7 }
  0x76   :  { %v538_v48 = vsel %vm536_vm1, 0.0|0.0, %v257_v19 }
  0x77   :  { %330 = vrot.lane.b32.xlu1 %v1574_v13, %s1311_s24  ;;  %v1618_v52 = vsel %vm581_vm2, %v538_v48, %v317_v18  ;;  %v1641_v18 = vrot.slane %v143_v28, 1 }
  0x79   :  { %v365_v24 = vpop.permute.xlu1 %364  ;;  %328 = vrot.lane.b32.xlu0 %v1528_v45, %s1311_s24  ;;  %v363_v26 = vpop.permute.xlu0 %362 }
  0x7a   :  { %v614_v61 = vsel %vm612_vm3, %v1618_v52, %v363_v26 }
  0x7b   :  { %336 = vrot.lane.b32.xlu1 %v1546_v58, %s1311_s24 }
  0x7d   :  { %v319_v31 = vpop.permute.xlu1 %318  ;;  %334 = vrot.lane.b32.xlu0 %v310_v50, %s1311_s24 }
  0x7f   :  { %376 = vrot.lane.b32.xlu1 %v1592_v27, %s1313_s26  ;;  %v259_v32 = vpop.permute.xlu0 %258 }
  0x80   :  { %v541_v46 = vsel %vm536_vm1, %v1375_v16, %v259_v32 }
  0x81   :  { %v411_v40 = vpop.permute.xlu1 %410  ;;  %374 = vrot.lane.b32.xlu0 %v1543_v55, %s1313_s26  ;;  %v585_v49 = vsel %vm581_vm2, %v541_v46, %v319_v31 }
  0x82   :  { %v616_v53 = vsel %vm612_vm3, %v585_v49, %v365_v24  ;;  %v98_v24 = vsel %vm85_vm0, 0.0, %v65_v11 }
  0x83   :  { %384 = vrot.lane.b32.xlu1 %v1598_v34, %s1313_s26  ;;  %v409_v41 = vpop.permute.xlu0 %408  ;;  %v649_v62 = vsel %vm645_vm4, %v616_v53, %v411_v40  ;;  %v144_v26 = vpack.c.bf16 %v114_v20, %v98_v24  ;;  %v1659_v31 = vpack.c.bf16 %v98_v24, %v98_v24  ;;  %v99_v40 = vsel %vm85_vm0, 0.0, %v66_v36 }
  0x84   :  { %v647_v4 = vsel %vm645_vm4, %v614_v61, %v409_v41  ;;  %v115_v41 = vsel %vm85_vm0, %v66_v36, 0.0 }
  0x85   :  { %v447_v47 = vpop.permute.xlu1 %446  ;;  %382 = vrot.lane.b32.xlu0 %v1550_v59, %s1313_s26  ;;  %v238_v32 = vshll.u32 %v144_v26, 16  ;;  %v145_v46 = vpack.c.bf16 %v115_v41, %v99_v40 }
  0x86   :  { %v682_v2 = vsel %vm678_vm5, %v649_v62, %v447_v47 }
  0x87   :  { %422 = vrot.lane.b32.xlu1 %v1605_v42, %s1314_s8  ;;  %v445_v50 = vpop.permute.xlu0 %444  ;;  %v245_v53 = vshll.u32 %v145_v46, 16  ;;  %v243_v11 = vshrl.u32 %v145_v46, 16 }
  0x88   :  { %v680_v8 = vsel %vm678_vm5, %v647_v4, %v445_v50  ;;  %v1686_v50 = vrot.slane %v144_v26, 1 }
  0x89   :  { %v479_v16 = vpop.permute.xlu1 %478  ;;  %420 = vrot.lane.b32.xlu0 %v206_v6, %s1314_s8 }
  0x8a   :  { %v715_v12 = vsel %vm711_vm6, %v682_v2, %v479_v16 }
  0x8b   :  { %430 = vrot.lane.b32.xlu1 %v1615_v51, %s1314_s8  ;;  %v477_v56 = vpop.permute.xlu0 %476 }
  0x8c   :  { %v713_v15 = vsel %vm711_vm6, %v680_v8, %v477_v56  ;;  %v1699_v8 = vpack.c.bf16 %v99_v40, %v99_v40 }
  0x8d   :  { %v509_v6 = vpop.permute.xlu1 %508  ;;  %428 = vrot.lane.b32.xlu0 %v1561_v10, %s1314_s8 }
  0x8e   :  { %v747_v19 = vsel %vm743_vm7, %v715_v12, %v509_v6 }
  0x8f   :  { %458 = vrot.lane.b32.xlu1 %v442_v57, %s1315_s13  ;;  %v507_v17 = vpop.permute.xlu0 %506 }
  0x90   :  { %v745_v10 = vsel %vm743_vm7, %v713_v15, %v507_v17 }
  0x91   :  { %v1238_v21 = vcombine.low %v745_v10, %v747_v19  ;;  %v263_v23 = vpop.permute.xlu1 %262  ;;  %456 = vrot.lane.b32.xlu0 %v1574_v13, %s1315_s13  ;;  %v247_v19 = vrot.slane %v245_v53, 1 }
  0x92   :  { %v547_v47 = vsel %vm536_vm1, %v1408_v37, %v263_v23  ;;  %v1243_v23 = vcombine.low %v1528_v45, %v1574_v13  ;;  %v1720_v45 = vrot.slane %v145_v46, 1 }
  0x93   :  { %466 = vrot.lane.b32.xlu1 %v1641_v18, %s1315_s13  ;;  %975 = vmatmul.mubr.bf16.vlgmr.msra.gmra.mrb[0].mxu0 %v1238_v21  ;;  %v261_v25 = vpop.permute.xlu0 %260 }
  0x94   :  { %1264 = vmatprep.mubr.msk.bf16.mxu0 %vm536_vm1, %v1241_v7  ;;  %v236_v7 = vshrl.u32 %v144_v26, 16  ;;  %v544_v49 = vsel %vm536_vm1, %v1373_v14, %v261_v25 }
  0x95   :  { %v323_v28 = vpop.permute.xlu1 %322  ;;  %464 = vrot.lane.b32.xlu0 %v1546_v58, %s1315_s13  ;;  %v240_v58 = vrot.slane %v238_v32, 1 }
  0x97   :  { %490 = vrot.lane.b32.xlu1 %v1309_v0, %s1316_s16  ;;  %v321_v29 = vpop.permute.xlu0 %320 }
  0x98   :  { %v587_v16 = vsel %vm581_vm2, %v544_v49, %v321_v29 }
  0x99   :  { %v369_v35 = vpop.permute.xlu1 %368  ;;  %488 = vrot.lane.b32.xlu0 %v1592_v27, %s1316_s16  ;;  %v241_v27 = vor.u32 %v240_v58, %v236_v7  ;;  %v36_v58 = vld [vmem:[%s2123_s0 + $0x78] sm:$0xff] }
  0x9a   :  { %v68_v41 = vrot.slane %v36_v58, 7 }
  0x9b   :  { %498 = vrot.lane.b32.xlu1 %v1659_v31, %s1316_s16  ;;  %v367_v5 = vpop.permute.xlu0 %366 }
  0x9c   :  { %v618_v61 = vsel %vm612_vm3, %v587_v16, %v367_v5  ;;  %v101_v46 = vsel %vm85_vm0, 0.0, %v68_v41 }
  0x9d   :  { %v415_v0 = vpop.permute.xlu1 %414  ;;  %496 = vrot.lane.b32.xlu0 %v1598_v34, %s1316_s16 }
  0x9f   :  { %520 = vrot.lane.b32.xlu1 %v1352_v3, %s1317_s19  ;;  %v413_v39 = vpop.permute.xlu0 %412  ;;  %v35_v3 = vld [vmem:[%s2123_s0 + $0x70] sm:$0xff] }
  0xa0   :  { %v67_v56 = vrot.slane %v35_v3, 7  ;;  %v651_v4 = vsel %vm645_vm4, %v618_v61, %v413_v39 }
  0xa1   :  { %v451_v43 = vpop.permute.xlu1 %450  ;;  %518 = vrot.lane.b32.xlu0 %v1605_v42, %s1317_s19  ;;  %v589_v42 = vsel %vm581_vm2, %v547_v47, %v323_v28  ;;  %v248_v28 = vor.u32 %v247_v19, %v243_v11  ;;  %v117_v47 = vsel %vm85_vm0, %v68_v41, 0.0 }
  0xa2   :  { %v620_v60 = vsel %vm612_vm3, %v589_v42, %v369_v35  ;;  %v100_v10 = vsel %vm85_vm0, 0.0, %v67_v56  ;;  %v116_v21 = vsel %vm85_vm0, %v67_v56, 0.0  ;;  %v1746_v49 = vpack.c.bf16 %v117_v47, %v101_v46 }
  0xa3   :  { %528 = vrot.lane.b32.xlu1 %v241_v27, %s1317_s19  ;;  %v449_v44 = vpop.permute.xlu0 %448  ;;  %v653_v62 = vsel %vm645_vm4, %v620_v60, %v415_v0  ;;  %v146_v29 = vpack.c.bf16 %v116_v21, %v100_v10  ;;  %v1735_v0 = vpack.c.bf16 %v100_v10, %v100_v10  ;;  %v148_v60 = vpack.c.bf16 %v101_v46, %v101_v46 }
  0xa4   :  { %v686_v6 = vsel %vm678_vm5, %v653_v62, %v451_v43  ;;  %v684_v2 = vsel %vm678_vm5, %v651_v4, %v449_v44  ;;  %v402_v61 = vshrl.u32 %v1746_v49, 16 }
  0xa5   :  { %v483_v48 = vpop.permute.xlu1 %482  ;;  %526 = vrot.lane.b32.xlu0 %v1615_v51, %s1317_s19  ;;  %v1722_v13 = vrot.slane %v146_v29, 1  ;;  %v252_v63 = vshll.u32 %v146_v29, 16  ;;  %v250_v39 = vshrl.u32 %v146_v29, 16 }
  0xa6   :  { %v719_v12 = vsel %vm711_vm6, %v686_v6, %v483_v48 }
  0xa7   :  { %280 = vrot.lane.b32.xlu1 %v241_v27, %s1312_s25  ;;  %v481_v37 = vpop.permute.xlu0 %480  ;;  %v1251_v5 = vcombine.low %v1720_v45, %v1722_v13  ;;  %v254_v40 = vrot.slane %v252_v63, 1  ;;  %v1245_v63 = vcombine.low %v442_v57, %v1349_v1 }
  0xa8   :  { %v717_v15 = vsel %vm711_vm6, %v684_v2, %v481_v37  ;;  %v404_v37 = vshll.u32 %v1746_v49, 16 }
  0xa9   :  { %v513_v14 = vpop.permute.xlu1 %512  ;;  %278 = vrot.lane.b32.xlu0 %v1615_v51, %s1312_s25  ;;  %v255_v44 = vor.u32 %v254_v40, %v250_v39 }
  0xaa   :  { %v751_v51 = vsel %vm743_vm7, %v719_v12, %v513_v14  ;;  %v406_v62 = vrot.slane %v404_v37, 1  ;;  %v443_v12 = vrot.slane %v1746_v49, 1 }
  0xab   :  { %340 = vrot.lane.b32.xlu1 %v1686_v50, %s1311_s24  ;;  %v511_v17 = vpop.permute.xlu0 %510 }
  0xac   :  { %v749_v20 = vsel %vm743_vm7, %v717_v15, %v511_v17  ;;  %v407_v6 = vor.u32 %v406_v62, %v402_v61 }
  0xad   :  { %v1240_v24 = vcombine.low %v749_v20, %v751_v51  ;;  %v1711_v25 = vpop.permute.xlu1 %266  ;;  %338 = vrot.lane.b32.xlu0 %v1641_v18, %s1311_s24 }
  0xae   :  { %v553_v19 = vsel %vm536_vm1, %v1476_v9, %v1711_v25 }
  0xaf   :  { %388 = vrot.lane.b32.xlu1 %v1699_v8, %s1313_s26  ;;  %983 = vmatmul.mubr.bf16.gmra.mrb[4].mxu0 %v1240_v24  ;;  %v265_v26 = vpop.permute.xlu0 %264 }
  0xb0   :  { %1265 = vmatprep.mubr.msk.bf16.mxu0 %vm536_vm1, %v1243_v23  ;;  %v550_v10 = vsel %vm536_vm1, %v1445_v54, %v265_v26 }
  0xb1   :  { %v325_v32 = vpop.permute.xlu1 %324  ;;  %386 = vrot.lane.b32.xlu0 %v1659_v31, %s1313_s26 }
  0xb2   :  { %v591_v21 = vsel %vm581_vm2, %v550_v10, %v325_v32 }
  0xb3   :  { %434 = vrot.lane.b32.xlu1 %v248_v28, %s1314_s8  ;;  %v273_v35 = vpop.permute.xlu0 %272 }
  0xb4   :  { %v562_v24 = vsel %vm536_vm1, %v1516_v38, %v273_v35 }
  0xb5   :  { %v1727_v7 = vpop.permute.xlu1 %332  ;;  %432 = vrot.lane.b32.xlu0 %v241_v27, %s1314_s8 }
  0xb6   :  { %v599_v38 = vsel %vm581_vm2, %v562_v24, %v1727_v7 }
  0xb7   :  { %470 = vrot.lane.b32.xlu1 %v1720_v45, %s1315_s13  ;;  %v327_v36 = vpop.permute.xlu0 %326 }
  0xb8   :  { %v593_v51 = vsel %vm581_vm2, %v553_v19, %v327_v36 }
  0xb9   :  { %v373_v43 = vpop.permute.xlu1 %372  ;;  %468 = vrot.lane.b32.xlu0 %v1686_v50, %s1315_s13 }
  0xbb   :  { %502 = vrot.lane.b32.xlu1 %v1735_v0, %s1316_s16  ;;  %v371_v27 = vpop.permute.xlu0 %370 }
  0xbc   :  { %v622_v9 = vsel %vm612_vm3, %v591_v21, %v371_v27 }
  0xbd   :  { %v381_v3 = vpop.permute.xlu1 %380  ;;  %500 = vrot.lane.b32.xlu0 %v1699_v8, %s1316_s16 }
  0xbe   :  { %v632_v39 = vsel %vm612_vm3, %v599_v38, %v381_v3 }
  0xbf   :  { %532 = vrot.lane.b32.xlu1 %v255_v44, %s1317_s19  ;;  %v379_v48 = vpop.permute.xlu0 %378 }
  0xc0   :  { %v630_v40 = vsel %vm612_vm3, %v1618_v52, %v379_v48 }
  0xc1   :  { %v419_v42 = vpop.permute.xlu1 %418  ;;  %530 = vrot.lane.b32.xlu0 %v248_v28, %s1317_s19 }
  0xc3   :  { %284 = vrot.lane.b32.xlu1 %v255_v44, %s1312_s25  ;;  %v417_v16 = vpop.permute.xlu0 %416 }
  0xc4   :  { %v655_v25 = vsel %vm645_vm4, %v622_v9, %v417_v16  ;;  %v1249_v16 = vcombine.low %v1641_v18, %v1686_v50 }
  0xc5   :  { %v427_v53 = vpop.permute.xlu1 %426  ;;  %282 = vrot.lane.b32.xlu0 %v248_v28, %s1312_s25  ;;  %v624_v28 = vsel %vm612_vm3, %v593_v51, %v373_v43 }
  0xc6   :  { %v657_v54 = vsel %vm645_vm4, %v624_v28, %v419_v42  ;;  %v665_v22 = vsel %vm645_vm4, %v632_v39, %v427_v53 }
  0xc7   :  { %344 = vrot.lane.b32.xlu1 %v1722_v13, %s1311_s24  ;;  %v425_v56 = vpop.permute.xlu0 %424 }
  0xc8   :  { %v663_v57 = vsel %vm645_vm4, %v630_v40, %v425_v56 }
  0xc9   :  { %v455_v4 = vpop.permute.xlu1 %454  ;;  %342 = vrot.lane.b32.xlu0 %v1720_v45, %s1311_s24 }
  0xca   :  { %v690_v29 = vsel %vm678_vm5, %v657_v54, %v455_v4 }
  0xcb   :  { %392 = vrot.lane.b32.xlu1 %v148_v60, %s1313_s26  ;;  %v453_v14 = vpop.permute.xlu0 %452 }
  0xcc   :  { %v688_v32 = vsel %vm678_vm5, %v655_v25, %v453_v14 }
  0xcd   :  { %v463_v2 = vpop.permute.xlu1 %462  ;;  %390 = vrot.lane.b32.xlu0 %v1735_v0, %s1313_s26 }
  0xcf   :  { %438 = vrot.lane.b32.xlu1 %v407_v6, %s1314_s8  ;;  %v461_v11 = vpop.permute.xlu0 %460 }
  0xd0   :  { %v696_v46 = vsel %vm678_vm5, %v663_v57, %v461_v11 }
  0xd1   :  { %v487_v15 = vpop.permute.xlu1 %486  ;;  %436 = vrot.lane.b32.xlu0 %v255_v44, %s1314_s8  ;;  %v698_v44 = vsel %vm678_vm5, %v665_v22, %v463_v2 }
  0xd2   :  { %v723_v35 = vsel %vm711_vm6, %v690_v29, %v487_v15 }
  0xd3   :  { %474 = vrot.lane.b32.xlu1 %v443_v12, %s1315_s13  ;;  %v485_v17 = vpop.permute.xlu0 %484 }
  0xd4   :  { %v721_v58 = vsel %vm711_vm6, %v688_v32, %v485_v17 }
  0xd5   :  { %v495_v20 = vpop.permute.xlu1 %494  ;;  %472 = vrot.lane.b32.xlu0 %v1722_v13, %s1315_s13 }
  0xd6   :  { %v731_v47 = vsel %vm711_vm6, %v698_v44, %v495_v20 }
  0xd7   :  { %v493_v23 = vpop.permute.xlu0 %492  ;;  %534 = vrot.lane.b32.xlu1 %v407_v6, %s1317_s19 }
  0xd8   :  { %v729_v3 = vsel %vm711_vm6, %v696_v46, %v493_v23 }
  0xd9   :  { %v517_v26 = vpop.permute.xlu1 %516  ;;  %504 = vrot.lane.b32.xlu0 %v148_v60, %s1316_s16 }
  0xda   :  { %v755_v41 = vsel %vm743_vm7, %v723_v35, %v517_v26 }
  0xdb   :  { %v515_v36 = vpop.permute.xlu0 %514 }
  0xdc   :  { %v753_v43 = vsel %vm743_vm7, %v721_v58, %v515_v36 }
  0xdd   :  { %v1242_v27 = vcombine.low %v753_v43, %v755_v41  ;;  %v525_v7 = vpop.permute.xlu1 %524 }
  0xde   :  { %v763_v48 = vsel %vm743_vm7, %v731_v47, %v525_v7 }
  0xdf   :  { %991 = vmatmul.mubr.bf16.gmra.mrb[8].mxu0 %v1242_v27  ;;  %v523_v52 = vpop.permute.xlu0 %522 }
  0xe0   :  { %v761_v42 = vsel %vm743_vm7, %v729_v3, %v523_v52  ;;  %1266 = vmatprep.mubr.msk.bf16.mxu0 %vm536_vm1, %v1245_v63 }
  0xe1   :  { %v1246_v37 = vcombine.low %v761_v42, %v763_v48  ;;  %v271_v53 = vpop.permute.xlu1 %270 }
  0xe2   :  { %v559_v54 = vsel %vm536_vm1, %v1543_v55, %v271_v53 }
  0xe3   :  { %1007 = vmatmul.mubr.bf16.vlgmr.msra.gmra.mrb[0].mxu1 %v1246_v37  ;;  %v269_v56 = vpop.permute.xlu0 %268 }
  0xe4   :  { %1268 = vmatprep.mubr.msk.bf16.mxu1 %vm536_vm1, %v1249_v16  ;;  %v556_v25 = vsel %vm536_vm1, %v1506_v30, %v269_v56 }
  0xe5   :  { %v277_v60 = vpop.permute.xlu1 %276 }
  0xe6   :  { %v568_v55 = vsel %vm536_vm1, %v1550_v59, %v277_v60 }
  0xe7   :  { %v275_v61 = vpop.permute.xlu0 %274 }
  0xe8   :  { %v565_v30 = vsel %vm536_vm1, %v1512_v33, %v275_v61 }
  0xe9   :  { %v331_v62 = vpop.permute.xlu1 %330 }
  0xea   :  { %v597_v26 = vsel %vm581_vm2, %v559_v54, %v331_v62 }
  0xeb   :  { %v329_v4 = vpop.permute.xlu0 %328 }
  0xec   :  { %v595_v29 = vsel %vm581_vm2, %v556_v25, %v329_v4 }
  0xed   :  { %v337_v14 = vpop.permute.xlu1 %336 }
  0xee   :  { %v603_v41 = vsel %vm581_vm2, %v568_v55, %v337_v14 }
  0xef   :  { %v335_v6 = vpop.permute.xlu0 %334 }
  0xf0   :  { %v601_v43 = vsel %vm581_vm2, %v565_v30, %v335_v6 }
  0xf1   :  { %v377_v2 = vpop.permute.xlu1 %376 }
  0xf2   :  { %v628_v63 = vsel %vm612_vm3, %v597_v26, %v377_v2 }
  0xf3   :  { %v375_v11 = vpop.permute.xlu0 %374 }
  0xf4   :  { %v626_v38 = vsel %vm612_vm3, %v595_v29, %v375_v11 }
  0xf5   :  { %v385_v15 = vpop.permute.xlu1 %384 }
  0xf6   :  { %v636_v7 = vsel %vm612_vm3, %v603_v41, %v385_v15 }
  0xf7   :  { %v383_v17 = vpop.permute.xlu0 %382 }
  0xf8   :  { %v634_v59 = vsel %vm612_vm3, %v601_v43, %v383_v17 }
  0xf9   :  { %v423_v19 = vpop.permute.xlu1 %422 }
  0xfa   :  { %v661_v35 = vsel %vm645_vm4, %v628_v63, %v423_v19  ;;  %v1253_v63 = vcombine.low %v443_v12, %v1349_v1 }
  0xfb   :  { %v421_v10 = vpop.permute.xlu0 %420 }
  0xfc   :  { %v659_v58 = vsel %vm645_vm4, %v626_v38, %v421_v10 }
  0xfd   :  { %v431_v51 = vpop.permute.xlu1 %430 }
  0xfe   :  { %v669_v46 = vsel %vm645_vm4, %v636_v7, %v431_v51 }
  0xff   :  { %v429_v18 = vpop.permute.xlu0 %428 }
 0x100   :  { %v667_v47 = vsel %vm645_vm4, %v634_v59, %v429_v18 }
 0x101   :  { %v459_v50 = vpop.permute.xlu1 %458 }
 0x102   :  { %v694_v39 = vsel %vm678_vm5, %v661_v35, %v459_v50 }
 0x103   :  { %v457_v20 = vpop.permute.xlu0 %456 }
 0x104   :  { %v692_v40 = vsel %vm678_vm5, %v659_v58, %v457_v20 }
 0x105   :  { %v467_v21 = vpop.permute.xlu1 %466 }
 0x106   :  { %v702_v48 = vsel %vm678_vm5, %v669_v46, %v467_v21 }
 0x107   :  { %v465_v23 = vpop.permute.xlu0 %464 }
 0x108   :  { %v700_v42 = vsel %vm678_vm5, %v667_v47, %v465_v23 }
 0x109   :  { %v1809_v24 = vpop.permute.xlu1 %490 }
 0x10a   :  { %v727_v22 = vsel %vm711_vm6, %v694_v39, %v1809_v24 }
 0x10b   :  { %v489_v28 = vpop.permute.xlu0 %488 }
 0x10c   :  { %v725_v57 = vsel %vm711_vm6, %v692_v40, %v489_v28 }
 0x10d   :  { %v499_v9 = vpop.permute.xlu1 %498 }
 0x10e   :  { %v735_v16 = vsel %vm711_vm6, %v702_v48, %v499_v9 }
 0x10f   :  { %v497_v32 = vpop.permute.xlu0 %496 }
 0x110   :  { %v733_v37 = vsel %vm711_vm6, %v700_v42, %v497_v32 }
 0x111   :  { %v1821_v36 = vpop.permute.xlu1 %520 }
 0x112   :  { %v759_v33 = vsel %vm743_vm7, %v727_v22, %v1821_v36 }
 0x113   :  { %v519_v27 = vpop.permute.xlu0 %518 }
 0x114   :  { %v757_v44 = vsel %vm743_vm7, %v725_v57, %v519_v27 }
 0x115   :  { %v1244_v3 = vcombine.low %v757_v44, %v759_v33  ;;  %v529_v52 = vpop.permute.xlu1 %528 }
 0x116   :  { %v767_v56 = vsel %vm743_vm7, %v735_v16, %v529_v52 }
 0x117   :  { %999 = vmatmul.mubr.bf16.gmra.mrb[12].mxu0 %v1244_v3  ;;  %v527_v53 = vpop.permute.xlu0 %526 }
 0x118   :  { %v765_v60 = vsel %vm743_vm7, %v733_v37, %v527_v53 }
 0x119   :  { %v1248_v61 = vcombine.low %v765_v60, %v767_v56  ;;  %v281_v62 = vpop.permute.xlu1 %280 }
 0x11a   :  { %v574_v51 = vsel %vm536_vm1, %v1659_v31, %v281_v62 }
 0x11b   :  { %1015 = vmatmul.mubr.bf16.gmra.mrb[4].mxu1 %v1248_v61  ;;  %v279_v4 = vpop.permute.xlu0 %278 }
 0x11c   :  { %1269 = vmatprep.mubr.msk.bf16.mxu1 %vm536_vm1, %v1251_v5  ;;  %v571_v50 = vsel %vm536_vm1, %v1598_v34, %v279_v4 }
 0x11d   :  { %v341_v14 = vpop.permute.xlu1 %340 }
 0x11e   :  { %v607_v20 = vsel %vm581_vm2, %v574_v51, %v341_v14 }
 0x11f   :  { %v339_v6 = vpop.permute.xlu0 %338 }
 0x120   :  { %v605_v45 = vsel %vm581_vm2, %v571_v50, %v339_v6 }
 0x121   :  { %v389_v2 = vpop.permute.xlu1 %388 }
 0x122   :  { %v640_v5 = vsel %vm612_vm3, %v607_v20, %v389_v2 }
 0x123   :  { %v387_v11 = vpop.permute.xlu0 %386 }
 0x124   :  { %v638_v21 = vsel %vm612_vm3, %v605_v45, %v387_v11 }
 0x125   :  { %v435_v15 = vpop.permute.xlu1 %434 }
 0x126   :  { %v673_v23 = vsel %vm645_vm4, %v640_v5, %v435_v15 }
 0x127   :  { %v433_v17 = vpop.permute.xlu0 %432 }
 0x128   :  { %v671_v28 = vsel %vm645_vm4, %v638_v21, %v433_v17 }
 0x129   :  { %v471_v19 = vpop.permute.xlu1 %470 }
 0x12a   :  { %v706_v31 = vsel %vm678_vm5, %v673_v23, %v471_v19 }
 0x12b   :  { %v469_v10 = vpop.permute.xlu0 %468 }
 0x12c   :  { %v704_v54 = vsel %vm678_vm5, %v671_v28, %v469_v10 }
 0x12d   :  { %v503_v18 = vpop.permute.xlu1 %502 }
 0x12e   :  { %v739_v34 = vsel %vm711_vm6, %v706_v31, %v503_v18 }
 0x12f   :  { %v501_v13 = vpop.permute.xlu0 %500 }
 0x130   :  { %v737_v25 = vsel %vm711_vm6, %v704_v54, %v501_v13 }
 0x131   :  { %v533_v9 = vpop.permute.xlu1 %532 }
 0x132   :  { %v771_v29 = vsel %vm743_vm7, %v739_v34, %v533_v9 }
 0x133   :  { %v531_v26 = vpop.permute.xlu0 %530 }
 0x134   :  { %v769_v32 = vsel %vm743_vm7, %v737_v25, %v531_v26 }
 0x135   :  { %v1250_v38 = vcombine.low %v769_v32, %v771_v29  ;;  %v285_v35 = vpop.permute.xlu1 %284 }
 0x136   :  { %v580_v41 = vsel %vm536_vm1, %v1735_v0, %v285_v35 }
 0x137   :  { %1023 = vmatmul.mubr.bf16.gmra.mrb[8].mxu1 %v1250_v38  ;;  %v283_v58 = vpop.permute.xlu0 %282 }
 0x138   :  { %1270 = vmatprep.mubr.msk.bf16.mxu1 %vm536_vm1, %v1253_v63  ;;  %v577_v27 = vsel %vm536_vm1, %v1699_v8, %v283_v58 }
 0x139   :  { %v345_v55 = vpop.permute.xlu1 %344 }
 0x13a   :  { %v611_v57 = vsel %vm581_vm2, %v580_v41, %v345_v55 }
 0x13b   :  { %v343_v30 = vpop.permute.xlu0 %342 }
 0x13c   :  { %v609_v33 = vsel %vm581_vm2, %v577_v27, %v343_v30 }
 0x13d   :  { %v393_v39 = vpop.permute.xlu1 %392 }
 0x13e   :  { %v644_v49 = vsel %vm612_vm3, %v611_v57, %v393_v39 }
 0x13f   :  { %v391_v40 = vpop.permute.xlu0 %390 }
 0x140   :  { %v642_v44 = vsel %vm612_vm3, %v609_v33, %v391_v40 }
 0x141   :  { %v439_v43 = vpop.permute.xlu1 %438 }
 0x142   :  { %v677_v12 = vsel %vm645_vm4, %v644_v49, %v439_v43 }
 0x143   :  { %v437_v22 = vpop.permute.xlu0 %436 }
 0x144   :  { %v675_v0 = vsel %vm645_vm4, %v642_v44, %v437_v22 }
 0x145   :  { %v475_v1 = vpop.permute.xlu1 %474 }
 0x146   :  { %v710_v7 = vsel %vm678_vm5, %v677_v12, %v475_v1 }
 0x147   :  { %v473_v59 = vpop.permute.xlu0 %472  ;;  %v742_v46 = vsel %vm711_vm6, %v710_v7, %v1809_v24 }
 0x148   :  { %v708_v3 = vsel %vm678_vm5, %v675_v0, %v473_v59  ;;  %v774_v8 = vsel %vm743_vm7, %v742_v46, %v1821_v36 }
 0x149   :  { %v535_v47 = vpop.permute.xlu1 %534 }
 0x14b   :  { %v505_v52 = vpop.permute.xlu0 %504 }
 0x14c   :  { %v741_v48 = vsel %vm711_vm6, %v708_v3, %v505_v52 }
 0x14d   :  { %v773_v42 = vsel %vm743_vm7, %v741_v48, %v535_v47 }
 0x14e   :  { %v1252_v16 = vcombine.low %v773_v42, %v774_v8 }
 0x150   :  { %1031 = vmatmul.mubr.bf16.gmra.mrb[12].mxu1 %v1252_v16 }
 0x166   :  { %v1889_v37 = vpop.f32.mrb[0].mxu0 }
 0x167   :  { %v1076_v53 = vmul.f32 %v1889_v37, %v1889_v37  ;;  %v978_v56 = vpop.f32.mrb[1].mxu0  ;;  %v1039_v60 = vsel %vm536_vm1, %v1889_v37, 0.0 }
 0x168   :  { %v1893_v24 = vpop.f32.mrb[2].mxu0 }
 0x169   :  { %v1040_v61 = vsel %vm536_vm1, %v1893_v24, 0.0  ;;  %v1077_v36 = vmul.f32 %v1893_v24, %v1893_v24  ;;  %v981_v62 = vpop.f32.mrb[3].mxu0  ;;  %v1092_v14 = vsel %vm536_vm1, %v1076_v53, 0.0 }
 0x16a   :  { %v1041_v4 = vadd.f32 %v1040_v61, %v1039_v60 }
 0x16b   :  { %v1093_v6 = vsel %vm536_vm1, %v1077_v36, 0.0 }
 0x16c   :  { %v1094_v2 = vadd.f32 %v1093_v6, %v1092_v14 }
 0x182   :  { %v1903_v11 = vpop.f32.mrb[4].mxu0 }
 0x183   :  { %v1042_v15 = vsel %vm536_vm1, %v1903_v11, 0.0  ;;  %v1078_v17 = vmul.f32 %v1903_v11, %v1903_v11  ;;  %v986_v19 = vpop.f32.mrb[5].mxu0 }
 0x184   :  { %v1043_v10 = vadd.f32 %v1042_v15, %v1041_v4  ;;  %v1909_v51 = vpop.f32.mrb[6].mxu0 }
 0x185   :  { %v1095_v18 = vsel %vm536_vm1, %v1078_v17, 0.0  ;;  %v1044_v50 = vsel %vm536_vm1, %v1909_v51, 0.0  ;;  %v1079_v20 = vmul.f32 %v1909_v51, %v1909_v51  ;;  %v989_v45 = vpop.f32.mrb[7].mxu0 }
 0x186   :  { %v1096_v13 = vadd.f32 %v1095_v18, %v1094_v2  ;;  %v1045_v5 = vadd.f32 %v1044_v50, %v1043_v10 }
 0x187   :  { %v1097_v21 = vsel %vm536_vm1, %v1079_v20, 0.0 }
 0x188   :  { %v1098_v23 = vadd.f32 %v1097_v21, %v1096_v13 }
 0x1b2   :  { %v1917_v28 = vpop.f32.mrb[8].mxu0 }
 0x1b3   :  { %v1046_v9 = vsel %vm536_vm1, %v1917_v28, 0.0  ;;  %v1080_v31 = vmul.f32 %v1917_v28, %v1917_v28  ;;  %v994_v54 = vpop.f32.mrb[9].mxu0 }
 0x1b4   :  { %v1047_v34 = vadd.f32 %v1046_v9, %v1045_v5  ;;  %v1923_v25 = vpop.f32.mrb[10].mxu0 }
 0x1b5   :  { %v1099_v26 = vsel %vm536_vm1, %v1080_v31, 0.0  ;;  %v1048_v29 = vsel %vm536_vm1, %v1923_v25, 0.0  ;;  %v1081_v32 = vmul.f32 %v1923_v25, %v1923_v25  ;;  %v997_v63 = vpop.f32.mrb[11].mxu0 }
 0x1b6   :  { %v1100_v38 = vadd.f32 %v1099_v26, %v1098_v23  ;;  %v1049_v35 = vadd.f32 %v1048_v29, %v1047_v34  ;;  %v1930_v58 = vpop.f32.mrb[0].mxu1 }
 0x1b7   :  { %v1101_v55 = vsel %vm536_vm1, %v1081_v32, 0.0  ;;  %v1010_v30 = vpop.f32.mrb[1].mxu1  ;;  %v1084_v27 = vmul.f32 %v1930_v58, %v1930_v58  ;;  %v1054_v3 = vsel %vm536_vm1, %v1930_v58, 0.0 }
 0x1b8   :  { %v1102_v39 = vadd.f32 %v1101_v55, %v1100_v38  ;;  %v1933_v40 = vpop.f32.mrb[2].mxu1 }
 0x1b9   :  { %v1013_v41 = vpop.f32.mrb[3].mxu1  ;;  %v1085_v52 = vmul.f32 %v1933_v40, %v1933_v40  ;;  %v1107_v56 = vsel %vm536_vm1, %v1084_v27, 0.0  ;;  %v1056_v60 = vsel %vm536_vm1, %v1933_v40, 0.0 }
 0x1bb   :  { %v1109_v14 = vsel %vm536_vm1, %v1085_v52, 0.0 }
 0x1ea   :  { %v1935_v43 = vpop.f32.mrb[12].mxu0 }
 0x1eb   :  { %v1050_v22 = vsel %vm536_vm1, %v1935_v43, 0.0  ;;  %v1082_v57 = vmul.f32 %v1935_v43, %v1935_v43  ;;  %v1002_v49 = vpop.f32.mrb[13].mxu0 }
 0x1ec   :  { %v1051_v1 = vadd.f32 %v1050_v22, %v1049_v35  ;;  %v1941_v12 = vpop.f32.mrb[14].mxu0 }
 0x1ed   :  { %v1103_v7 = vsel %vm536_vm1, %v1082_v57, 0.0  ;;  %v1052_v59 = vsel %vm536_vm1, %v1941_v12, 0.0  ;;  %v1083_v33 = vmul.f32 %v1941_v12, %v1941_v12  ;;  %v1005_v44 = vpop.f32.mrb[15].mxu0 }
 0x1ee   :  { %v1104_v0 = vadd.f32 %v1103_v7, %v1102_v39  ;;  %v1053_v46 = vadd.f32 %v1052_v59, %v1051_v1  ;;  %v1950_v47 = vpop.f32.mrb[4].mxu1 }
 0x1ef   :  { %v1105_v48 = vsel %vm536_vm1, %v1083_v33, 0.0  ;;  %v1018_v8 = vpop.f32.mrb[5].mxu1  ;;  %v1086_v61 = vmul.f32 %v1950_v47, %v1950_v47  ;;  %v1058_v6 = vsel %vm536_vm1, %v1950_v47, 0.0 }
 0x1f0   :  { %v1055_v42 = vadd.f32 %v1054_v3, %v1053_v46  ;;  %v1106_v16 = vadd.f32 %v1105_v48, %v1104_v0  ;;  %v1957_v53 = vpop.f32.mrb[6].mxu1 }
 0x1f1   :  { %v1021_v36 = vpop.f32.mrb[7].mxu1  ;;  %v1087_v2 = vmul.f32 %v1957_v53, %v1957_v53  ;;  %v1111_v19 = vsel %vm536_vm1, %v1086_v61, 0.0  ;;  %v1060_v10 = vsel %vm536_vm1, %v1957_v53, 0.0 }
 0x1f2   :  { %v1108_v62 = vadd.f32 %v1107_v56, %v1106_v16  ;;  %v1057_v4 = vadd.f32 %v1056_v60, %v1055_v42 }
 0x1f3   :  { %v1113_v20 = vsel %vm536_vm1, %v1087_v2, 0.0 }
 0x1f4   :  { %v1059_v15 = vadd.f32 %v1058_v6, %v1057_v4  ;;  %v1110_v17 = vadd.f32 %v1109_v14, %v1108_v62 }
 0x1f6   :  { %v1112_v18 = vadd.f32 %v1111_v19, %v1110_v17  ;;  %v1061_v50 = vadd.f32 %v1060_v10, %v1059_v15  ;;  %v1143_v19 = vlaneseq }
 0x1f8   :  { %v1114_v45 = vadd.f32 %v1113_v20, %v1112_v18  ;;  %v1144_v10 = vshrl.u32 %v1143_v19, 7  ;;  %v1135_v18 = vld [vmem:[%s2125_s2] sm:$0x1] }
 0x20a   :  { %v1973_v13 = vpop.f32.mrb[8].mxu1 }
 0x20b   :  { %v1062_v5 = vsel %vm536_vm1, %v1973_v13, 0.0  ;;  %v1088_v21 = vmul.f32 %v1973_v13, %v1973_v13  ;;  %v1026_v23 = vpop.f32.mrb[9].mxu1 }
 0x20c   :  { %v1063_v9 = vadd.f32 %v1062_v5, %v1061_v50  ;;  %v1979_v31 = vpop.f32.mrb[10].mxu1  ;;  %v1145_v50 = vsub.s32 0, %v1144_v10  ;;  %v1139_v5 = vld [vmem:[%s2126_s3] sm:$0x1] }
 0x20d   :  { %v1115_v54 = vsel %vm536_vm1, %v1088_v21, 0.0  ;;  %v1064_v34 = vsel %vm536_vm1, %v1979_v31, 0.0  ;;  %v1089_v26 = vmul.f32 %v1979_v31, %v1979_v31  ;;  %v1029_v29 = vpop.f32.mrb[11].mxu1 }
 0x20e   :  { %v1116_v32 = vadd.f32 %v1115_v54, %v1114_v45  ;;  %v1065_v63 = vadd.f32 %v1064_v34, %v1063_v9 }
 0x20f   :  { %v1117_v38 = vsel %vm536_vm1, %v1089_v26, 0.0 }
 0x210   :  { %v1118_v35 = vadd.f32 %v1117_v38, %v1116_v32 }
 0x223   :  { %v1032_v55 = vpop.f32.mrb[12].mxu1 }
 0x224   :  { %v1066_v30 = vsel %vm536_vm1, %v1032_v55, 0.0  ;;  %v1090_v39 = vmul.f32 %v1032_v55, %v1032_v55  ;;  %v1034_v41 = vpop.f32.mrb[13].mxu1 }
 0x225   :  { %v1067_v22 = vadd.f32 %v1066_v30, %v1065_v63  ;;  %v1035_v57 = vpop.f32.mrb[14].mxu1 }
 0x226   :  { %v1119_v49 = vsel %vm536_vm1, %v1090_v39, 0.0  ;;  %v1068_v1 = vsel %vm536_vm1, %v1035_v57, 0.0  ;;  %v1091_v27 = vmul.f32 %v1035_v57, %v1035_v57  ;;  %v1037_v7 = vpop.f32.mrb[15].mxu1 }
 0x227   :  { %v1120_v59 = vadd.f32 %v1119_v49, %v1118_v35  ;;  %v1069_v33 = vadd.f32 %v1068_v1, %v1067_v22  ;;  %v1190_v1 = vld [vmem:[%s2127_s4 + $0x20] sm:$0xff]  ;;  %v1192_v7 = vld [vmem:[%s2127_s4 + $0x30] sm:$0xff] }
 0x228   :  { %v1121_v44 = vsel %vm536_vm1, %v1091_v27, 0.0  ;;  %v1191_v27 = vld [vmem:[%s2127_s4 + $0x28] sm:$0xff] }
 0x229   :  { %v1070_v0 = vrot.slane %v1069_v33, 4  ;;  %v1122_v46 = vadd.f32 %v1121_v44, %v1120_v59 }
 0x22b   :  { %v1071_v3 = vadd.f32 %v1070_v0, %v1069_v33  ;;  %v1123_v52 = vrot.slane %v1122_v46, 4 }
 0x22d   :  { %v1072_v48 = vrot.slane %v1071_v3, 2  ;;  %v1124_v8 = vadd.f32 %v1123_v52, %v1122_v46  ;;  %v1193_v46 = vld [vmem:[%s2127_s4 + $0x38] sm:$0xff]  ;;  %v1195_v52 = vld [vmem:[%s2127_s4 + $0x48] sm:$0xff] }
 0x22f   :  { %v1073_v42 = vadd.f32 %v1072_v48, %v1071_v3  ;;  %v1125_v16 = vrot.slane %v1124_v8, 2  ;;  %v1194_v3 = vld [vmem:[%s2127_s4 + $0x40] sm:$0xff] }
 0x231   :  { %v1074_v56 = vrot.slane %v1073_v42, 1  ;;  %v1126_v60 = vadd.f32 %v1125_v16, %v1124_v8 }
 0x233   :  { %v1075_v61 = vadd.f32 %v1074_v56, %v1073_v42  ;;  %v1127_v36 = vrot.slane %v1126_v60, 1  ;;  %v1196_v56 = vld [vmem:[%s2127_s4 + $0x50] sm:$0xff] }
 0x235   :  { %v1128_v62 = vadd.f32 %v1127_v36, %v1126_v60  ;;  %v1130_v4 = vmul.f32 0.0078125, %v1075_v61  ;;  %v1197_v60 = vld [vmem:[%s2127_s4 + $0x58] sm:$0xff]  ;;  %v1198_v61 = vld [vmem:[%s2127_s4 + $0x60] sm:$0xff]  ;;  %v1199_v36 = vld [vmem:[%s2127_s4 + $0x68] sm:$0xff] }
 0x237   :  { %v1131_v14 = vmul.f32 0.0078125, %v1128_v62  ;;  %v1132_v6 = vmul.f32 %v1130_v4, %v1130_v4  ;;  %v1200_v62 = vld [vmem:[%s2127_s4 + $0x70] sm:$0xff] }
 0x239   :  { %v1133_v2 = vsub.f32 %v1131_v14, %v1132_v6 }
 0x23b   :  { %v1134_v15 = vmax.f32 %v1133_v2, 0.0 }
 0x23d   :  { %v1136_v17 = vadd.f32 1e-05, %v1134_v15 }
 0x23f   :  { %1307 = vrsqrt.f32 %v1136_v17 }
 0x249   :  { %v1308_v20 = vpop.eup %1307 }
 0x24a   :  { %v1138_v45 = vmul.f32 %v1308_v20, %v1135_v18 }
 0x24c   :  { %v1140_v21 = vmul.f32 %v1138_v45, %v1130_v4  ;;  %v1146_v23 = vrot.slane %v1138_v45, %v1145_v50  ;;  %v1201_v4 = vld [vmem:[%s2127_s4 + $0x78] sm:$0xff] }
 0x24e   :  { %v1141_v9 = vsub.f32 %v1139_v5, %v1140_v21  ;;  %v1148_v54 = vmul.f32 %v1146_v23, %v1889_v37  ;;  %v1149_v34 = vmul.f32 %v1146_v23, %v1893_v24  ;;  %v1150_v26 = vmul.f32 %v1146_v23, %v1903_v11 }
 0x24f   :  { %v1151_v29 = vmul.f32 %v1146_v23, %v1909_v51  ;;  %v1152_v32 = vmul.f32 %v1146_v23, %v1917_v28  ;;  %v1153_v63 = vmul.f32 %v1146_v23, %v1923_v25  ;;  %v1154_v38 = vmul.f32 %v1146_v23, %v1935_v43  ;;  %v1186_v25 = vld [vmem:[%s2127_s4] sm:$0xff] }
 0x250   :  { %v1155_v35 = vmul.f32 %v1146_v23, %v1941_v12  ;;  %v1156_v30 = vmul.f32 %v1146_v23, %v1930_v58  ;;  %v1157_v39 = vmul.f32 %v1146_v23, %v1933_v40  ;;  %v1158_v37 = vmul.f32 %v1146_v23, %v1950_v47  ;;  %v1187_v40 = vld [vmem:[%s2127_s4 + $0x8] sm:$0xff]  ;;  %v1188_v47 = vld [vmem:[%s2127_s4 + $0x10] sm:$0xff] }
 0x251   :  { %v1159_v24 = vmul.f32 %v1146_v23, %v1957_v53  ;;  %v1160_v11 = vmul.f32 %v1146_v23, %v1973_v13  ;;  %v1161_v51 = vmul.f32 %v1146_v23, %v1979_v31  ;;  %v1162_v41 = vmul.f32 %v1146_v23, %v1032_v55  ;;  %v1189_v53 = vld [vmem:[%s2127_s4 + $0x18] sm:$0xff] }
 0x252   :  { %v1163_v28 = vmul.f32 %v1146_v23, %v1035_v57  ;;  %v1168_v22 = vrot.slane %v1141_v9, %v1145_v50 }
 0x254   :  { %v1170_v43 = vadd.f32 %v1168_v22, %v1148_v54  ;;  %v1171_v12 = vadd.f32 %v1168_v22, %v1149_v34  ;;  %v1172_v58 = vadd.f32 %v1168_v22, %v1150_v26  ;;  %v1173_v49 = vadd.f32 %v1168_v22, %v1151_v29 }
 0x255   :  { %v1174_v13 = vadd.f32 %v1168_v22, %v1152_v32  ;;  %v1175_v31 = vadd.f32 %v1168_v22, %v1153_v63  ;;  %v1176_v55 = vadd.f32 %v1168_v22, %v1154_v38  ;;  %v1177_v57 = vadd.f32 %v1168_v22, %v1155_v35 }
 0x256   :  { %v1178_v59 = vadd.f32 %v1168_v22, %v1156_v30  ;;  %v1179_v33 = vadd.f32 %v1168_v22, %v1157_v39  ;;  %v1180_v44 = vadd.f32 %v1168_v22, %v1158_v37  ;;  %v1181_v0 = vadd.f32 %v1168_v22, %v1159_v24 }
 0x257   :  { %v1182_v48 = vadd.f32 %v1168_v22, %v1160_v11  ;;  %v1183_v8 = vadd.f32 %v1168_v22, %v1161_v51  ;;  %v1184_v42 = vadd.f32 %v1168_v22, %v1162_v41  ;;  %v1185_v16 = vadd.f32 %v1168_v22, %v1163_v28 }
 0x258   :  { %v1202_v14 = vadd.f32 %v1186_v25, %v1170_v43  ;;  %v1203_v6 = vadd.f32 %v1187_v40, %v1171_v12  ;;  %v1204_v2 = vadd.f32 %v1188_v47, %v1172_v58  ;;  %v1205_v15 = vadd.f32 %v1189_v53, %v1173_v49 }
 0x259   :  { %v1206_v17 = vadd.f32 %v1190_v1, %v1174_v13  ;;  %v1207_v19 = vadd.f32 %v1191_v27, %v1175_v31  ;;  %v1208_v10 = vadd.f32 %v1192_v7, %v1176_v55  ;;  %v1209_v18 = vadd.f32 %v1193_v46, %v1177_v57 }
 0x25a   :  { %v1210_v50 = vadd.f32 %v1194_v3, %v1178_v59  ;;  %v1211_v20 = vadd.f32 %v1195_v52, %v1179_v33  ;;  %v1212_v45 = vadd.f32 %v1196_v56, %v1180_v44  ;;  %v1213_v5 = vadd.f32 %v1197_v60, %v1181_v0  ;;  %1218 = vst.msk [vmem:[%s2128_s5] sm:$0xff] %vm536_vm1, %v1202_v14 }
 0x25b   :  { %1219 = vst.msk [vmem:[%s2128_s5 + $0x8] sm:$0xff] %vm536_vm1, %v1203_v6  ;;  %1220 = vst.msk [vmem:[%s2128_s5 + $0x10] sm:$0xff] %vm536_vm1, %v1204_v2  ;;  %v1214_v21 = vadd.f32 %v1198_v61, %v1182_v48  ;;  %v1215_v23 = vadd.f32 %v1199_v36, %v1183_v8  ;;  %v1216_v9 = vadd.f32 %v1200_v62, %v1184_v42 }
 0x25c   :  { %1221 = vst.msk [vmem:[%s2128_s5 + $0x18] sm:$0xff] %vm536_vm1, %v1205_v15  ;;  %v1217_v54 = vadd.f32 %v1201_v4, %v1185_v16  ;;  %1222 = vst.msk [vmem:[%s2128_s5 + $0x20] sm:$0xff] %vm536_vm1, %v1206_v17 }
 0x25d   :  { %1223 = vst.msk [vmem:[%s2128_s5 + $0x28] sm:$0xff] %vm536_vm1, %v1207_v19  ;;  %1224 = vst.msk [vmem:[%s2128_s5 + $0x30] sm:$0xff] %vm536_vm1, %v1208_v10 }
 0x25e   :  { %1225 = vst.msk [vmem:[%s2128_s5 + $0x38] sm:$0xff] %vm536_vm1, %v1209_v18  ;;  %1226 = vst.msk [vmem:[%s2128_s5 + $0x40] sm:$0xff] %vm536_vm1, %v1210_v50 }
 0x25f   :  { %1227 = vst.msk [vmem:[%s2128_s5 + $0x48] sm:$0xff] %vm536_vm1, %v1211_v20  ;;  %1228 = vst.msk [vmem:[%s2128_s5 + $0x50] sm:$0xff] %vm536_vm1, %v1212_v45 }
 0x260   :  { %1229 = vst.msk [vmem:[%s2128_s5 + $0x58] sm:$0xff] %vm536_vm1, %v1213_v5  ;;  %1230 = vst.msk [vmem:[%s2128_s5 + $0x60] sm:$0xff] %vm536_vm1, %v1214_v21 }
 0x261   :  { %1231 = vst.msk [vmem:[%s2128_s5 + $0x68] sm:$0xff] %vm536_vm1, %v1215_v23  ;;  %1232 = vst.msk [vmem:[%s2128_s5 + $0x70] sm:$0xff] %vm536_vm1, %v1216_v9 }
 0x262   :  { %1233 = vst.msk [vmem:[%s2128_s5 + $0x78] sm:$0xff] %vm536_vm1, %v1217_v54 }

// kernel: gan_middle_forward.7
= control target key start
LH: loop header
LB: loop body
LE: loop exit
PB: predicated region body
PF: predicated region fallthrough
CT: control target
= control target key end

     0   :  { %v1530_v0 = vmov 0.0|0.0   ;;  %v1531_v2 = vmov 0   ;;  %vm82_vm0 = vcmask 1040384   ;;  %s1532_s21 = smov 32   ;;  %s1533_s22 = smov 16   ;;  %vm533_vm1 = vcmask 130048   ;;  %s2377_s0 = inlined_call_operand.vmem [shape: f32[2,8,8,16], index: 0, kind: input, shape index: {}]   ;;  %s2378_s1 = inlined_call_operand.vmem [shape: bf16[144,32], index: 1, kind: input, shape index: {}]   ;;  %s2379_s2 = inlined_call_operand.vmem [shape: f32[1,32], index: 2, kind: input, shape index: {}]   ;;  %s2380_s3 = inlined_call_operand.vmem [shape: f32[1,32], index: 3, kind: input, shape index: {}]   ;;  %s2381_s4 = inlined_call_operand.vmem [shape: f32[2,8,8,16], index: 4, kind: output, shape index: {}]  }
   0x1   :  { %v1565_v1 = vrot.slane %v1530_v0, 1  ;;  %v1568_v3 = vrot.slane %v1531_v2, 1  ;;  %v19_v4 = vld [vmem:[%s2377_s0 + $0x8] sm:$0xff]  ;;  %v18_v5 = vld [vmem:[%s2377_s0] sm:$0xff]  ;;  %939 = vmatprep.subr.bf16.mxu0 %v1531_v2  ;;  %1428 = vmatprep.subr.bf16.mxu1 %v1531_v2  ;;  %v20_v8 = vld [vmem:[%s2377_s0 + $0x10] sm:$0xff]  ;;  %s1534_s23 = smov 48  }
   0x2   :  { %v51_v6 = vrot.slane %v19_v4, 7  ;;  %v50_v7 = vrot.slane %v18_v5, 7  ;;  %v52_v9 = vrot.slane %v20_v8, 7  ;;  %v1455_v23 = vld [vmem:[%s2378_s1] sm:$0xff]   ;;  %v1456_v27 = vld [vmem:[%s2378_s1 + $0x8] sm:$0xff]   ;;  %v1457_v32 = vld [vmem:[%s2378_s1 + $0x10] sm:$0xff]  }
   0x3   :  { %313 = vrot.lane.b32.xlu1 %v1565_v1, %s1532_s21  ;;  %253 = vrot.lane.b32.xlu0 %v1568_v3, %s1533_s22  ;;  %s1535_s30 = smov 64   ;;  %v21_v35 = vld [vmem:[%s2377_s0 + $0x18] sm:$0xff]  ;;  %s1536_s9 = smov 80   ;;  %v1459_v41 = vld [vmem:[%s2378_s1 + $0x20] sm:$0xff]   ;;  %vm578_vm2 = vcmask 261120   ;;  %vm609_vm3 = vcmask 392192  }
   0x4   :  { %v84_v10 = vsel %vm82_vm0, 0.0, %v51_v6  ;;  %v100_v11 = vsel %vm82_vm0, %v51_v6, 0.0  ;;  %v83_v12 = vsel %vm82_vm0, 0.0, %v50_v7  ;;  %v99_v13 = vsel %vm82_vm0, %v50_v7, 0.0  ;;  %940 = vmatpush1.bf16.msra.mxu0 %v1455_v23  ;;  %1437 = vmatpush1.bf16.msra.mxu1 %v1455_v23  ;;  %v1458_v36 = vld [vmem:[%s2378_s1 + $0x18] sm:$0xff]   ;;  %s1537_s12 = smov 96  }
   0x5   :  { %v1589_v14 = vpack.c.bf16 %v84_v10, %v84_v10  ;;  %v131_v15 = vpack.c.bf16 %v100_v11, %v84_v10  ;;  %v1591_v16 = vpack.c.bf16 %v83_v12, %v83_v12  ;;  %v130_v17 = vpack.c.bf16 %v99_v13, %v83_v12  ;;  %941 = vmatprep.subr.bf16.mxu0 %v1531_v2  ;;  %v1460_v45 = vld [vmem:[%s2378_s1 + $0x28] sm:$0xff]   ;;  %s1538_s15 = smov 112   ;;  %v22_v47 = vld [vmem:[%s2377_s0 + $0x20] sm:$0xff]  ;;  %v1461_v48 = vld [vmem:[%s2378_s1 + $0x30] sm:$0xff]  }
   0x6   :  { %v85_v18 = vsel %vm82_vm0, 0.0, %v52_v9  ;;  %v101_v22 = vsel %vm82_vm0, %v52_v9, 0.0  ;;  %1429 = vmatprep.subr.bf16.mxu1 %v1531_v2  ;;  %v53_v40 = vrot.slane %v21_v35, 7  ;;  %v54_v51 = vrot.slane %v22_v47, 7  ;;  %v1462_v52 = vld [vmem:[%s2378_s1 + $0x38] sm:$0xff]   ;;  %v1463_v59 = vld [vmem:[%s2378_s1 + $0x40] sm:$0xff]  }
   0x7   :  { %361 = vrot.lane.b32.xlu1 %v1589_v14, %s1534_s23  ;;  %359 = vrot.lane.b32.xlu0 %v1591_v16, %s1534_s23  ;;  %v299_v19 = vrot.slane %v130_v17, 1  ;;  %v156_v20 = vshrl.u32 %v130_v17, 16  ;;  %v158_v21 = vshll.u32 %v130_v17, 16  ;;  %v163_v24 = vshrl.u32 %v131_v15, 16  ;;  %v26_v62 = vld [vmem:[%s2377_s0 + $0x40] sm:$0xff]  ;;  %v23_v17 = vld [vmem:[%s2377_s0 + $0x28] sm:$0xff] }
   0x8   :  { %v165_v25 = vshll.u32 %v131_v15, 16  ;;  %v132_v30 = vpack.c.bf16 %v101_v22, %v85_v18  ;;  %942 = vmatpush1.bf16.msra.mxu0 %v1456_v27  ;;  %1438 = vmatpush1.bf16.msra.mxu1 %v1456_v27  ;;  %v300_v33 = vrot.slane %v131_v15, 1  ;;  %v1624_v37 = vpack.c.bf16 %v85_v18, %v85_v18 }
   0x9   :  { %v160_v26 = vrot.slane %v158_v21, 1  ;;  %943 = vmatprep.subr.bf16.mxu0 %v1531_v2  ;;  %1430 = vmatprep.subr.bf16.mxu1 %v1531_v2  ;;  %v86_v43 = vsel %vm82_vm0, 0.0, %v53_v40  ;;  %v102_v44 = vsel %vm82_vm0, %v53_v40, 0.0  ;;  %v87_v57 = vsel %vm82_vm0, 0.0, %v54_v51  ;;  %v27_v21 = vld [vmem:[%s2377_s0 + $0x48] sm:$0xff] }
   0xa   :  { %v167_v28 = vrot.slane %v165_v25, 1  ;;  %v172_v34 = vshll.u32 %v132_v30, 16  ;;  %v170_v38 = vshrl.u32 %v132_v30, 16  ;;  %v133_v46 = vpack.c.bf16 %v102_v44, %v86_v43 }
   0xb   :  { %315 = vrot.lane.b32.xlu1 %v299_v19, %s1532_s21  ;;  %v161_v29 = vor.u32 %v160_v26, %v156_v20  ;;  %v301_v49 = vrot.slane %v132_v30, 1  ;;  %v1661_v54 = vpack.c.bf16 %v86_v43, %v86_v43  ;;  %v103_v58 = vsel %vm82_vm0, %v54_v51, 0.0  ;;  %v24_v43 = vld [vmem:[%s2377_s0 + $0x30] sm:$0xff] }
   0xc   :  { %v168_v31 = vor.u32 %v167_v28, %v163_v24  ;;  %944 = vmatpush1.bf16.msra.mxu0 %v1457_v32  ;;  %1439 = vmatpush1.bf16.msra.mxu1 %v1457_v32  ;;  %v174_v39 = vrot.slane %v172_v34, 1  ;;  %v179_v50 = vshll.u32 %v133_v46, 16  ;;  %v177_v55 = vshrl.u32 %v133_v46, 16 }
   0xd   :  { %255 = vrot.lane.b32.xlu0 %v161_v29, %s1533_s22  ;;  %945 = vmatprep.subr.bf16.mxu0 %v1531_v2  ;;  %v1380_v53 = vcombine.low %v300_v33, %v301_v49  ;;  %v134_v61 = vpack.c.bf16 %v103_v58, %v87_v57  ;;  %v1680_v63 = vrot.slane %v133_v46, 1  ;;  %v58_v4 = vrot.slane %v26_v62, 7  ;;  %v28_v46 = vld [vmem:[%s2377_s0 + $0x50] sm:$0xff] }
   0xe   :  { %1431 = vmatprep.subr.bf16.mxu1 %v1531_v2  ;;  %v175_v42 = vor.u32 %v174_v39, %v170_v38  ;;  %v181_v56 = vrot.slane %v179_v50, 1  ;;  %v1692_v9 = vpack.c.bf16 %v87_v57, %v87_v57  ;;  %v55_v20 = vrot.slane %v23_v17, 7 }
   0xf   :  { %407 = vrot.lane.b32.xlu1 %v168_v31, %s1535_s30  ;;  %1404 = vmatprep.mubr.msk.bf16.mxu0 %vm533_vm1, %v1380_v53  ;;  %v1682_v5 = vrot.slane %v134_v61, 1  ;;  %v186_v6 = vshll.u32 %v134_v61, 16  ;;  %v107_v8 = vsel %vm82_vm0, %v58_v4, 0.0  ;;  %v184_v10 = vshrl.u32 %v134_v61, 16 }
  0x10   :  { %946 = vmatpush1.bf16.msra.mxu0 %v1458_v36  ;;  %1440 = vmatpush1.bf16.msra.mxu1 %v1458_v36  ;;  %v182_v60 = vor.u32 %v181_v56, %v177_v55  ;;  %v104_v22 = vsel %vm82_vm0, %v55_v20, 0.0  ;;  %v88_v24 = vsel %vm82_vm0, 0.0, %v55_v20  ;;  %v59_v25 = vrot.slane %v27_v21, 7 }
  0x11   :  { %405 = vrot.lane.b32.xlu0 %v161_v29, %s1535_s30  ;;  %947 = vmatprep.subr.bf16.mxu0 %v1531_v2  ;;  %v1382_v7 = vcombine.low %v1680_v63, %v1682_v5  ;;  %v188_v11 = vrot.slane %v186_v6, 1  ;;  %v135_v27 = vpack.c.bf16 %v104_v22, %v88_v24  ;;  %v1722_v30 = vpack.c.bf16 %v88_v24, %v88_v24 }
  0x12   :  { %1432 = vmatprep.subr.bf16.mxu1 %v1531_v2  ;;  %v108_v28 = vsel %vm82_vm0, %v59_v25, 0.0  ;;  %v92_v29 = vsel %vm82_vm0, 0.0, %v59_v25  ;;  %v56_v44 = vrot.slane %v24_v43, 7  ;;  %vm642_vm4 = vcmask 523264  }
  0x13   :  { %443 = vrot.lane.b32.xlu1 %v300_v33, %s1536_s9  ;;  %v189_v13 = vor.u32 %v188_v11, %v184_v10  ;;  %v193_v32 = vshll.u32 %v135_v27, 16  ;;  %v191_v34 = vshrl.u32 %v135_v27, 16  ;;  %v25_v11 = vld [vmem:[%s2377_s0 + $0x38] sm:$0xff]  ;;  %vm675_vm5 = vcmask 654336  }
  0x14   :  { %948 = vmatpush1.bf16.msra.mxu0 %v1459_v41  ;;  %1441 = vmatpush1.bf16.msra.mxu1 %v1459_v41  ;;  %v105_v47 = vsel %vm82_vm0, %v56_v44, 0.0  ;;  %vm708_vm6 = vcmask 785408   ;;  %vm740_vm7 = vcmask 916480  }
  0x15   :  { %441 = vrot.lane.b32.xlu0 %v299_v19, %s1536_s9  ;;  %949 = vmatprep.subr.bf16.mxu0 %v1531_v2  ;;  %v195_v35 = vrot.slane %v193_v32, 1 }
  0x16   :  { %1433 = vmatprep.subr.bf16.mxu1 %v1531_v2 }
  0x17   :  { %475 = vrot.lane.b32.xlu1 %v1624_v37, %s1537_s12  ;;  %v196_v39 = vor.u32 %v195_v35, %v191_v34 }
  0x18   :  { %950 = vmatpush1.bf16.msra.mxu0 %v1460_v45  ;;  %1442 = vmatpush1.bf16.msra.mxu1 %v1460_v45  ;;  %v1744_v45 = vrot.slane %v135_v27, 1 }
  0x19   :  { %473 = vrot.lane.b32.xlu0 %v1589_v14, %s1537_s12  ;;  %951 = vmatprep.subr.bf16.mxu0 %v1531_v2 }
  0x1a   :  { %1434 = vmatprep.subr.bf16.mxu1 %v1531_v2 }
  0x1b   :  { %505 = vrot.lane.b32.xlu1 %v175_v42, %s1538_s15 }
  0x1c   :  { %952 = vmatpush1.bf16.msra.mxu0 %v1461_v48  ;;  %1443 = vmatpush1.bf16.msra.mxu1 %v1461_v48  ;;  %v89_v48 = vsel %vm82_vm0, 0.0, %v56_v44 }
  0x1d   :  { %503 = vrot.lane.b32.xlu0 %v168_v31, %s1538_s15  ;;  %953 = vmatprep.subr.bf16.mxu0 %v1531_v2  ;;  %v136_v51 = vpack.c.bf16 %v105_v47, %v89_v48  ;;  %v1759_v55 = vpack.c.bf16 %v89_v48, %v89_v48 }
  0x1e   :  { %1435 = vmatprep.subr.bf16.mxu1 %v1531_v2 }
  0x1f   :  { %259 = vrot.lane.b32.xlu1 %v175_v42, %s1533_s22  ;;  %v200_v57 = vshll.u32 %v136_v51, 16 }
  0x20   :  { %954 = vmatpush1.bf16.msra.mxu0 %v1462_v52  ;;  %1444 = vmatpush1.bf16.msra.mxu1 %v1462_v52 }
  0x21   :  { %257 = vrot.lane.b32.xlu0 %v168_v31, %s1533_s22  ;;  %955 = vmatprep.subr.bf16.mxu0 %v1531_v2  ;;  %v138_v31 = vpack.c.bf16 %v108_v28, %v92_v29  ;;  %v202_v61 = vrot.slane %v200_v57, 1 }
  0x22   :  { %1436 = vmatprep.subr.bf16.mxu1 %v1531_v2  ;;  %v91_v2 = vsel %vm82_vm0, 0.0, %v58_v4 }
  0x23   :  { %319 = vrot.lane.b32.xlu1 %v301_v49, %s1532_s21  ;;  %v1695_v12 = vpack.c.bf16 %v107_v8, %v91_v2  ;;  %v214_v36 = vshll.u32 %v138_v31, 16  ;;  %v1732_v38 = vpack.c.bf16 %v91_v2, %v91_v2  ;;  %v212_v40 = vshrl.u32 %v138_v31, 16 }
  0x24   :  { %956 = vmatpush1.bf16.msra.mxu0 %v1463_v59  ;;  %1445 = vmatpush1.bf16.msra.mxu1 %v1463_v59  ;;  %v307_v50 = vrot.slane %v138_v31, 1 }
  0x25   :  { %317 = vrot.lane.b32.xlu0 %v300_v33, %s1532_s21  ;;  %v207_v15 = vshll.u32 %v1695_v12, 16  ;;  %v205_v18 = vshrl.u32 %v1695_v12, 16  ;;  %v306_v26 = vrot.slane %v1695_v12, 1  ;;  %v1728_v33 = vpack.c.bf16 %v92_v29, %v92_v29 }
  0x26   :  { %v216_v41 = vrot.slane %v214_v36, 1  ;;  %v57_v12 = vrot.slane %v25_v11, 7 }
  0x27   :  { %365 = vrot.lane.b32.xlu1 %v1661_v54, %s1534_s23  ;;  %v209_v19 = vrot.slane %v207_v15, 1  ;;  %v29_v15 = vld [vmem:[%s2377_s0 + $0x58] sm:$0xff] }
  0x28   :  { %v106_v17 = vsel %vm82_vm0, %v57_v12, 0.0  ;;  %v90_v20 = vsel %vm82_vm0, 0.0, %v57_v12  ;;  %v61_v21 = vrot.slane %v29_v15, 7 }
  0x29   :  { %363 = vrot.lane.b32.xlu0 %v1624_v37, %s1534_s23  ;;  %v210_v23 = vor.u32 %v209_v19, %v205_v18  ;;  %v1800_v22 = vpack.c.bf16 %v106_v17, %v90_v20  ;;  %v1808_v27 = vpack.c.bf16 %v90_v20, %v90_v20 }
  0x2a   :  { %v94_v25 = vsel %vm82_vm0, 0.0, %v61_v21 }
  0x2b   :  { %411 = vrot.lane.b32.xlu1 %v182_v60, %s1535_s30  ;;  %v394_v29 = vshll.u32 %v1800_v22, 16  ;;  %v1814_v34 = vpack.c.bf16 %v94_v25, %v94_v25  ;;  %v392_v35 = vshrl.u32 %v1800_v22, 16  ;;  %v439_v57 = vrot.slane %v1800_v22, 1 }
  0x2d   :  { %409 = vrot.lane.b32.xlu0 %v175_v42, %s1535_s30  ;;  %v217_v42 = vor.u32 %v216_v41, %v212_v40  ;;  %v396_v36 = vrot.slane %v394_v29, 1 }
  0x2f   :  { %447 = vrot.lane.b32.xlu1 %v1680_v63, %s1536_s9 }
  0x31   :  { %445 = vrot.lane.b32.xlu0 %v301_v49, %s1536_s9  ;;  %v60_v49 = vrot.slane %v28_v46, 7 }
  0x33   :  { %479 = vrot.lane.b32.xlu1 %v1692_v9, %s1537_s12  ;;  %v109_v52 = vsel %vm82_vm0, %v60_v49, 0.0  ;;  %v93_v53 = vsel %vm82_vm0, 0.0, %v60_v49 }
  0x34   :  { %v139_v56 = vpack.c.bf16 %v109_v52, %v93_v53  ;;  %v1766_v59 = vpack.c.bf16 %v93_v53, %v93_v53 }
  0x35   :  { %477 = vrot.lane.b32.xlu0 %v1661_v54, %s1537_s12 }
  0x36   :  { %v1762_v58 = vrot.slane %v139_v56, 1  ;;  %v221_v62 = vshll.u32 %v139_v56, 16  ;;  %v219_v2 = vshrl.u32 %v139_v56, 16 }
  0x37   :  { %509 = vrot.lane.b32.xlu1 %v189_v13, %s1538_s15 }
  0x38   :  { %v1388_v4 = vcombine.low %v307_v50, %v1762_v58  ;;  %v223_v8 = vrot.slane %v221_v62, 1 }
  0x39   :  { %507 = vrot.lane.b32.xlu0 %v182_v60, %s1538_s15 }
  0x3a   :  { %1408 = vmatprep.mubr.msk.bf16.mxu1 %vm533_vm1, %v1388_v4  ;;  %v1777_v10 = vor.u32 %v223_v8, %v219_v2 }
  0x3b   :  { %263 = vrot.lane.b32.xlu1 %v189_v13, %s1533_s22 }
  0x3d   :  { %261 = vrot.lane.b32.xlu0 %v182_v60, %s1533_s22  ;;  %v198_v60 = vshrl.u32 %v136_v51, 16 }
  0x3f   :  { %321 = vrot.lane.b32.xlu1 %v1680_v63, %s1532_s21  ;;  %v203_v6 = vor.u32 %v202_v61, %v198_v60  ;;  %v30_v60 = vld [vmem:[%s2377_s0 + $0x60] sm:$0xff]  ;;  %v31_v63 = vld [vmem:[%s2377_s0 + $0x68] sm:$0xff] }
  0x40   :  { %v62_v11 = vrot.slane %v30_v60, 7 }
  0x41   :  { %269 = vrot.lane.b32.xlu0 %v210_v23, %s1533_s22 }
  0x42   :  { %v111_v20 = vsel %vm82_vm0, %v62_v11, 0.0 }
  0x43   :  { %329 = vrot.lane.b32.xlu1 %v306_v26, %s1532_s21 }
  0x45   :  { %323 = vrot.lane.b32.xlu0 %v1682_v5, %s1532_s21 }
  0x47   :  { %369 = vrot.lane.b32.xlu1 %v1722_v30, %s1534_s23 }
  0x49   :  { %367 = vrot.lane.b32.xlu0 %v1692_v9, %s1534_s23 }
  0x4b   :  { %377 = vrot.lane.b32.xlu1 %v1728_v33, %s1534_s23 }
  0x4d   :  { %375 = vrot.lane.b32.xlu0 %v1732_v38, %s1534_s23 }
  0x4f   :  { %415 = vrot.lane.b32.xlu1 %v196_v39, %s1535_s30 }
  0x51   :  { %413 = vrot.lane.b32.xlu0 %v189_v13, %s1535_s30  ;;  %v1790_v13 = vrot.slane %v136_v51, 1 }
  0x53   :  { %423 = vrot.lane.b32.xlu1 %v217_v42, %s1535_s30 }
  0x55   :  { %421 = vrot.lane.b32.xlu0 %v210_v23, %s1535_s30  ;;  %v110_v23 = vsel %vm82_vm0, %v61_v21, 0.0 }
  0x56   :  { %v140_v28 = vpack.c.bf16 %v110_v23, %v94_v25 }
  0x57   :  { %451 = vrot.lane.b32.xlu1 %v1744_v45, %s1536_s9 }
  0x58   :  { %v226_v43 = vshrl.u32 %v140_v28, 16 }
  0x59   :  { %449 = vrot.lane.b32.xlu0 %v1682_v5, %s1536_s9 }
  0x5b   :  { %459 = vrot.lane.b32.xlu1 %v307_v50, %s1536_s9 }
  0x5d   :  { %457 = vrot.lane.b32.xlu0 %v306_v26, %s1536_s9 }
  0x5f   :  { %483 = vrot.lane.b32.xlu1 %v1759_v55, %s1537_s12 }
  0x61   :  { %481 = vrot.lane.b32.xlu0 %v1722_v30, %s1537_s12 }
  0x63   :  { %491 = vrot.lane.b32.xlu1 %v1766_v59, %s1537_s12 }
  0x65   :  { %489 = vrot.lane.b32.xlu0 %v1728_v33, %s1537_s12 }
  0x67   :  { %513 = vrot.lane.b32.xlu1 %v203_v6, %s1538_s15 }
  0x69   :  { %511 = vrot.lane.b32.xlu0 %v196_v39, %s1538_s15 }
  0x6b   :  { %521 = vrot.lane.b32.xlu1 %v1777_v10, %s1538_s15 }
  0x6d   :  { %519 = vrot.lane.b32.xlu0 %v217_v42, %s1538_s15 }
  0x6f   :  { %267 = vrot.lane.b32.xlu1 %v203_v6, %s1533_s22 }
  0x71   :  { %265 = vrot.lane.b32.xlu0 %v196_v39, %s1533_s22  ;;  %v228_v39 = vshll.u32 %v140_v28, 16 }
  0x73   :  { %273 = vrot.lane.b32.xlu1 %v1777_v10, %s1533_s22  ;;  %v230_v44 = vrot.slane %v228_v39, 1 }
  0x75   :  { %v314_v18 = vpop.permute.xlu1 %313  ;;  %v254_v19 = vpop.permute.xlu0 %253  ;;  %271 = vrot.lane.b32.xlu0 %v217_v42, %s1533_s22  ;;  %v1821_v42 = vor.u32 %v396_v36, %v392_v35  ;;  %v1831_v51 = vor.u32 %v230_v44, %v226_v43  ;;  %v63_v36 = vrot.slane %v31_v63, 7 }
  0x76   :  { %v535_v48 = vsel %vm533_vm1, 0.0|0.0, %v254_v19 }
  0x77   :  { %327 = vrot.lane.b32.xlu1 %v1790_v13, %s1532_s21  ;;  %v1834_v52 = vsel %vm578_vm2, %v535_v48, %v314_v18  ;;  %v1857_v18 = vrot.slane %v140_v28, 1 }
  0x79   :  { %v362_v24 = vpop.permute.xlu1 %361  ;;  %325 = vrot.lane.b32.xlu0 %v1744_v45, %s1532_s21  ;;  %v360_v26 = vpop.permute.xlu0 %359 }
  0x7a   :  { %v611_v61 = vsel %vm609_vm3, %v1834_v52, %v360_v26 }
  0x7b   :  { %333 = vrot.lane.b32.xlu1 %v1762_v58, %s1532_s21 }
  0x7d   :  { %v316_v31 = vpop.permute.xlu1 %315  ;;  %331 = vrot.lane.b32.xlu0 %v307_v50, %s1532_s21 }
  0x7f   :  { %373 = vrot.lane.b32.xlu1 %v1808_v27, %s1534_s23  ;;  %v256_v32 = vpop.permute.xlu0 %255 }
  0x80   :  { %v538_v46 = vsel %vm533_vm1, %v1591_v16, %v256_v32 }
  0x81   :  { %v408_v40 = vpop.permute.xlu1 %407  ;;  %371 = vrot.lane.b32.xlu0 %v1759_v55, %s1534_s23  ;;  %v582_v49 = vsel %vm578_vm2, %v538_v46, %v316_v31 }
  0x82   :  { %v613_v53 = vsel %vm609_vm3, %v582_v49, %v362_v24  ;;  %v95_v24 = vsel %vm82_vm0, 0.0, %v62_v11 }
  0x83   :  { %381 = vrot.lane.b32.xlu1 %v1814_v34, %s1534_s23  ;;  %v406_v41 = vpop.permute.xlu0 %405  ;;  %v646_v62 = vsel %vm642_vm4, %v613_v53, %v408_v40  ;;  %v141_v26 = vpack.c.bf16 %v111_v20, %v95_v24  ;;  %v1875_v31 = vpack.c.bf16 %v95_v24, %v95_v24  ;;  %v96_v40 = vsel %vm82_vm0, 0.0, %v63_v36 }
  0x84   :  { %v644_v4 = vsel %vm642_vm4, %v611_v61, %v406_v41  ;;  %v112_v41 = vsel %vm82_vm0, %v63_v36, 0.0 }
  0x85   :  { %v444_v47 = vpop.permute.xlu1 %443  ;;  %379 = vrot.lane.b32.xlu0 %v1766_v59, %s1534_s23  ;;  %v235_v32 = vshll.u32 %v141_v26, 16  ;;  %v142_v46 = vpack.c.bf16 %v112_v41, %v96_v40 }
  0x86   :  { %v679_v2 = vsel %vm675_vm5, %v646_v62, %v444_v47 }
  0x87   :  { %419 = vrot.lane.b32.xlu1 %v1821_v42, %s1535_s30  ;;  %v442_v50 = vpop.permute.xlu0 %441  ;;  %v242_v53 = vshll.u32 %v142_v46, 16  ;;  %v240_v11 = vshrl.u32 %v142_v46, 16 }
  0x88   :  { %v677_v8 = vsel %vm675_vm5, %v644_v4, %v442_v50  ;;  %v1902_v50 = vrot.slane %v141_v26, 1 }
  0x89   :  { %v476_v16 = vpop.permute.xlu1 %475  ;;  %417 = vrot.lane.b32.xlu0 %v203_v6, %s1535_s30 }
  0x8a   :  { %v712_v12 = vsel %vm708_vm6, %v679_v2, %v476_v16 }
  0x8b   :  { %427 = vrot.lane.b32.xlu1 %v1831_v51, %s1535_s30  ;;  %v474_v56 = vpop.permute.xlu0 %473 }
  0x8c   :  { %v710_v15 = vsel %vm708_vm6, %v677_v8, %v474_v56  ;;  %v1915_v8 = vpack.c.bf16 %v96_v40, %v96_v40 }
  0x8d   :  { %v506_v6 = vpop.permute.xlu1 %505  ;;  %425 = vrot.lane.b32.xlu0 %v1777_v10, %s1535_s30 }
  0x8e   :  { %v744_v19 = vsel %vm740_vm7, %v712_v12, %v506_v6 }
  0x8f   :  { %455 = vrot.lane.b32.xlu1 %v439_v57, %s1536_s9  ;;  %v504_v17 = vpop.permute.xlu0 %503 }
  0x90   :  { %v742_v10 = vsel %vm740_vm7, %v710_v15, %v504_v17 }
  0x91   :  { %v1379_v21 = vcombine.low %v742_v10, %v744_v19  ;;  %v260_v23 = vpop.permute.xlu1 %259  ;;  %453 = vrot.lane.b32.xlu0 %v1790_v13, %s1536_s9  ;;  %v244_v19 = vrot.slane %v242_v53, 1 }
  0x92   :  { %v544_v47 = vsel %vm533_vm1, %v1624_v37, %v260_v23  ;;  %v1384_v23 = vcombine.low %v1744_v45, %v1790_v13  ;;  %v1936_v45 = vrot.slane %v142_v46, 1 }
  0x93   :  { %463 = vrot.lane.b32.xlu1 %v1857_v18, %s1536_s9  ;;  %972 = vmatmul.mubr.bf16.vlgmr.msra.gmra.mrb[0].mxu0 %v1379_v21  ;;  %v258_v25 = vpop.permute.xlu0 %257 }
  0x94   :  { %1405 = vmatprep.mubr.msk.bf16.mxu0 %vm533_vm1, %v1382_v7  ;;  %v233_v7 = vshrl.u32 %v141_v26, 16  ;;  %v541_v49 = vsel %vm533_vm1, %v1589_v14, %v258_v25 }
  0x95   :  { %v320_v28 = vpop.permute.xlu1 %319  ;;  %461 = vrot.lane.b32.xlu0 %v1762_v58, %s1536_s9  ;;  %v237_v58 = vrot.slane %v235_v32, 1 }
  0x97   :  { %487 = vrot.lane.b32.xlu1 %v1530_v0, %s1537_s12  ;;  %v318_v29 = vpop.permute.xlu0 %317 }
  0x98   :  { %v584_v16 = vsel %vm578_vm2, %v541_v49, %v318_v29 }
  0x99   :  { %v366_v35 = vpop.permute.xlu1 %365  ;;  %485 = vrot.lane.b32.xlu0 %v1808_v27, %s1537_s12  ;;  %v238_v27 = vor.u32 %v237_v58, %v233_v7  ;;  %v33_v58 = vld [vmem:[%s2377_s0 + $0x78] sm:$0xff] }
  0x9a   :  { %v65_v41 = vrot.slane %v33_v58, 7 }
  0x9b   :  { %495 = vrot.lane.b32.xlu1 %v1875_v31, %s1537_s12  ;;  %v364_v5 = vpop.permute.xlu0 %363 }
  0x9c   :  { %v615_v61 = vsel %vm609_vm3, %v584_v16, %v364_v5  ;;  %v98_v46 = vsel %vm82_vm0, 0.0, %v65_v41 }
  0x9d   :  { %v412_v0 = vpop.permute.xlu1 %411  ;;  %493 = vrot.lane.b32.xlu0 %v1814_v34, %s1537_s12 }
  0x9f   :  { %517 = vrot.lane.b32.xlu1 %v1568_v3, %s1538_s15  ;;  %v410_v39 = vpop.permute.xlu0 %409  ;;  %v32_v3 = vld [vmem:[%s2377_s0 + $0x70] sm:$0xff] }
  0xa0   :  { %v64_v56 = vrot.slane %v32_v3, 7  ;;  %v648_v4 = vsel %vm642_vm4, %v615_v61, %v410_v39 }
  0xa1   :  { %v448_v43 = vpop.permute.xlu1 %447  ;;  %515 = vrot.lane.b32.xlu0 %v1821_v42, %s1538_s15  ;;  %v586_v42 = vsel %vm578_vm2, %v544_v47, %v320_v28  ;;  %v245_v28 = vor.u32 %v244_v19, %v240_v11  ;;  %v114_v47 = vsel %vm82_vm0, %v65_v41, 0.0 }
  0xa2   :  { %v617_v60 = vsel %vm609_vm3, %v586_v42, %v366_v35  ;;  %v97_v10 = vsel %vm82_vm0, 0.0, %v64_v56  ;;  %v113_v21 = vsel %vm82_vm0, %v64_v56, 0.0  ;;  %v1962_v49 = vpack.c.bf16 %v114_v47, %v98_v46 }
  0xa3   :  { %525 = vrot.lane.b32.xlu1 %v238_v27, %s1538_s15  ;;  %v446_v44 = vpop.permute.xlu0 %445  ;;  %v650_v62 = vsel %vm642_vm4, %v617_v60, %v412_v0  ;;  %v143_v29 = vpack.c.bf16 %v113_v21, %v97_v10  ;;  %v1951_v0 = vpack.c.bf16 %v97_v10, %v97_v10  ;;  %v145_v60 = vpack.c.bf16 %v98_v46, %v98_v46 }
  0xa4   :  { %v683_v6 = vsel %vm675_vm5, %v650_v62, %v448_v43  ;;  %v681_v2 = vsel %vm675_vm5, %v648_v4, %v446_v44  ;;  %v399_v61 = vshrl.u32 %v1962_v49, 16 }
  0xa5   :  { %v480_v48 = vpop.permute.xlu1 %479  ;;  %523 = vrot.lane.b32.xlu0 %v1831_v51, %s1538_s15  ;;  %v1938_v13 = vrot.slane %v143_v29, 1  ;;  %v249_v63 = vshll.u32 %v143_v29, 16  ;;  %v247_v39 = vshrl.u32 %v143_v29, 16 }
  0xa6   :  { %v716_v12 = vsel %vm708_vm6, %v683_v6, %v480_v48 }
  0xa7   :  { %277 = vrot.lane.b32.xlu1 %v238_v27, %s1533_s22  ;;  %v478_v37 = vpop.permute.xlu0 %477  ;;  %v1392_v5 = vcombine.low %v1936_v45, %v1938_v13  ;;  %v251_v40 = vrot.slane %v249_v63, 1  ;;  %v1386_v63 = vcombine.low %v439_v57, %v1565_v1 }
  0xa8   :  { %v714_v15 = vsel %vm708_vm6, %v681_v2, %v478_v37  ;;  %v401_v37 = vshll.u32 %v1962_v49, 16 }
  0xa9   :  { %v510_v14 = vpop.permute.xlu1 %509  ;;  %275 = vrot.lane.b32.xlu0 %v1831_v51, %s1533_s22  ;;  %v252_v44 = vor.u32 %v251_v40, %v247_v39 }
  0xaa   :  { %v748_v51 = vsel %vm740_vm7, %v716_v12, %v510_v14  ;;  %v403_v62 = vrot.slane %v401_v37, 1  ;;  %v440_v12 = vrot.slane %v1962_v49, 1 }
  0xab   :  { %337 = vrot.lane.b32.xlu1 %v1902_v50, %s1532_s21  ;;  %v508_v17 = vpop.permute.xlu0 %507 }
  0xac   :  { %v746_v20 = vsel %vm740_vm7, %v714_v15, %v508_v17  ;;  %v404_v6 = vor.u32 %v403_v62, %v399_v61 }
  0xad   :  { %v1381_v24 = vcombine.low %v746_v20, %v748_v51  ;;  %v1927_v25 = vpop.permute.xlu1 %263  ;;  %335 = vrot.lane.b32.xlu0 %v1857_v18, %s1532_s21 }
  0xae   :  { %v550_v19 = vsel %vm533_vm1, %v1692_v9, %v1927_v25 }
  0xaf   :  { %385 = vrot.lane.b32.xlu1 %v1915_v8, %s1534_s23  ;;  %980 = vmatmul.mubr.bf16.gmra.mrb[4].mxu0 %v1381_v24  ;;  %v262_v26 = vpop.permute.xlu0 %261 }
  0xb0   :  { %1406 = vmatprep.mubr.msk.bf16.mxu0 %vm533_vm1, %v1384_v23  ;;  %v547_v10 = vsel %vm533_vm1, %v1661_v54, %v262_v26 }
  0xb1   :  { %v322_v32 = vpop.permute.xlu1 %321  ;;  %383 = vrot.lane.b32.xlu0 %v1875_v31, %s1534_s23 }
  0xb2   :  { %v588_v21 = vsel %vm578_vm2, %v547_v10, %v322_v32 }
  0xb3   :  { %431 = vrot.lane.b32.xlu1 %v245_v28, %s1535_s30  ;;  %v270_v35 = vpop.permute.xlu0 %269 }
  0xb4   :  { %v559_v24 = vsel %vm533_vm1, %v1732_v38, %v270_v35 }
  0xb5   :  { %v1943_v7 = vpop.permute.xlu1 %329  ;;  %429 = vrot.lane.b32.xlu0 %v238_v27, %s1535_s30 }
  0xb6   :  { %v596_v38 = vsel %vm578_vm2, %v559_v24, %v1943_v7 }
  0xb7   :  { %467 = vrot.lane.b32.xlu1 %v1936_v45, %s1536_s9  ;;  %v324_v36 = vpop.permute.xlu0 %323 }
  0xb8   :  { %v590_v51 = vsel %vm578_vm2, %v550_v19, %v324_v36 }
  0xb9   :  { %v370_v43 = vpop.permute.xlu1 %369  ;;  %465 = vrot.lane.b32.xlu0 %v1902_v50, %s1536_s9 }
  0xbb   :  { %499 = vrot.lane.b32.xlu1 %v1951_v0, %s1537_s12  ;;  %v368_v27 = vpop.permute.xlu0 %367 }
  0xbc   :  { %v619_v9 = vsel %vm609_vm3, %v588_v21, %v368_v27 }
  0xbd   :  { %v378_v3 = vpop.permute.xlu1 %377  ;;  %497 = vrot.lane.b32.xlu0 %v1915_v8, %s1537_s12 }
  0xbe   :  { %v629_v39 = vsel %vm609_vm3, %v596_v38, %v378_v3 }
  0xbf   :  { %529 = vrot.lane.b32.xlu1 %v252_v44, %s1538_s15  ;;  %v376_v48 = vpop.permute.xlu0 %375 }
  0xc0   :  { %v627_v40 = vsel %vm609_vm3, %v1834_v52, %v376_v48 }
  0xc1   :  { %v416_v42 = vpop.permute.xlu1 %415  ;;  %527 = vrot.lane.b32.xlu0 %v245_v28, %s1538_s15 }
  0xc3   :  { %281 = vrot.lane.b32.xlu1 %v252_v44, %s1533_s22  ;;  %v414_v16 = vpop.permute.xlu0 %413 }
  0xc4   :  { %v652_v25 = vsel %vm642_vm4, %v619_v9, %v414_v16  ;;  %v1390_v16 = vcombine.low %v1857_v18, %v1902_v50 }
  0xc5   :  { %v424_v53 = vpop.permute.xlu1 %423  ;;  %279 = vrot.lane.b32.xlu0 %v245_v28, %s1533_s22  ;;  %v621_v28 = vsel %vm609_vm3, %v590_v51, %v370_v43 }
  0xc6   :  { %v654_v54 = vsel %vm642_vm4, %v621_v28, %v416_v42  ;;  %v662_v22 = vsel %vm642_vm4, %v629_v39, %v424_v53 }
  0xc7   :  { %341 = vrot.lane.b32.xlu1 %v1938_v13, %s1532_s21  ;;  %v422_v56 = vpop.permute.xlu0 %421 }
  0xc8   :  { %v660_v57 = vsel %vm642_vm4, %v627_v40, %v422_v56 }
  0xc9   :  { %v452_v4 = vpop.permute.xlu1 %451  ;;  %339 = vrot.lane.b32.xlu0 %v1936_v45, %s1532_s21 }
  0xca   :  { %v687_v29 = vsel %vm675_vm5, %v654_v54, %v452_v4 }
  0xcb   :  { %389 = vrot.lane.b32.xlu1 %v145_v60, %s1534_s23  ;;  %v450_v14 = vpop.permute.xlu0 %449 }
  0xcc   :  { %v685_v32 = vsel %vm675_vm5, %v652_v25, %v450_v14 }
  0xcd   :  { %v460_v2 = vpop.permute.xlu1 %459  ;;  %387 = vrot.lane.b32.xlu0 %v1951_v0, %s1534_s23 }
  0xcf   :  { %435 = vrot.lane.b32.xlu1 %v404_v6, %s1535_s30  ;;  %v458_v11 = vpop.permute.xlu0 %457 }
  0xd0   :  { %v693_v46 = vsel %vm675_vm5, %v660_v57, %v458_v11 }
  0xd1   :  { %v484_v15 = vpop.permute.xlu1 %483  ;;  %433 = vrot.lane.b32.xlu0 %v252_v44, %s1535_s30  ;;  %v695_v44 = vsel %vm675_vm5, %v662_v22, %v460_v2 }
  0xd2   :  { %v720_v35 = vsel %vm708_vm6, %v687_v29, %v484_v15 }
  0xd3   :  { %471 = vrot.lane.b32.xlu1 %v440_v12, %s1536_s9  ;;  %v482_v17 = vpop.permute.xlu0 %481 }
  0xd4   :  { %v718_v58 = vsel %vm708_vm6, %v685_v32, %v482_v17 }
  0xd5   :  { %v492_v20 = vpop.permute.xlu1 %491  ;;  %469 = vrot.lane.b32.xlu0 %v1938_v13, %s1536_s9 }
  0xd6   :  { %v728_v47 = vsel %vm708_vm6, %v695_v44, %v492_v20 }
  0xd7   :  { %v490_v23 = vpop.permute.xlu0 %489  ;;  %531 = vrot.lane.b32.xlu1 %v404_v6, %s1538_s15 }
  0xd8   :  { %v726_v3 = vsel %vm708_vm6, %v693_v46, %v490_v23 }
  0xd9   :  { %v514_v26 = vpop.permute.xlu1 %513  ;;  %501 = vrot.lane.b32.xlu0 %v145_v60, %s1537_s12 }
  0xda   :  { %v752_v41 = vsel %vm740_vm7, %v720_v35, %v514_v26 }
  0xdb   :  { %v512_v36 = vpop.permute.xlu0 %511 }
  0xdc   :  { %v750_v43 = vsel %vm740_vm7, %v718_v58, %v512_v36 }
  0xdd   :  { %v1383_v27 = vcombine.low %v750_v43, %v752_v41  ;;  %v522_v7 = vpop.permute.xlu1 %521 }
  0xde   :  { %v760_v48 = vsel %vm740_vm7, %v728_v47, %v522_v7 }
  0xdf   :  { %988 = vmatmul.mubr.bf16.gmra.mrb[8].mxu0 %v1383_v27  ;;  %v520_v52 = vpop.permute.xlu0 %519 }
  0xe0   :  { %v758_v42 = vsel %vm740_vm7, %v726_v3, %v520_v52  ;;  %1407 = vmatprep.mubr.msk.bf16.mxu0 %vm533_vm1, %v1386_v63 }
  0xe1   :  { %v1387_v37 = vcombine.low %v758_v42, %v760_v48  ;;  %v268_v53 = vpop.permute.xlu1 %267 }
  0xe2   :  { %v556_v54 = vsel %vm533_vm1, %v1759_v55, %v268_v53 }
  0xe3   :  { %1004 = vmatmul.mubr.bf16.vlgmr.msra.gmra.mrb[0].mxu1 %v1387_v37  ;;  %v266_v56 = vpop.permute.xlu0 %265 }
  0xe4   :  { %1409 = vmatprep.mubr.msk.bf16.mxu1 %vm533_vm1, %v1390_v16  ;;  %v553_v25 = vsel %vm533_vm1, %v1722_v30, %v266_v56 }
  0xe5   :  { %v274_v60 = vpop.permute.xlu1 %273 }
  0xe6   :  { %v565_v55 = vsel %vm533_vm1, %v1766_v59, %v274_v60 }
  0xe7   :  { %v272_v61 = vpop.permute.xlu0 %271 }
  0xe8   :  { %v562_v30 = vsel %vm533_vm1, %v1728_v33, %v272_v61 }
  0xe9   :  { %v328_v62 = vpop.permute.xlu1 %327 }
  0xea   :  { %v594_v26 = vsel %vm578_vm2, %v556_v54, %v328_v62 }
  0xeb   :  { %v326_v4 = vpop.permute.xlu0 %325 }
  0xec   :  { %v592_v29 = vsel %vm578_vm2, %v553_v25, %v326_v4 }
  0xed   :  { %v334_v14 = vpop.permute.xlu1 %333 }
  0xee   :  { %v600_v41 = vsel %vm578_vm2, %v565_v55, %v334_v14 }
  0xef   :  { %v332_v6 = vpop.permute.xlu0 %331 }
  0xf0   :  { %v598_v43 = vsel %vm578_vm2, %v562_v30, %v332_v6 }
  0xf1   :  { %v374_v2 = vpop.permute.xlu1 %373 }
  0xf2   :  { %v625_v63 = vsel %vm609_vm3, %v594_v26, %v374_v2 }
  0xf3   :  { %v372_v11 = vpop.permute.xlu0 %371 }
  0xf4   :  { %v623_v38 = vsel %vm609_vm3, %v592_v29, %v372_v11 }
  0xf5   :  { %v382_v15 = vpop.permute.xlu1 %381 }
  0xf6   :  { %v633_v7 = vsel %vm609_vm3, %v600_v41, %v382_v15 }
  0xf7   :  { %v380_v17 = vpop.permute.xlu0 %379 }
  0xf8   :  { %v631_v59 = vsel %vm609_vm3, %v598_v43, %v380_v17 }
  0xf9   :  { %v420_v19 = vpop.permute.xlu1 %419 }
  0xfa   :  { %v658_v35 = vsel %vm642_vm4, %v625_v63, %v420_v19  ;;  %v1394_v63 = vcombine.low %v440_v12, %v1565_v1 }
  0xfb   :  { %v418_v10 = vpop.permute.xlu0 %417 }
  0xfc   :  { %v656_v58 = vsel %vm642_vm4, %v623_v38, %v418_v10 }
  0xfd   :  { %v428_v51 = vpop.permute.xlu1 %427 }
  0xfe   :  { %v666_v46 = vsel %vm642_vm4, %v633_v7, %v428_v51 }
  0xff   :  { %v426_v18 = vpop.permute.xlu0 %425 }
 0x100   :  { %v664_v47 = vsel %vm642_vm4, %v631_v59, %v426_v18 }
 0x101   :  { %v456_v50 = vpop.permute.xlu1 %455 }
 0x102   :  { %v691_v39 = vsel %vm675_vm5, %v658_v35, %v456_v50 }
 0x103   :  { %v454_v20 = vpop.permute.xlu0 %453 }
 0x104   :  { %v689_v40 = vsel %vm675_vm5, %v656_v58, %v454_v20 }
 0x105   :  { %v464_v21 = vpop.permute.xlu1 %463 }
 0x106   :  { %v699_v48 = vsel %vm675_vm5, %v666_v46, %v464_v21 }
 0x107   :  { %v462_v23 = vpop.permute.xlu0 %461 }
 0x108   :  { %v697_v42 = vsel %vm675_vm5, %v664_v47, %v462_v23 }
 0x109   :  { %v2025_v24 = vpop.permute.xlu1 %487 }
 0x10a   :  { %v724_v22 = vsel %vm708_vm6, %v691_v39, %v2025_v24 }
 0x10b   :  { %v486_v28 = vpop.permute.xlu0 %485 }
 0x10c   :  { %v722_v57 = vsel %vm708_vm6, %v689_v40, %v486_v28 }
 0x10d   :  { %v496_v9 = vpop.permute.xlu1 %495 }
 0x10e   :  { %v732_v16 = vsel %vm708_vm6, %v699_v48, %v496_v9 }
 0x10f   :  { %v494_v32 = vpop.permute.xlu0 %493 }
 0x110   :  { %v730_v37 = vsel %vm708_vm6, %v697_v42, %v494_v32 }
 0x111   :  { %v2037_v36 = vpop.permute.xlu1 %517 }
 0x112   :  { %v756_v33 = vsel %vm740_vm7, %v724_v22, %v2037_v36 }
 0x113   :  { %v516_v27 = vpop.permute.xlu0 %515 }
 0x114   :  { %v754_v44 = vsel %vm740_vm7, %v722_v57, %v516_v27 }
 0x115   :  { %v1385_v3 = vcombine.low %v754_v44, %v756_v33  ;;  %v526_v52 = vpop.permute.xlu1 %525 }
 0x116   :  { %v764_v56 = vsel %vm740_vm7, %v732_v16, %v526_v52 }
 0x117   :  { %996 = vmatmul.mubr.bf16.gmra.mrb[12].mxu0 %v1385_v3  ;;  %v524_v53 = vpop.permute.xlu0 %523 }
 0x118   :  { %v762_v60 = vsel %vm740_vm7, %v730_v37, %v524_v53 }
 0x119   :  { %v1389_v61 = vcombine.low %v762_v60, %v764_v56  ;;  %v278_v62 = vpop.permute.xlu1 %277 }
 0x11a   :  { %v571_v51 = vsel %vm533_vm1, %v1875_v31, %v278_v62 }
 0x11b   :  { %1012 = vmatmul.mubr.bf16.gmra.mrb[4].mxu1 %v1389_v61  ;;  %v276_v4 = vpop.permute.xlu0 %275 }
 0x11c   :  { %1410 = vmatprep.mubr.msk.bf16.mxu1 %vm533_vm1, %v1392_v5  ;;  %v568_v50 = vsel %vm533_vm1, %v1814_v34, %v276_v4 }
 0x11d   :  { %v338_v14 = vpop.permute.xlu1 %337 }
 0x11e   :  { %v604_v20 = vsel %vm578_vm2, %v571_v51, %v338_v14 }
 0x11f   :  { %v336_v6 = vpop.permute.xlu0 %335 }
 0x120   :  { %v602_v45 = vsel %vm578_vm2, %v568_v50, %v336_v6 }
 0x121   :  { %v386_v2 = vpop.permute.xlu1 %385 }
 0x122   :  { %v637_v5 = vsel %vm609_vm3, %v604_v20, %v386_v2 }
 0x123   :  { %v384_v11 = vpop.permute.xlu0 %383 }
 0x124   :  { %v635_v21 = vsel %vm609_vm3, %v602_v45, %v384_v11 }
 0x125   :  { %v432_v15 = vpop.permute.xlu1 %431 }
 0x126   :  { %v670_v23 = vsel %vm642_vm4, %v637_v5, %v432_v15 }
 0x127   :  { %v430_v17 = vpop.permute.xlu0 %429 }
 0x128   :  { %v668_v28 = vsel %vm642_vm4, %v635_v21, %v430_v17 }
 0x129   :  { %v468_v19 = vpop.permute.xlu1 %467 }
 0x12a   :  { %v703_v31 = vsel %vm675_vm5, %v670_v23, %v468_v19 }
 0x12b   :  { %v466_v10 = vpop.permute.xlu0 %465 }
 0x12c   :  { %v701_v54 = vsel %vm675_vm5, %v668_v28, %v466_v10 }
 0x12d   :  { %v500_v18 = vpop.permute.xlu1 %499 }
 0x12e   :  { %v736_v34 = vsel %vm708_vm6, %v703_v31, %v500_v18 }
 0x12f   :  { %v498_v13 = vpop.permute.xlu0 %497 }
 0x130   :  { %v734_v25 = vsel %vm708_vm6, %v701_v54, %v498_v13 }
 0x131   :  { %v530_v9 = vpop.permute.xlu1 %529 }
 0x132   :  { %v768_v29 = vsel %vm740_vm7, %v736_v34, %v530_v9 }
 0x133   :  { %v528_v26 = vpop.permute.xlu0 %527 }
 0x134   :  { %v766_v32 = vsel %vm740_vm7, %v734_v25, %v528_v26 }
 0x135   :  { %v1391_v38 = vcombine.low %v766_v32, %v768_v29  ;;  %v282_v35 = vpop.permute.xlu1 %281 }
 0x136   :  { %v577_v41 = vsel %vm533_vm1, %v1951_v0, %v282_v35 }
 0x137   :  { %1020 = vmatmul.mubr.bf16.gmra.mrb[8].mxu1 %v1391_v38  ;;  %v280_v58 = vpop.permute.xlu0 %279 }
 0x138   :  { %1411 = vmatprep.mubr.msk.bf16.mxu1 %vm533_vm1, %v1394_v63  ;;  %v574_v27 = vsel %vm533_vm1, %v1915_v8, %v280_v58 }
 0x139   :  { %v342_v55 = vpop.permute.xlu1 %341 }
 0x13a   :  { %v608_v57 = vsel %vm578_vm2, %v577_v41, %v342_v55 }
 0x13b   :  { %v340_v30 = vpop.permute.xlu0 %339 }
 0x13c   :  { %v606_v33 = vsel %vm578_vm2, %v574_v27, %v340_v30 }
 0x13d   :  { %v390_v39 = vpop.permute.xlu1 %389 }
 0x13e   :  { %v641_v49 = vsel %vm609_vm3, %v608_v57, %v390_v39 }
 0x13f   :  { %v388_v40 = vpop.permute.xlu0 %387 }
 0x140   :  { %v639_v44 = vsel %vm609_vm3, %v606_v33, %v388_v40 }
 0x141   :  { %v436_v43 = vpop.permute.xlu1 %435 }
 0x142   :  { %v674_v12 = vsel %vm642_vm4, %v641_v49, %v436_v43 }
 0x143   :  { %v434_v22 = vpop.permute.xlu0 %433 }
 0x144   :  { %v672_v0 = vsel %vm642_vm4, %v639_v44, %v434_v22 }
 0x145   :  { %v472_v1 = vpop.permute.xlu1 %471 }
 0x146   :  { %v707_v7 = vsel %vm675_vm5, %v674_v12, %v472_v1 }
 0x147   :  { %v470_v59 = vpop.permute.xlu0 %469  ;;  %v739_v46 = vsel %vm708_vm6, %v707_v7, %v2025_v24 }
 0x148   :  { %v705_v3 = vsel %vm675_vm5, %v672_v0, %v470_v59  ;;  %v771_v8 = vsel %vm740_vm7, %v739_v46, %v2037_v36 }
 0x149   :  { %v532_v47 = vpop.permute.xlu1 %531 }
 0x14b   :  { %v502_v52 = vpop.permute.xlu0 %501 }
 0x14c   :  { %v738_v48 = vsel %vm708_vm6, %v705_v3, %v502_v52 }
 0x14d   :  { %v770_v42 = vsel %vm740_vm7, %v738_v48, %v532_v47 }
 0x14e   :  { %v1393_v16 = vcombine.low %v770_v42, %v771_v8 }
 0x150   :  { %1028 = vmatmul.mubr.bf16.gmra.mrb[12].mxu1 %v1393_v16 }
 0x166   :  { %v2105_v37 = vpop.f32.mrb[0].mxu0 }
 0x167   :  { %v1073_v53 = vmul.f32 %v2105_v37, %v2105_v37  ;;  %v975_v56 = vpop.f32.mrb[1].mxu0  ;;  %v1036_v60 = vsel %vm578_vm2, %v2105_v37, 0.0 }
 0x168   :  { %v2109_v24 = vpop.f32.mrb[2].mxu0 }
 0x169   :  { %v1037_v61 = vsel %vm578_vm2, %v2109_v24, 0.0  ;;  %v1074_v36 = vmul.f32 %v2109_v24, %v2109_v24  ;;  %v978_v62 = vpop.f32.mrb[3].mxu0  ;;  %v1089_v14 = vsel %vm578_vm2, %v1073_v53, 0.0 }
 0x16a   :  { %v1038_v4 = vadd.f32 %v1037_v61, %v1036_v60 }
 0x16b   :  { %v1090_v6 = vsel %vm578_vm2, %v1074_v36, 0.0 }
 0x16c   :  { %v1091_v2 = vadd.f32 %v1090_v6, %v1089_v14 }
 0x182   :  { %v2119_v11 = vpop.f32.mrb[4].mxu0 }
 0x183   :  { %v1039_v15 = vsel %vm578_vm2, %v2119_v11, 0.0  ;;  %v1075_v17 = vmul.f32 %v2119_v11, %v2119_v11  ;;  %v983_v19 = vpop.f32.mrb[5].mxu0 }
 0x184   :  { %v1040_v10 = vadd.f32 %v1039_v15, %v1038_v4  ;;  %v2125_v51 = vpop.f32.mrb[6].mxu0 }
 0x185   :  { %v1092_v18 = vsel %vm578_vm2, %v1075_v17, 0.0  ;;  %v1041_v50 = vsel %vm578_vm2, %v2125_v51, 0.0  ;;  %v1076_v20 = vmul.f32 %v2125_v51, %v2125_v51  ;;  %v986_v45 = vpop.f32.mrb[7].mxu0 }
 0x186   :  { %v1093_v13 = vadd.f32 %v1092_v18, %v1091_v2  ;;  %v1042_v5 = vadd.f32 %v1041_v50, %v1040_v10 }
 0x187   :  { %v1094_v21 = vsel %vm578_vm2, %v1076_v20, 0.0 }
 0x188   :  { %v1095_v23 = vadd.f32 %v1094_v21, %v1093_v13 }
 0x1b2   :  { %v2133_v28 = vpop.f32.mrb[8].mxu0 }
 0x1b3   :  { %v1043_v9 = vsel %vm578_vm2, %v2133_v28, 0.0  ;;  %v1077_v31 = vmul.f32 %v2133_v28, %v2133_v28  ;;  %v991_v54 = vpop.f32.mrb[9].mxu0 }
 0x1b4   :  { %v1044_v34 = vadd.f32 %v1043_v9, %v1042_v5  ;;  %v2139_v25 = vpop.f32.mrb[10].mxu0 }
 0x1b5   :  { %v1096_v26 = vsel %vm578_vm2, %v1077_v31, 0.0  ;;  %v1045_v29 = vsel %vm578_vm2, %v2139_v25, 0.0  ;;  %v1078_v32 = vmul.f32 %v2139_v25, %v2139_v25  ;;  %v994_v63 = vpop.f32.mrb[11].mxu0 }
 0x1b6   :  { %v1097_v38 = vadd.f32 %v1096_v26, %v1095_v23  ;;  %v1046_v35 = vadd.f32 %v1045_v29, %v1044_v34  ;;  %v2146_v58 = vpop.f32.mrb[0].mxu1 }
 0x1b7   :  { %v1098_v55 = vsel %vm578_vm2, %v1078_v32, 0.0  ;;  %v1007_v30 = vpop.f32.mrb[1].mxu1  ;;  %v1081_v27 = vmul.f32 %v2146_v58, %v2146_v58  ;;  %v1051_v3 = vsel %vm578_vm2, %v2146_v58, 0.0 }
 0x1b8   :  { %v1099_v39 = vadd.f32 %v1098_v55, %v1097_v38  ;;  %v2149_v40 = vpop.f32.mrb[2].mxu1 }
 0x1b9   :  { %v1010_v41 = vpop.f32.mrb[3].mxu1  ;;  %v1082_v52 = vmul.f32 %v2149_v40, %v2149_v40  ;;  %v1104_v56 = vsel %vm578_vm2, %v1081_v27, 0.0  ;;  %v1053_v60 = vsel %vm578_vm2, %v2149_v40, 0.0 }
 0x1bb   :  { %v1106_v14 = vsel %vm578_vm2, %v1082_v52, 0.0 }
 0x1ea   :  { %v2151_v43 = vpop.f32.mrb[12].mxu0 }
 0x1eb   :  { %v1047_v22 = vsel %vm578_vm2, %v2151_v43, 0.0  ;;  %v1079_v57 = vmul.f32 %v2151_v43, %v2151_v43  ;;  %v999_v49 = vpop.f32.mrb[13].mxu0 }
 0x1ec   :  { %v1048_v1 = vadd.f32 %v1047_v22, %v1046_v35  ;;  %v2157_v12 = vpop.f32.mrb[14].mxu0 }
 0x1ed   :  { %v1100_v7 = vsel %vm578_vm2, %v1079_v57, 0.0  ;;  %v1049_v59 = vsel %vm578_vm2, %v2157_v12, 0.0  ;;  %v1080_v33 = vmul.f32 %v2157_v12, %v2157_v12  ;;  %v1002_v44 = vpop.f32.mrb[15].mxu0 }
 0x1ee   :  { %v1101_v0 = vadd.f32 %v1100_v7, %v1099_v39  ;;  %v1050_v46 = vadd.f32 %v1049_v59, %v1048_v1  ;;  %v2166_v47 = vpop.f32.mrb[4].mxu1 }
 0x1ef   :  { %v1102_v48 = vsel %vm578_vm2, %v1080_v33, 0.0  ;;  %v1015_v8 = vpop.f32.mrb[5].mxu1  ;;  %v1083_v61 = vmul.f32 %v2166_v47, %v2166_v47  ;;  %v1055_v6 = vsel %vm578_vm2, %v2166_v47, 0.0 }
 0x1f0   :  { %v1052_v42 = vadd.f32 %v1051_v3, %v1050_v46  ;;  %v1103_v16 = vadd.f32 %v1102_v48, %v1101_v0  ;;  %v2173_v53 = vpop.f32.mrb[6].mxu1 }
 0x1f1   :  { %v1018_v36 = vpop.f32.mrb[7].mxu1  ;;  %v1084_v2 = vmul.f32 %v2173_v53, %v2173_v53  ;;  %v1108_v19 = vsel %vm578_vm2, %v1083_v61, 0.0  ;;  %v1057_v10 = vsel %vm578_vm2, %v2173_v53, 0.0 }
 0x1f2   :  { %v1105_v62 = vadd.f32 %v1104_v56, %v1103_v16  ;;  %v1054_v4 = vadd.f32 %v1053_v60, %v1052_v42 }
 0x1f3   :  { %v1110_v20 = vsel %vm578_vm2, %v1084_v2, 0.0 }
 0x1f4   :  { %v1056_v15 = vadd.f32 %v1055_v6, %v1054_v4  ;;  %v1107_v17 = vadd.f32 %v1106_v14, %v1105_v62 }
 0x1f6   :  { %v1109_v18 = vadd.f32 %v1108_v19, %v1107_v17  ;;  %v1058_v50 = vadd.f32 %v1057_v10, %v1056_v15  ;;  %v1140_v19 = vlaneseq }
 0x1f8   :  { %v1111_v45 = vadd.f32 %v1110_v20, %v1109_v18  ;;  %v1141_v10 = vshrl.u32 %v1140_v19, 7  ;;  %v1132_v18 = vld [vmem:[%s2379_s2] sm:$0x1] }
 0x20a   :  { %v2189_v13 = vpop.f32.mrb[8].mxu1 }
 0x20b   :  { %v1059_v5 = vsel %vm578_vm2, %v2189_v13, 0.0  ;;  %v1085_v21 = vmul.f32 %v2189_v13, %v2189_v13  ;;  %v1023_v23 = vpop.f32.mrb[9].mxu1 }
 0x20c   :  { %v1060_v9 = vadd.f32 %v1059_v5, %v1058_v50  ;;  %v2195_v31 = vpop.f32.mrb[10].mxu1  ;;  %v1142_v50 = vsub.s32 0, %v1141_v10  ;;  %v1136_v5 = vld [vmem:[%s2380_s3] sm:$0x1] }
 0x20d   :  { %v1112_v54 = vsel %vm578_vm2, %v1085_v21, 0.0  ;;  %v1061_v34 = vsel %vm578_vm2, %v2195_v31, 0.0  ;;  %v1086_v26 = vmul.f32 %v2195_v31, %v2195_v31  ;;  %v1026_v29 = vpop.f32.mrb[11].mxu1 }
 0x20e   :  { %v1113_v32 = vadd.f32 %v1112_v54, %v1111_v45  ;;  %v1062_v63 = vadd.f32 %v1061_v34, %v1060_v9 }
 0x20f   :  { %v1114_v38 = vsel %vm578_vm2, %v1086_v26, 0.0 }
 0x210   :  { %v1115_v35 = vadd.f32 %v1114_v38, %v1113_v32 }
 0x223   :  { %v2203_v55 = vpop.f32.mrb[12].mxu1 }
 0x224   :  { %v1063_v30 = vsel %vm578_vm2, %v2203_v55, 0.0  ;;  %v1087_v39 = vmul.f32 %v2203_v55, %v2203_v55  ;;  %v1031_v41 = vpop.f32.mrb[13].mxu1 }
 0x225   :  { %v1064_v22 = vadd.f32 %v1063_v30, %v1062_v63  ;;  %v1032_v57 = vpop.f32.mrb[14].mxu1 }
 0x226   :  { %v1116_v49 = vsel %vm578_vm2, %v1087_v39, 0.0  ;;  %v1065_v1 = vsel %vm578_vm2, %v1032_v57, 0.0  ;;  %v1088_v27 = vmul.f32 %v1032_v57, %v1032_v57  ;;  %v1034_v7 = vpop.f32.mrb[15].mxu1 }
 0x227   :  { %v1117_v59 = vadd.f32 %v1116_v49, %v1115_v35  ;;  %v1066_v33 = vadd.f32 %v1065_v1, %v1064_v22 }
 0x228   :  { %v1118_v44 = vsel %vm578_vm2, %v1088_v27, 0.0 }
 0x229   :  { %v1067_v0 = vrot.slane %v1066_v33, 4  ;;  %v1119_v46 = vadd.f32 %v1118_v44, %v1117_v59 }
 0x22b   :  { %v1068_v3 = vadd.f32 %v1067_v0, %v1066_v33  ;;  %v1120_v52 = vrot.slane %v1119_v46, 4 }
 0x22d   :  { %v1069_v48 = vrot.slane %v1068_v3, 2  ;;  %v1121_v8 = vadd.f32 %v1120_v52, %v1119_v46 }
 0x22f   :  { %v1070_v42 = vadd.f32 %v1069_v48, %v1068_v3  ;;  %v1122_v16 = vrot.slane %v1121_v8, 2 }
 0x231   :  { %v1071_v56 = vrot.slane %v1070_v42, 1  ;;  %v1123_v60 = vadd.f32 %v1122_v16, %v1121_v8 }
 0x233   :  { %v1072_v61 = vadd.f32 %v1071_v56, %v1070_v42  ;;  %v1124_v36 = vrot.slane %v1123_v60, 1 }
 0x235   :  { %v1125_v62 = vadd.f32 %v1124_v36, %v1123_v60  ;;  %v1127_v4 = vmul.f32 0.0078125, %v1072_v61 }
 0x237   :  { %v1128_v14 = vmul.f32 0.0078125, %v1125_v62  ;;  %v1129_v6 = vmul.f32 %v1127_v4, %v1127_v4 }
 0x239   :  { %v1130_v2 = vsub.f32 %v1128_v14, %v1129_v6 }
 0x23b   :  { %v1131_v15 = vmax.f32 %v1130_v2, 0.0 }
 0x23d   :  { %v1133_v17 = vadd.f32 1e-05, %v1131_v15 }
 0x23f   :  { %1464 = vrsqrt.f32 %v1133_v17 }
 0x249   :  { %v1465_v20 = vpop.eup %1464 }
 0x24a   :  { %v1135_v45 = vmul.f32 %v1465_v20, %v1132_v18 }
 0x24c   :  { %v1137_v21 = vmul.f32 %v1135_v45, %v1127_v4  ;;  %v1143_v23 = vrot.slane %v1135_v45, %v1142_v50 }
 0x24e   :  { %v1138_v9 = vsub.f32 %v1136_v5, %v1137_v21  ;;  %v1160_v54 = vmul.f32 %v1143_v23, %v1032_v57  ;;  %v1146_v34 = vmul.f32 %v1143_v23, %v2109_v24  ;;  %v1145_v26 = vmul.f32 %v1143_v23, %v2105_v37 }
 0x24f   :  { %v1148_v29 = vmul.f32 %v1143_v23, %v2125_v51  ;;  %v1147_v32 = vmul.f32 %v1143_v23, %v2119_v11  ;;  %v1150_v63 = vmul.f32 %v1143_v23, %v2139_v25  ;;  %v1149_v38 = vmul.f32 %v1143_v23, %v2133_v28 }
 0x250   :  { %v1165_v35 = vrot.slane %v1138_v9, %v1142_v50  ;;  %v1152_v30 = vmul.f32 %v1143_v23, %v2157_v12  ;;  %v1151_v39 = vmul.f32 %v1143_v23, %v2151_v43  ;;  %v1154_v41 = vmul.f32 %v1143_v23, %v2149_v40 }
 0x251   :  { %v1153_v22 = vmul.f32 %v1143_v23, %v2146_v58  ;;  %v1156_v24 = vmul.f32 %v1143_v23, %v2173_v53  ;;  %v1155_v37 = vmul.f32 %v1143_v23, %v2166_v47  ;;  %v1158_v51 = vmul.f32 %v1143_v23, %v2195_v31 }
 0x252   :  { %v2231_v11 = vadd.f32 %v1165_v35, %v1160_v54  ;;  %v2233_v25 = vadd.f32 %v1165_v35, %v1146_v34  ;;  %v2235_v28 = vadd.f32 %v1165_v35, %v1145_v26  ;;  %v2237_v57 = vadd.f32 %v1165_v35, %v1148_v29 }
 0x253   :  { %v2239_v12 = vadd.f32 %v1165_v35, %v1147_v32  ;;  %v2241_v43 = vadd.f32 %v1165_v35, %v1150_v63  ;;  %v2243_v40 = vadd.f32 %v1165_v35, %v1149_v38  ;;  %v2245_v58 = vadd.f32 %v1165_v35, %v1152_v30 }
 0x254   :  { %v1413_v47 = vmul.f32 -1.442695, %v2233_v25  ;;  %v1412_v53 = vmul.f32 -1.442695, %v2235_v28  ;;  %v2249_v31 = vadd.f32 %v1165_v35, %v1151_v39  ;;  %v1415_v49 = vmul.f32 -1.442695, %v2237_v57 }
 0x255   :  { %v2252_v1 = vadd.f32 %v1165_v35, %v1154_v41  ;;  %v1414_v27 = vmul.f32 -1.442695, %v2239_v12  ;;  %v1417_v7 = vmul.f32 -1.442695, %v2241_v43  ;;  %v1416_v59 = vmul.f32 -1.442695, %v2243_v40 }
 0x256   :  { %1466 = vpow2.f32 %v1413_v47  ;;  %v2257_v33 = vadd.f32 %v1165_v35, %v1153_v22  ;;  %v2259_v44 = vadd.f32 %v1165_v35, %v1156_v24  ;;  %v2261_v0 = vadd.f32 %v1165_v35, %v1155_v37 }
 0x257   :  { %1468 = vpow2.f32 %v1412_v53  ;;  %v2263_v46 = vadd.f32 %v1165_v35, %v1158_v51  ;;  %v1157_v3 = vmul.f32 %v1143_v23, %v2189_v13  ;;  %v1419_v52 = vmul.f32 -1.442695, %v2245_v58 }
 0x258   :  { %1470 = vpow2.f32 %v1415_v49  ;;  %v1159_v48 = vmul.f32 %v1143_v23, %v2203_v55  ;;  %v1418_v8 = vmul.f32 -1.442695, %v2249_v31  ;;  %v1421_v56 = vmul.f32 -1.442695, %v2252_v1 }
 0x259   :  { %1472 = vpow2.f32 %v1414_v27  ;;  %v2269_v42 = vadd.f32 %v1165_v35, %v1157_v3  ;;  %v1420_v13 = vmul.f32 -1.442695, %v2257_v33  ;;  %v1423_v55 = vmul.f32 -1.442695, %v2259_v44 }
 0x25a   :  { %1474 = vpow2.f32 %v1417_v7  ;;  %v2271_v16 = vadd.f32 %v1165_v35, %v1159_v48  ;;  %v1422_v14 = vmul.f32 -1.442695, %v2261_v0  ;;  %v1427_v18 = vmul.f32 -1.442695, %v2231_v11 }
 0x25b   :  { %1476 = vpow2.f32 %v1416_v59  ;;  %v1425_v9 = vmul.f32 -1.442695, %v2263_v46  ;;  %v1424_v34 = vmul.f32 -1.442695, %v2269_v42 }
 0x25c   :  { %1478 = vpow2.f32 %v1419_v52  ;;  %v1426_v29 = vmul.f32 -1.442695, %v2271_v16 }
 0x25d   :  { %1480 = vpow2.f32 %v1418_v8 }
 0x25e   :  { %1482 = vpow2.f32 %v1421_v56 }
 0x25f   :  { %1484 = vpow2.f32 %v1420_v13 }
 0x260   :  { %v1467_v60 = vpop.eup %1466 }
 0x261   :  { %v1469_v61 = vpop.eup %1468  ;;  %v1232_v36 = vadd.f32 1.0, %v1467_v60 }
 0x262   :  { %v1471_v62 = vpop.eup %1470  ;;  %v1231_v4 = vadd.f32 1.0, %v1469_v61 }
 0x263   :  { %v1473_v6 = vpop.eup %1472  ;;  %1486 = vrcp.f32 %v1232_v36  ;;  %v1234_v2 = vadd.f32 1.0, %v1471_v62 }
 0x264   :  { %v1475_v15 = vpop.eup %1474  ;;  %1488 = vrcp.f32 %v1231_v4  ;;  %v1233_v17 = vadd.f32 1.0, %v1473_v6 }
 0x265   :  { %v1477_v19 = vpop.eup %1476  ;;  %1490 = vpow2.f32 %v1423_v55  ;;  %v1236_v20 = vadd.f32 1.0, %v1475_v15 }
 0x266   :  { %v1479_v10 = vpop.eup %1478  ;;  %1492 = vpow2.f32 %v1422_v14  ;;  %v1235_v45 = vadd.f32 1.0, %v1477_v19 }
 0x267   :  { %v1481_v50 = vpop.eup %1480  ;;  %1494 = vrcp.f32 %v1234_v2  ;;  %v1238_v5 = vadd.f32 1.0, %v1479_v10 }
 0x268   :  { %1496 = vrcp.f32 %v1233_v17  ;;  %v1237_v21 = vadd.f32 1.0, %v1481_v50  ;;  %v1483_v23 = vpop.eup %1482 }
 0x269   :  { %1498 = vpow2.f32 %v1427_v18  ;;  %v1485_v54 = vpop.eup %1484  ;;  %v1240_v38 = vadd.f32 1.0, %v1483_v23 }
 0x26a   :  { %1500 = vrcp.f32 %v1236_v20  ;;  %v1239_v30 = vadd.f32 1.0, %v1485_v54 }
 0x26b   :  { %1502 = vrcp.f32 %v1235_v45 }
 0x26c   :  { %1504 = vrcp.f32 %v1238_v5 }
 0x26d   :  { %v1487_v26 = vpop.eup %1486  ;;  %1506 = vrcp.f32 %v1237_v21 }
 0x26e   :  { %v1489_v32 = vpop.eup %1488  ;;  %1297 = vrot.lane.b32.xlu1 %v1487_v26, %s1538_s15  ;;  %1508 = vpow2.f32 %v1425_v9 }
 0x26f   :  { %v1491_v63 = vpop.eup %1490  ;;  %1295 = vrot.lane.b32.xlu0 %v1489_v32, %s1538_s15  ;;  %1510 = vpow2.f32 %v1424_v34 }
 0x270   :  { %v1493_v35 = vpop.eup %1492  ;;  %1512 = vpow2.f32 %v1426_v29  ;;  %v1242_v22 = vadd.f32 1.0, %v1491_v63 }
 0x271   :  { %v1495_v39 = vpop.eup %1494  ;;  %1514 = vrcp.f32 %v1240_v38  ;;  %v1241_v37 = vadd.f32 1.0, %v1493_v35 }
 0x272   :  { %v1497_v41 = vpop.eup %1496  ;;  %1301 = vrot.lane.b32.xlu1 %v1495_v39, %s1538_s15  ;;  %1516 = vrcp.f32 %v1239_v30 }
 0x273   :  { %1299 = vrot.lane.b32.xlu0 %v1497_v41, %s1538_s15  ;;  %v1499_v24 = vpop.eup %1498  ;;  %1518 = vrcp.f32 %v1242_v22 }
 0x274   :  { %v1501_v51 = vpop.eup %1500  ;;  %1520 = vrcp.f32 %v1241_v37  ;;  %v1246_v48 = vadd.f32 1.0, %v1499_v24 }
 0x275   :  { %v1503_v47 = vpop.eup %1502 }
 0x276   :  { %1305 = vrot.lane.b32.xlu1 %v1501_v51, %s1538_s15  ;;  %v1505_v53 = vpop.eup %1504 }
 0x277   :  { %1303 = vrot.lane.b32.xlu0 %v1503_v47, %s1538_s15  ;;  %v1507_v49 = vpop.eup %1506 }
 0x278   :  { %v1509_v27 = vpop.eup %1508 }
 0x279   :  { %v1511_v7 = vpop.eup %1510  ;;  %v1244_v59 = vadd.f32 1.0, %v1509_v27 }
 0x27a   :  { %1309 = vrot.lane.b32.xlu1 %v1505_v53, %s1538_s15  ;;  %v1513_v3 = vpop.eup %1512  ;;  %v1243_v52 = vadd.f32 1.0, %v1511_v7 }
 0x27b   :  { %1307 = vrot.lane.b32.xlu0 %v1507_v49, %s1538_s15  ;;  %1522 = vrcp.f32 %v1244_v59  ;;  %v1515_v8 = vpop.eup %1514  ;;  %v1245_v56 = vadd.f32 1.0, %v1513_v3 }
 0x27c   :  { %1524 = vrcp.f32 %v1243_v52  ;;  %v1517_v13 = vpop.eup %1516 }
 0x27d   :  { %1526 = vrcp.f32 %v1246_v48  ;;  %v1519_v60 = vpop.eup %1518 }
 0x27e   :  { %1313 = vrot.lane.b32.xlu1 %v1515_v8, %s1538_s15  ;;  %1528 = vrcp.f32 %v1245_v56  ;;  %v1521_v61 = vpop.eup %1520 }
 0x27f   :  { %1311 = vrot.lane.b32.xlu0 %v1517_v13, %s1538_s15 }
 0x282   :  { %1317 = vrot.lane.b32.xlu1 %v1519_v60, %s1538_s15 }
 0x283   :  { %1315 = vrot.lane.b32.xlu0 %v1521_v61, %s1538_s15 }
 0x285   :  { %v1523_v36 = vpop.eup %1522 }
 0x286   :  { %v1525_v55 = vpop.eup %1524  ;;  %1321 = vrot.lane.b32.xlu1 %v1523_v36, %s1538_s15 }
 0x287   :  { %1319 = vrot.lane.b32.xlu0 %v1525_v55, %s1538_s15  ;;  %v1527_v62 = vpop.eup %1526 }
 0x288   :  { %v1529_v4 = vpop.eup %1528 }
 0x28a   :  { %1325 = vrot.lane.b32.xlu1 %v1527_v62, %s1538_s15 }
 0x28b   :  { %1323 = vrot.lane.b32.xlu0 %v1529_v4, %s1538_s15 }
 0x2e0   :  { %v1298_v14 = vpop.permute.xlu1 %1297 }
 0x2e1   :  { %v1344_v6 = vmul.f32 %v1298_v14, %v2233_v25  ;;  %v1296_v2 = vpop.permute.xlu0 %1295 }
 0x2e2   :  { %v1343_v15 = vmul.f32 %v1296_v2, %v2235_v28 }
 0x2e3   :  { %1360 = vst.msk [vmem:[%s2381_s4 + $0x8] sm:$0xff] %vm533_vm1, %v1344_v6 }
 0x2e4   :  { %1359 = vst.msk [vmem:[%s2381_s4] sm:$0xff] %vm533_vm1, %v1343_v15  ;;  %v1302_v17 = vpop.permute.xlu1 %1301 }
 0x2e5   :  { %v1346_v19 = vmul.f32 %v1302_v17, %v2237_v57  ;;  %v1300_v10 = vpop.permute.xlu0 %1299 }
 0x2e6   :  { %v1345_v18 = vmul.f32 %v1300_v10, %v2239_v12 }
 0x2e7   :  { %1362 = vst.msk [vmem:[%s2381_s4 + $0x18] sm:$0xff] %vm533_vm1, %v1346_v19 }
 0x2e8   :  { %1361 = vst.msk [vmem:[%s2381_s4 + $0x10] sm:$0xff] %vm533_vm1, %v1345_v18  ;;  %v1306_v25 = vpop.permute.xlu1 %1305 }
 0x2e9   :  { %v1348_v28 = vmul.f32 %v1306_v25, %v2241_v43  ;;  %v1304_v50 = vpop.permute.xlu0 %1303 }
 0x2ea   :  { %v1347_v20 = vmul.f32 %v1304_v50, %v2243_v40 }
 0x2eb   :  { %1364 = vst.msk [vmem:[%s2381_s4 + $0x28] sm:$0xff] %vm533_vm1, %v1348_v28 }
 0x2ec   :  { %1363 = vst.msk [vmem:[%s2381_s4 + $0x20] sm:$0xff] %vm533_vm1, %v1347_v20  ;;  %v1310_v57 = vpop.permute.xlu1 %1309 }
 0x2ed   :  { %v1350_v12 = vmul.f32 %v1310_v57, %v2245_v58  ;;  %v1308_v45 = vpop.permute.xlu0 %1307 }
 0x2ee   :  { %v1349_v5 = vmul.f32 %v1308_v45, %v2249_v31 }
 0x2ef   :  { %1366 = vst.msk [vmem:[%s2381_s4 + $0x38] sm:$0xff] %vm533_vm1, %v1350_v12 }
 0x2f0   :  { %1365 = vst.msk [vmem:[%s2381_s4 + $0x30] sm:$0xff] %vm533_vm1, %v1349_v5  ;;  %v1314_v43 = vpop.permute.xlu1 %1313 }
 0x2f1   :  { %v1352_v40 = vmul.f32 %v1314_v43, %v2252_v1  ;;  %v1312_v21 = vpop.permute.xlu0 %1311 }
 0x2f2   :  { %v1351_v23 = vmul.f32 %v1312_v21, %v2257_v33 }
 0x2f3   :  { %1368 = vst.msk [vmem:[%s2381_s4 + $0x48] sm:$0xff] %vm533_vm1, %v1352_v40 }
 0x2f4   :  { %1367 = vst.msk [vmem:[%s2381_s4 + $0x40] sm:$0xff] %vm533_vm1, %v1351_v23  ;;  %v1318_v58 = vpop.permute.xlu1 %1317 }
 0x2f5   :  { %v1354_v31 = vmul.f32 %v1318_v58, %v2259_v44  ;;  %v1316_v9 = vpop.permute.xlu0 %1315 }
 0x2f6   :  { %v1353_v54 = vmul.f32 %v1316_v9, %v2261_v0 }
 0x2f7   :  { %1370 = vst.msk [vmem:[%s2381_s4 + $0x58] sm:$0xff] %vm533_vm1, %v1354_v31 }
 0x2f8   :  { %1369 = vst.msk [vmem:[%s2381_s4 + $0x50] sm:$0xff] %vm533_vm1, %v1353_v54  ;;  %v1322_v1 = vpop.permute.xlu1 %1321 }
 0x2f9   :  { %v1356_v33 = vmul.f32 %v1322_v1, %v2263_v46  ;;  %v1320_v34 = vpop.permute.xlu0 %1319 }
 0x2fa   :  { %v1355_v26 = vmul.f32 %v1320_v34, %v2269_v42 }
 0x2fb   :  { %1372 = vst.msk [vmem:[%s2381_s4 + $0x68] sm:$0xff] %vm533_vm1, %v1356_v33 }
 0x2fc   :  { %1371 = vst.msk [vmem:[%s2381_s4 + $0x60] sm:$0xff] %vm533_vm1, %v1355_v26  ;;  %v1326_v44 = vpop.permute.xlu1 %1325 }
 0x2fd   :  { %v1358_v0 = vmul.f32 %v1326_v44, %v2231_v11  ;;  %v1324_v29 = vpop.permute.xlu0 %1323 }
 0x2fe   :  { %v1357_v32 = vmul.f32 %v1324_v29, %v2271_v16 }
 0x2ff   :  { %1374 = vst.msk [vmem:[%s2381_s4 + $0x78] sm:$0xff] %vm533_vm1, %v1358_v0 }
 0x300   :  { %1373 = vst.msk [vmem:[%s2381_s4 + $0x70] sm:$0xff] %vm533_vm1, %v1357_v32 }

// kernel: gan_middle_forward.6
= control target key start
LH: loop header
LB: loop body
LE: loop exit
PB: predicated region body
PF: predicated region fallthrough
CT: control target
= control target key end

     0   :  { %v1814_v3 = vmov 0   ;;  %s1815_s9 = smov 8   ;;  %s1816_s26 = smov 24   ;;  %v1817_v26 = vmov 0.0|0.0   ;;  %vm115_vm0 = vcmask 64512   ;;  %vm180_vm1 = vcmask 1040384   ;;  %s3032_s0 = inlined_call_operand.vmem [shape: f32[2,8,8,16], index: 0, kind: input, shape index: {}]   ;;  %s3033_s1 = inlined_call_operand.vmem [shape: f32[2,1,1,8], index: 1, kind: input, shape index: {}]   ;;  %s3034_s2 = inlined_call_operand.vmem [shape: bf16[216,32], index: 2, kind: input, shape index: {}]   ;;  %s3035_s3 = inlined_call_operand.vmem [shape: f32[1,32], index: 3, kind: input, shape index: {}]   ;;  %s3036_s4 = inlined_call_operand.vmem [shape: f32[1,32], index: 4, kind: input, shape index: {}]   ;;  %s3037_s5 = inlined_call_operand.vmem [shape: f32[2,8,8,16], index: 5, kind: output, shape index: {}]  }
   0x1   :  { %v21_v0 = vld [vmem:[%s3032_s0] sm:$0xff]  ;;  %v22_v1 = vld [vmem:[%s3032_s0 + $0x8] sm:$0xff]  ;;  %v23_v2 = vld [vmem:[%s3032_s0 + $0x10] sm:$0xff]  ;;  %1157 = vmatprep.subr.bf16.mxu0 %v1814_v3  ;;  %1654 = vmatprep.subr.bf16.mxu1 %v1814_v3  ;;  %v1907_v25 = vrot.slane %v1814_v3, 1  ;;  %v1912_v27 = vrot.slane %v1817_v26, 1  ;;  %s1818_s27 = smov 48  }
   0x2   :  { %v1694_v4 = vpack.i.bf16 %v22_v1, %v21_v0  ;;  %v24_v5 = vld [vmem:[%s3032_s0 + $0x18] sm:$0xff]  ;;  %v25_v6 = vld [vmem:[%s3032_s0 + $0x20] sm:$0xff]  ;;  %v26_v9 = vld [vmem:[%s3032_s0 + $0x28] sm:$0xff]  ;;  %s1819_s29 = smov 16   ;;  %s1820_s30 = smov 72   ;;  %vm1153_vm2 = vcmask 1043456  }
   0x3   :  { %v29_v7 = vld [vmem:[%s3032_s0 + $0x40] sm:$0xff]  ;;  %v27_v10 = vld [vmem:[%s3032_s0 + $0x30] sm:$0xff]  ;;  %v1699_v11 = vpack.i.bf16 %v24_v5, %v23_v2  ;;  %v30_v13 = vld [vmem:[%s3032_s0 + $0x48] sm:$0xff]  ;;  %s1821_s15 = smov 120   ;;  %s1822_s18 = smov 64   ;;  %vm661_vm3 = vcmask 195584  }
   0x4   :  { %v1704_v8 = vpack.i.bf16 %v29_v7, %v25_v6  ;;  %1695 = vrot.lane.b32.xlu0 %v1694_v4, %s1815_s9  ;;  %v1709_v12 = vpack.i.bf16 %v27_v10, %v26_v9  ;;  %v31_v14 = vld [vmem:[%s3032_s0 + $0x50] sm:$0xff]  ;;  %v28_v15 = vld [vmem:[%s3032_s0 + $0x38] sm:$0xff]  ;;  %v33_v18 = vld [vmem:[%s3032_s0 + $0x60] sm:$0xff]  ;;  %s1823_s8 = smov 40   ;;  %s1824_s11 = smov 96   ;;  %vm836_vm4 = vcmask 130048  }
   0x5   :  { %v32_v16 = vld [vmem:[%s3032_s0 + $0x58] sm:$0xff]  ;;  %v1714_v17 = vpack.i.bf16 %v31_v14, %v30_v13  ;;  %v34_v19 = vld [vmem:[%s3032_s0 + $0x68] sm:$0xff]  ;;  %v35_v21 = vld [vmem:[%s3032_s0 + $0x70] sm:$0xff]  ;;  %vm868_vm5 = vcmask 326656   ;;  %vm706_vm6 = vcmask 392192   ;;  %vm737_vm7 = vcmask 588800  }
   0x6   :  { %1705 = vrot.lane.b32.xlu1 %v1704_v8, %s1815_s9  ;;  %v1719_v20 = vpack.i.bf16 %v32_v16, %v28_v15  ;;  %v36_v22 = vld [vmem:[%s3032_s0 + $0x78] sm:$0xff]  ;;  %v1724_v23 = vpack.i.bf16 %v34_v19, %v33_v18  ;;  %v1919_v29 = vld [vmem:[%s3033_s1] ss:$0 sm:$0xff]  ;;  %v1996_v63 = vld [vmem:[%s3033_s1 + $0x1] ss:$0 sm:$0xff]  ;;  %vm900_vm8 = vcmask 523264  }
   0x7   :  { %v1729_v24 = vpack.i.bf16 %v36_v22, %v35_v21  ;;  %vm770_vm9 = vcmask 785408   ;;  %vm1128_vm10 = vcmask 719872   ;;  %vm803_vm11 = vcmask 982016  }
   0x8   :  { %1700 = vrot.lane.b32.xlu0 %v1699_v11, %s1815_s9  ;;  %vm1254_vm12 = vcmask 261120  }
   0xa   :  { %1710 = vrot.lane.b32.xlu1 %v1709_v12, %s1815_s9 }
   0xc   :  { %1715 = vrot.lane.b32.xlu0 %v1714_v17, %s1815_s9 }
   0xe   :  { %1720 = vrot.lane.b32.xlu1 %v1719_v20, %s1815_s9 }
  0x10   :  { %1725 = vrot.lane.b32.xlu0 %v1724_v23, %s1815_s9 }
  0x12   :  { %1730 = vrot.lane.b32.xlu1 %v1729_v24, %s1815_s9 }
  0x14   :  { %351 = vrot.lane.b32.xlu0 %v1907_v25, %s1816_s26 }
  0x18   :  { %411 = vrot.lane.b32.xlu0 %v1912_v27, %s1818_s27 }
  0x76   :  { %v1696_v28 = vpop.permute.xlu0 %1695 }
  0x77   :  { %v1698_v30 = vunpack.i.h.bf16 %v1696_v28  ;;  %v1697_v31 = vunpack.i.l.bf16 %v1696_v28 }
  0x78   :  { %v1921_v32 = vpop.permute.xlu1 %1705 }
  0x79   :  { %v1925_v33 = vsel %vm115_vm0, %v1919_v29, %v1698_v30  ;;  %v1929_v34 = vsel %vm115_vm0, %v1919_v29, %v1697_v31  ;;  %v1707_v40 = vunpack.i.l.bf16 %v1921_v32  ;;  %v1708_v16 = vunpack.i.h.bf16 %v1921_v32 }
  0x7a   :  { %v1701_v35 = vpop.permute.xlu0 %1700  ;;  %v149_v36 = vrot.slane %v1925_v33, 7  ;;  %v148_v37 = vrot.slane %v1929_v34, 7 }
  0x7b   :  { %v1703_v38 = vunpack.i.h.bf16 %v1701_v35  ;;  %v1702_v39 = vunpack.i.l.bf16 %v1701_v35  ;;  %v1961_v51 = vsel %vm115_vm0, %v1919_v29, %v1707_v40  ;;  %v2062_v22 = vsel %vm115_vm0, %v1996_v63, %v1708_v16 }
  0x7c   :  { %v1711_v41 = vpop.permute.xlu1 %1710  ;;  %v1937_v42 = vsel %vm180_vm1, 0.0, %v149_v36  ;;  %v1951_v46 = vsel %vm180_vm1, 0.0, %v148_v37  ;;  %v152_v59 = vrot.slane %v1961_v51, 7  ;;  %v156_v24 = vrot.slane %v2062_v22, 7  ;;  %v1743_v22 = vld [vmem:[%s3034_s2 + $0x48] sm:$0xff]  }
  0x7d   :  { %v1941_v43 = vpack.c.bf16 %v1937_v42, %v1937_v42  ;;  %v1945_v44 = vsel %vm115_vm0, %v1919_v29, %v1702_v39  ;;  %v1713_v47 = vunpack.i.h.bf16 %v1711_v41  ;;  %v1712_v48 = vunpack.i.l.bf16 %v1711_v41 }
  0x7e   :  { %v150_v45 = vrot.slane %v1945_v44, 7  ;;  %v1716_v49 = vpop.permute.xlu0 %1715  ;;  %v1957_v50 = vsel %vm115_vm0, %v1919_v29, %v1703_v38  ;;  %v1975_v56 = vpack.c.bf16 %v1951_v46, %v1951_v46  ;;  %v2014_v7 = vsel %vm180_vm1, 0.0, %v152_v59  ;;  %v1734_v38 = vld [vmem:[%s3034_s2] sm:$0xff]  }
  0x7f   :  { %571 = vrot.lane.b32.xlu0 %v1941_v43, %s1819_s29  ;;  %v151_v53 = vrot.slane %v1957_v50, 7  ;;  %v1718_v54 = vunpack.i.h.bf16 %v1716_v49  ;;  %v1717_v57 = vunpack.i.l.bf16 %v1716_v49  ;;  %v1985_v60 = vsel %vm115_vm0, %v1919_v29, %v1712_v48  ;;  %1158 = vmatpush1.bf16.msra.mxu0 %v1734_v38 }
  0x80   :  { %v1966_v52 = vsel %vm180_vm1, 0.0, %v150_v45  ;;  %v122_v61 = vsel %vm115_vm0, %v1919_v29, %v1713_v47  ;;  %v153_v0 = vrot.slane %v1985_v60, 7  ;;  %v2024_v9 = vpack.c.bf16 %v2014_v7, %v2014_v7  ;;  %v1721_v19 = vpop.permute.xlu1 %1720  ;;  %v1735_v47 = vld [vmem:[%s3034_s2 + $0x8] sm:$0xff]   ;;  %1668 = vmatpush1.bf16.msra.mxu1 %v1734_v38  ;;  %1159 = vmatprep.subr.bf16.mxu0 %v1814_v3  ;;  %v1745_v60 = vld [vmem:[%s3034_s2 + $0x58] sm:$0xff]  }
  0x81   :  { %v1971_v55 = vpack.c.bf16 %v1966_v52, %v1966_v52  ;;  %v1980_v58 = vsel %vm180_vm1, 0.0, %v151_v53  ;;  %v154_v62 = vrot.slane %v122_v61, 7  ;;  %v126_v1 = vsel %vm115_vm0, %v1996_v63, %v1718_v54  ;;  %1655 = vmatprep.subr.bf16.mxu1 %v1814_v3 }
  0x82   :  { %v2003_v2 = vpack.c.bf16 %v1980_v58, %v1980_v58  ;;  %v2009_v6 = vsel %vm115_vm0, %v1996_v63, %v1717_v57  ;;  %v158_v10 = vrot.slane %v126_v1, 7  ;;  %v2029_v11 = vsel %vm180_vm1, 0.0, %v153_v0  ;;  %v1726_v23 = vpop.permute.xlu0 %1725 }
  0x83   :  { %573 = vrot.lane.b32.xlu1 %v1971_v55, %s1819_s29  ;;  %457 = vrot.lane.b32.xlu0 %v1975_v56, %s1820_s30  ;;  %v187_v4 = vsel %vm180_vm1, 0.0, %v154_v62  ;;  %v203_v5 = vsel %vm180_vm1, %v154_v62, 0.0  ;;  %v157_v12 = vrot.slane %v2009_v6, 7  ;;  %v2043_v17 = vpack.c.bf16 %v2029_v11, %v2029_v11  ;;  %v1746_v6 = vld [vmem:[%s3034_s2 + $0x60] sm:$0xff]  }
  0x84   :  { %v2016_v8 = vpack.c.bf16 %v203_v5, %v187_v4  ;;  %v191_v13 = vsel %vm180_vm1, 0.0, %v158_v10  ;;  %v207_v14 = vsel %vm180_vm1, %v158_v10, 0.0  ;;  %v2054_v20 = vpack.c.bf16 %v187_v4, %v187_v4  ;;  %v1731_v35 = vpop.permute.xlu1 %1730  ;;  %1160 = vmatpush1.bf16.msra.mxu0 %v1735_v47  ;;  %1669 = vmatpush1.bf16.msra.mxu1 %v1735_v47  ;;  %v1737_v47 = vld [vmem:[%s3034_s2 + $0x18] sm:$0xff]  }
  0x85   :  { %v2034_v15 = vpack.c.bf16 %v207_v14, %v191_v13  ;;  %3043 = vst [vmem:[#allocation2_spill] sm:$0xff] %v2043_v17  ;;  %v2048_v18 = vsel %vm180_vm1, 0.0, %v157_v12  ;;  %v1728_v28 = vunpack.i.h.bf16 %v1726_v23  ;;  %v197_v30 = vsel %vm180_vm1, %v148_v37, 0.0  ;;  %1161 = vmatprep.subr.bf16.mxu0 %v1814_v3  ;;  %1656 = vmatprep.subr.bf16.mxu1 %v1814_v3 }
  0x86   :  { %3044 = vst [vmem:[#allocation3_spill] sm:$0xff] %v2054_v20  ;;  %v2058_v21 = vpack.c.bf16 %v2048_v18, %v2048_v18  ;;  %v2072_v31 = vpack.c.bf16 %v191_v13, %v191_v13  ;;  %v1723_v34 = vunpack.i.h.bf16 %v1721_v19  ;;  %v1722_v40 = vunpack.i.l.bf16 %v1721_v19  ;;  %v1736_v13 = vld [vmem:[%s3034_s2 + $0x10] sm:$0xff]  }
  0x87   :  { %459 = vrot.lane.b32.xlu1 %v1941_v43, %s1820_s30  ;;  %575 = vrot.lane.b32.xlu0 %v2003_v2, %s1819_s29  ;;  %v129_v32 = vsel %vm115_vm0, %v1996_v63, %v1728_v28  ;;  %v2080_v37 = vpack.c.bf16 %v197_v30, %v1951_v46  ;;  %v2085_v41 = vsel %vm180_vm1, 0.0, %v156_v24  ;;  %v1727_v48 = vunpack.i.l.bf16 %v1726_v23 }
  0x88   :  { %3045 = vst [vmem:[#allocation4_spill] sm:$0xff] %v2058_v21  ;;  %3046 = vst [vmem:[#allocation5_spill] sm:$0xff] %v2072_v31  ;;  %v161_v39 = vrot.slane %v129_v32, 7  ;;  %v1733_v49 = vunpack.i.h.bf16 %v1731_v35  ;;  %v1732_v54 = vunpack.i.l.bf16 %v1731_v35  ;;  %v198_v57 = vsel %vm180_vm1, %v149_v36, 0.0  ;;  %1162 = vmatpush1.bf16.msra.mxu0 %v1736_v13  ;;  %1670 = vmatpush1.bf16.msra.mxu1 %v1736_v13  ;;  %v1741_v13 = vld [vmem:[%s3034_s2 + $0x38] sm:$0xff]  }
  0x89   :  { %v2100_v61 = vpack.c.bf16 %v2085_v41, %v2085_v41  ;;  %v123_v4 = vsel %vm115_vm0, %v1919_v29, %v1722_v40  ;;  %v127_v33 = vsel %vm115_vm0, %v1996_v63, %v1723_v34  ;;  %v397_v29 = vrot.slane %v2080_v37, 1  ;;  %1163 = vmatprep.subr.bf16.mxu0 %v1814_v3  ;;  %1657 = vmatprep.subr.bf16.mxu1 %v1814_v3 }
  0x8a   :  { %v210_v46 = vsel %vm180_vm1, %v161_v39, 0.0  ;;  %v131_v62 = vsel %vm115_vm0, %v1996_v63, %v1733_v49  ;;  %v130_v1 = vsel %vm115_vm0, %v1996_v63, %v1732_v54  ;;  %v155_v10 = vrot.slane %v123_v4, 7 }
  0x8b   :  { %577 = vrot.lane.b32.xlu1 %v2024_v9, %s1819_s29  ;;  %461 = vrot.lane.b32.xlu0 %v1971_v55, %s1820_s30  ;;  %v163_v36 = vrot.slane %v131_v62, 7  ;;  %v162_v5 = vrot.slane %v130_v1, 7  ;;  %v159_v14 = vrot.slane %v127_v33, 7  ;;  %v128_v16 = vsel %vm115_vm0, %v1996_v63, %v1727_v48  ;;  %v1739_v33 = vld [vmem:[%s3034_s2 + $0x28] sm:$0xff]  }
  0x8c   :  { %v2125_v28 = vsel %vm180_vm1, 0.0, %v155_v10  ;;  %v204_v30 = vsel %vm180_vm1, %v155_v10, 0.0  ;;  %v2131_v32 = vpack.c.bf16 %v198_v57, %v1937_v42  ;;  %v160_v40 = vrot.slane %v128_v16, 7  ;;  %1164 = vmatpush1.bf16.msra.mxu0 %v1737_v47  ;;  %1671 = vmatpush1.bf16.msra.mxu1 %v1737_v47 }
  0x8d   :  { %v212_v19 = vsel %vm180_vm1, %v163_v36, 0.0  ;;  %v211_v23 = vsel %vm180_vm1, %v162_v5, 0.0  ;;  %v2134_v35 = vpack.c.bf16 %v204_v30, %v2125_v28  ;;  %v2137_v63 = vsel %vm180_vm1, 0.0, %v159_v14  ;;  %1165 = vmatprep.subr.bf16.mxu0 %v1814_v3  ;;  %1658 = vmatprep.subr.bf16.mxu1 %v1814_v3  ;;  %v1744_v30 = vld [vmem:[%s3034_s2 + $0x50] sm:$0xff]  }
  0x8e   :  { %v208_v38 = vsel %vm180_vm1, %v159_v14, 0.0  ;;  %v2150_v42 = vsel %vm180_vm1, 0.0, %v161_v39  ;;  %v2153_v48 = vsel %vm180_vm1, 0.0, %v160_v40  ;;  %v209_v49 = vsel %vm180_vm1, %v160_v40, 0.0  ;;  %v1738_v39 = vld [vmem:[%s3034_s2 + $0x20] sm:$0xff]  }
  0x8f   :  { %463 = vrot.lane.b32.xlu1 %v2003_v2, %s1820_s30  ;;  %579 = vrot.lane.b32.xlu0 %v2043_v17, %s1819_s29  ;;  %v2141_v34 = vpack.c.bf16 %v208_v38, %v2137_v63  ;;  %v199_v54 = vsel %vm180_vm1, %v150_v45, 0.0  ;;  %v398_v57 = vrot.slane %v2131_v32, 1  ;;  %v2163_v62 = vpack.c.bf16 %v209_v49, %v2153_v48 }
  0x90   :  { %v2169_v1 = vpack.c.bf16 %v210_v46, %v2150_v42  ;;  %v2176_v44 = vpack.c.bf16 %v199_v54, %v1966_v52  ;;  %v2179_v45 = vsel %vm180_vm1, 0.0, %v162_v5  ;;  %v2182_v4 = vsel %vm180_vm1, 0.0, %v163_v36  ;;  %1166 = vmatpush1.bf16.msra.mxu0 %v1738_v39  ;;  %1672 = vmatpush1.bf16.msra.mxu1 %v1738_v39  ;;  %v1740_v36 = vld [vmem:[%s3034_s2 + $0x30] sm:$0xff]  }
  0x91   :  { %v200_v46 = vsel %vm180_vm1, %v151_v53, 0.0  ;;  %v2191_v10 = vpack.c.bf16 %v211_v23, %v2179_v45  ;;  %v2196_v52 = vpack.c.bf16 %v212_v19, %v2182_v4  ;;  %1167 = vmatprep.subr.bf16.mxu0 %v1814_v3  ;;  %1659 = vmatprep.subr.bf16.mxu1 %v1814_v3  ;;  %v201_v5 = vsel %vm180_vm1, %v152_v59, 0.0  ;;  %v1742_v59 = vld [vmem:[%s3034_s2 + $0x40] sm:$0xff]  }
  0x92   :  { %v2201_v50 = vpack.c.bf16 %v200_v46, %v1980_v58  ;;  %v399_v53 = vrot.slane %v2176_v44, 1  ;;  %v263_v14 = vshll.u32 %v2131_v32, 16  ;;  %v256_v23 = vshll.u32 %v2080_v37, 16 }
  0x93   :  { %581 = vrot.lane.b32.xlu1 %v2054_v20, %s1819_s29  ;;  %587 = vrot.lane.b32.xlu0 %v2058_v21, %s1819_s29  ;;  %v202_v38 = vsel %vm180_vm1, %v153_v0, 0.0  ;;  %v206_v0 = vsel %vm180_vm1, %v157_v12, 0.0  ;;  %v270_v46 = vshll.u32 %v2176_v44, 16 }
  0x94   :  { %1168 = vmatpush1.bf16.msra.mxu0 %v1739_v33  ;;  %1673 = vmatpush1.bf16.msra.mxu1 %v1739_v33  ;;  %v400_v58 = vrot.slane %v2201_v50, 1  ;;  %v265_v19 = vrot.slane %v263_v14, 1  ;;  %v258_v47 = vrot.slane %v256_v23, 1  ;;  %v233_v49 = vpack.c.bf16 %v202_v38, %v2029_v11  ;;  %v1747_v33 = vld [vmem:[%s3034_s2 + $0x68] ss:$0 sps:$4 sm:$0xff]  }
  0x95   :  { %1169 = vmatprep.subr.bf16.mxu0 %v1814_v3  ;;  %1660 = vmatprep.subr.bf16.mxu1 %v1814_v3 }
  0x96   :  { %v2272_v11 = vrot.slane %v233_v49, 1 }
  0x97   :  { %589 = vrot.lane.b32.xlu1 %v2072_v31, %s1819_s29  ;;  %465 = vrot.lane.b32.xlu0 %v2024_v9, %s1820_s30 }
  0x98   :  { %1170 = vmatpush1.bf16.msra.mxu0 %v1740_v36  ;;  %1674 = vmatpush1.bf16.msra.mxu1 %v1740_v36  ;;  %v272_v36 = vrot.slane %v270_v46, 1 }
  0x99   :  { %1171 = vmatprep.subr.bf16.mxu0 %v1814_v3  ;;  %1661 = vmatprep.subr.bf16.mxu1 %v1814_v3 }
  0x9b   :  { %467 = vrot.lane.b32.xlu1 %v2043_v17, %s1820_s30  ;;  %473 = vrot.lane.b32.xlu0 %v2100_v61, %s1820_s30  ;;  %v338_v17 = vshrl.u32 %v2169_v1, 16 }
  0x9c   :  { %1172 = vmatpush1.bf16.msra.mxu0 %v1741_v13  ;;  %1675 = vmatpush1.bf16.msra.mxu1 %v1741_v13 }
  0x9d   :  { %1173 = vmatprep.subr.bf16.mxu0 %v1814_v3  ;;  %1662 = vmatprep.subr.bf16.mxu1 %v1814_v3 }
  0x9f   :  { %475 = vrot.lane.b32.xlu1 %v2058_v21, %s1820_s30  ;;  %539 = vrot.lane.b32.xlu0 %v397_v29, %s1821_s15 }
  0xa0   :  { %1174 = vmatpush1.bf16.msra.mxu0 %v1742_v59  ;;  %1676 = vmatpush1.bf16.msra.mxu1 %v1742_v59 }
  0xa1   :  { %1175 = vmatprep.subr.bf16.mxu0 %v1814_v3  ;;  %1663 = vmatprep.subr.bf16.mxu1 %v1814_v3 }
  0xa3   :  { %413 = vrot.lane.b32.xlu1 %v397_v29, %s1818_s27  ;;  %631 = vrot.lane.b32.xlu0 %v398_v57, %s1822_s18  ;;  %v2219_v29 = vpack.c.bf16 %v201_v5, %v2014_v7  ;;  %v205_v7 = vsel %vm180_vm1, %v156_v24, 0.0  ;;  %v1155_v5 = vsel %vm1153_vm2, %v1747_v33, 0  ;;  %v403_v33 = vrot.slane %v2016_v8, 1 }
  0xa4   :  { %v2238_v16 = vpack.c.bf16 %v205_v7, %v2085_v41  ;;  %1176 = vmatpush1.bf16.msra.mxu0 %v1743_v22  ;;  %1677 = vmatpush1.bf16.msra.mxu1 %v1743_v22  ;;  %v261_v41 = vshrl.u32 %v2131_v32, 16  ;;  %v254_v32 = vshrl.u32 %v2080_v37, 16  ;;  %v236_v37 = vpack.c.bf16 %v206_v0, %v2048_v18  ;;  %v2320_v0 = vpop.permute.xlu0 %351 }
  0xa5   :  { %v401_v51 = vrot.slane %v2219_v29, 1  ;;  %1177 = vmatprep.subr.bf16.mxu0 %v1814_v3  ;;  %1664 = vmatprep.subr.bf16.mxu1 %v1814_v3  ;;  %v275_v18 = vshrl.u32 %v2201_v50, 16  ;;  %v284_v59 = vshll.u32 %v2219_v29, 16  ;;  %v291_v7 = vshll.u32 %v233_v49, 16 }
  0xa6   :  { %v404_v24 = vrot.slane %v2238_v16, 1  ;;  %v266_v40 = vor.u32 %v265_v19, %v261_v41  ;;  %v259_v54 = vor.u32 %v258_v47, %v254_v32  ;;  %v2284_v12 = vrot.slane %v236_v37, 1 }
  0xa7   :  { %541 = vrot.lane.b32.xlu1 %v398_v57, %s1821_s15  ;;  %415 = vrot.lane.b32.xlu0 %v398_v57, %s1818_s27  ;;  %v277_v57 = vshll.u32 %v2201_v50, 16  ;;  %v268_v50 = vshrl.u32 %v2176_v44, 16  ;;  %v305_v13 = vshll.u32 %v2238_v16, 16  ;;  %v282_v14 = vshrl.u32 %v2219_v29, 16 }
  0xa8   :  { %1178 = vmatpush1.bf16.msra.mxu0 %v1744_v30  ;;  %1678 = vmatpush1.bf16.msra.mxu1 %v1744_v30  ;;  %v289_v44 = vshrl.u32 %v233_v49, 16  ;;  %v293_v19 = vrot.slane %v291_v7, 1  ;;  %v312_v23 = vshll.u32 %v236_v37, 16  ;;  %v310_v30 = vshrl.u32 %v236_v37, 16 }
  0xa9   :  { %1179 = vmatprep.subr.bf16.mxu0 %v1814_v3  ;;  %1665 = vmatprep.subr.bf16.mxu1 %v1814_v3  ;;  %v279_v39 = vrot.slane %v277_v57, 1  ;;  %v298_v29 = vshll.u32 %v2016_v8, 16  ;;  %v296_v47 = vshrl.u32 %v2016_v8, 16  ;;  %v319_v32 = vshll.u32 %v2034_v15, 16 }
  0xaa   :  { %v294_v41 = vor.u32 %v293_v19, %v289_v44  ;;  %v314_v38 = vrot.slane %v312_v23, 1  ;;  %v2392_v44 = vpack.c.bf16 %v2137_v63, %v2137_v63  ;;  %v492_v19 = vshll.u32 %v2134_v35, 16 }
  0xab   :  { %633 = vrot.lane.b32.xlu1 %v399_v53, %s1822_s18  ;;  %543 = vrot.lane.b32.xlu0 %v399_v53, %s1821_s15  ;;  %v300_v49 = vrot.slane %v298_v29, 1  ;;  %v321_v57 = vrot.slane %v319_v32, 1  ;;  %v2422_v29 = vpack.c.bf16 %v2153_v48, %v2153_v48 }
  0xac   :  { %1180 = vmatpush1.bf16.msra.mxu0 %v1745_v60  ;;  %1679 = vmatpush1.bf16.msra.mxu1 %v1745_v60  ;;  %3047 = vst [vmem:[#allocation6_spill] sm:$0xff] %v2392_v44 }
  0xad   :  { %1181 = vmatprep.subr.bf16.mxu0 %v1814_v3  ;;  %1666 = vmatprep.subr.bf16.mxu1 %v1814_v3  ;;  %v2318_v60 = vor.u32 %v300_v49, %v296_v47 }
  0xaf   :  { %417 = vrot.lane.b32.xlu1 %v399_v53, %s1818_s27  ;;  %635 = vrot.lane.b32.xlu0 %v400_v58, %s1822_s18  ;;  %v280_v53 = vor.u32 %v279_v39, %v275_v18 }
  0xb0   :  { %1182 = vmatpush1.bf16.msra.mxu0 %v1746_v6  ;;  %1680 = vmatpush1.bf16.msra.mxu1 %v1746_v6  ;;  %v2332_v6 = vpop.permute.xlu0 %411 }
  0xb1   :  { %1183 = vmatprep.subr.bf16.mxu0 %v1814_v3  ;;  %1667 = vmatprep.subr.bf16.mxu1 %v1814_v3  ;;  %v303_v3 = vshrl.u32 %v2238_v16, 16 }
  0xb3   :  { %545 = vrot.lane.b32.xlu1 %v400_v58, %s1821_s15  ;;  %421 = vrot.lane.b32.xlu0 %v401_v51, %s1818_s27 }
  0xb4   :  { %1184 = vmatpush1.bf16.msra.mxu0 %v1155_v5  ;;  %1681 = vmatpush1.bf16.msra.mxu1 %v1155_v5  ;;  %v406_v5 = vrot.slane %v2034_v15, 1 }
  0xb7   :  { %637 = vrot.lane.b32.xlu1 %v401_v51, %s1822_s18  ;;  %547 = vrot.lane.b32.xlu0 %v401_v51, %s1821_s15  ;;  %v307_v51 = vrot.slane %v305_v13, 1 }
  0xb9   :  { %v308_v22 = vor.u32 %v307_v51, %v303_v3  ;;  %v242_v51 = vpack.c.bf16 %v2125_v28, %v2125_v28 }
  0xbb   :  { %419 = vrot.lane.b32.xlu1 %v400_v58, %s1818_s27  ;;  %555 = vrot.lane.b32.xlu0 %v404_v24, %s1821_s15  ;;  %v273_v58 = vor.u32 %v272_v36, %v268_v50 }
  0xbf   :  { %427 = vrot.lane.b32.xlu1 %v404_v24, %s1818_s27  ;;  %601 = vrot.lane.b32.xlu0 %v266_v40, %s1823_s8  ;;  %v286_v24 = vrot.slane %v284_v59, 1 }
  0xc1   :  { %v287_v16 = vor.u32 %v286_v24, %v282_v14  ;;  %v537_v14 = vrot.slane %v2134_v35, 1  ;;  %v407_v24 = vrot.slane %v2141_v34, 1 }
  0xc3   :  { %549 = vrot.lane.b32.xlu1 %v2272_v11, %s1821_s15  ;;  %503 = vrot.lane.b32.xlu0 %v259_v54, %s1824_s11 }
  0xc7   :  { %557 = vrot.lane.b32.xlu1 %v2284_v12, %s1821_s15  ;;  %355 = vrot.lane.b32.xlu0 %v266_v40, %s1816_s26 }
  0xcb   :  { %353 = vrot.lane.b32.xlu1 %v259_v54, %s1816_s26  ;;  %605 = vrot.lane.b32.xlu0 %v280_v53, %s1823_s8  ;;  %v317_v54 = vshrl.u32 %v2034_v15, 16 }
  0xcd   :  { %v2326_v37 = vor.u32 %v321_v57, %v317_v54 }
  0xcf   :  { %603 = vrot.lane.b32.xlu1 %v273_v58, %s1823_s8  ;;  %507 = vrot.lane.b32.xlu0 %v273_v58, %s1824_s11 }
  0xd3   :  { %505 = vrot.lane.b32.xlu1 %v266_v40, %s1824_s11  ;;  %359 = vrot.lane.b32.xlu0 %v280_v53, %s1816_s26  ;;  %v315_v40 = vor.u32 %v314_v38, %v310_v30  ;;  %v326_v30 = vshll.u32 %v2141_v34, 16 }
  0xd5   :  { %v328_v49 = vrot.slane %v326_v30, 1 }
  0xd7   :  { %357 = vrot.lane.b32.xlu1 %v273_v58, %s1816_s26  ;;  %367 = vrot.lane.b32.xlu0 %v308_v22, %s1816_s26 }
  0xdb   :  { %607 = vrot.lane.b32.xlu1 %v287_v16, %s1823_s8  ;;  %609 = vrot.lane.b32.xlu0 %v294_v41, %s1823_s8 }
  0xdf   :  { %509 = vrot.lane.b32.xlu1 %v280_v53, %s1824_s11  ;;  %617 = vrot.lane.b32.xlu0 %v315_v40, %s1823_s8 }
  0xe3   :  { %361 = vrot.lane.b32.xlu1 %v287_v16, %s1816_s26  ;;  %511 = vrot.lane.b32.xlu0 %v287_v16, %s1824_s11  ;;  %v490_v16 = vshrl.u32 %v2134_v35, 16  ;;  %v324_v35 = vshrl.u32 %v2141_v34, 16  ;;  %v333_v34 = vshll.u32 %v2163_v62, 16 }
  0xe5   :  { %v329_v54 = vor.u32 %v328_v49, %v324_v35 }
  0xe7   :  { %611 = vrot.lane.b32.xlu1 %v2318_v60, %s1823_s8  ;;  %519 = vrot.lane.b32.xlu0 %v308_v22, %s1824_s11 }
  0xeb   :  { %619 = vrot.lane.b32.xlu1 %v2326_v37, %s1823_s8  ;;  %639 = vrot.lane.b32.xlu0 %v2272_v11, %s1822_s18 }
  0xef   :  { %513 = vrot.lane.b32.xlu1 %v294_v41, %s1824_s11  ;;  %647 = vrot.lane.b32.xlu0 %v2284_v12, %s1822_s18 }
  0xf1   :  { %v2337_v39 = vpop.permute.xlu0 %571 }
  0xf3   :  { %521 = vrot.lane.b32.xlu1 %v315_v40, %s1824_s11  ;;  %363 = vrot.lane.b32.xlu0 %v294_v41, %s1816_s26  ;;  %v494_v41 = vrot.slane %v492_v19, 1  ;;  %v335_v19 = vrot.slane %v333_v34, 1 }
  0xf5   :  { %v2341_v46 = vpop.permute.xlu1 %573  ;;  %v2343_v18 = vpop.permute.xlu0 %457  ;;  %v495_v47 = vor.u32 %v494_v41, %v490_v16 }
  0xf7   :  { %641 = vrot.lane.b32.xlu1 %v403_v33, %s1822_s18  ;;  %369 = vrot.lane.b32.xlu0 %v315_v40, %s1816_s26 }
  0xf9   :  { %v2348_v53 = vpop.permute.xlu1 %459  ;;  %v2350_v36 = vpop.permute.xlu0 %575 }
  0xfb   :  { %649 = vrot.lane.b32.xlu1 %v406_v5, %s1822_s18  ;;  %423 = vrot.lane.b32.xlu0 %v2272_v11, %s1818_s27 }
  0xfd   :  { %v2356_v50 = vpop.permute.xlu1 %577  ;;  %v2358_v58 = vpop.permute.xlu0 %461 }
  0xff   :  { %365 = vrot.lane.b32.xlu1 %v2318_v60, %s1816_s26  ;;  %429 = vrot.lane.b32.xlu0 %v2284_v12, %s1818_s27 }
 0x101   :  { %v2364_v8 = vpop.permute.xlu1 %463  ;;  %v2366_v13 = vpop.permute.xlu0 %579 }
 0x103   :  { %371 = vrot.lane.b32.xlu1 %v2326_v37, %s1816_s26  ;;  %551 = vrot.lane.b32.xlu0 %v403_v33, %s1821_s15 }
 0x105   :  { %v2371_v15 = vpop.permute.xlu1 %581  ;;  %v2373_v11 = vpop.permute.xlu0 %587 }
 0x107   :  { %425 = vrot.lane.b32.xlu1 %v403_v33, %s1818_s27  ;;  %559 = vrot.lane.b32.xlu0 %v406_v5, %s1821_s15 }
 0x109   :  { %v2377_v3 = vpop.permute.xlu1 %589  ;;  %v2379_v12 = vpop.permute.xlu0 %465 }
 0x10b   :  { %431 = vrot.lane.b32.xlu1 %v406_v5, %s1818_s27  ;;  %583 = vrot.lane.b32.xlu0 %v242_v51, %s1819_s29 }
 0x10d   :  { %v2385_v59 = vpop.permute.xlu1 %467  ;;  %v2387_v7 = vpop.permute.xlu0 %473 }
 0x10f   :  { %553 = vrot.lane.b32.xlu1 %v537_v14, %s1821_s15  ;;  %591 = vrot.lane.b32.xlu0 %v2392_v44, %s1819_s29 }
 0x111   :  { %v2397_v28 = vpop.permute.xlu1 %475  ;;  %v2399_v22 = vpop.permute.xlu0 %539 }
 0x113   :  { %561 = vrot.lane.b32.xlu1 %v407_v24, %s1821_s15  ;;  %469 = vrot.lane.b32.xlu0 %v2054_v20, %s1820_s30 }
 0x115   :  { %v2406_v63 = vpop.permute.xlu1 %413  ;;  %v2408_v23 = vpop.permute.xlu0 %631 }
 0x117   :  { %585 = vrot.lane.b32.xlu1 %v1817_v26, %s1819_s29  ;;  %477 = vrot.lane.b32.xlu0 %v2072_v31, %s1820_s30 }
 0x119   :  { %v2416_v38 = vpop.permute.xlu1 %541  ;;  %v2418_v40 = vpop.permute.xlu0 %415 }
 0x11b   :  { %593 = vrot.lane.b32.xlu1 %v2422_v29, %s1819_s29  ;;  %613 = vrot.lane.b32.xlu0 %v495_v47, %s1823_s8 }
 0x11d   :  { %v2428_v26 = vpop.permute.xlu1 %633  ;;  %v2430_v32 = vpop.permute.xlu0 %543 }
 0x11f   :  { %471 = vrot.lane.b32.xlu1 %v242_v51, %s1820_s30  ;;  %621 = vrot.lane.b32.xlu0 %v329_v54, %s1823_s8  ;;  %v331_v51 = vshrl.u32 %v2163_v62, 16 }
 0x121   :  { %v2434_v48 = vpop.permute.xlu1 %417  ;;  %v2436_v57 = vpop.permute.xlu0 %635  ;;  %v2456_v30 = vor.u32 %v335_v19, %v331_v51  ;;  %v408_v51 = vrot.slane %v2163_v62, 1  ;;  %v838_v62 = vsel %vm836_vm4, %v2399_v22, %v2337_v39 }
 0x123   :  { %479 = vrot.lane.b32.xlu1 %v2392_v44, %s1820_s30  ;;  %515 = vrot.lane.b32.xlu0 %v2318_v60, %s1824_s11  ;;  %v2483_v44 = vpack.c.bf16 %v2150_v42, %v2150_v42 }
 0x125   :  { %v2443_v33 = vpop.permute.xlu1 %545  ;;  %v2445_v5 = vpop.permute.xlu0 %421 }
 0x127   :  { %615 = vrot.lane.b32.xlu1 %v1907_v25, %s1823_s8  ;;  %523 = vrot.lane.b32.xlu0 %v2326_v37, %s1824_s11 }
 0x129   :  { %v2452_v16 = vpop.permute.xlu1 %637  ;;  %v2454_v41 = vpop.permute.xlu0 %547 }
 0x12b   :  { %623 = vrot.lane.b32.xlu1 %v2456_v30, %s1823_s8  ;;  %643 = vrot.lane.b32.xlu0 %v537_v14, %s1822_s18 }
 0x12d   :  { %v2461_v60 = vpop.permute.xlu1 %419  ;;  %v2463_v35 = vpop.permute.xlu0 %555 }
 0x12f   :  { %517 = vrot.lane.b32.xlu1 %v495_v47, %s1824_s11  ;;  %651 = vrot.lane.b32.xlu0 %v407_v24, %s1822_s18 }
 0x131   :  { %v2467_v25 = vpop.permute.xlu1 %427  ;;  %v602_v37 = vpop.permute.xlu0 %601 }
 0x132   :  { %v870_v42 = vsel %vm868_vm5, %v838_v62, %v602_v37 }
 0x133   :  { %525 = vrot.lane.b32.xlu1 %v329_v54, %s1824_s11  ;;  %373 = vrot.lane.b32.xlu0 %v329_v54, %s1816_s26 }
 0x135   :  { %v2471_v49 = vpop.permute.xlu1 %549  ;;  %v504_v34 = vpop.permute.xlu0 %503 }
 0x137   :  { %645 = vrot.lane.b32.xlu1 %v1912_v27, %s1822_s18  ;;  %433 = vrot.lane.b32.xlu0 %v407_v24, %s1818_s27  ;;  %v340_v27 = vshll.u32 %v2169_v1, 16  ;;  %v663_v24 = vsel %vm661_vm3, 0.0|0.0, %v2320_v0  ;;  %v840_v0 = vsel %vm836_vm4, %v2416_v38, %v2341_v46  ;;  %v902_v46 = vsel %vm900_vm8, %v870_v42, %v2408_v23 }
 0x138   :  { %v347_v42 = vshll.u32 %v2191_v10, 16 }
 0x139   :  { %v2476_v14 = vpop.permute.xlu1 %557  ;;  %v356_v47 = vpop.permute.xlu0 %355 }
 0x13b   :  { %653 = vrot.lane.b32.xlu1 %v408_v51, %s1822_s18  ;;  %563 = vrot.lane.b32.xlu0 %v408_v51, %s1821_s15 }
 0x13d   :  { %v354_v54 = vpop.permute.xlu1 %353  ;;  %v606_v19 = vpop.permute.xlu0 %605 }
 0x13e   :  { %v666_v31 = vsel %vm661_vm3, %v1975_v56, %v354_v54  ;;  %v342_v56 = vrot.slane %v340_v27, 1  ;;  %v2504_v54 = vsel %vm706_vm6, %v663_v24, %v2332_v6 }
 0x13f   :  { %375 = vrot.lane.b32.xlu1 %v2456_v30, %s1816_s26  ;;  %595 = vrot.lane.b32.xlu0 %v2483_v44, %s1819_s29  ;;  %v710_v20 = vsel %vm706_vm6, %v666_v31, %v2406_v63  ;;  %v739_v62 = vsel %vm737_vm7, %v2504_v54, %v2343_v18 }
 0x140   :  { %v772_v31 = vsel %vm770_vm9, %v739_v62, %v504_v34  ;;  %v741_v18 = vsel %vm737_vm7, %v710_v20, %v2348_v53  ;;  %v343_v24 = vor.u32 %v342_v56, %v338_v17  ;;  %v669_v53 = vsel %vm661_vm3, %v1941_v43, %v356_v47 }
 0x141   :  { %v604_v21 = vpop.permute.xlu1 %603  ;;  %v508_v39 = vpop.permute.xlu0 %507  ;;  %v805_v23 = vsel %vm803_vm11, %v772_v31, %v2399_v22  ;;  %v2537_v34 = vpack.c.bf16 %v2179_v45, %v2179_v45  ;;  %v842_v22 = vsel %vm836_vm4, %v2430_v32, %v2350_v36  ;;  %v712_v43 = vsel %vm706_vm6, %v669_v53, %v2418_v40 }
 0x142   :  { %v872_v37 = vsel %vm868_vm5, %v840_v0, %v604_v21  ;;  %v874_v45 = vsel %vm868_vm5, %v842_v22, %v606_v19  ;;  %v844_v47 = vsel %vm836_vm4, %v2443_v33, %v2356_v50  ;;  %v743_v19 = vsel %vm737_vm7, %v712_v43, %v2358_v58 }
 0x143   :  { %435 = vrot.lane.b32.xlu1 %v408_v51, %s1818_s27  ;;  %481 = vrot.lane.b32.xlu0 %v2422_v29, %s1820_s30  ;;  %v904_v6 = vsel %vm900_vm8, %v872_v37, %v2428_v26  ;;  %v409_v51 = vrot.slane %v2169_v1, 1  ;;  %v349_v37 = vrot.slane %v347_v42, 1  ;;  %v906_v40 = vsel %vm900_vm8, %v874_v45, %v2436_v57 }
 0x144   :  { %v1601_v21 = vcombine.low %v902_v46, %v904_v6  ;;  %v776_v46 = vsel %vm770_vm9, %v743_v19, %v508_v39  ;;  %v848_v43 = vsel %vm836_vm4, %v2471_v49, %v2371_v15 }
 0x145   :  { %v506_v63 = vpop.permute.xlu1 %505  ;;  %v2522_v27 = vpop.permute.xlu0 %359 }
 0x146   :  { %v774_v0 = vsel %vm770_vm9, %v741_v18, %v506_v63  ;;  %1630 = vmatprep.mubr.msk.bf16.mxu0 %vm1128_vm10, %v1601_v21 }
 0x147   :  { %v807_v26 = vsel %vm803_vm11, %v774_v0, %v2416_v38  ;;  %565 = vrot.lane.b32.xlu1 %v409_v51, %s1821_s15  ;;  %625 = vrot.lane.b32.xlu0 %v343_v24, %s1823_s8 }
 0x148   :  { %v1600_v20 = vcombine.low %v805_v23, %v807_v26  ;;  %v410_v26 = vrot.slane %v2191_v10, 1 }
 0x149   :  { %v358_v1 = vpop.permute.xlu1 %357  ;;  %v368_v17 = vpop.permute.xlu0 %367 }
 0x14a   :  { %1190 = vmatmul.mubr.bf16.vlgmr.msra.gmra.mrb[0].mxu0 %v1600_v20  ;;  %v672_v38 = vsel %vm661_vm3, %v1971_v55, %v358_v1  ;;  %v345_v55 = vshrl.u32 %v2191_v10, 16  ;;  %v243_v20 = vpack.c.bf16 %v2182_v4, %v2182_v4  ;;  %v675_v10 = vsel %vm661_vm3, %v2003_v2, %v2522_v27 }
 0x14b   :  { %597 = vrot.lane.b32.xlu1 %v2537_v34, %s1819_s29  ;;  %527 = vrot.lane.b32.xlu0 %v2456_v30, %s1824_s11  ;;  %v714_v62 = vsel %vm706_vm6, %v672_v38, %v2434_v48  ;;  %v687_v42 = vsel %vm661_vm3, %v2100_v61, %v368_v17  ;;  %v499_v4 = vshll.u32 %v2196_v52, 16 }
 0x14c   :  { %v745_v48 = vsel %vm737_vm7, %v714_v62, %v2364_v8  ;;  %v350_v57 = vor.u32 %v349_v37, %v345_v55  ;;  %v724_v61 = vsel %vm706_vm6, %v687_v42, %v2467_v25 }
 0x14d   :  { %v608_v56 = vpop.permute.xlu1 %607  ;;  %v2555_v36 = vpop.permute.xlu0 %609  ;;  %v501_v45 = vrot.slane %v499_v4, 1 }
 0x14e   :  { %v876_v30 = vsel %vm868_vm5, %v844_v47, %v608_v56 }
 0x14f   :  { %v908_v50 = vsel %vm900_vm8, %v876_v30, %v2452_v16  ;;  %483 = vrot.lane.b32.xlu1 %v2483_v44, %s1820_s30  ;;  %655 = vrot.lane.b32.xlu0 %v409_v51, %s1822_s18  ;;  %v809_v16 = vsel %vm803_vm11, %v776_v46, %v2430_v32 }
 0x150   :  { %v1603_v6 = vcombine.low %v906_v40, %v908_v50  ;;  %v856_v40 = vsel %vm836_vm4, %v2476_v14, %v2377_v3 }
 0x151   :  { %v510_v31 = vpop.permute.xlu1 %509  ;;  %v2573_v21 = vpop.permute.xlu0 %617 }
 0x152   :  { %v778_v58 = vsel %vm770_vm9, %v745_v48, %v510_v31  ;;  %1631 = vmatprep.mubr.msk.bf16.mxu0 %vm1128_vm10, %v1603_v6 }
 0x153   :  { %v811_v63 = vsel %vm803_vm11, %v778_v58, %v2443_v33  ;;  %627 = vrot.lane.b32.xlu1 %v350_v57, %s1823_s8  ;;  %377 = vrot.lane.b32.xlu0 %v343_v24, %s1816_s26 }
 0x154   :  { %v1602_v39 = vcombine.low %v809_v16, %v811_v63 }
 0x155   :  { %v362_v8 = vpop.permute.xlu1 %361  ;;  %v512_v18 = vpop.permute.xlu0 %511 }
 0x156   :  { %1198 = vmatmul.mubr.bf16.gmra.mrb[4].mxu0 %v1602_v39  ;;  %v678_v53 = vsel %vm661_vm3, %v2024_v9, %v362_v8  ;;  %v716_v9 = vsel %vm706_vm6, %v675_v10, %v2461_v60  ;;  %v497_v60 = vshrl.u32 %v2196_v52, 16 }
 0x157   :  { %529 = vrot.lane.b32.xlu1 %v343_v24, %s1824_s11  ;;  %437 = vrot.lane.b32.xlu0 %v409_v51, %s1818_s27  ;;  %v718_v1 = vsel %vm706_vm6, %v678_v53, %v2445_v5  ;;  %v538_v5 = vrot.slane %v2196_v52, 1  ;;  %v747_v38 = vsel %vm737_vm7, %v716_v9, %v2379_v12  ;;  %v757_v52 = vsel %vm737_vm7, %v724_v61, %v2397_v28 }
 0x158   :  { %v749_v2 = vsel %vm737_vm7, %v718_v1, %v2385_v59  ;;  %v846_v59 = vsel %vm836_vm4, %v2454_v41, %v2366_v13  ;;  %v780_v25 = vsel %vm770_vm9, %v747_v38, %v512_v18  ;;  %v854_v28 = vsel %vm836_vm4, %v2463_v35, %v2373_v11 }
 0x159   :  { %v612_v0 = vpop.permute.xlu1 %611  ;;  %v520_v23 = vpop.permute.xlu0 %519  ;;  %v878_v12 = vsel %vm868_vm5, %v846_v59, %v2555_v36  ;;  %v755_v36 = vsel %vm737_vm7, %v2504_v54, %v2387_v7  ;;  %v813_v30 = vsel %vm803_vm11, %v780_v25, %v2454_v41  ;;  %v886_v41 = vsel %vm868_vm5, %v854_v28, %v2573_v21  ;;  %v3049_v59 = vld [vmem:[#allocation2_spill] sm:$0xff] }
 0x15a   :  { %v880_v47 = vsel %vm868_vm5, %v848_v43, %v612_v0  ;;  %v788_v19 = vsel %vm770_vm9, %v755_v36, %v520_v23  ;;  %v502_v11 = vor.u32 %v501_v45, %v497_v60 }
 0x15b   :  { %657 = vrot.lane.b32.xlu1 %v410_v26, %s1822_s18  ;;  %567 = vrot.lane.b32.xlu0 %v410_v26, %s1821_s15  ;;  %v821_v31 = vsel %vm803_vm11, %v788_v19, %v2463_v35 }
 0x15d   :  { %v620_v32 = vpop.permute.xlu1 %619  ;;  %v640_v33 = vpop.permute.xlu0 %639 }
 0x15e   :  { %v910_v37 = vsel %vm900_vm8, %v878_v12, %v640_v33  ;;  %v888_v54 = vsel %vm868_vm5, %v856_v40, %v620_v32 }
 0x15f   :  { %379 = vrot.lane.b32.xlu1 %v350_v57, %s1816_s26  ;;  %599 = vrot.lane.b32.xlu0 %v243_v20, %s1819_s29 }
 0x161   :  { %v514_v51 = vpop.permute.xlu1 %513  ;;  %v648_v24 = vpop.permute.xlu0 %647 }
 0x162   :  { %v782_v17 = vsel %vm770_vm9, %v749_v2, %v514_v51  ;;  %v918_v48 = vsel %vm900_vm8, %v886_v41, %v648_v24 }
 0x163   :  { %439 = vrot.lane.b32.xlu1 %v410_v26, %s1818_s27  ;;  %487 = vrot.lane.b32.xlu0 %v243_v20, %s1820_s30  ;;  %v815_v56 = vsel %vm803_vm11, %v782_v17, %v2471_v49  ;;  %v3048_v17 = vld [vmem:[#allocation3_spill] sm:$0xff] }
 0x164   :  { %v1604_v7 = vcombine.low %v813_v30, %v815_v56 }
 0x165   :  { %v522_v27 = vpop.permute.xlu1 %521  ;;  %v2608_v22 = vpop.permute.xlu0 %363 }
 0x166   :  { %v790_v15 = vsel %vm770_vm9, %v757_v52, %v522_v27  ;;  %v681_v43 = vsel %vm661_vm3, %v3049_v59, %v2608_v22  ;;  %v3050_v52 = vld [vmem:[#allocation4_spill] sm:$0xff] }
 0x167   :  { %569 = vrot.lane.b32.xlu1 %v538_v5, %s1821_s15  ;;  %531 = vrot.lane.b32.xlu0 %v350_v57, %s1824_s11  ;;  %v823_v50 = vsel %vm803_vm11, %v790_v15, %v2476_v14 }
 0x168   :  { %v1608_v57 = vcombine.low %v821_v31, %v823_v50 }
 0x169   :  { %v642_v55 = vpop.permute.xlu1 %641  ;;  %v2633_v13 = vpop.permute.xlu0 %369 }
 0x16a   :  { %v912_v62 = vsel %vm900_vm8, %v880_v47, %v642_v55  ;;  %v690_v55 = vsel %vm661_vm3, %v3050_v52, %v2633_v13 }
 0x16b   :  { %v1605_v49 = vcombine.low %v910_v37, %v912_v62  ;;  %485 = vrot.lane.b32.xlu1 %v2537_v34, %s1820_s30  ;;  %659 = vrot.lane.b32.xlu0 %v538_v5, %s1822_s18  ;;  %v3051_v37 = vld [vmem:[#allocation5_spill] sm:$0xff] }
 0x16d   :  { %v650_v46 = vpop.permute.xlu1 %649  ;;  %v424_v6 = vpop.permute.xlu0 %423  ;;  %1632 = vmatprep.mubr.msk.bf16.mxu0 %vm1128_vm10, %v1605_v49 }
 0x16e   :  { %v920_v3 = vsel %vm900_vm8, %v888_v54, %v650_v46  ;;  %1206 = vmatmul.mubr.bf16.gmra.mrb[8].mxu0 %v1604_v7  ;;  %v720_v47 = vsel %vm706_vm6, %v681_v43, %v424_v6 }
 0x16f   :  { %629 = vrot.lane.b32.xlu1 %v502_v11, %s1823_s8  ;;  %v1609_v21 = vcombine.low %v918_v48, %v920_v3 }
 0x171   :  { %v366_v58 = vpop.permute.xlu1 %365  ;;  %1634 = vmatprep.mubr.msk.bf16.mxu1 %vm1128_vm10, %v1609_v21  ;;  %v430_v14 = vpop.permute.xlu0 %429 }
 0x172   :  { %1222 = vmatmul.mubr.bf16.vlgmr.msra.gmra.mrb[0].mxu1 %v1608_v57  ;;  %v684_v38 = vsel %vm661_vm3, %v3048_v17, %v366_v58  ;;  %v726_v54 = vsel %vm706_vm6, %v690_v55, %v430_v14 }
 0x173   :  { %533 = vrot.lane.b32.xlu1 %v502_v11, %s1824_s11 }
 0x175   :  { %v372_v16 = vpop.permute.xlu1 %371  ;;  %v552_v63 = vpop.permute.xlu0 %551 }
 0x176   :  { %v693_v15 = vsel %vm661_vm3, %v3051_v37, %v372_v16 }
 0x179   :  { %v426_v39 = vpop.permute.xlu1 %425  ;;  %v2666_v8 = vpop.permute.xlu0 %559 }
 0x17a   :  { %v722_v60 = vsel %vm706_vm6, %v684_v38, %v426_v39  ;;  %v3052_v38 = vld [vmem:[#allocation6_spill] sm:$0xff] }
 0x17d   :  { %v432_v18 = vpop.permute.xlu1 %431  ;;  %v584_v0 = vpop.permute.xlu0 %583 }
 0x17e   :  { %v728_v36 = vsel %vm706_vm6, %v693_v15, %v432_v18  ;;  %v850_v22 = vsel %vm836_vm4, %v552_v63, %v584_v0 }
 0x181   :  { %v554_v23 = vpop.permute.xlu1 %553  ;;  %v592_v35 = vpop.permute.xlu0 %591 }
 0x182   :  { %v858_v31 = vsel %vm836_vm4, %v2666_v8, %v592_v35 }
 0x185   :  { %v562_v26 = vpop.permute.xlu1 %561  ;;  %v470_v32 = vpop.permute.xlu0 %469 }
 0x186   :  { %v751_v62 = vsel %vm737_vm7, %v720_v47, %v470_v32 }
 0x189   :  { %v2668_v33 = vpop.permute.xlu1 %585  ;;  %v478_v20 = vpop.permute.xlu0 %477 }
 0x18a   :  { %v852_v30 = vsel %vm836_vm4, %v554_v23, %v2668_v33  ;;  %v759_v11 = vsel %vm737_vm7, %v726_v54, %v478_v20 }
 0x18d   :  { %v594_v53 = vpop.permute.xlu1 %593  ;;  %v614_v10 = vpop.permute.xlu0 %613 }
 0x18e   :  { %v882_v28 = vsel %vm868_vm5, %v850_v22, %v614_v10  ;;  %v860_v21 = vsel %vm836_vm4, %v562_v26, %v594_v53 }
 0x191   :  { %v472_v51 = vpop.permute.xlu1 %471  ;;  %v622_v24 = vpop.permute.xlu0 %621 }
 0x192   :  { %v753_v25 = vsel %vm737_vm7, %v722_v60, %v472_v51  ;;  %v890_v14 = vsel %vm868_vm5, %v858_v31, %v622_v24 }
 0x195   :  { %v480_v1 = vpop.permute.xlu1 %479  ;;  %v516_v42 = vpop.permute.xlu0 %515 }
 0x196   :  { %v784_v49 = vsel %vm770_vm9, %v751_v62, %v516_v42  ;;  %v761_v40 = vsel %vm737_vm7, %v728_v36, %v480_v1 }
 0x197   :  { %v817_v48 = vsel %vm803_vm11, %v784_v49, %v552_v63 }
 0x199   :  { %v2670_v9 = vpop.permute.xlu1 %615  ;;  %v524_v4 = vpop.permute.xlu0 %523 }
 0x19a   :  { %v884_v13 = vsel %vm868_vm5, %v852_v30, %v2670_v9  ;;  %v792_v57 = vsel %vm770_vm9, %v759_v11, %v524_v4 }
 0x19b   :  { %v825_v35 = vsel %vm803_vm11, %v792_v57, %v2666_v8 }
 0x19d   :  { %v624_v2 = vpop.permute.xlu1 %623  ;;  %v644_v27 = vpop.permute.xlu0 %643 }
 0x19e   :  { %v914_v50 = vsel %vm900_vm8, %v882_v28, %v644_v27  ;;  %v892_v16 = vsel %vm868_vm5, %v860_v21, %v624_v2 }
 0x1a1   :  { %v518_v5 = vpop.permute.xlu1 %517  ;;  %v652_v61 = vpop.permute.xlu0 %651 }
 0x1a2   :  { %v786_v56 = vsel %vm770_vm9, %v753_v25, %v518_v5  ;;  %v922_v63 = vsel %vm900_vm8, %v890_v14, %v652_v61 }
 0x1a3   :  { %v819_v19 = vsel %vm803_vm11, %v786_v56, %v554_v23 }
 0x1a4   :  { %v1606_v58 = vcombine.low %v817_v48, %v819_v19 }
 0x1a5   :  { %v526_v45 = vpop.permute.xlu1 %525  ;;  %v374_v12 = vpop.permute.xlu0 %373 }
 0x1a6   :  { %v794_v46 = vsel %vm770_vm9, %v761_v40, %v526_v45  ;;  %v696_v60 = vsel %vm661_vm3, %v3052_v38, %v374_v12 }
 0x1a7   :  { %v827_v39 = vsel %vm803_vm11, %v794_v46, %v562_v26 }
 0x1a8   :  { %v1610_v20 = vcombine.low %v825_v35, %v827_v39 }
 0x1a9   :  { %v2697_v7 = vpop.permute.xlu1 %645  ;;  %v434_v41 = vpop.permute.xlu0 %433 }
 0x1aa   :  { %v916_v6 = vsel %vm900_vm8, %v884_v13, %v2697_v7  ;;  %v730_v45 = vsel %vm706_vm6, %v696_v60, %v434_v41 }
 0x1ab   :  { %v1607_v3 = vcombine.low %v914_v50, %v916_v6 }
 0x1ad   :  { %v654_v18 = vpop.permute.xlu1 %653  ;;  %v564_v0 = vpop.permute.xlu0 %563  ;;  %1633 = vmatprep.mubr.msk.bf16.mxu0 %vm1128_vm10, %v1607_v3 }
 0x1ae   :  { %v924_v23 = vsel %vm900_vm8, %v892_v16, %v654_v18  ;;  %1214 = vmatmul.mubr.bf16.gmra.mrb[12].mxu0 %v1606_v58 }
 0x1af   :  { %v1611_v32 = vcombine.low %v922_v63, %v924_v23 }
 0x1b1   :  { %v376_v53 = vpop.permute.xlu1 %375  ;;  %1635 = vmatprep.mubr.msk.bf16.mxu1 %vm1128_vm10, %v1611_v32  ;;  %v596_v10 = vpop.permute.xlu0 %595 }
 0x1b2   :  { %1230 = vmatmul.mubr.bf16.gmra.mrb[4].mxu1 %v1610_v20  ;;  %v699_v8 = vsel %vm661_vm3, %v2422_v29, %v376_v53  ;;  %v862_v52 = vsel %vm836_vm4, %v564_v0, %v596_v10 }
 0x1b5   :  { %v436_v26 = vpop.permute.xlu1 %435  ;;  %v482_v51 = vpop.permute.xlu0 %481 }
 0x1b6   :  { %v732_v17 = vsel %vm706_vm6, %v699_v8, %v436_v26  ;;  %v763_v56 = vsel %vm737_vm7, %v730_v45, %v482_v51 }
 0x1b9   :  { %v566_v24 = vpop.permute.xlu1 %565  ;;  %v626_v1 = vpop.permute.xlu0 %625 }
 0x1ba   :  { %v894_v37 = vsel %vm868_vm5, %v862_v52, %v626_v1 }
 0x1bd   :  { %v598_v42 = vpop.permute.xlu1 %597  ;;  %v528_v4 = vpop.permute.xlu0 %527 }
 0x1be   :  { %v864_v55 = vsel %vm836_vm4, %v566_v24, %v598_v42  ;;  %v796_v29 = vsel %vm770_vm9, %v763_v56, %v528_v4 }
 0x1bf   :  { %v829_v49 = vsel %vm803_vm11, %v796_v29, %v564_v0 }
 0x1c1   :  { %v484_v2 = vpop.permute.xlu1 %483  ;;  %v656_v27 = vpop.permute.xlu0 %655 }
 0x1c2   :  { %v765_v59 = vsel %vm737_vm7, %v732_v17, %v484_v2  ;;  %v926_v22 = vsel %vm900_vm8, %v894_v37, %v656_v27 }
 0x1c5   :  { %v628_v5 = vpop.permute.xlu1 %627  ;;  %v378_v61 = vpop.permute.xlu0 %377 }
 0x1c6   :  { %v896_v12 = vsel %vm868_vm5, %v864_v55, %v628_v5  ;;  %v702_v48 = vsel %vm661_vm3, %v2483_v44, %v378_v61 }
 0x1c9   :  { %v530_v43 = vpop.permute.xlu1 %529  ;;  %v438_v25 = vpop.permute.xlu0 %437 }
 0x1ca   :  { %v798_v47 = vsel %vm770_vm9, %v765_v59, %v530_v43  ;;  %v734_v3 = vsel %vm706_vm6, %v702_v48, %v438_v25 }
 0x1cb   :  { %v831_v15 = vsel %vm803_vm11, %v798_v47, %v566_v24 }
 0x1cc   :  { %v1612_v40 = vcombine.low %v829_v49, %v831_v15 }
 0x1cd   :  { %v658_v62 = vpop.permute.xlu1 %657  ;;  %v568_v36 = vpop.permute.xlu0 %567 }
 0x1ce   :  { %v928_v30 = vsel %vm900_vm8, %v896_v12, %v658_v62 }
 0x1cf   :  { %v1613_v28 = vcombine.low %v926_v22, %v928_v30 }
 0x1d1   :  { %v380_v13 = vpop.permute.xlu1 %379  ;;  %1636 = vmatprep.mubr.msk.bf16.mxu1 %vm1128_vm10, %v1613_v28  ;;  %v600_v19 = vpop.permute.xlu0 %599 }
 0x1d2   :  { %1238 = vmatmul.mubr.bf16.gmra.mrb[8].mxu1 %v1612_v40  ;;  %v705_v21 = vsel %vm661_vm3, %v2537_v34, %v380_v13  ;;  %v866_v57 = vsel %vm836_vm4, %v568_v36, %v600_v19 }
 0x1d5   :  { %v440_v41 = vpop.permute.xlu1 %439  ;;  %v488_v54 = vpop.permute.xlu0 %487 }
 0x1d6   :  { %v736_v16 = vsel %vm706_vm6, %v705_v21, %v440_v41 }
 0x1d7   :  { %v769_v34 = vsel %vm737_vm7, %v736_v16, %v488_v54 }
 0x1d9   :  { %v570_v50 = vpop.permute.xlu1 %569  ;;  %v532_v46 = vpop.permute.xlu0 %531 }
 0x1da   :  { %v867_v6 = vsel %vm836_vm4, %v570_v50, %v2668_v33 }
 0x1db   :  { %v899_v31 = vsel %vm868_vm5, %v867_v6, %v2670_v9 }
 0x1dc   :  { %v931_v44 = vsel %vm900_vm8, %v899_v31, %v2697_v7 }
 0x1dd   :  { %v486_v11 = vpop.permute.xlu1 %485  ;;  %v660_v33 = vpop.permute.xlu0 %659 }
 0x1de   :  { %v767_v58 = vsel %vm737_vm7, %v734_v3, %v486_v11 }
 0x1df   :  { %v800_v9 = vsel %vm770_vm9, %v767_v58, %v532_v46 }
 0x1e0   :  { %v833_v32 = vsel %vm803_vm11, %v800_v9, %v568_v36 }
 0x1e1   :  { %v630_v14 = vpop.permute.xlu1 %629 }
 0x1e2   :  { %v898_v39 = vsel %vm868_vm5, %v866_v57, %v630_v14 }
 0x1e3   :  { %v930_v18 = vsel %vm900_vm8, %v898_v39, %v660_v33 }
 0x1e4   :  { %v1615_v0 = vcombine.low %v930_v18, %v931_v44 }
 0x1e5   :  { %v534_v63 = vpop.permute.xlu1 %533 }
 0x1e6   :  { %v802_v23 = vsel %vm770_vm9, %v769_v34, %v534_v63  ;;  %1637 = vmatprep.mubr.msk.bf16.mxu1 %vm1128_vm10, %v1615_v0 }
 0x1e7   :  { %v835_v35 = vsel %vm803_vm11, %v802_v23, %v570_v50 }
 0x1e8   :  { %v1614_v20 = vcombine.low %v833_v32, %v835_v35 }
 0x1ea   :  { %1246 = vmatmul.mubr.bf16.gmra.mrb[12].mxu1 %v1614_v20 }
 0x21d   :  { %v2760_v53 = vpop.f32.mrb[0].mxu0 }
 0x21e   :  { %v1292_v7 = vmul.f32 %v2760_v53, %v2760_v53  ;;  %v1193_v10 = vpop.f32.mrb[1].mxu0  ;;  %v1255_v51 = vsel %vm1254_vm12, %v2760_v53, 0.0 }
 0x21f   :  { %v2764_v26 = vpop.f32.mrb[2].mxu0 }
 0x220   :  { %v1256_v24 = vsel %vm1254_vm12, %v2764_v26, 0.0  ;;  %v1293_v1 = vmul.f32 %v2764_v26, %v2764_v26  ;;  %v1196_v42 = vpop.f32.mrb[3].mxu0  ;;  %v1308_v2 = vsel %vm1254_vm12, %v1292_v7, 0.0 }
 0x221   :  { %v1257_v4 = vadd.f32 %v1256_v24, %v1255_v51 }
 0x222   :  { %v1309_v27 = vsel %vm1254_vm12, %v1293_v1, 0.0 }
 0x223   :  { %v1310_v5 = vadd.f32 %v1309_v27, %v1308_v2 }
 0x229   :  { %v2774_v61 = vpop.f32.mrb[4].mxu0 }
 0x22a   :  { %v1258_v8 = vsel %vm1254_vm12, %v2774_v61, 0.0  ;;  %v1294_v17 = vmul.f32 %v2774_v61, %v2774_v61  ;;  %v1201_v38 = vpop.f32.mrb[5].mxu0 }
 0x22b   :  { %v1259_v60 = vadd.f32 %v1258_v8, %v1257_v4  ;;  %v2780_v59 = vpop.f32.mrb[6].mxu0 }
 0x22c   :  { %v1311_v43 = vsel %vm1254_vm12, %v1294_v17, 0.0  ;;  %v1260_v25 = vsel %vm1254_vm12, %v2780_v59, 0.0  ;;  %v1295_v45 = vmul.f32 %v2780_v59, %v2780_v59  ;;  %v1204_v47 = vpop.f32.mrb[7].mxu0 }
 0x22d   :  { %v1312_v56 = vadd.f32 %v1311_v43, %v1310_v5  ;;  %v1261_v52 = vadd.f32 %v1260_v25, %v1259_v60 }
 0x22e   :  { %v1313_v55 = vsel %vm1254_vm12, %v1295_v45, 0.0 }
 0x22f   :  { %v1314_v29 = vadd.f32 %v1313_v55, %v1312_v56 }
 0x241   :  { %v2788_v37 = vpop.f32.mrb[8].mxu0 }
 0x242   :  { %v1262_v12 = vsel %vm1254_vm12, %v2788_v37, 0.0  ;;  %v1296_v15 = vmul.f32 %v2788_v37, %v2788_v37  ;;  %v1209_v62 = vpop.f32.mrb[9].mxu0 }
 0x243   :  { %v1263_v36 = vadd.f32 %v1262_v12, %v1261_v52  ;;  %v2794_v22 = vpop.f32.mrb[10].mxu0 }
 0x244   :  { %v1315_v30 = vsel %vm1254_vm12, %v1296_v15, 0.0  ;;  %v1264_v49 = vsel %vm1254_vm12, %v2794_v22, 0.0  ;;  %v1297_v28 = vmul.f32 %v2794_v22, %v2794_v22  ;;  %v1212_v40 = vpop.f32.mrb[11].mxu0 }
 0x245   :  { %v1316_v13 = vadd.f32 %v1315_v30, %v1314_v29  ;;  %v1265_v19 = vadd.f32 %v1264_v49, %v1263_v36  ;;  %v2801_v41 = vpop.f32.mrb[0].mxu1 }
 0x246   :  { %v1317_v54 = vsel %vm1254_vm12, %v1297_v28, 0.0  ;;  %v1225_v50 = vpop.f32.mrb[1].mxu1  ;;  %v1300_v14 = vmul.f32 %v2801_v41, %v2801_v41  ;;  %v1270_v34 = vsel %vm1254_vm12, %v2801_v41, 0.0 }
 0x247   :  { %v1318_v46 = vadd.f32 %v1317_v54, %v1316_v13  ;;  %v2804_v6 = vpop.f32.mrb[2].mxu1 }
 0x248   :  { %v1228_v11 = vpop.f32.mrb[3].mxu1  ;;  %v1301_v63 = vmul.f32 %v2804_v6, %v2804_v6  ;;  %v1323_v10 = vsel %vm1254_vm12, %v1300_v14, 0.0  ;;  %v1272_v51 = vsel %vm1254_vm12, %v2804_v6, 0.0 }
 0x24a   :  { %v1325_v2 = vsel %vm1254_vm12, %v1301_v63, 0.0 }
 0x281   :  { %v2806_v48 = vpop.f32.mrb[12].mxu0 }
 0x282   :  { %v1266_v3 = vsel %vm1254_vm12, %v2806_v48, 0.0  ;;  %v1298_v31 = vmul.f32 %v2806_v48, %v2806_v48  ;;  %v1217_v21 = vpop.f32.mrb[13].mxu0 }
 0x283   :  { %v1267_v57 = vadd.f32 %v1266_v3, %v1265_v19  ;;  %v2812_v58 = vpop.f32.mrb[14].mxu0 }
 0x284   :  { %v1319_v16 = vsel %vm1254_vm12, %v1298_v31, 0.0  ;;  %v1268_v33 = vsel %vm1254_vm12, %v2812_v58, 0.0  ;;  %v1299_v39 = vmul.f32 %v2812_v58, %v2812_v58  ;;  %v1220_v44 = vpop.f32.mrb[15].mxu0 }
 0x285   :  { %v1320_v18 = vadd.f32 %v1319_v16, %v1318_v46  ;;  %v1269_v9 = vadd.f32 %v1268_v33, %v1267_v57  ;;  %v2821_v0 = vpop.f32.mrb[4].mxu1 }
 0x286   :  { %v1321_v23 = vsel %vm1254_vm12, %v1299_v39, 0.0  ;;  %v1233_v35 = vpop.f32.mrb[5].mxu1  ;;  %v1302_v24 = vmul.f32 %v2821_v0, %v2821_v0  ;;  %v1274_v27 = vsel %vm1254_vm12, %v2821_v0, 0.0 }
 0x287   :  { %v1271_v32 = vadd.f32 %v1270_v34, %v1269_v9  ;;  %v1322_v20 = vadd.f32 %v1321_v23, %v1320_v18  ;;  %v2828_v7 = vpop.f32.mrb[6].mxu1 }
 0x288   :  { %v1236_v1 = vpop.f32.mrb[7].mxu1  ;;  %v1303_v5 = vmul.f32 %v2828_v7, %v2828_v7  ;;  %v1327_v38 = vsel %vm1254_vm12, %v1302_v24, 0.0  ;;  %v1276_v60 = vsel %vm1254_vm12, %v2828_v7, 0.0 }
 0x289   :  { %v1324_v42 = vadd.f32 %v1323_v10, %v1322_v20  ;;  %v1273_v4 = vadd.f32 %v1272_v51, %v1271_v32 }
 0x28a   :  { %v1329_v45 = vsel %vm1254_vm12, %v1303_v5, 0.0 }
 0x28b   :  { %v1275_v8 = vadd.f32 %v1274_v27, %v1273_v4  ;;  %v1326_v17 = vadd.f32 %v1325_v2, %v1324_v42 }
 0x28d   :  { %v1328_v43 = vadd.f32 %v1327_v38, %v1326_v17  ;;  %v1277_v25 = vadd.f32 %v1276_v60, %v1275_v8  ;;  %v1359_v38 = vlaneseq }
 0x28f   :  { %v1330_v47 = vadd.f32 %v1329_v45, %v1328_v43  ;;  %v1360_v60 = vshrl.u32 %v1359_v38, 7  ;;  %v1351_v43 = vld [vmem:[%s3035_s3] sm:$0x1]  ;;  %s1825_s3 = smov 112  }
 0x2a5   :  { %v2844_v56 = vpop.f32.mrb[8].mxu1 }
 0x2a6   :  { %v1278_v52 = vsel %vm1254_vm12, %v2844_v56, 0.0  ;;  %v1304_v55 = vmul.f32 %v2844_v56, %v2844_v56  ;;  %v1241_v29 = vpop.f32.mrb[9].mxu1 }
 0x2a7   :  { %v1279_v12 = vadd.f32 %v1278_v52, %v1277_v25  ;;  %v2850_v15 = vpop.f32.mrb[10].mxu1  ;;  %v1361_v25 = vsub.s32 0, %v1360_v60  ;;  %v1355_v52 = vld [vmem:[%s3036_s4] sm:$0x1] }
 0x2a8   :  { %v1331_v62 = vsel %vm1254_vm12, %v1304_v55, 0.0  ;;  %v1280_v36 = vsel %vm1254_vm12, %v2850_v15, 0.0  ;;  %v1305_v30 = vmul.f32 %v2850_v15, %v2850_v15  ;;  %v1244_v49 = vpop.f32.mrb[11].mxu1 }
 0x2a9   :  { %v1332_v28 = vadd.f32 %v1331_v62, %v1330_v47  ;;  %v1281_v40 = vadd.f32 %v1280_v36, %v1279_v12 }
 0x2aa   :  { %v1333_v13 = vsel %vm1254_vm12, %v1305_v30, 0.0 }
 0x2ab   :  { %v1334_v19 = vadd.f32 %v1333_v13, %v1332_v28 }
 0x2bd   :  { %v2858_v54 = vpop.f32.mrb[12].mxu1 }
 0x2be   :  { %v1282_v50 = vsel %vm1254_vm12, %v2858_v54, 0.0  ;;  %v1306_v46 = vmul.f32 %v2858_v54, %v2858_v54  ;;  %v1249_v11 = vpop.f32.mrb[13].mxu1 }
 0x2bf   :  { %v1283_v3 = vadd.f32 %v1282_v50, %v1281_v40  ;;  %v1250_v31 = vpop.f32.mrb[14].mxu1 }
 0x2c0   :  { %v1335_v21 = vsel %vm1254_vm12, %v1306_v46, 0.0  ;;  %v1284_v57 = vsel %vm1254_vm12, %v1250_v31, 0.0  ;;  %v1307_v14 = vmul.f32 %v1250_v31, %v1250_v31  ;;  %v1252_v16 = vpop.f32.mrb[15].mxu1 }
 0x2c1   :  { %v1336_v33 = vadd.f32 %v1335_v21, %v1334_v19  ;;  %v1285_v39 = vadd.f32 %v1284_v57, %v1283_v3 }
 0x2c2   :  { %v1337_v44 = vsel %vm1254_vm12, %v1307_v14, 0.0 }
 0x2c3   :  { %v1286_v18 = vrot.slane %v1285_v39, 4  ;;  %v1338_v9 = vadd.f32 %v1337_v44, %v1336_v33 }
 0x2c5   :  { %v1287_v34 = vadd.f32 %v1286_v18, %v1285_v39  ;;  %v1339_v63 = vrot.slane %v1338_v9, 4 }
 0x2c7   :  { %v1288_v23 = vrot.slane %v1287_v34, 2  ;;  %v1340_v35 = vadd.f32 %v1339_v63, %v1338_v9 }
 0x2c9   :  { %v1289_v32 = vadd.f32 %v1288_v23, %v1287_v34  ;;  %v1341_v20 = vrot.slane %v1340_v35, 2 }
 0x2cb   :  { %v1290_v10 = vrot.slane %v1289_v32, 1  ;;  %v1342_v51 = vadd.f32 %v1341_v20, %v1340_v35 }
 0x2cd   :  { %v1291_v24 = vadd.f32 %v1290_v10, %v1289_v32  ;;  %v1343_v1 = vrot.slane %v1342_v51, 1 }
 0x2cf   :  { %v1344_v42 = vadd.f32 %v1343_v1, %v1342_v51  ;;  %v1346_v4 = vmul.f32 0.0078125, %v1291_v24 }
 0x2d1   :  { %v1347_v2 = vmul.f32 0.0078125, %v1344_v42  ;;  %v1348_v27 = vmul.f32 %v1346_v4, %v1346_v4 }
 0x2d3   :  { %v1349_v5 = vsub.f32 %v1347_v2, %v1348_v27 }
 0x2d5   :  { %v1350_v8 = vmax.f32 %v1349_v5, 0.0 }
 0x2d7   :  { %v1352_v17 = vadd.f32 1e-05, %v1350_v8 }
 0x2d9   :  { %1748 = vrsqrt.f32 %v1352_v17 }
 0x2e3   :  { %v1749_v45 = vpop.eup %1748 }
 0x2e4   :  { %v1354_v47 = vmul.f32 %v1749_v45, %v1351_v43 }
 0x2e6   :  { %v1356_v55 = vmul.f32 %v1354_v47, %v1346_v4  ;;  %v1362_v29 = vrot.slane %v1354_v47, %v1361_v25 }
 0x2e8   :  { %v1357_v12 = vsub.f32 %v1355_v52, %v1356_v55  ;;  %v1379_v62 = vmul.f32 %v1362_v29, %v1250_v31  ;;  %v1365_v36 = vmul.f32 %v1362_v29, %v2764_v26  ;;  %v1364_v30 = vmul.f32 %v1362_v29, %v2760_v53 }
 0x2e9   :  { %v1367_v49 = vmul.f32 %v1362_v29, %v2780_v59  ;;  %v1366_v28 = vmul.f32 %v1362_v29, %v2774_v61  ;;  %v1369_v40 = vmul.f32 %v1362_v29, %v2794_v22  ;;  %v1368_v13 = vmul.f32 %v1362_v29, %v2788_v37 }
 0x2ea   :  { %v1384_v19 = vrot.slane %v1357_v12, %v1361_v25  ;;  %v1371_v50 = vmul.f32 %v1362_v29, %v2812_v58  ;;  %v1370_v46 = vmul.f32 %v1362_v29, %v2806_v48  ;;  %v1373_v11 = vmul.f32 %v1362_v29, %v2804_v6 }
 0x2eb   :  { %v1372_v3 = vmul.f32 %v1362_v29, %v2801_v41  ;;  %v1375_v26 = vmul.f32 %v1362_v29, %v2828_v7  ;;  %v1374_v53 = vmul.f32 %v1362_v29, %v2821_v0  ;;  %v1377_v59 = vmul.f32 %v1362_v29, %v2850_v15 }
 0x2ec   :  { %v2886_v61 = vadd.f32 %v1384_v19, %v1379_v62  ;;  %v2888_v22 = vadd.f32 %v1384_v19, %v1365_v36  ;;  %v2890_v37 = vadd.f32 %v1384_v19, %v1364_v30  ;;  %v2892_v31 = vadd.f32 %v1384_v19, %v1367_v49 }
 0x2ed   :  { %v2894_v58 = vadd.f32 %v1384_v19, %v1366_v28  ;;  %v2896_v48 = vadd.f32 %v1384_v19, %v1369_v40  ;;  %v2898_v6 = vadd.f32 %v1384_v19, %v1368_v13  ;;  %v2900_v41 = vadd.f32 %v1384_v19, %v1371_v50 }
 0x2ee   :  { %v1639_v0 = vmul.f32 -1.442695, %v2888_v22  ;;  %v1638_v7 = vmul.f32 -1.442695, %v2890_v37  ;;  %v2904_v15 = vadd.f32 %v1384_v19, %v1370_v46  ;;  %v1641_v21 = vmul.f32 -1.442695, %v2892_v31 }
 0x2ef   :  { %v2907_v57 = vadd.f32 %v1384_v19, %v1373_v11  ;;  %v1640_v14 = vmul.f32 -1.442695, %v2894_v58  ;;  %v1643_v16 = vmul.f32 -1.442695, %v2896_v48  ;;  %v1642_v33 = vmul.f32 -1.442695, %v2898_v6 }
 0x2f0   :  { %1750 = vpow2.f32 %v1639_v0  ;;  %v2912_v39 = vadd.f32 %v1384_v19, %v1372_v3  ;;  %v2914_v44 = vadd.f32 %v1384_v19, %v1375_v26  ;;  %v2916_v18 = vadd.f32 %v1384_v19, %v1374_v53 }
 0x2f1   :  { %1752 = vpow2.f32 %v1638_v7  ;;  %v2918_v9 = vadd.f32 %v1384_v19, %v1377_v59  ;;  %v1376_v34 = vmul.f32 %v1362_v29, %v2844_v56  ;;  %v1645_v63 = vmul.f32 -1.442695, %v2900_v41 }
 0x2f2   :  { %1754 = vpow2.f32 %v1641_v21  ;;  %v1378_v23 = vmul.f32 %v1362_v29, %v2858_v54  ;;  %v1644_v35 = vmul.f32 -1.442695, %v2904_v15  ;;  %v1647_v10 = vmul.f32 -1.442695, %v2907_v57 }
 0x2f3   :  { %1756 = vpow2.f32 %v1640_v14  ;;  %v2924_v32 = vadd.f32 %v1384_v19, %v1376_v34  ;;  %v1646_v56 = vmul.f32 -1.442695, %v2912_v39  ;;  %v1649_v54 = vmul.f32 -1.442695, %v2914_v44 }
 0x2f4   :  { %1758 = vpow2.f32 %v1643_v16  ;;  %v2926_v20 = vadd.f32 %v1384_v19, %v1378_v23  ;;  %v1648_v2 = vmul.f32 -1.442695, %v2916_v18  ;;  %v1653_v43 = vmul.f32 -1.442695, %v2886_v61 }
 0x2f5   :  { %1760 = vpow2.f32 %v1642_v33  ;;  %v1651_v12 = vmul.f32 -1.442695, %v2918_v9  ;;  %v1650_v36 = vmul.f32 -1.442695, %v2924_v32 }
 0x2f6   :  { %1762 = vpow2.f32 %v1645_v63  ;;  %v1652_v49 = vmul.f32 -1.442695, %v2926_v20 }
 0x2f7   :  { %1764 = vpow2.f32 %v1644_v35 }
 0x2f8   :  { %1766 = vpow2.f32 %v1647_v10 }
 0x2f9   :  { %1768 = vpow2.f32 %v1646_v56 }
 0x2fa   :  { %v1751_v51 = vpop.eup %1750 }
 0x2fb   :  { %v1753_v24 = vpop.eup %1752  ;;  %v1451_v1 = vadd.f32 1.0, %v1751_v51 }
 0x2fc   :  { %v1755_v42 = vpop.eup %1754  ;;  %v1450_v4 = vadd.f32 1.0, %v1753_v24 }
 0x2fd   :  { %v1757_v27 = vpop.eup %1756  ;;  %1770 = vrcp.f32 %v1451_v1  ;;  %v1453_v5 = vadd.f32 1.0, %v1755_v42 }
 0x2fe   :  { %v1759_v8 = vpop.eup %1758  ;;  %1772 = vrcp.f32 %v1450_v4  ;;  %v1452_v17 = vadd.f32 1.0, %v1757_v27 }
 0x2ff   :  { %v1761_v38 = vpop.eup %1760  ;;  %1774 = vpow2.f32 %v1649_v54  ;;  %v1455_v45 = vadd.f32 1.0, %v1759_v8 }
 0x300   :  { %v1763_v60 = vpop.eup %1762  ;;  %1776 = vpow2.f32 %v1648_v2  ;;  %v1454_v47 = vadd.f32 1.0, %v1761_v38 }
 0x301   :  { %v1765_v25 = vpop.eup %1764  ;;  %1778 = vrcp.f32 %v1453_v5  ;;  %v1457_v52 = vadd.f32 1.0, %v1763_v60 }
 0x302   :  { %1780 = vrcp.f32 %v1452_v17  ;;  %v1456_v55 = vadd.f32 1.0, %v1765_v25  ;;  %v1767_v29 = vpop.eup %1766 }
 0x303   :  { %1782 = vpow2.f32 %v1653_v43  ;;  %v1769_v62 = vpop.eup %1768  ;;  %v1459_v13 = vadd.f32 1.0, %v1767_v29 }
 0x304   :  { %1784 = vrcp.f32 %v1455_v45  ;;  %v1458_v50 = vadd.f32 1.0, %v1769_v62 }
 0x305   :  { %1786 = vrcp.f32 %v1454_v47 }
 0x306   :  { %1788 = vrcp.f32 %v1457_v52 }
 0x307   :  { %v1771_v30 = vpop.eup %1770  ;;  %1790 = vrcp.f32 %v1456_v55 }
 0x308   :  { %v1773_v28 = vpop.eup %1772  ;;  %1516 = vrot.lane.b32.xlu0 %v1771_v30, %s1825_s3  ;;  %1792 = vpow2.f32 %v1651_v12 }
 0x309   :  { %v1775_v40 = vpop.eup %1774  ;;  %1514 = vrot.lane.b32.xlu1 %v1773_v28, %s1825_s3  ;;  %1794 = vpow2.f32 %v1650_v36 }
 0x30a   :  { %v1777_v19 = vpop.eup %1776  ;;  %1796 = vpow2.f32 %v1652_v49  ;;  %v1461_v3 = vadd.f32 1.0, %v1775_v40 }
 0x30b   :  { %v1779_v46 = vpop.eup %1778  ;;  %1798 = vrcp.f32 %v1459_v13  ;;  %v1460_v53 = vadd.f32 1.0, %v1777_v19 }
 0x30c   :  { %v1781_v11 = vpop.eup %1780  ;;  %1520 = vrot.lane.b32.xlu0 %v1779_v46, %s1825_s3  ;;  %1800 = vrcp.f32 %v1458_v50 }
 0x30d   :  { %1518 = vrot.lane.b32.xlu1 %v1781_v11, %s1825_s3  ;;  %v1783_v26 = vpop.eup %1782  ;;  %1802 = vrcp.f32 %v1461_v3 }
 0x30e   :  { %v1785_v59 = vpop.eup %1784  ;;  %1804 = vrcp.f32 %v1460_v53  ;;  %v1465_v23 = vadd.f32 1.0, %v1783_v26 }
 0x30f   :  { %v1787_v0 = vpop.eup %1786 }
 0x310   :  { %1524 = vrot.lane.b32.xlu0 %v1785_v59, %s1825_s3  ;;  %v1789_v7 = vpop.eup %1788 }
 0x311   :  { %1522 = vrot.lane.b32.xlu1 %v1787_v0, %s1825_s3  ;;  %v1791_v21 = vpop.eup %1790 }
 0x312   :  { %v1793_v14 = vpop.eup %1792 }
 0x313   :  { %v1795_v16 = vpop.eup %1794  ;;  %v1463_v33 = vadd.f32 1.0, %v1793_v14 }
 0x314   :  { %1528 = vrot.lane.b32.xlu0 %v1789_v7, %s1825_s3  ;;  %v1797_v34 = vpop.eup %1796  ;;  %v1462_v63 = vadd.f32 1.0, %v1795_v16 }
 0x315   :  { %1526 = vrot.lane.b32.xlu1 %v1791_v21, %s1825_s3  ;;  %1806 = vrcp.f32 %v1463_v33  ;;  %v1799_v35 = vpop.eup %1798  ;;  %v1464_v10 = vadd.f32 1.0, %v1797_v34 }
 0x316   :  { %1808 = vrcp.f32 %v1462_v63  ;;  %v1801_v56 = vpop.eup %1800 }
 0x317   :  { %1810 = vrcp.f32 %v1465_v23  ;;  %v1803_v51 = vpop.eup %1802 }
 0x318   :  { %1532 = vrot.lane.b32.xlu0 %v1799_v35, %s1825_s3  ;;  %1812 = vrcp.f32 %v1464_v10  ;;  %v1805_v24 = vpop.eup %1804 }
 0x319   :  { %1530 = vrot.lane.b32.xlu1 %v1801_v56, %s1825_s3 }
 0x31c   :  { %1536 = vrot.lane.b32.xlu0 %v1803_v51, %s1825_s3 }
 0x31d   :  { %1534 = vrot.lane.b32.xlu1 %v1805_v24, %s1825_s3 }
 0x31f   :  { %v1807_v1 = vpop.eup %1806 }
 0x320   :  { %v1809_v54 = vpop.eup %1808  ;;  %1540 = vrot.lane.b32.xlu0 %v1807_v1, %s1825_s3 }
 0x321   :  { %1538 = vrot.lane.b32.xlu1 %v1809_v54, %s1825_s3  ;;  %v1811_v42 = vpop.eup %1810 }
 0x322   :  { %v1813_v4 = vpop.eup %1812 }
 0x324   :  { %1544 = vrot.lane.b32.xlu0 %v1811_v42, %s1825_s3 }
 0x325   :  { %1542 = vrot.lane.b32.xlu1 %v1813_v4, %s1825_s3 }
 0x37a   :  { %v1517_v2 = vpop.permute.xlu0 %1516 }
 0x37b   :  { %v1563_v27 = vmul.f32 %v1517_v2, %v2888_v22  ;;  %v1515_v5 = vpop.permute.xlu1 %1514 }
 0x37c   :  { %v1562_v8 = vmul.f32 %v1515_v5, %v2890_v37 }
 0x37d   :  { %1579 = vst.msk [vmem:[%s3037_s5 + $0x8] sm:$0xff] %vm836_vm4, %v1563_v27 }
 0x37e   :  { %1578 = vst.msk [vmem:[%s3037_s5] sm:$0xff] %vm836_vm4, %v1562_v8  ;;  %v1521_v17 = vpop.permute.xlu0 %1520 }
 0x37f   :  { %v1565_v38 = vmul.f32 %v1521_v17, %v2892_v31  ;;  %v1519_v60 = vpop.permute.xlu1 %1518 }
 0x380   :  { %v1564_v43 = vmul.f32 %v1519_v60, %v2894_v58 }
 0x381   :  { %1581 = vst.msk [vmem:[%s3037_s5 + $0x18] sm:$0xff] %vm836_vm4, %v1565_v38 }
 0x382   :  { %1580 = vst.msk [vmem:[%s3037_s5 + $0x10] sm:$0xff] %vm836_vm4, %v1564_v43  ;;  %v1525_v22 = vpop.permute.xlu0 %1524 }
 0x383   :  { %v1567_v37 = vmul.f32 %v1525_v22, %v2896_v48  ;;  %v1523_v25 = vpop.permute.xlu1 %1522 }
 0x384   :  { %v1566_v45 = vmul.f32 %v1523_v25, %v2898_v6 }
 0x385   :  { %1583 = vst.msk [vmem:[%s3037_s5 + $0x28] sm:$0xff] %vm836_vm4, %v1567_v37 }
 0x386   :  { %1582 = vst.msk [vmem:[%s3037_s5 + $0x20] sm:$0xff] %vm836_vm4, %v1566_v45  ;;  %v1529_v31 = vpop.permute.xlu0 %1528 }
 0x387   :  { %v1569_v58 = vmul.f32 %v1529_v31, %v2900_v41  ;;  %v1527_v47 = vpop.permute.xlu1 %1526 }
 0x388   :  { %v1568_v52 = vmul.f32 %v1527_v47, %v2904_v15 }
 0x389   :  { %1585 = vst.msk [vmem:[%s3037_s5 + $0x38] sm:$0xff] %vm836_vm4, %v1569_v58 }
 0x38a   :  { %1584 = vst.msk [vmem:[%s3037_s5 + $0x30] sm:$0xff] %vm836_vm4, %v1568_v52  ;;  %v1533_v48 = vpop.permute.xlu0 %1532 }
 0x38b   :  { %v1571_v6 = vmul.f32 %v1533_v48, %v2907_v57  ;;  %v1531_v55 = vpop.permute.xlu1 %1530 }
 0x38c   :  { %v1570_v29 = vmul.f32 %v1531_v55, %v2912_v39 }
 0x38d   :  { %1587 = vst.msk [vmem:[%s3037_s5 + $0x48] sm:$0xff] %vm836_vm4, %v1571_v6 }
 0x38e   :  { %1586 = vst.msk [vmem:[%s3037_s5 + $0x40] sm:$0xff] %vm836_vm4, %v1570_v29  ;;  %v1537_v41 = vpop.permute.xlu0 %1536 }
 0x38f   :  { %v1573_v15 = vmul.f32 %v1537_v41, %v2914_v44  ;;  %v1535_v12 = vpop.permute.xlu1 %1534 }
 0x390   :  { %v1572_v62 = vmul.f32 %v1535_v12, %v2916_v18 }
 0x391   :  { %1589 = vst.msk [vmem:[%s3037_s5 + $0x58] sm:$0xff] %vm836_vm4, %v1573_v15 }
 0x392   :  { %1588 = vst.msk [vmem:[%s3037_s5 + $0x50] sm:$0xff] %vm836_vm4, %v1572_v62  ;;  %v1541_v57 = vpop.permute.xlu0 %1540 }
 0x393   :  { %v1575_v39 = vmul.f32 %v1541_v57, %v2918_v9  ;;  %v1539_v36 = vpop.permute.xlu1 %1538 }
 0x394   :  { %v1574_v30 = vmul.f32 %v1539_v36, %v2924_v32 }
 0x395   :  { %1591 = vst.msk [vmem:[%s3037_s5 + $0x68] sm:$0xff] %vm836_vm4, %v1575_v39 }
 0x396   :  { %1590 = vst.msk [vmem:[%s3037_s5 + $0x60] sm:$0xff] %vm836_vm4, %v1574_v30  ;;  %v1545_v44 = vpop.permute.xlu0 %1544 }
 0x397   :  { %v1577_v18 = vmul.f32 %v1545_v44, %v2886_v61  ;;  %v1543_v49 = vpop.permute.xlu1 %1542 }
 0x398   :  { %v1576_v28 = vmul.f32 %v1543_v49, %v2926_v20 }
 0x399   :  { %1593 = vst.msk [vmem:[%s3037_s5 + $0x78] sm:$0xff] %vm836_vm4, %v1577_v18 }
 0x39a   :  { %1592 = vst.msk [vmem:[%s3037_s5 + $0x70] sm:$0xff] %vm836_vm4, %v1576_v28 }

// kernel: gan_middle_forward.11
= control target key start
LH: loop header
LB: loop body
LE: loop exit
PB: predicated region body
PF: predicated region fallthrough
CT: control target
= control target key end

     0   :  { %v4056_v0 = vmov 0   ;;  %vm146_vm0 = vcmask 1040384   ;;  %s4057_s23 = smov 16   ;;  %v4058_v9 = vmov 0.0|0.0   ;;  %vm960_vm1 = vcmask 1046528   ;;  %s4059_s28 = smov 32   ;;  %s6998_s0 = inlined_call_operand.vmem [shape: f32[2,16,16,16], index: 0, kind: input, shape index: {}]   ;;  %s6999_s1 = inlined_call_operand.vmem [shape: bf16[144,16], index: 1, kind: input, shape index: {}]   ;;  %s7000_s2 = inlined_call_operand.vmem [shape: f32[1,16], index: 2, kind: input, shape index: {}]   ;;  %s7001_s3 = inlined_call_operand.vmem [shape: f32[1,16], index: 3, kind: input, shape index: {}]   ;;  %s7002_s4 = inlined_call_operand.vmem [shape: f32[2,16,16,8], index: 4, kind: output, shape index: {}]  }
   0x1   :  { %v4092_v1 = vrot.slane %v4056_v0, 1  ;;  %v18_v2 = vld [vmem:[%s6998_s0] sm:$0xff]  ;;  %v19_v3 = vld [vmem:[%s6998_s0 + $0x8] sm:$0xff]  ;;  %v20_v4 = vld [vmem:[%s6998_s0 + $0x10] sm:$0xff]  ;;  %2111 = vmatprep.subr.bf16.mxu0 %v4056_v0  ;;  %3761 = vmatprep.subr.bf16.mxu1 %v4056_v0  ;;  %v4111_v10 = vrot.slane %v4058_v9, 1  ;;  %s4060_s29 = smov 48  }
   0x2   :  { %v147_v5 = vrot.slane %v18_v2, 7  ;;  %v148_v6 = vrot.slane %v19_v3, 7  ;;  %v21_v7 = vld [vmem:[%s6998_s0 + $0x18] sm:$0xff]  ;;  %v150_v8 = vrot.slane %v20_v4, 7  ;;  %vm468_vm2 = vsmask.f32 7424 }
   0x3   :  { %837 = vrot.lane.b32.xlu0 %v4092_v1, %s4057_s23  ;;  %v151_v11 = vrot.slane %v21_v7, 7  ;;  %v22_v12 = vld [vmem:[%s6998_s0 + $0x20] sm:$0xff]  ;;  %v23_v17 = vld [vmem:[%s6998_s0 + $0x28] sm:$0xff]  ;;  %s4061_s6 = smov 96   ;;  %s4062_s7 = smov 80   ;;  %v24_v49 = vld [vmem:[%s6998_s0 + $0x30] sm:$0xff] }
   0x4   :  { %v149_v13 = vsel %vm146_vm0, %v147_v5, %v148_v6  ;;  %v339_v14 = vsel %vm146_vm0, 0.0, %v147_v5  ;;  %v340_v15 = vsel %vm146_vm0, 0.0, %v150_v8  ;;  %v371_v16 = vsel %vm146_vm0, %v148_v6, 0.0  ;;  %v3789_v38 = vld [vmem:[%s6999_s1] sm:$0xff]   ;;  %v3790_v45 = vld [vmem:[%s6999_s1 + $0x8] sm:$0xff]   ;;  %v25_v50 = vld [vmem:[%s6998_s0 + $0x38] sm:$0xff] }
   0x5   :  { %v4123_v18 = vpack.c.bf16 %v149_v13, %v339_v14  ;;  %v152_v19 = vsel %vm146_vm0, %v150_v8, %v151_v11  ;;  %v434_v20 = vpack.c.bf16 %v371_v16, %v371_v16  ;;  %v372_v21 = vsel %vm146_vm0, %v151_v11, 0.0  ;;  %2112 = vmatpush1.bf16.msra.mxu0 %v3789_v38  ;;  %3770 = vmatpush1.bf16.msra.mxu1 %v3789_v38  ;;  %s4063_s14 = smov 112   ;;  %s4064_s15 = smov 64   ;;  %v3791_v53 = vld [vmem:[%s6999_s1 + $0x10] sm:$0xff]   ;;  %v3792_v61 = vld [vmem:[%s6999_s1 + $0x18] sm:$0xff]   ;;  %v3793_v6 = vld [vmem:[%s6999_s1 + $0x20] sm:$0xff]  }
   0x6   :  { %v4127_v22 = vpack.c.bf16 %v152_v19, %v340_v15  ;;  %v4129_v23 = vpack.c.bf16 %v372_v21, %v372_v21  ;;  %v153_v24 = vrot.slane %v22_v12, 7  ;;  %v154_v25 = vrot.slane %v23_v17, 7  ;;  %2113 = vmatprep.subr.bf16.mxu0 %v4056_v0  ;;  %3762 = vmatprep.subr.bf16.mxu1 %v4056_v0  ;;  %v3794_v13 = vld [vmem:[%s6999_s1 + $0x28] sm:$0xff]   ;;  %v26_v14 = vld [vmem:[%s6998_s0 + $0x40] sm:$0xff] }
   0x7   :  { %1053 = vrot.lane.b32.xlu0 %v4111_v10, %s4059_s28  ;;  %1117 = vrot.lane.b32.xlu1 %v4123_v18, %s4060_s29  ;;  %v963_v26 = vrot.slane %v4123_v18, 1  ;;  %v964_v27 = vrot.slane %v434_v20, 1  ;;  %v478_v28 = vshrl.u32 %v4123_v18, 16  ;;  %v480_v29 = vshll.u32 %v4123_v18, 16  ;;  %v27_v15 = vld [vmem:[%s6998_s0 + $0x48] sm:$0xff] }
   0x8   :  { %v490_v30 = vshrl.u32 %v4127_v22, 16  ;;  %v492_v31 = vshll.u32 %v4127_v22, 16  ;;  %v497_v32 = vshll.u32 %v4129_v23, 16  ;;  %v485_v33 = vshll.u32 %v434_v20, 16 }
   0x9   :  { %v965_v34 = vsel %vm960_vm1, %v963_v26, %v964_v27  ;;  %v482_v35 = vrot.slane %v480_v29, 1  ;;  %v155_v36 = vsel %vm146_vm0, %v153_v24, %v154_v25  ;;  %v341_v37 = vsel %vm146_vm0, 0.0, %v153_v24  ;;  %2114 = vmatpush1.bf16.msra.mxu0 %v3790_v45  ;;  %3771 = vmatpush1.bf16.msra.mxu1 %v3790_v45  ;;  %v3796_v29 = vld [vmem:[%s6999_s1 + $0x38] sm:$0xff]  }
   0xa   :  { %v494_v39 = vrot.slane %v492_v31, 1  ;;  %v499_v40 = vrot.slane %v497_v32, 1  ;;  %v487_v41 = vrot.slane %v485_v33, 1  ;;  %v4150_v44 = vpack.c.bf16 %v155_v36, %v341_v37  ;;  %2115 = vmatprep.subr.bf16.mxu0 %v4056_v0  ;;  %3763 = vmatprep.subr.bf16.mxu1 %v4056_v0  ;;  %v28_v36 = vld [vmem:[%s6998_s0 + $0x50] sm:$0xff]  ;;  %v29_v37 = vld [vmem:[%s6998_s0 + $0x58] sm:$0xff] }
   0xb   :  { %1341 = vrot.lane.b32.xlu1 %v4127_v22, %s4061_s6  ;;  %1277 = vrot.lane.b32.xlu0 %v965_v34, %s4062_s7  ;;  %v483_v42 = vor.u32 %v482_v35, %v478_v28  ;;  %v373_v47 = vsel %vm146_vm0, %v154_v25, 0.0  ;;  %v156_v54 = vrot.slane %v24_v49, 7  ;;  %v157_v55 = vrot.slane %v25_v50, 7 }
   0xc   :  { %v495_v43 = vor.u32 %v494_v39, %v490_v30  ;;  %v4168_v51 = vpack.c.bf16 %v373_v47, %v373_v47  ;;  %v504_v52 = vshll.u32 %v4150_v44, 16  ;;  %v966_v56 = vrot.slane %v4127_v22, 1 }
   0xd   :  { %v488_v46 = vsel %vm468_vm2, %v483_v42, %v487_v41  ;;  %v967_v57 = vrot.slane %v4129_v23, 1  ;;  %v502_v58 = vshrl.u32 %v4150_v44, 16  ;;  %2116 = vmatpush1.bf16.msra.mxu0 %v3791_v53  ;;  %3772 = vmatpush1.bf16.msra.mxu1 %v3791_v53  ;;  %v158_v62 = vsel %vm146_vm0, %v156_v54, %v157_v55  ;;  %v3795_v23 = vld [vmem:[%s6999_s1 + $0x30] sm:$0xff]  }
   0xe   :  { %v500_v48 = vsel %vm468_vm2, %v495_v43, %v499_v40  ;;  %v506_v59 = vrot.slane %v504_v52, 1  ;;  %v509_v60 = vshll.u32 %v4168_v51, 16  ;;  %v342_v63 = vsel %vm146_vm0, 0.0, %v156_v54  ;;  %2117 = vmatprep.subr.bf16.mxu0 %v4056_v0  ;;  %3764 = vmatprep.subr.bf16.mxu1 %v4056_v0  ;;  %v52_v42 = vld [vmem:[%s6998_s0 + $0x110] sm:$0xff]  ;;  %v53_v43 = vld [vmem:[%s6998_s0 + $0x118] sm:$0xff] }
   0xf   :  { %1403 = vrot.lane.b32.xlu0 %v500_v48, %s4063_s14  ;;  %1205 = vrot.lane.b32.xlu1 %v488_v46, %s4064_s15  ;;  %v968_v2 = vsel %vm960_vm1, %v966_v56, %v967_v57  ;;  %v4193_v5 = vpack.c.bf16 %v158_v62, %v342_v63  ;;  %v374_v7 = vsel %vm146_vm0, %v157_v55, 0.0  ;;  %v969_v16 = vrot.slane %v4150_v44, 1 }
  0x10   :  { %v507_v3 = vor.u32 %v506_v59, %v502_v58  ;;  %v511_v4 = vrot.slane %v509_v60, 1  ;;  %v4205_v11 = vpack.c.bf16 %v374_v7, %v374_v7  ;;  %v970_v17 = vrot.slane %v4168_v51, 1  ;;  %v30_v7 = vld [vmem:[%s6998_s0 + $0x60] sm:$0xff] }
  0x11   :  { %2118 = vmatpush1.bf16.msra.mxu0 %v3792_v61  ;;  %3773 = vmatpush1.bf16.msra.mxu1 %v3792_v61  ;;  %v516_v12 = vshll.u32 %v4193_v5, 16  ;;  %v514_v19 = vshrl.u32 %v4193_v5, 16  ;;  %v159_v24 = vrot.slane %v26_v14, 7  ;;  %v160_v25 = vrot.slane %v27_v15, 7 }
  0x12   :  { %2119 = vmatprep.subr.bf16.mxu0 %v4056_v0  ;;  %3765 = vmatprep.subr.bf16.mxu1 %v4056_v0  ;;  %v512_v8 = vsel %vm468_vm2, %v507_v3, %v511_v4  ;;  %v521_v21 = vshll.u32 %v4205_v11, 16  ;;  %vm1465_vm3 = vcmask 130048   ;;  %v4234_v26 = vsel %vm960_vm1, %v969_v16, %v970_v17 }
  0x13   :  { %1055 = vrot.lane.b32.xlu0 %v965_v34, %s4059_s28  ;;  %839 = vrot.lane.b32.xlu1 %v488_v46, %s4057_s23  ;;  %v518_v20 = vrot.slane %v516_v12, 1  ;;  %v161_v30 = vsel %vm146_vm0, %v159_v24, %v160_v25  ;;  %v343_v31 = vsel %vm146_vm0, 0.0, %v159_v24  ;;  %v3797_v34 = vld [vmem:[%s6999_s1 + $0x40] sm:$0xff]   ;;  %v375_v35 = vsel %vm146_vm0, %v160_v25, 0.0 }
  0x14   :  { %v523_v28 = vrot.slane %v521_v21, 1  ;;  %3665 = vmatprep.mubr.msk.bf16.mxu0 %vm1465_vm3, %v968_v2  ;;  %v4248_v33 = vpack.c.bf16 %v161_v30, %v343_v31  ;;  %v438_v38 = vpack.c.bf16 %v375_v35, %v375_v35  ;;  %v162_v40 = vrot.slane %v28_v36, 7  ;;  %v32_v30 = vld [vmem:[%s6998_s0 + $0x70] sm:$0xff]  ;;  %v33_v31 = vld [vmem:[%s6998_s0 + $0x78] sm:$0xff] }
  0x15   :  { %2120 = vmatpush1.bf16.msra.mxu0 %v3793_v6  ;;  %3774 = vmatpush1.bf16.msra.mxu1 %v3793_v6  ;;  %v519_v27 = vor.u32 %v518_v20, %v514_v19  ;;  %v163_v41 = vrot.slane %v29_v37, 7  ;;  %v973_v45 = vrot.slane %v4205_v11, 1  ;;  %v198_v49 = vrot.slane %v52_v42, 7 }
  0x16   :  { %2121 = vmatprep.subr.bf16.mxu0 %v4056_v0  ;;  %3766 = vmatprep.subr.bf16.mxu1 %v4056_v0  ;;  %v528_v39 = vshll.u32 %v4248_v33, 16  ;;  %v526_v46 = vshrl.u32 %v4248_v33, 16  ;;  %v199_v50 = vrot.slane %v53_v43, 7  ;;  %v344_v52 = vsel %vm146_vm0, 0.0, %v162_v40 }
  0x17   :  { %1207 = vrot.lane.b32.xlu0 %v500_v48, %s4064_s15  ;;  %1119 = vrot.lane.b32.xlu1 %v4127_v22, %s4060_s29  ;;  %v524_v32 = vsel %vm468_vm2, %v519_v27, %v523_v28  ;;  %v164_v51 = vsel %vm146_vm0, %v162_v40, %v163_v41  ;;  %v356_v54 = vsel %vm146_vm0, 0.0, %v198_v49  ;;  %v376_v60 = vsel %vm146_vm0, %v163_v41, 0.0 }
  0x18   :  { %v530_v47 = vrot.slane %v528_v39, 1  ;;  %v200_v53 = vsel %vm146_vm0, %v198_v49, %v199_v50  ;;  %v388_v55 = vsel %vm146_vm0, %v199_v50, 0.0  ;;  %v4289_v59 = vpack.c.bf16 %v164_v51, %v344_v52  ;;  %v34_v52 = vld [vmem:[%s6998_s0 + $0x80] sm:$0xff] }
  0x19   :  { %2122 = vmatpush1.bf16.msra.mxu0 %v3794_v13  ;;  %3775 = vmatpush1.bf16.msra.mxu1 %v3794_v13  ;;  %v4292_v61 = vpack.c.bf16 %v200_v53, %v356_v54  ;;  %v4294_v62 = vpack.c.bf16 %v388_v55, %v388_v55  ;;  %v439_v3 = vpack.c.bf16 %v376_v60, %v376_v60  ;;  %v975_v11 = vrot.slane %v4248_v33, 1  ;;  %v35_v53 = vld [vmem:[%s6998_s0 + $0x88] sm:$0xff] }
  0x1a   :  { %2123 = vmatprep.subr.bf16.mxu0 %v4056_v0  ;;  %3767 = vmatprep.subr.bf16.mxu1 %v4056_v0  ;;  %v531_v57 = vor.u32 %v530_v47, %v526_v46  ;;  %v540_v4 = vshll.u32 %v4289_v59, 16  ;;  %v976_v13 = vrot.slane %v438_v38, 1  ;;  %v538_v14 = vshrl.u32 %v4289_v59, 16 }
  0x1b   :  { %1343 = vrot.lane.b32.xlu0 %v4150_v44, %s4061_s6  ;;  %1279 = vrot.lane.b32.xlu1 %v968_v2, %s4062_s7  ;;  %v1011_v63 = vrot.slane %v4292_v61, 1  ;;  %v1012_v6 = vrot.slane %v4294_v62, 1  ;;  %v545_v16 = vshll.u32 %v439_v3, 16  ;;  %v165_v17 = vrot.slane %v30_v7, 7 }
  0x1c   :  { %v542_v15 = vrot.slane %v540_v4, 1  ;;  %v4324_v20 = vsel %vm960_vm1, %v975_v11, %v976_v13  ;;  %v168_v35 = vrot.slane %v32_v30, 7  ;;  %v169_v36 = vrot.slane %v33_v31, 7 }
  0x1d   :  { %2124 = vmatpush1.bf16.msra.mxu0 %v3795_v23  ;;  %3776 = vmatpush1.bf16.msra.mxu1 %v3795_v23  ;;  %v4314_v12 = vsel %vm960_vm1, %v1011_v63, %v1012_v6  ;;  %v547_v23 = vrot.slane %v545_v16, 1  ;;  %v345_v25 = vsel %vm146_vm0, 0.0, %v165_v17  ;;  %v978_v37 = vrot.slane %v4289_v59, 1  ;;  %v51_v16 = vld [vmem:[%s6998_s0 + $0x108] sm:$0xff] }
  0x1e   :  { %2125 = vmatprep.subr.bf16.mxu0 %v4056_v0  ;;  %3768 = vmatprep.subr.bf16.mxu1 %v4056_v0  ;;  %v543_v21 = vor.u32 %v542_v15, %v538_v14  ;;  %v170_v42 = vsel %vm146_vm0, %v168_v35, %v169_v36  ;;  %v346_v43 = vsel %vm146_vm0, 0.0, %v168_v35  ;;  %v171_v63 = vrot.slane %v34_v52, 7  ;;  %v50_v15 = vld [vmem:[%s6998_s0 + $0x100] sm:$0xff]  ;;  %v37_v35 = vld [vmem:[%s6998_s0 + $0x98] sm:$0xff] }
  0x1f   :  { %841 = vrot.lane.b32.xlu0 %v500_v48, %s4057_s23  ;;  %1405 = vrot.lane.b32.xlu1 %v512_v8, %s4063_s14  ;;  %v533_v48 = vshll.u32 %v438_v38, 16  ;;  %v979_v38 = vrot.slane %v439_v3, 1  ;;  %v4358_v47 = vpack.c.bf16 %v170_v42, %v346_v43  ;;  %v175_v42 = vrot.slane %v37_v35, 7 }
  0x20   :  { %3681 = vmatprep.mubr.msk.bf16.mxu1 %vm1465_vm3, %v4314_v12  ;;  %v548_v27 = vsel %vm468_vm2, %v543_v21, %v547_v23  ;;  %v195_v21 = vrot.slane %v50_v15, 7  ;;  %v196_v23 = vrot.slane %v51_v16, 7  ;;  %vm1528_vm4 = vcmask 261120  }
  0x21   :  { %2126 = vmatpush1.bf16.msra.mxu0 %v3796_v29  ;;  %3777 = vmatpush1.bf16.msra.mxu1 %v3796_v29  ;;  %v535_v58 = vrot.slane %v533_v48, 1  ;;  %v378_v48 = vsel %vm146_vm0, %v169_v36, 0.0  ;;  %v564_v51 = vshll.u32 %v4358_v47, 16  ;;  %vm1591_vm5 = vcmask 392192  }
  0x22   :  { %2127 = vmatprep.subr.bf16.mxu0 %v4056_v0  ;;  %3769 = vmatprep.subr.bf16.mxu1 %v4056_v0  ;;  %v972_v0 = vrot.slane %v4193_v5, 1  ;;  %v441_v50 = vpack.c.bf16 %v378_v48, %v378_v48  ;;  %v197_v31 = vsel %vm146_vm0, %v195_v21, %v196_v23  ;;  %vm1656_vm6 = vcmask 523264  }
  0x23   :  { %1121 = vrot.lane.b32.xlu0 %v4150_v44, %s4060_s29  ;;  %1057 = vrot.lane.b32.xlu1 %v968_v2, %s4059_s28  ;;  %v536_v2 = vsel %vm468_vm2, %v531_v57, %v535_v58  ;;  %v562_v57 = vshrl.u32 %v4358_v47, 16  ;;  %v566_v58 = vrot.slane %v564_v51, 1  ;;  %vm1721_vm7 = vcmask 654336  }
  0x24   :  { %v4287_v56 = vsel %vm960_vm1, %v972_v0, %v973_v45  ;;  %v4356_v0 = vsel %vm960_vm1, %v978_v37, %v979_v38  ;;  %v569_v60 = vshll.u32 %v441_v50, 16  ;;  %v677_v35 = vshll.u32 %v4294_v62, 16 }
  0x25   :  { %2128 = vmatpush1.bf16.msra.mxu0 %v3797_v34  ;;  %3778 = vmatpush1.bf16.msra.mxu1 %v3797_v34  ;;  %v567_v4 = vor.u32 %v566_v58, %v562_v57  ;;  %vm1786_vm8 = vcmask 785408   ;;  %vm1850_vm9 = vcmask 916480   ;;  %vm3587_vm10 = vcmask 64512  }
  0x26   :  { %v571_v6 = vrot.slane %v569_v60, 1 }
  0x27   :  { %1281 = vrot.lane.b32.xlu0 %v4234_v26, %s4062_s7  ;;  %1209 = vrot.lane.b32.xlu1 %v512_v8, %s4064_s15 }
  0x28   :  { %v572_v11 = vsel %vm468_vm2, %v567_v4, %v571_v6 }
  0x2b   :  { %1407 = vrot.lane.b32.xlu0 %v524_v32, %s4063_s14  ;;  %1345 = vrot.lane.b32.xlu1 %v4193_v5, %s4061_s6 }
  0x2f   :  { %1059 = vrot.lane.b32.xlu0 %v4234_v26, %s4059_s28  ;;  %843 = vrot.lane.b32.xlu1 %v512_v8, %s4057_s23  ;;  %v31_v8 = vld [vmem:[%s6998_s0 + $0x68] sm:$0xff] }
  0x30   :  { %v166_v19 = vrot.slane %v31_v8, 7  ;;  %v347_v8 = vsel %vm146_vm0, 0.0, %v171_v63 }
  0x32   :  { %v167_v24 = vsel %vm146_vm0, %v165_v17, %v166_v19  ;;  %v377_v29 = vsel %vm146_vm0, %v166_v19, 0.0 }
  0x33   :  { %1211 = vrot.lane.b32.xlu0 %v524_v32, %s4064_s15  ;;  %1123 = vrot.lane.b32.xlu1 %v4193_v5, %s4060_s29  ;;  %v4332_v28 = vpack.c.bf16 %v167_v24, %v345_v25  ;;  %v984_v24 = vrot.slane %v4358_v47, 1  ;;  %v985_v25 = vrot.slane %v441_v50, 1 }
  0x35   :  { %v552_v34 = vshll.u32 %v4332_v28, 16  ;;  %v550_v39 = vshrl.u32 %v4332_v28, 16  ;;  %v981_v54 = vrot.slane %v4332_v28, 1  ;;  %v4420_v36 = vsel %vm960_vm1, %v984_v24, %v985_v25 }
  0x37   :  { %1347 = vrot.lane.b32.xlu0 %v4248_v33, %s4061_s6  ;;  %1283 = vrot.lane.b32.xlu1 %v4287_v56, %s4062_s7  ;;  %v554_v40 = vrot.slane %v552_v34, 1  ;;  %v36_v34 = vld [vmem:[%s6998_s0 + $0x90] sm:$0xff] }
  0x39   :  { %v555_v45 = vor.u32 %v554_v40, %v550_v39  ;;  %v387_v40 = vsel %vm146_vm0, %v196_v23, 0.0  ;;  %v672_v23 = vshll.u32 %v4292_v61, 16 }
  0x3b   :  { %845 = vrot.lane.b32.xlu0 %v524_v32, %s4057_s23  ;;  %1409 = vrot.lane.b32.xlu1 %v536_v2, %s4063_s14  ;;  %v440_v32 = vpack.c.bf16 %v377_v29, %v377_v29 }
  0x3d   :  { %v557_v41 = vshll.u32 %v440_v32, 16  ;;  %v982_v55 = vrot.slane %v440_v32, 1  ;;  %v355_v32 = vsel %vm146_vm0, 0.0, %v195_v21 }
  0x3e   :  { %v4422_v39 = vpack.c.bf16 %v197_v31, %v355_v32  ;;  %v670_v32 = vshrl.u32 %v4292_v61, 16 }
  0x3f   :  { %1125 = vrot.lane.b32.xlu0 %v4248_v33, %s4060_s29  ;;  %1061 = vrot.lane.b32.xlu1 %v4287_v56, %s4059_s28  ;;  %v559_v46 = vrot.slane %v557_v41, 1  ;;  %v4382_v3 = vsel %vm960_vm1, %v981_v54, %v982_v55  ;;  %v174_v41 = vrot.slane %v36_v34, 7  ;;  %v380_v54 = vsel %vm146_vm0, %v175_v42, 0.0 }
  0x40   :  { %v658_v50 = vshrl.u32 %v4422_v39, 16  ;;  %v4447_v60 = vpack.c.bf16 %v380_v54, %v380_v54  ;;  %v674_v34 = vrot.slane %v672_v23, 1  ;;  %v39_v54 = vld [vmem:[%s6998_s0 + $0xa8] sm:$0xff] }
  0x41   :  { %v560_v49 = vsel %vm468_vm2, %v555_v45, %v559_v46  ;;  %v449_v45 = vpack.c.bf16 %v387_v40, %v387_v40  ;;  %v660_v46 = vshll.u32 %v4422_v39, 16  ;;  %v176_v48 = vsel %vm146_vm0, %v174_v41, %v175_v42 }
  0x42   :  { %v593_v16 = vshll.u32 %v4447_v60, 16 }
  0x43   :  { %1285 = vrot.lane.b32.xlu0 %v4324_v20, %s4062_s7  ;;  %1213 = vrot.lane.b32.xlu1 %v536_v2, %s4064_s15  ;;  %v662_v51 = vrot.slane %v660_v46, 1  ;;  %v665_v52 = vshll.u32 %v449_v45, 16  ;;  %v1009_v15 = vrot.slane %v449_v45, 1  ;;  %v675_v46 = vor.u32 %v674_v34, %v670_v32 }
  0x47   :  { %1411 = vrot.lane.b32.xlu0 %v548_v27, %s4063_s14  ;;  %1349 = vrot.lane.b32.xlu1 %v4289_v59, %s4061_s6 }
  0x4b   :  { %1063 = vrot.lane.b32.xlu0 %v4324_v20, %s4059_s28  ;;  %847 = vrot.lane.b32.xlu1 %v536_v2, %s4057_s23  ;;  %v172_v2 = vrot.slane %v35_v53, 7 }
  0x4d   :  { %v173_v7 = vsel %vm146_vm0, %v171_v63, %v172_v2  ;;  %v379_v14 = vsel %vm146_vm0, %v172_v2, 0.0  ;;  %v663_v63 = vor.u32 %v662_v51, %v658_v50  ;;  %v667_v2 = vrot.slane %v665_v52, 1  ;;  %v38_v52 = vld [vmem:[%s6998_s0 + $0xa0] sm:$0xff] }
  0x4e   :  { %v4390_v13 = vpack.c.bf16 %v173_v7, %v347_v8  ;;  %v442_v17 = vpack.c.bf16 %v379_v14, %v379_v14  ;;  %v1008_v14 = vrot.slane %v4422_v39, 1 }
  0x4f   :  { %1215 = vrot.lane.b32.xlu0 %v548_v27, %s4064_s15  ;;  %1127 = vrot.lane.b32.xlu1 %v4289_v59, %s4060_s29 }
  0x50   :  { %v576_v19 = vshll.u32 %v4390_v13, 16  ;;  %v581_v30 = vshll.u32 %v442_v17, 16  ;;  %v987_v57 = vrot.slane %v4390_v13, 1  ;;  %v988_v58 = vrot.slane %v442_v17, 1 }
  0x51   :  { %v668_v17 = vsel %vm468_vm2, %v663_v63, %v667_v2  ;;  %v178_v63 = vrot.slane %v39_v54, 7 }
  0x52   :  { %v578_v29 = vrot.slane %v576_v19, 1  ;;  %v583_v38 = vrot.slane %v581_v30, 1  ;;  %v4451_v8 = vsel %vm960_vm1, %v987_v57, %v988_v58  ;;  %v595_v30 = vrot.slane %v593_v16, 1 }
  0x53   :  { %1351 = vrot.lane.b32.xlu0 %v4332_v28, %s4061_s6  ;;  %1287 = vrot.lane.b32.xlu1 %v4356_v0, %s4062_s7  ;;  %v177_v58 = vrot.slane %v38_v52, 7  ;;  %v381_v32 = vsel %vm146_vm0, %v178_v63, 0.0 }
  0x57   :  { %849 = vrot.lane.b32.xlu0 %v548_v27, %s4057_s23  ;;  %1413 = vrot.lane.b32.xlu1 %v560_v49, %s4063_s14  ;;  %v574_v27 = vshrl.u32 %v4390_v13, 16 }
  0x59   :  { %v579_v37 = vor.u32 %v578_v29, %v574_v27  ;;  %v1010_v29 = vsel %vm960_vm1, %v1008_v14, %v1009_v15  ;;  %v349_v14 = vsel %vm146_vm0, 0.0, %v177_v58 }
  0x5b   :  { %1129 = vrot.lane.b32.xlu0 %v4332_v28, %s4060_s29  ;;  %1065 = vrot.lane.b32.xlu1 %v4356_v0, %s4059_s28  ;;  %v4430_v43 = vsel %vm468_vm2, %v579_v37, %v583_v38 }
  0x5f   :  { %1289 = vrot.lane.b32.xlu0 %v4382_v3, %s4062_s7  ;;  %1217 = vrot.lane.b32.xlu1 %v560_v49, %s4064_s15 }
  0x63   :  { %1415 = vrot.lane.b32.xlu0 %v572_v11, %s4063_s14  ;;  %1353 = vrot.lane.b32.xlu1 %v4358_v47, %s4061_s6 }
  0x67   :  { %1067 = vrot.lane.b32.xlu0 %v4382_v3, %s4059_s28  ;;  %851 = vrot.lane.b32.xlu1 %v560_v49, %s4057_s23  ;;  %v348_v49 = vsel %vm146_vm0, 0.0, %v174_v41 }
  0x68   :  { %v4439_v53 = vpack.c.bf16 %v176_v48, %v348_v49  ;;  %v679_v48 = vrot.slane %v677_v35, 1 }
  0x6a   :  { %v588_v4 = vshll.u32 %v4439_v53, 16  ;;  %v586_v19 = vshrl.u32 %v4439_v53, 16  ;;  %v4497_v57 = vsel %vm468_vm2, %v675_v46, %v679_v48 }
  0x6b   :  { %1219 = vrot.lane.b32.xlu0 %v572_v11, %s4064_s15  ;;  %1131 = vrot.lane.b32.xlu1 %v4358_v47, %s4060_s29 }
  0x6c   :  { %v590_v21 = vrot.slane %v588_v4, 1 }
  0x6e   :  { %v591_v31 = vor.u32 %v590_v21, %v586_v19 }
  0x6f   :  { %1355 = vrot.lane.b32.xlu0 %v4390_v13, %s4061_s6  ;;  %1291 = vrot.lane.b32.xlu1 %v4420_v36, %s4062_s7 }
  0x70   :  { %v4481_v62 = vsel %vm468_vm2, %v591_v31, %v595_v30 }
  0x73   :  { %853 = vrot.lane.b32.xlu0 %v572_v11, %s4057_s23  ;;  %1417 = vrot.lane.b32.xlu1 %v4430_v43, %s4063_s14 }
  0x75   :  { %v838_v55 = vpop.permute.xlu0 %837 }
  0x76   :  { %v1467_v11 = vsel %vm1465_vm3, 0.0|0.0, %v838_v55 }
  0x77   :  { %1133 = vrot.lane.b32.xlu0 %v4390_v13, %s4060_s29  ;;  %1069 = vrot.lane.b32.xlu1 %v4420_v36, %s4059_s28 }
  0x79   :  { %v1054_v6 = vpop.permute.xlu0 %1053  ;;  %v1118_v7 = vpop.permute.xlu1 %1117 }
  0x7a   :  { %v4464_v27 = vsel %vm1528_vm4, %v1467_v11, %v1054_v6  ;;  %v55_v11 = vld [vmem:[%s6998_s0 + $0x128] sm:$0xff] }
  0x7b   :  { %1221 = vrot.lane.b32.xlu0 %v4430_v43, %s4064_s15  ;;  %1149 = vrot.lane.b32.xlu1 %v4422_v39, %s4060_s29  ;;  %v1593_v37 = vsel %vm1591_vm5, %v4464_v27, %v1118_v7  ;;  %v54_v7 = vld [vmem:[%s6998_s0 + $0x120] sm:$0xff]  ;;  %v202_v23 = vrot.slane %v55_v11, 7 }
  0x7c   :  { %v201_v21 = vrot.slane %v54_v7, 7 }
  0x7d   :  { %v1342_v24 = vpop.permute.xlu1 %1341  ;;  %v1278_v25 = vpop.permute.xlu0 %1277 }
  0x7e   :  { %v203_v34 = vsel %vm146_vm0, %v201_v21, %v202_v23  ;;  %v357_v35 = vsel %vm146_vm0, 0.0, %v201_v21 }
  0x7f   :  { %1293 = vrot.lane.b32.xlu0 %v4451_v8, %s4062_s7  ;;  %1237 = vrot.lane.b32.xlu1 %v668_v17, %s4064_s15 }
  0x81   :  { %v1404_v38 = vpop.permute.xlu0 %1403  ;;  %v1206_v40 = vpop.permute.xlu1 %1205 }
  0x82   :  { %v1658_v41 = vsel %vm1656_vm6, %v1593_v37, %v1206_v40  ;;  %v990_v40 = vrot.slane %v4439_v53, 1 }
  0x83   :  { %v1723_v42 = vsel %vm1721_vm7, %v1658_v41, %v1278_v25  ;;  %1357 = vrot.lane.b32.xlu0 %v4439_v53, %s4061_s6  ;;  %1309 = vrot.lane.b32.xlu1 %v1010_v29, %s4062_s7  ;;  %v991_v41 = vrot.slane %v4447_v60, 1 }
  0x84   :  { %v1788_v45 = vsel %vm1786_vm8, %v1723_v42, %v1342_v24  ;;  %v4535_v42 = vpack.c.bf16 %v381_v32, %v381_v32  ;;  %v41_v32 = vld [vmem:[%s6998_s0 + $0xb8] sm:$0xff] }
  0x85   :  { %v1056_v49 = vpop.permute.xlu0 %1055  ;;  %v840_v50 = vpop.permute.xlu1 %839  ;;  %v1852_v51 = vsel %vm1850_vm9, %v1788_v45, %v1404_v38  ;;  %v4537_v45 = vpack.c.bf16 %v203_v34, %v357_v35 }
  0x86   :  { %v1469_v55 = vsel %vm1465_vm3, %v4123_v18, %v840_v50  ;;  %2144 = vmatmul.mubr.bf16.vlgmr.msra.gmra.mrb[0].mxu0 %v1852_v51  ;;  %v4549_v50 = vsel %vm960_vm1, %v990_v40, %v991_v41  ;;  %v605_v51 = vshll.u32 %v4535_v42, 16  ;;  %v56_v40 = vld [vmem:[%s6998_s0 + $0x130] sm:$0xff]  ;;  %v57_v41 = vld [vmem:[%s6998_s0 + $0x138] sm:$0xff] }
  0x87   :  { %1419 = vrot.lane.b32.xlu0 %v4481_v62, %s4063_s14  ;;  %1373 = vrot.lane.b32.xlu1 %v4292_v61, %s4061_s6  ;;  %v1532_v4 = vsel %vm1528_vm4, %v1469_v55, %v1056_v49 }
  0x88   :  { %3666 = vmatprep.mubr.msk.bf16.mxu0 %vm1465_vm3, %v4234_v26  ;;  %v179_v26 = vsel %vm146_vm0, %v177_v58, %v178_v63 }
  0x89   :  { %v1208_v2 = vpop.permute.xlu0 %1207  ;;  %v1120_v6 = vpop.permute.xlu1 %1119 }
  0x8a   :  { %v1595_v18 = vsel %vm1591_vm5, %v1532_v4, %v1120_v6  ;;  %v607_v4 = vrot.slane %v605_v51, 1  ;;  %v682_v6 = vshrl.u32 %v4537_v45, 16  ;;  %v205_v51 = vrot.slane %v57_v41, 7 }
  0x8b   :  { %855 = vrot.lane.b32.xlu0 %v4430_v43, %s4057_s23  ;;  %1435 = vrot.lane.b32.xlu1 %v4497_v57, %s4063_s14  ;;  %v1660_v16 = vsel %vm1656_vm6, %v1595_v18, %v1208_v2  ;;  %v4520_v43 = vpack.c.bf16 %v179_v26, %v349_v14 }
  0x8d   :  { %v1344_v15 = vpop.permute.xlu0 %1343  ;;  %v1280_v19 = vpop.permute.xlu1 %1279  ;;  %v598_v60 = vshrl.u32 %v4520_v43, 16 }
  0x8e   :  { %v1725_v24 = vsel %vm1721_vm7, %v1660_v16, %v1280_v19 }
  0x8f   :  { %1071 = vrot.lane.b32.xlu0 %v4451_v8, %s4059_s28  ;;  %869 = vrot.lane.b32.xlu1 %v668_v17, %s4057_s23  ;;  %v1790_v31 = vsel %vm1786_vm8, %v1725_v24, %v1344_v15  ;;  %v600_v17 = vshll.u32 %v4520_v43, 16 }
  0x91   :  { %v842_v25 = vpop.permute.xlu0 %841  ;;  %v1406_v30 = vpop.permute.xlu1 %1405  ;;  %v602_v49 = vrot.slane %v600_v17, 1  ;;  %v181_v17 = vrot.slane %v41_v32, 7 }
  0x92   :  { %v1855_v37 = vsel %vm1850_vm9, %v1790_v31, %v1406_v30  ;;  %v1471_v38 = vsel %vm1465_vm3, %v4127_v22, %v842_v25  ;;  %v389_v22 = vsel %vm146_vm0, %v202_v23, 0.0  ;;  %v40_v30 = vld [vmem:[%s6998_s0 + $0xb0] sm:$0xff] }
  0x93   :  { %1135 = vrot.lane.b32.xlu0 %v4439_v53, %s4060_s29  ;;  %1085 = vrot.lane.b32.xlu1 %v1010_v29, %s4059_s28  ;;  %v4552_v52 = vpack.c.bf16 %v389_v22, %v389_v22  ;;  %v603_v2 = vor.u32 %v602_v49, %v598_v60  ;;  %v204_v49 = vrot.slane %v56_v40, 7 }
  0x94   :  { %2152 = vmatmul.mubr.bf16.gmra.mrb[4].mxu0 %v1855_v37 }
  0x95   :  { %v1122_v46 = vpop.permute.xlu0 %1121  ;;  %v1058_v48 = vpop.permute.xlu1 %1057  ;;  %3667 = vmatprep.mubr.msk.bf16.mxu0 %vm1465_vm3, %v4287_v56  ;;  %v684_v56 = vshll.u32 %v4537_v45, 16  ;;  %v689_v7 = vshll.u32 %v4552_v52, 16  ;;  %v4571_v19 = vsel %vm468_vm2, %v603_v2, %v607_v4  ;;  %v206_v2 = vsel %vm146_vm0, %v204_v49, %v205_v51 }
  0x96   :  { %v1534_v29 = vsel %vm1528_vm4, %v1471_v38, %v1058_v48  ;;  %v358_v4 = vsel %vm146_vm0, 0.0, %v204_v49 }
  0x97   :  { %1223 = vrot.lane.b32.xlu0 %v4481_v62, %s4064_s15  ;;  %1151 = vrot.lane.b32.xlu1 %v4292_v61, %s4060_s29  ;;  %v1597_v55 = vsel %vm1591_vm5, %v1534_v29, %v1122_v46  ;;  %v686_v18 = vrot.slane %v684_v56, 1  ;;  %v691_v23 = vrot.slane %v689_v7, 1  ;;  %v994_v7 = vrot.slane %v4535_v42, 1 }
  0x99   :  { %v1282_v54 = vpop.permute.xlu0 %1281  ;;  %v1210_v58 = vpop.permute.xlu1 %1209  ;;  %v687_v21 = vor.u32 %v686_v18, %v682_v6 }
  0x9a   :  { %v1662_v63 = vsel %vm1656_vm6, %v1597_v55, %v1210_v58 }
  0x9b   :  { %1295 = vrot.lane.b32.xlu0 %v4549_v50, %s4062_s7  ;;  %1239 = vrot.lane.b32.xlu1 %v4497_v57, %s4064_s15  ;;  %v1727_v26 = vsel %vm1721_vm7, %v1662_v63, %v1282_v54  ;;  %v4588_v34 = vsel %vm468_vm2, %v687_v21, %v691_v23  ;;  %v382_v54 = vsel %vm146_vm0, %v181_v17, 0.0  ;;  %v1014_v21 = vrot.slane %v4537_v45, 1 }
  0x9c   :  { %v1015_v23 = vrot.slane %v4552_v52, 1 }
  0x9d   :  { %v1408_v11 = vpop.permute.xlu0 %1407  ;;  %v1346_v14 = vpop.permute.xlu1 %1345 }
  0x9e   :  { %v1792_v15 = vsel %vm1786_vm8, %v1727_v26, %v1346_v14  ;;  %v4628_v14 = vpack.c.bf16 %v206_v2, %v358_v4  ;;  %v4655_v52 = vsel %vm960_vm1, %v1014_v21, %v1015_v23 }
  0x9f   :  { %1359 = vrot.lane.b32.xlu0 %v4520_v43, %s4061_s6  ;;  %1311 = vrot.lane.b32.xlu1 %v4314_v12, %s4062_s7  ;;  %v1858_v16 = vsel %vm1850_vm9, %v1792_v15, %v1408_v11  ;;  %v4625_v11 = vpack.c.bf16 %v382_v54, %v382_v54 }
  0xa0   :  { %2160 = vmatmul.mubr.bf16.gmra.mrb[8].mxu0 %v1858_v16 }
  0xa1   :  { %v1060_v24 = vpop.permute.xlu0 %1059  ;;  %v844_v25 = vpop.permute.xlu1 %843  ;;  %3668 = vmatprep.mubr.msk.bf16.mxu0 %vm1465_vm3, %v4324_v20  ;;  %v180_v20 = vrot.slane %v40_v30, 7 }
  0xa2   :  { %v1473_v31 = vsel %vm1465_vm3, %v4150_v44, %v844_v25 }
  0xa3   :  { %1421 = vrot.lane.b32.xlu0 %v4571_v19, %s4063_s14  ;;  %1375 = vrot.lane.b32.xlu1 %v4537_v45, %s4061_s6  ;;  %v1536_v37 = vsel %vm1528_vm4, %v1473_v31, %v1060_v24  ;;  %v350_v46 = vsel %vm146_vm0, 0.0, %v180_v20  ;;  %v182_v60 = vsel %vm146_vm0, %v180_v20, %v181_v17  ;;  %v617_v24 = vshll.u32 %v4625_v11, 16 }
  0xa4   :  { %v696_v31 = vshll.u32 %v4628_v14, 16 }
  0xa5   :  { %v1212_v35 = vpop.permute.xlu0 %1211  ;;  %v1124_v38 = vpop.permute.xlu1 %1123 }
  0xa6   :  { %v1599_v44 = vsel %vm1591_vm5, %v1536_v37, %v1124_v38  ;;  %v619_v38 = vrot.slane %v617_v24, 1  ;;  %v698_v40 = vrot.slane %v696_v31, 1 }
  0xa7   :  { %857 = vrot.lane.b32.xlu0 %v4481_v62, %s4057_s23  ;;  %1437 = vrot.lane.b32.xlu1 %v4588_v34, %s4063_s14  ;;  %v1664_v22 = vsel %vm1656_vm6, %v1599_v44, %v1212_v35  ;;  %v4610_v62 = vpack.c.bf16 %v182_v60, %v350_v46  ;;  %v694_v44 = vshrl.u32 %v4628_v14, 16 }
  0xa9   :  { %v1348_v48 = vpop.permute.xlu0 %1347  ;;  %v1284_v29 = vpop.permute.xlu1 %1283  ;;  %v612_v26 = vshll.u32 %v4610_v62, 16 }
  0xaa   :  { %v1729_v56 = vsel %vm1721_vm7, %v1664_v22, %v1284_v29 }
  0xab   :  { %1073 = vrot.lane.b32.xlu0 %v4549_v50, %s4059_s28  ;;  %871 = vrot.lane.b32.xlu1 %v4497_v57, %s4057_s23  ;;  %v1794_v63 = vsel %vm1786_vm8, %v1729_v56, %v1348_v48  ;;  %v993_v57 = vrot.slane %v4520_v43, 1  ;;  %v614_v25 = vrot.slane %v612_v26, 1 }
  0xad   :  { %v846_v55 = vpop.permute.xlu0 %845  ;;  %v1410_v58 = vpop.permute.xlu1 %1409  ;;  %v4639_v42 = vsel %vm960_vm1, %v993_v57, %v994_v7 }
  0xae   :  { %v1861_v6 = vsel %vm1850_vm9, %v1794_v63, %v1410_v58  ;;  %v1475_v18 = vsel %vm1465_vm3, %v4193_v5, %v846_v55  ;;  %v390_v5 = vsel %vm146_vm0, %v205_v51, 0.0  ;;  %v699_v51 = vor.u32 %v698_v40, %v694_v44  ;;  %v42_v58 = vld [vmem:[%s6998_s0 + $0xc0] sm:$0xff]  ;;  %v43_v63 = vld [vmem:[%s6998_s0 + $0xc8] sm:$0xff] }
  0xaf   :  { %1137 = vrot.lane.b32.xlu0 %v4520_v43, %s4060_s29  ;;  %1087 = vrot.lane.b32.xlu1 %v4314_v12, %s4059_s28  ;;  %v4645_v30 = vpack.c.bf16 %v390_v5, %v390_v5  ;;  %v996_v40 = vrot.slane %v4610_v62, 1 }
  0xb0   :  { %2168 = vmatmul.mubr.bf16.gmra.mrb[12].mxu0 %v1861_v6  ;;  %v184_v6 = vrot.slane %v43_v63, 7 }
  0xb1   :  { %v1126_v15 = vpop.permute.xlu0 %1125  ;;  %v1062_v16 = vpop.permute.xlu1 %1061  ;;  %3669 = vmatprep.mubr.msk.bf16.mxu0 %vm1465_vm3, %v4356_v0  ;;  %v610_v0 = vshrl.u32 %v4610_v62, 16  ;;  %v701_v41 = vshll.u32 %v4645_v30, 16 }
  0xb2   :  { %v1538_v12 = vsel %vm1528_vm4, %v1475_v18, %v1062_v16 }
  0xb3   :  { %1225 = vrot.lane.b32.xlu0 %v4571_v19, %s4064_s15  ;;  %1153 = vrot.lane.b32.xlu1 %v4537_v45, %s4060_s29  ;;  %v1601_v20 = vsel %vm1591_vm5, %v1538_v12, %v1126_v15  ;;  %v615_v17 = vor.u32 %v614_v25, %v610_v0  ;;  %v703_v56 = vrot.slane %v701_v41, 1  ;;  %v59_v15 = vld [vmem:[%s6998_s0 + $0x148] sm:$0xff]  ;;  %v997_v41 = vrot.slane %v4625_v11, 1 }
  0xb4   :  { %v208_v0 = vrot.slane %v59_v15, 7  ;;  %v1017_v11 = vrot.slane %v4628_v14, 1 }
  0xb5   :  { %v1286_v32 = vpop.permute.xlu0 %1285  ;;  %v1214_v35 = vpop.permute.xlu1 %1213  ;;  %v4667_v49 = vsel %vm468_vm2, %v615_v17, %v619_v38  ;;  %v4684_v4 = vsel %vm468_vm2, %v699_v51, %v703_v56  ;;  %v1018_v51 = vrot.slane %v4645_v30, 1 }
  0xb6   :  { %v1666_v37 = vsel %vm1656_vm6, %v1601_v20, %v1214_v35  ;;  %v383_v35 = vsel %vm146_vm0, %v184_v6, 0.0 }
  0xb7   :  { %1297 = vrot.lane.b32.xlu0 %v4639_v42, %s4062_s7  ;;  %1241 = vrot.lane.b32.xlu1 %v4588_v34, %s4064_s15  ;;  %v1731_v48 = vsel %vm1721_vm7, %v1666_v37, %v1286_v32  ;;  %v4751_v30 = vsel %vm960_vm1, %v1017_v11, %v1018_v51 }
  0xb9   :  { %v1412_v46 = vpop.permute.xlu0 %1411  ;;  %v1350_v22 = vpop.permute.xlu1 %1349 }
  0xba   :  { %v1796_v29 = vsel %vm1786_vm8, %v1731_v48, %v1350_v22 }
  0xbb   :  { %1361 = vrot.lane.b32.xlu0 %v4610_v62, %s4061_s6  ;;  %1313 = vrot.lane.b32.xlu1 %v4655_v52, %s4062_s7  ;;  %v1864_v60 = vsel %vm1850_vm9, %v1796_v29, %v1412_v46  ;;  %v4722_v46 = vpack.c.bf16 %v383_v35, %v383_v35  ;;  %v45_v35 = vld [vmem:[%s6998_s0 + $0xd8] sm:$0xff] }
  0xbc   :  { %2176 = vmatmul.mubr.bf16.gmra.mrb[16].mxu0 %v1864_v60 }
  0xbd   :  { %v1064_v54 = vpop.permute.xlu0 %1063  ;;  %v848_v55 = vpop.permute.xlu1 %847  ;;  %3670 = vmatprep.mubr.msk.bf16.mxu0 %vm1465_vm3, %v4382_v3  ;;  %v183_v3 = vrot.slane %v42_v58, 7 }
  0xbe   :  { %v1477_v2 = vsel %vm1465_vm3, %v4248_v33, %v848_v55  ;;  %v58_v33 = vld [vmem:[%s6998_s0 + $0x140] sm:$0xff]  ;;  %v4738_v55 = vsel %vm960_vm1, %v996_v40, %v997_v41 }
  0xbf   :  { %1423 = vrot.lane.b32.xlu0 %v4667_v49, %s4063_s14  ;;  %1377 = vrot.lane.b32.xlu1 %v4628_v14, %s4061_s6  ;;  %v1540_v57 = vsel %vm1528_vm4, %v1477_v2, %v1064_v54  ;;  %v185_v16 = vsel %vm146_vm0, %v183_v3, %v184_v6  ;;  %v351_v5 = vsel %vm146_vm0, 0.0, %v183_v3  ;;  %v207_v24 = vrot.slane %v58_v33, 7 }
  0xc1   :  { %v1216_v18 = vpop.permute.xlu0 %1215  ;;  %v1128_v7 = vpop.permute.xlu1 %1127  ;;  %v209_v37 = vsel %vm146_vm0, %v207_v24, %v208_v0  ;;  %v359_v38 = vsel %vm146_vm0, 0.0, %v207_v24 }
  0xc2   :  { %v1603_v26 = vsel %vm1591_vm5, %v1540_v57, %v1128_v7  ;;  %v4724_v48 = vpack.c.bf16 %v209_v37, %v359_v38 }
  0xc3   :  { %859 = vrot.lane.b32.xlu0 %v4571_v19, %s4057_s23  ;;  %1439 = vrot.lane.b32.xlu1 %v4684_v4, %s4063_s14  ;;  %v1668_v21 = vsel %vm1656_vm6, %v1603_v26, %v1216_v18  ;;  %v4706_v19 = vpack.c.bf16 %v185_v16, %v351_v5 }
  0xc4   :  { %v708_v63 = vshll.u32 %v4724_v48, 16  ;;  %v706_v26 = vshrl.u32 %v4724_v48, 16 }
  0xc5   :  { %v1352_v12 = vpop.permute.xlu0 %1351  ;;  %v1288_v23 = vpop.permute.xlu1 %1287  ;;  %v622_v56 = vshrl.u32 %v4706_v19, 16 }
  0xc6   :  { %v1733_v25 = vsel %vm1721_vm7, %v1668_v21, %v1288_v23  ;;  %v710_v33 = vrot.slane %v708_v63, 1 }
  0xc7   :  { %1075 = vrot.lane.b32.xlu0 %v4639_v42, %s4059_s28  ;;  %873 = vrot.lane.b32.xlu1 %v4588_v34, %s4057_s23  ;;  %v1798_v20 = vsel %vm1786_vm8, %v1733_v25, %v1352_v12  ;;  %v624_v34 = vshll.u32 %v4706_v19, 16 }
  0xc9   :  { %v850_v31 = vpop.permute.xlu0 %849  ;;  %v1414_v32 = vpop.permute.xlu1 %1413  ;;  %v626_v54 = vrot.slane %v624_v34, 1 }
  0xca   :  { %v1867_v17 = vsel %vm1850_vm9, %v1798_v20, %v1414_v32  ;;  %v1479_v44 = vsel %vm1465_vm3, %v4289_v59, %v850_v31  ;;  %v391_v59 = vsel %vm146_vm0, %v208_v0, 0.0  ;;  %v711_v0 = vor.u32 %v710_v33, %v706_v26  ;;  %v44_v20 = vld [vmem:[%s6998_s0 + $0xd0] sm:$0xff] }
  0xcb   :  { %1139 = vrot.lane.b32.xlu0 %v4610_v62, %s4060_s29  ;;  %1089 = vrot.lane.b32.xlu1 %v4655_v52, %s4059_s28  ;;  %v4741_v58 = vpack.c.bf16 %v391_v59, %v391_v59  ;;  %v627_v57 = vor.u32 %v626_v54, %v622_v56  ;;  %v999_v33 = vrot.slane %v4706_v19, 1 }
  0xcc   :  { %2184 = vmatmul.mubr.bf16.gmra.mrb[20].mxu0 %v1867_v17  ;;  %v187_v17 = vrot.slane %v45_v35, 7 }
  0xcd   :  { %v1130_v22 = vpop.permute.xlu0 %1129  ;;  %v1066_v29 = vpop.permute.xlu1 %1065  ;;  %3671 = vmatprep.mubr.msk.bf16.mxu0 %vm1465_vm3, %v4420_v36  ;;  %v629_v36 = vshll.u32 %v4722_v46, 16  ;;  %v713_v15 = vshll.u32 %v4741_v58, 16 }
  0xce   :  { %v1542_v60 = vsel %vm1528_vm4, %v1479_v44, %v1066_v29  ;;  %v384_v63 = vsel %vm146_vm0, %v187_v17, 0.0 }
  0xcf   :  { %1227 = vrot.lane.b32.xlu0 %v4667_v49, %s4064_s15  ;;  %1155 = vrot.lane.b32.xlu1 %v4628_v14, %s4060_s29  ;;  %v1605_v3 = vsel %vm1591_vm5, %v1542_v60, %v1130_v22  ;;  %v631_v7 = vrot.slane %v629_v36, 1  ;;  %v715_v25 = vrot.slane %v713_v15, 1  ;;  %v61_v22 = vld [vmem:[%s6998_s0 + $0x158] sm:$0xff]  ;;  %v1000_v15 = vrot.slane %v4722_v46, 1 }
  0xd0   :  { %v211_v54 = vrot.slane %v61_v22, 7 }
  0xd1   :  { %v1290_v2 = vpop.permute.xlu0 %1289  ;;  %v1218_v6 = vpop.permute.xlu1 %1217  ;;  %v4763_v24 = vsel %vm468_vm2, %v627_v57, %v631_v7  ;;  %v4780_v38 = vsel %vm468_vm2, %v711_v0, %v715_v25  ;;  %v1021_v0 = vrot.slane %v4741_v58, 1 }
  0xd2   :  { %v1670_v18 = vsel %vm1656_vm6, %v1605_v3, %v1218_v6 }
  0xd3   :  { %1299 = vrot.lane.b32.xlu0 %v4738_v55, %s4062_s7  ;;  %1243 = vrot.lane.b32.xlu1 %v4684_v4, %s4064_s15  ;;  %v1735_v5 = vsel %vm1721_vm7, %v1670_v18, %v1290_v2 }
  0xd5   :  { %v1416_v16 = vpop.permute.xlu0 %1415  ;;  %v1354_v12 = vpop.permute.xlu1 %1353 }
  0xd6   :  { %v1800_v21 = vsel %vm1786_vm8, %v1735_v5, %v1354_v12 }
  0xd7   :  { %1363 = vrot.lane.b32.xlu0 %v4706_v19, %s4061_s6  ;;  %1315 = vrot.lane.b32.xlu1 %v4751_v30, %s4062_s7  ;;  %v1870_v23 = vsel %vm1850_vm9, %v1800_v21, %v1416_v16  ;;  %v392_v21 = vsel %vm146_vm0, %v211_v54, 0.0 }
  0xd8   :  { %2192 = vmatmul.mubr.bf16.gmra.mrb[24].mxu0 %v1870_v23  ;;  %v1020_v23 = vrot.slane %v4724_v48, 1 }
  0xd9   :  { %v1068_v31 = vpop.permute.xlu0 %1067  ;;  %v852_v32 = vpop.permute.xlu1 %851  ;;  %3672 = vmatprep.mubr.msk.bf16.mxu0 %vm1465_vm3, %v4451_v8  ;;  %v186_v8 = vrot.slane %v44_v20, 7 }
  0xda   :  { %v1481_v37 = vsel %vm1465_vm3, %v4332_v28, %v852_v32  ;;  %v60_v28 = vld [vmem:[%s6998_s0 + $0x150] sm:$0xff]  ;;  %v4832_v32 = vsel %vm960_vm1, %v999_v33, %v1000_v15  ;;  %v4842_v58 = vsel %vm960_vm1, %v1020_v23, %v1021_v0  ;;  %v62_v33 = vld [vmem:[%s6998_s0 + $0x160] sm:$0xff]  ;;  %v63_v15 = vld [vmem:[%s6998_s0 + $0x168] sm:$0xff] }
  0xdb   :  { %1425 = vrot.lane.b32.xlu0 %v4763_v24, %s4063_s14  ;;  %1379 = vrot.lane.b32.xlu1 %v4724_v48, %s4061_s6  ;;  %v1544_v34 = vsel %vm1528_vm4, %v1481_v37, %v1068_v31  ;;  %v188_v29 = vsel %vm146_vm0, %v186_v8, %v187_v17  ;;  %v352_v59 = vsel %vm146_vm0, 0.0, %v186_v8  ;;  %v210_v56 = vrot.slane %v60_v28, 7 }
  0xdc   :  { %v213_v0 = vrot.slane %v62_v33, 7 }
  0xdd   :  { %v1220_v44 = vpop.permute.xlu0 %1219  ;;  %v1132_v40 = vpop.permute.xlu1 %1131  ;;  %v212_v18 = vsel %vm146_vm0, %v210_v56, %v211_v54  ;;  %v360_v57 = vsel %vm146_vm0, 0.0, %v210_v56  ;;  %v46_v54 = vld [vmem:[%s6998_s0 + $0xe0] sm:$0xff] }
  0xde   :  { %v1607_v41 = vsel %vm1591_vm5, %v1544_v34, %v1132_v40  ;;  %v4818_v16 = vpack.c.bf16 %v212_v18, %v360_v57 }
  0xdf   :  { %861 = vrot.lane.b32.xlu0 %v4667_v49, %s4057_s23  ;;  %1441 = vrot.lane.b32.xlu1 %v4780_v38, %s4063_s14  ;;  %v1672_v11 = vsel %vm1656_vm6, %v1607_v41, %v1220_v44  ;;  %v4802_v49 = vpack.c.bf16 %v188_v29, %v352_v59 }
  0xe0   :  { %v720_v20 = vshll.u32 %v4818_v16, 16  ;;  %v718_v34 = vshrl.u32 %v4818_v16, 16 }
  0xe1   :  { %v1356_v60 = vpop.permute.xlu0 %1355  ;;  %v1292_v51 = vpop.permute.xlu1 %1291  ;;  %v636_v26 = vshll.u32 %v4802_v49, 16  ;;  %v634_v46 = vshrl.u32 %v4802_v49, 16 }
  0xe2   :  { %v1737_v36 = vsel %vm1721_vm7, %v1672_v11, %v1292_v51  ;;  %v722_v40 = vrot.slane %v720_v20, 1 }
  0xe3   :  { %1077 = vrot.lane.b32.xlu0 %v4738_v55, %s4059_s28  ;;  %875 = vrot.lane.b32.xlu1 %v4684_v4, %s4057_s23  ;;  %v1802_v6 = vsel %vm1786_vm8, %v1737_v36, %v1356_v60  ;;  %v4813_v4 = vpack.c.bf16 %v384_v63, %v384_v63  ;;  %v638_v25 = vrot.slane %v636_v26, 1  ;;  %v47_v36 = vld [vmem:[%s6998_s0 + $0xe8] sm:$0xff] }
  0xe4   :  { %v723_v60 = vor.u32 %v722_v40, %v718_v34  ;;  %v190_v26 = vrot.slane %v47_v36, 7 }
  0xe5   :  { %v854_v2 = vpop.permute.xlu0 %853  ;;  %v1418_v3 = vpop.permute.xlu1 %1417  ;;  %v641_v31 = vshll.u32 %v4813_v4, 16  ;;  %v639_v8 = vor.u32 %v638_v25, %v634_v46  ;;  %v214_v46 = vrot.slane %v63_v15, 7 }
  0xe6   :  { %v1873_v7 = vsel %vm1850_vm9, %v1802_v6, %v1418_v3  ;;  %v1483_v44 = vsel %vm1465_vm3, %v4358_v47, %v854_v2  ;;  %v385_v40 = vsel %vm146_vm0, %v190_v26, 0.0 }
  0xe7   :  { %1141 = vrot.lane.b32.xlu0 %v4706_v19, %s4060_s29  ;;  %1091 = vrot.lane.b32.xlu1 %v4751_v30, %s4059_s28  ;;  %v643_v17 = vrot.slane %v641_v31, 1 }
  0xe8   :  { %2200 = vmatmul.mubr.bf16.gmra.mrb[28].mxu0 %v1873_v7  ;;  %v189_v7 = vrot.slane %v46_v54, 7 }
  0xe9   :  { %v1134_v5 = vpop.permute.xlu0 %1133  ;;  %v1070_v12 = vpop.permute.xlu1 %1069  ;;  %3673 = vmatprep.mubr.msk.bf16.mxu0 %vm1465_vm3, %v4549_v50  ;;  %v4834_v50 = vpack.c.bf16 %v392_v21, %v392_v21  ;;  %v4854_v59 = vsel %vm468_vm2, %v639_v8, %v643_v17  ;;  %v215_v8 = vsel %vm146_vm0, %v213_v0, %v214_v46  ;;  %v361_v17 = vsel %vm146_vm0, 0.0, %v213_v0 }
  0xea   :  { %v1546_v29 = vsel %vm1528_vm4, %v1483_v44, %v1070_v12 }
  0xeb   :  { %1229 = vrot.lane.b32.xlu0 %v4763_v24, %s4064_s15  ;;  %1157 = vrot.lane.b32.xlu1 %v4724_v48, %s4060_s29  ;;  %v725_v41 = vshll.u32 %v4834_v50, 16  ;;  %v1609_v56 = vsel %vm1591_vm5, %v1546_v29, %v1134_v5  ;;  %v393_v29 = vsel %vm146_vm0, %v214_v46, 0.0 }
  0xed   :  { %v1222_v35 = vpop.permute.xlu0 %1221  ;;  %v1150_v37 = vpop.permute.xlu1 %1149  ;;  %v727_v47 = vrot.slane %v725_v41, 1  ;;  %v4911_v41 = vpack.c.bf16 %v215_v8, %v361_v17 }
  0xee   :  { %v1674_v63 = vsel %vm1656_vm6, %v1609_v56, %v1222_v35  ;;  %v1625_v5 = vsel %vm1591_vm5, %v4464_v27, %v1150_v37  ;;  %v191_v27 = vsel %vm146_vm0, %v189_v7, %v190_v26  ;;  %v353_v35 = vsel %vm146_vm0, 0.0, %v189_v7 }
  0xef   :  { %1301 = vrot.lane.b32.xlu0 %v4832_v32, %s4062_s7  ;;  %1245 = vrot.lane.b32.xlu1 %v4780_v38, %s4064_s15  ;;  %v4870_v3 = vsel %vm468_vm2, %v723_v60, %v727_v47  ;;  %v4898_v37 = vpack.c.bf16 %v191_v27, %v353_v35  ;;  %v1024_v56 = vrot.slane %v4834_v50, 1  ;;  %v48_v27 = vld [vmem:[%s6998_s0 + $0xf0] sm:$0xff] }
  0xf1   :  { %v1294_v28 = vpop.permute.xlu0 %1293  ;;  %v1238_v22 = vpop.permute.xlu1 %1237  ;;  %v646_v54 = vshrl.u32 %v4898_v37, 16 }
  0xf2   :  { %v1739_v2 = vsel %vm1721_vm7, %v1674_v63, %v1294_v28  ;;  %v1690_v21 = vsel %vm1656_vm6, %v1625_v5, %v1238_v22  ;;  %v4913_v28 = vpack.c.bf16 %v385_v40, %v385_v40  ;;  %v648_v22 = vshll.u32 %v4898_v37, 16 }
  0xf3   :  { %1365 = vrot.lane.b32.xlu0 %v4802_v49, %s4061_s6  ;;  %1317 = vrot.lane.b32.xlu1 %v4842_v58, %s4062_s7 }
  0xf4   :  { %v650_v36 = vrot.slane %v648_v22, 1  ;;  %v653_v63 = vshll.u32 %v4913_v28, 16 }
  0xf5   :  { %v1358_v11 = vpop.permute.xlu0 %1357  ;;  %v1310_v51 = vpop.permute.xlu1 %1309 }
  0xf6   :  { %v1804_v6 = vsel %vm1786_vm8, %v1739_v2, %v1358_v11  ;;  %v1755_v23 = vsel %vm1721_vm7, %v1690_v21, %v1310_v51  ;;  %v4925_v11 = vpack.c.bf16 %v393_v29, %v393_v29  ;;  %v732_v51 = vshll.u32 %v4911_v41, 16 }
  0xf7   :  { %1427 = vrot.lane.b32.xlu0 %v4854_v59, %s4063_s14  ;;  %1381 = vrot.lane.b32.xlu1 %v4818_v16, %s4061_s6  ;;  %v651_v26 = vor.u32 %v650_v36, %v646_v54  ;;  %v655_v33 = vrot.slane %v653_v63, 1 }
  0xf8   :  { %v737_v7 = vshll.u32 %v4925_v11, 16 }
  0xf9   :  { %v1420_v18 = vpop.permute.xlu0 %1419  ;;  %v1374_v57 = vpop.permute.xlu1 %1373  ;;  %v4947_v0 = vsel %vm468_vm2, %v651_v26, %v655_v33 }
  0xfa   :  { %v1876_v12 = vsel %vm1850_vm9, %v1804_v6, %v1420_v18  ;;  %v1820_v25 = vsel %vm1786_vm8, %v1755_v23, %v1374_v57  ;;  %v730_v18 = vshrl.u32 %v4911_v41, 16  ;;  %v734_v57 = vrot.slane %v732_v51, 1  ;;  %v64_v51 = vld [vmem:[%s6998_s0 + $0x170] sm:$0xff] }
  0xfb   :  { %863 = vrot.lane.b32.xlu0 %v4763_v24, %s4057_s23  ;;  %1443 = vrot.lane.b32.xlu1 %v4870_v3, %s4063_s14  ;;  %v739_v23 = vrot.slane %v737_v7, 1 }
  0xfc   :  { %2208 = vmatmul.mubr.bf16.gmra.mrb[32].mxu0 %v1876_v12  ;;  %v735_v21 = vor.u32 %v734_v57, %v730_v18 }
  0xfd   :  { %v856_v31 = vpop.permute.xlu0 %855  ;;  %v1436_v20 = vpop.permute.xlu1 %1435  ;;  %3674 = vmatprep.mubr.msk.bf16.mxu0 %vm1465_vm3, %v4639_v42  ;;  %v1002_v42 = vrot.slane %v4802_v49, 1 }
  0xfe   :  { %v1900_v24 = vsel %vm1850_vm9, %v1820_v25, %v1436_v20  ;;  %v1485_v12 = vsel %vm1465_vm3, %v4390_v13, %v856_v31  ;;  %v49_v13 = vld [vmem:[%s6998_s0 + $0xf8] sm:$0xff] }
  0xff   :  { %1079 = vrot.lane.b32.xlu0 %v4832_v32, %s4059_s28  ;;  %877 = vrot.lane.b32.xlu1 %v4780_v38, %s4057_s23  ;;  %v1003_v38 = vrot.slane %v4813_v4, 1  ;;  %v1023_v4 = vrot.slane %v4818_v16, 1  ;;  %v193_v40 = vrot.slane %v49_v13, 7 }
 0x100   :  { %2272 = vmatmul.mubr.bf16.vlgmr.msra.gmra.mrb[0].mxu1 %v1900_v24  ;;  %v4963_v24 = vsel %vm468_vm2, %v735_v21, %v739_v23 }
 0x101   :  { %v1072_v44 = vpop.permute.xlu0 %1071  ;;  %v870_v34 = vpop.permute.xlu1 %869  ;;  %3682 = vmatprep.mubr.msk.bf16.mxu1 %vm1465_vm3, %v4655_v52  ;;  %v4922_v47 = vsel %vm960_vm1, %v1002_v42, %v1003_v38  ;;  %v4938_v50 = vsel %vm960_vm1, %v1023_v4, %v1024_v56  ;;  %v386_v33 = vsel %vm146_vm0, %v193_v40, 0.0 }
 0x102   :  { %v1548_v46 = vsel %vm1528_vm4, %v1485_v12, %v1072_v44  ;;  %v1499_v8 = vsel %vm1465_vm3, %v4422_v39, %v870_v34  ;;  %v192_v44 = vrot.slane %v48_v27, 7  ;;  %v65_v39 = vld [vmem:[%s6998_s0 + $0x178] sm:$0xff]  ;;  %v1006_v12 = vrot.slane %v4913_v28, 1 }
 0x103   :  { %1143 = vrot.lane.b32.xlu0 %v4802_v49, %s4060_s29  ;;  %1093 = vrot.lane.b32.xlu1 %v4842_v58, %s4059_s28  ;;  %v217_v18 = vrot.slane %v65_v39, 7  ;;  %v5008_v21 = vpack.c.bf16 %v386_v33, %v386_v33  ;;  %v1027_v27 = vrot.slane %v4925_v11, 1 }
 0x104   :  { %v194_v56 = vsel %vm146_vm0, %v192_v44, %v193_v40  ;;  %v354_v54 = vsel %vm146_vm0, 0.0, %v192_v44 }
 0x105   :  { %v1136_v60 = vpop.permute.xlu0 %1135  ;;  %v1086_v52 = vpop.permute.xlu1 %1085  ;;  %v4994_v57 = vpack.c.bf16 %v194_v56, %v354_v54 }
 0x106   :  { %v1611_v31 = vsel %vm1591_vm5, %v1548_v46, %v1136_v60  ;;  %v1562_v42 = vsel %vm1528_vm4, %v1499_v8, %v1086_v52 }
 0x107   :  { %1231 = vrot.lane.b32.xlu0 %v4854_v59, %s4064_s15  ;;  %1159 = vrot.lane.b32.xlu1 %v4818_v16, %s4060_s29  ;;  %v1182_v28 = vshrl.u32 %v4994_v57, 16 }
 0x109   :  { %v1224_v2 = vpop.permute.xlu0 %1223  ;;  %v1152_v6 = vpop.permute.xlu1 %1151 }
 0x10a   :  { %v1676_v35 = vsel %vm1656_vm6, %v1611_v31, %v1224_v2  ;;  %v1627_v60 = vsel %vm1591_vm5, %v1562_v42, %v1152_v6  ;;  %v216_v6 = vrot.slane %v64_v51, 7 }
 0x10b   :  { %1303 = vrot.lane.b32.xlu0 %v4922_v47, %s4062_s7  ;;  %1247 = vrot.lane.b32.xlu1 %v4870_v3, %s4064_s15 }
 0x10d   :  { %v1296_v15 = vpop.permute.xlu0 %1295  ;;  %v1240_v5 = vpop.permute.xlu1 %1239 }
 0x10e   :  { %v1741_v17 = vsel %vm1721_vm7, %v1676_v35, %v1296_v15  ;;  %v1692_v34 = vsel %vm1656_vm6, %v1627_v60, %v1240_v5  ;;  %v218_v15 = vsel %vm146_vm0, %v216_v6, %v217_v18  ;;  %v362_v5 = vsel %vm146_vm0, 0.0, %v216_v6 }
 0x10f   :  { %1367 = vrot.lane.b32.xlu0 %v4898_v37, %s4061_s6  ;;  %1319 = vrot.lane.b32.xlu1 %v4938_v50, %s4062_s7  ;;  %v5010_v23 = vpack.c.bf16 %v218_v15, %v362_v5  ;;  %v1189_v35 = vshll.u32 %v5008_v21, 16 }
 0x111   :  { %v1360_v25 = vpop.permute.xlu0 %1359  ;;  %v1312_v20 = vpop.permute.xlu1 %1311 }
 0x112   :  { %v1806_v38 = vsel %vm1786_vm8, %v1741_v17, %v1360_v25  ;;  %v1757_v52 = vsel %vm1721_vm7, %v1692_v34, %v1312_v20  ;;  %v1026_v20 = vrot.slane %v4911_v41, 1  ;;  %v744_v17 = vshll.u32 %v5010_v23, 16 }
 0x113   :  { %1429 = vrot.lane.b32.xlu0 %v4947_v0, %s4063_s14  ;;  %1383 = vrot.lane.b32.xlu1 %v4911_v41, %s4061_s6 }
 0x114   :  { %v5032_v11 = vsel %vm960_vm1, %v1026_v20, %v1027_v27 }
 0x115   :  { %v1422_v22 = vpop.permute.xlu0 %1421  ;;  %v1376_v29 = vpop.permute.xlu1 %1375 }
 0x116   :  { %v1879_v4 = vsel %vm1850_vm9, %v1806_v38, %v1422_v22  ;;  %v1822_v36 = vsel %vm1786_vm8, %v1757_v52, %v1376_v29  ;;  %v1191_v38 = vrot.slane %v1189_v35, 1  ;;  %v742_v22 = vshrl.u32 %v5010_v23, 16 }
 0x117   :  { %865 = vrot.lane.b32.xlu0 %v4854_v59, %s4057_s23  ;;  %1445 = vrot.lane.b32.xlu1 %v4963_v24, %s4063_s14  ;;  %v746_v29 = vrot.slane %v744_v17, 1 }
 0x118   :  { %2216 = vmatmul.mubr.bf16.gmra.mrb[36].mxu0 %v1879_v4 }
 0x119   :  { %v858_v63 = vpop.permute.xlu0 %857  ;;  %v1438_v2 = vpop.permute.xlu1 %1437  ;;  %3675 = vmatprep.mubr.msk.bf16.mxu0 %vm1465_vm3, %v4738_v55  ;;  %v1184_v55 = vshll.u32 %v4994_v57, 16  ;;  %v747_v52 = vor.u32 %v746_v29, %v742_v22  ;;  %v1029_v29 = vrot.slane %v5010_v23, 1 }
 0x11a   :  { %v1903_v59 = vsel %vm1850_vm9, %v1822_v36, %v1438_v2  ;;  %v1487_v39 = vsel %vm1465_vm3, %v4439_v53, %v858_v63 }
 0x11b   :  { %1081 = vrot.lane.b32.xlu0 %v4922_v47, %s4059_s28  ;;  %879 = vrot.lane.b32.xlu1 %v4870_v3, %s4057_s23  ;;  %v1005_v3 = vrot.slane %v4898_v37, 1  ;;  %v1186_v13 = vrot.slane %v1184_v55, 1 }
 0x11c   :  { %2280 = vmatmul.mubr.bf16.gmra.mrb[4].mxu1 %v1903_v59 }
 0x11d   :  { %v1074_v7 = vpop.permute.xlu0 %1073  ;;  %v872_v26 = vpop.permute.xlu1 %871  ;;  %3683 = vmatprep.mubr.msk.bf16.mxu1 %vm1465_vm3, %v4751_v30  ;;  %v394_v30 = vsel %vm146_vm0, %v217_v18, 0.0  ;;  %v5021_v31 = vsel %vm960_vm1, %v1005_v3, %v1006_v12  ;;  %v1187_v42 = vor.u32 %v1186_v13, %v1182_v28  ;;  %v66_v12 = vld [vmem:[%s6998_s0 + $0x180] sm:$0xff] }
 0x11e   :  { %v5024_v8 = vpack.c.bf16 %v394_v30, %v394_v30  ;;  %v1550_v54 = vsel %vm1528_vm4, %v1487_v39, %v1074_v7  ;;  %v1501_v53 = vsel %vm1465_vm3, %v4292_v61, %v872_v26  ;;  %v67_v61 = vld [vmem:[%s6998_s0 + $0x188] sm:$0xff]  ;;  %v219_v27 = vrot.slane %v66_v12, 7 }
 0x11f   :  { %1145 = vrot.lane.b32.xlu0 %v4898_v37, %s4060_s29  ;;  %1095 = vrot.lane.b32.xlu1 %v4938_v50, %s4059_s28  ;;  %v1192_v34 = vsel %vm468_vm2, %v1187_v42, %v1191_v38  ;;  %v220_v28 = vrot.slane %v67_v61, 7 }
 0x120   :  { %v749_v60 = vshll.u32 %v5024_v8, 16 }
 0x121   :  { %v1138_v46 = vpop.permute.xlu0 %1137  ;;  %v1088_v25 = vpop.permute.xlu1 %1087  ;;  %v221_v17 = vsel %vm146_vm0, %v219_v27, %v220_v28  ;;  %v395_v22 = vsel %vm146_vm0, %v220_v28, 0.0 }
 0x122   :  { %v751_v56 = vrot.slane %v749_v60, 1  ;;  %v1613_v6 = vsel %vm1591_vm5, %v1550_v54, %v1138_v46  ;;  %v1564_v7 = vsel %vm1528_vm4, %v1501_v53, %v1088_v25  ;;  %v1030_v60 = vrot.slane %v5024_v8, 1 }
 0x123   :  { %1233 = vrot.lane.b32.xlu0 %v4947_v0, %s4064_s15  ;;  %1161 = vrot.lane.b32.xlu1 %v4911_v41, %s4060_s29 }
 0x124   :  { %v5053_v59 = vsel %vm468_vm2, %v747_v52, %v751_v56  ;;  %v5114_v54 = vsel %vm960_vm1, %v1029_v29, %v1030_v60 }
 0x125   :  { %v1226_v44 = vpop.permute.xlu0 %1225  ;;  %v1154_v40 = vpop.permute.xlu1 %1153 }
 0x126   :  { %v1678_v18 = vsel %vm1656_vm6, %v1613_v6, %v1226_v44  ;;  %v1629_v55 = vsel %vm1591_vm5, %v1564_v7, %v1154_v40  ;;  %v363_v44 = vsel %vm146_vm0, 0.0, %v219_v27 }
 0x127   :  { %1305 = vrot.lane.b32.xlu0 %v5021_v31, %s4062_s7  ;;  %1249 = vrot.lane.b32.xlu1 %v4963_v24, %s4064_s15  ;;  %v5089_v40 = vpack.c.bf16 %v221_v17, %v363_v44 }
 0x129   :  { %v1298_v4 = vpop.permute.xlu0 %1297  ;;  %v1242_v51 = vpop.permute.xlu1 %1241 }
 0x12a   :  { %v1743_v63 = vsel %vm1721_vm7, %v1678_v18, %v1298_v4  ;;  %v1694_v26 = vsel %vm1656_vm6, %v1629_v55, %v1242_v51  ;;  %v5106_v4 = vpack.c.bf16 %v395_v22, %v395_v22  ;;  %v756_v51 = vshll.u32 %v5089_v40, 16 }
 0x12b   :  { %1369 = vrot.lane.b32.xlu0 %v4994_v57, %s4061_s6  ;;  %1321 = vrot.lane.b32.xlu1 %v5032_v11, %s4062_s7 }
 0x12c   :  { %v758_v8 = vrot.slane %v756_v51, 1  ;;  %v1033_v22 = vrot.slane %v5106_v4, 1 }
 0x12d   :  { %v1362_v36 = vpop.permute.xlu0 %1361  ;;  %v1314_v2 = vpop.permute.xlu1 %1313 }
 0x12e   :  { %v1808_v33 = vsel %vm1786_vm8, %v1743_v63, %v1362_v36  ;;  %v1759_v46 = vsel %vm1721_vm7, %v1694_v26, %v1314_v2  ;;  %v754_v36 = vshrl.u32 %v5089_v40, 16  ;;  %v761_v2 = vshll.u32 %v5106_v4, 16 }
 0x12f   :  { %1431 = vrot.lane.b32.xlu0 %v1192_v34, %s4063_s14  ;;  %1385 = vrot.lane.b32.xlu1 %v5010_v23, %s4061_s6 }
 0x131   :  { %v1424_v15 = vpop.permute.xlu0 %1423  ;;  %v1378_v5 = vpop.permute.xlu1 %1377 }
 0x132   :  { %v1882_v3 = vsel %vm1850_vm9, %v1808_v33, %v1424_v15  ;;  %v1824_v25 = vsel %vm1786_vm8, %v1759_v46, %v1378_v5  ;;  %v759_v33 = vor.u32 %v758_v8, %v754_v36  ;;  %v763_v15 = vrot.slane %v761_v2, 1 }
 0x133   :  { %867 = vrot.lane.b32.xlu0 %v4947_v0, %s4057_s23  ;;  %1447 = vrot.lane.b32.xlu1 %v5053_v59, %s4063_s14 }
 0x134   :  { %2224 = vmatmul.mubr.bf16.gmra.mrb[40].mxu0 %v1882_v3 }
 0x135   :  { %v860_v30 = vpop.permute.xlu0 %859  ;;  %v1440_v20 = vpop.permute.xlu1 %1439  ;;  %3676 = vmatprep.mubr.msk.bf16.mxu0 %vm1465_vm3, %v4832_v32  ;;  %v1271_v32 = vrot.slane %v4994_v57, 1 }
 0x136   :  { %v1906_v13 = vsel %vm1850_vm9, %v1824_v25, %v1440_v20  ;;  %v1489_v53 = vsel %vm1465_vm3, %v4520_v43, %v860_v30  ;;  %v5140_v25 = vsel %vm468_vm2, %v759_v33, %v763_v15  ;;  %v70_v30 = vld [vmem:[%s6998_s0 + $0x1a0] sm:$0xff]  ;;  %v71_v20 = vld [vmem:[%s6998_s0 + $0x1a8] sm:$0xff] }
 0x137   :  { %1083 = vrot.lane.b32.xlu0 %v5021_v31, %s4059_s28  ;;  %881 = vrot.lane.b32.xlu1 %v4963_v24, %s4057_s23  ;;  %v1272_v24 = vrot.slane %v5008_v21, 1  ;;  %v69_v21 = vld [vmem:[%s6998_s0 + $0x198] sm:$0xff] }
 0x138   :  { %2288 = vmatmul.mubr.bf16.gmra.mrb[8].mxu1 %v1906_v13  ;;  %v223_v56 = vrot.slane %v69_v21, 7 }
 0x139   :  { %v1076_v0 = vpop.permute.xlu0 %1075  ;;  %v874_v35 = vpop.permute.xlu1 %873  ;;  %3684 = vmatprep.mubr.msk.bf16.mxu1 %vm1465_vm3, %v4842_v58  ;;  %v5096_v58 = vsel %vm960_vm1, %v1271_v32, %v1272_v24  ;;  %v225_v32 = vrot.slane %v70_v30, 7  ;;  %v226_v24 = vrot.slane %v71_v20, 7 }
 0x13a   :  { %v1552_v5 = vsel %vm1528_vm4, %v1489_v53, %v1076_v0  ;;  %v396_v61 = vsel %vm146_vm0, %v223_v56, 0.0 }
 0x13b   :  { %1147 = vrot.lane.b32.xlu0 %v4994_v57, %s4060_s29  ;;  %1097 = vrot.lane.b32.xlu1 %v5032_v11, %s4059_s28  ;;  %v68_v57 = vld [vmem:[%s6998_s0 + $0x190] sm:$0xff]  ;;  %v365_v4 = vsel %vm146_vm0, 0.0, %v225_v32 }
 0x13c   :  { %v222_v52 = vrot.slane %v68_v57, 7 }
 0x13d   :  { %v1140_v42 = vpop.permute.xlu0 %1139  ;;  %v1090_v38 = vpop.permute.xlu1 %1089 }
 0x13e   :  { %v224_v63 = vsel %vm146_vm0, %v222_v52, %v223_v56  ;;  %v364_v7 = vsel %vm146_vm0, 0.0, %v222_v52  ;;  %v1615_v43 = vsel %vm1591_vm5, %v1552_v5, %v1140_v42 }
 0x13f   :  { %1235 = vrot.lane.b32.xlu0 %v1192_v34, %s4064_s15  ;;  %1163 = vrot.lane.b32.xlu1 %v5010_v23, %s4060_s29  ;;  %v5127_v12 = vpack.c.bf16 %v224_v63, %v364_v7  ;;  %v73_v7 = vld [vmem:[%s6998_s0 + $0x1b8] sm:$0xff] }
 0x140   :  { %v229_v20 = vrot.slane %v73_v7, 7 }
 0x141   :  { %v1228_v39 = vpop.permute.xlu0 %1227  ;;  %v1156_v34 = vpop.permute.xlu1 %1155  ;;  %v768_v0 = vshll.u32 %v5127_v12, 16  ;;  %v766_v60 = vshrl.u32 %v5127_v12, 16 }
 0x142   :  { %v1680_v26 = vsel %vm1656_vm6, %v1615_v43, %v1228_v39 }
 0x143   :  { %1307 = vrot.lane.b32.xlu0 %v5096_v58, %s4062_s7  ;;  %1251 = vrot.lane.b32.xlu1 %v5053_v59, %s4064_s15  ;;  %v770_v51 = vrot.slane %v768_v0, 1 }
 0x145   :  { %v1300_v6 = vpop.permute.xlu0 %1299  ;;  %v1244_v18 = vpop.permute.xlu1 %1243  ;;  %v771_v36 = vor.u32 %v770_v51, %v766_v60 }
 0x146   :  { %v1745_v46 = vsel %vm1721_vm7, %v1680_v26, %v1300_v6  ;;  %v397_v6 = vsel %vm146_vm0, %v226_v24, 0.0 }
 0x147   :  { %1371 = vrot.lane.b32.xlu0 %v4058_v9, %s4061_s6  ;;  %1323 = vrot.lane.b32.xlu1 %v5114_v54, %s4062_s7  ;;  %v1503_v9 = vsel %vm1465_vm3, %v4537_v45, %v874_v35  ;;  %v5150_v45 = vpack.c.bf16 %v396_v61, %v396_v61 }
 0x149   :  { %v1364_v55 = vpop.permute.xlu0 %1363  ;;  %v1316_v3 = vpop.permute.xlu1 %1315  ;;  %v773_v39 = vshll.u32 %v5150_v45, 16 }
 0x14a   :  { %v1810_v27 = vsel %vm1786_vm8, %v1745_v46, %v1364_v55  ;;  %v5202_v55 = vpack.c.bf16 %v397_v6, %v397_v6  ;;  %v75_v6 = vld [vmem:[%s6998_s0 + $0x1c8] sm:$0xff] }
 0x14b   :  { %1433 = vrot.lane.b32.xlu0 %v4092_v1, %s4063_s14  ;;  %1387 = vrot.lane.b32.xlu1 %v5089_v40, %s4061_s6  ;;  %v1566_v1 = vsel %vm1528_vm4, %v1503_v9, %v1090_v38  ;;  %v1032_v38 = vrot.slane %v5089_v40, 1  ;;  %v775_v8 = vrot.slane %v773_v39, 1 }
 0x14c   :  { %v1631_v35 = vsel %vm1591_vm5, %v1566_v1, %v1156_v34 }
 0x14d   :  { %v1426_v28 = vpop.permute.xlu0 %1425  ;;  %v1380_v13 = vpop.permute.xlu1 %1379  ;;  %v1696_v44 = vsel %vm1656_vm6, %v1631_v35, %v1244_v18  ;;  %v5180_v56 = vsel %vm960_vm1, %v1032_v38, %v1033_v22  ;;  %v5195_v63 = vsel %vm468_vm2, %v771_v36, %v775_v8 }
 0x14e   :  { %v1885_v17 = vsel %vm1850_vm9, %v1810_v27, %v1426_v28  ;;  %v1761_v42 = vsel %vm1721_vm7, %v1696_v44, %v1316_v3  ;;  %v785_v44 = vshll.u32 %v5202_v55, 16 }
 0x14f   :  { %2232 = vmatmul.mubr.bf16.gmra.mrb[44].mxu0 %v1885_v17  ;;  %1449 = vrot.lane.b32.xlu1 %v5140_v25, %s4063_s14  ;;  %v1826_v57 = vsel %vm1786_vm8, %v1761_v42, %v1380_v13  ;;  %v1036_v42 = vrot.slane %v5150_v45, 1 }
 0x150   :  { %883 = vrot.lane.b32.xlu0 %v5053_v59, %s4057_s23  ;;  %3677 = vmatprep.mubr.msk.bf16.mxu0 %vm1465_vm3, %v4922_v47  ;;  %v227_v59 = vsel %vm146_vm0, %v225_v32, %v226_v24  ;;  %v1035_v24 = vrot.slane %v5127_v12, 1  ;;  %v787_v39 = vrot.slane %v785_v44, 1 }
 0x151   :  { %v862_v21 = vpop.permute.xlu0 %861  ;;  %v1442_v29 = vpop.permute.xlu1 %1441  ;;  %v5182_v2 = vpack.c.bf16 %v227_v59, %v365_v4 }
 0x152   :  { %v1909_v34 = vsel %vm1850_vm9, %v1826_v57, %v1442_v29  ;;  %v1491_v29 = vsel %vm1465_vm3, %v4610_v62, %v862_v21  ;;  %v5238_v45 = vsel %vm960_vm1, %v1035_v24, %v1036_v42  ;;  %v74_v62 = vld [vmem:[%s6998_s0 + $0x1c0] sm:$0xff] }
 0x153   :  { %1099 = vrot.lane.b32.xlu1 %v5114_v54, %s4059_s28  ;;  %2296 = vmatmul.mubr.bf16.gmra.mrb[12].mxu1 %v1909_v34  ;;  %v780_v3 = vshll.u32 %v5182_v2, 16  ;;  %v778_v28 = vshrl.u32 %v5182_v2, 16  ;;  %v398_v34 = vsel %vm146_vm0, %v229_v20, 0.0 }
 0x154   :  { %1165 = vrot.lane.b32.xlu0 %v5089_v40, %s4060_s29  ;;  %3685 = vmatprep.mubr.msk.bf16.mxu1 %vm1465_vm3, %v4938_v50  ;;  %v72_v50 = vld [vmem:[%s6998_s0 + $0x1b0] sm:$0xff] }
 0x155   :  { %v1078_v47 = vpop.permute.xlu0 %1077  ;;  %v5177_v52 = vpop.permute.xlu1 %875  ;;  %v228_v61 = vrot.slane %v72_v50, 7  ;;  %v782_v17 = vrot.slane %v780_v3, 1 }
 0x156   :  { %v1554_v21 = vsel %vm1528_vm4, %v1491_v29, %v1078_v47  ;;  %v1039_v29 = vrot.slane %v5202_v55, 1 }
 0x157   :  { %1253 = vrot.lane.b32.xlu1 %v5140_v25, %s4064_s15  ;;  %v230_v38 = vsel %vm146_vm0, %v228_v61, %v229_v20  ;;  %v366_v22 = vsel %vm146_vm0, 0.0, %v228_v61  ;;  %v783_v51 = vor.u32 %v782_v17, %v778_v28 }
 0x158   :  { %1325 = vrot.lane.b32.xlu0 %v5180_v56, %s4062_s7 }
 0x159   :  { %v1142_v18 = vpop.permute.xlu0 %1141  ;;  %v5192_v53 = vpop.f32.mrb[0].mxu0  ;;  %v5247_v8 = vsel %vm468_vm2, %v783_v51, %v787_v39 }
 0x15a   :  { %v2533_v33 = vmul.f32 %v5192_v53, %v5192_v53  ;;  %v1092_v15 = vpop.permute.xlu1 %1091  ;;  %v2147_v5 = vpop.f32.mrb[1].mxu0  ;;  %v2400_v26 = vsel %vm1465_vm3, %v5192_v53, 0.0  ;;  %v1617_v4 = vsel %vm1591_vm5, %v1554_v21, %v1142_v18  ;;  %v231_v18 = vrot.slane %v74_v62, 7 }
 0x15b   :  { %v5205_v43 = vpop.f32.mrb[2].mxu0  ;;  %1389 = vrot.lane.b32.xlu1 %v5127_v12, %s4061_s6  ;;  %v1505_v5 = vsel %vm1465_vm3, %v4628_v14, %v5177_v52  ;;  %v232_v52 = vrot.slane %v75_v6, 7 }
 0x15c   :  { %v2401_v9 = vsel %vm1465_vm3, %v5205_v43, 0.0  ;;  %v2534_v46 = vmul.f32 %v5205_v43, %v5205_v43  ;;  %1451 = vrot.lane.b32.xlu0 %v5195_v63, %s4063_s14  ;;  %v2150_v30 = vpop.f32.mrb[3].mxu0  ;;  %v2597_v13 = vsel %vm1465_vm3, %v2533_v33, 0.0  ;;  %v5257_v33 = vpack.c.bf16 %v398_v34, %v398_v34 }
 0x15d   :  { %v2402_v1 = vadd.f32 %v2401_v9, %v2400_v26  ;;  %v1230_v27 = vpop.permute.xlu0 %1229 }
 0x15e   :  { %v2598_v0 = vsel %vm1465_vm3, %v2534_v46, 0.0  ;;  %v1158_v35 = vpop.permute.xlu1 %1157  ;;  %v1682_v50 = vsel %vm1656_vm6, %v1617_v4, %v1230_v27  ;;  %v1568_v46 = vsel %vm1528_vm4, %v1505_v5, %v1092_v15  ;;  %v797_v62 = vshll.u32 %v5257_v33, 16 }
 0x15f   :  { %v2599_v32 = vadd.f32 %v2598_v0, %v2597_v13  ;;  %885 = vrot.lane.b32.xlu1 %v5140_v25, %s4057_s23  ;;  %v5233_v25 = vpack.c.bf16 %v230_v38, %v366_v22  ;;  %v1633_v15 = vsel %vm1591_vm5, %v1568_v46, %v1158_v35  ;;  %v1038_v38 = vrot.slane %v5182_v2, 1 }
 0x160   :  { %1101 = vrot.lane.b32.xlu0 %v5180_v56, %s4059_s28  ;;  %v799_v6 = vrot.slane %v797_v62, 1  ;;  %v399_v5 = vsel %vm146_vm0, %v232_v52, 0.0 }
 0x161   :  { %v1302_v57 = vpop.permute.xlu0 %1301  ;;  %v792_v47 = vshll.u32 %v5233_v25, 16  ;;  %v790_v51 = vshrl.u32 %v5233_v25, 16  ;;  %v5303_v4 = vsel %vm960_vm1, %v1038_v38, %v1039_v29  ;;  %v1041_v62 = vrot.slane %v5233_v25, 1 }
 0x162   :  { %v1246_v60 = vpop.permute.xlu1 %1245  ;;  %v1747_v3 = vsel %vm1721_vm7, %v1682_v50, %v1302_v57 }
 0x163   :  { %1167 = vrot.lane.b32.xlu1 %v5127_v12, %s4060_s29  ;;  %v1698_v22 = vsel %vm1656_vm6, %v1633_v15, %v1246_v60  ;;  %v794_v34 = vrot.slane %v792_v47, 1  ;;  %v76_v15 = vld [vmem:[%s6998_s0 + $0x1d0] sm:$0xff] }
 0x164   :  { %1255 = vrot.lane.b32.xlu0 %v5195_v63, %s4064_s15 }
 0x165   :  { %v1366_v59 = vpop.permute.xlu0 %1365 }
 0x166   :  { %v1318_v36 = vpop.permute.xlu1 %1317  ;;  %v1812_v30 = vsel %vm1786_vm8, %v1747_v3, %v1366_v59  ;;  %v233_v59 = vsel %vm146_vm0, %v231_v18, %v232_v52 }
 0x167   :  { %v5253_v7 = vpop.f32.mrb[4].mxu0  ;;  %1327 = vrot.lane.b32.xlu1 %v5238_v45, %s4062_s7  ;;  %v1763_v35 = vsel %vm1721_vm7, %v1698_v22, %v1318_v36  ;;  %v795_v36 = vor.u32 %v794_v34, %v790_v51 }
 0x168   :  { %v2403_v61 = vsel %vm1465_vm3, %v5253_v7, 0.0  ;;  %v2535_v26 = vmul.f32 %v5253_v7, %v5253_v7  ;;  %v2155_v9 = vpop.f32.mrb[5].mxu0  ;;  %1391 = vrot.lane.b32.xlu0 %v5182_v2, %s4061_s6 }
 0x169   :  { %v2404_v20 = vadd.f32 %v2403_v61, %v2402_v1  ;;  %v5272_v27 = vpop.f32.mrb[6].mxu0  ;;  %v1428_v14 = vpop.permute.xlu0 %1427 }
 0x16a   :  { %v2600_v28 = vsel %vm1465_vm3, %v2535_v26, 0.0  ;;  %v2405_v13 = vsel %vm1465_vm3, %v5272_v27, 0.0  ;;  %v2536_v0 = vmul.f32 %v5272_v27, %v5272_v27  ;;  %v2158_v17 = vpop.f32.mrb[7].mxu0  ;;  %v1382_v44 = vpop.permute.xlu1 %1381  ;;  %v1888_v24 = vsel %vm1850_vm9, %v1812_v30, %v1428_v14 }
 0x16b   :  { %v2601_v42 = vadd.f32 %v2600_v28, %v2599_v32  ;;  %v2406_v1 = vadd.f32 %v2405_v13, %v2404_v20  ;;  %2240 = vmatmul.mubr.bf16.gmra.mrb[48].mxu0 %v1888_v24  ;;  %1453 = vrot.lane.b32.xlu1 %v5247_v8, %s4063_s14  ;;  %v1828_v60 = vsel %vm1786_vm8, %v1763_v35, %v1382_v44 }
 0x16c   :  { %v2602_v57 = vsel %vm1465_vm3, %v2536_v0, 0.0  ;;  %887 = vrot.lane.b32.xlu0 %v5195_v63, %s4057_s23  ;;  %3678 = vmatprep.mubr.msk.bf16.mxu0 %vm1465_vm3, %v5021_v31  ;;  %v367_v63 = vsel %vm146_vm0, 0.0, %v231_v18  ;;  %v5323_v30 = vsel %vm468_vm2, %v795_v36, %v799_v6  ;;  %v5331_v17 = vpack.c.bf16 %v399_v5, %v399_v5 }
 0x16d   :  { %v2603_v32 = vadd.f32 %v2602_v57, %v2601_v42  ;;  %v864_v39 = vpop.permute.xlu0 %863  ;;  %v5305_v50 = vpack.c.bf16 %v233_v59, %v367_v63  ;;  %v77_v42 = vld [vmem:[%s6998_s0 + $0x1d8] sm:$0xff] }
 0x16e   :  { %v1444_v21 = vpop.permute.xlu1 %1443  ;;  %v809_v35 = vshll.u32 %v5331_v17, 16  ;;  %v235_v34 = vrot.slane %v77_v42, 7  ;;  %v1493_v63 = vsel %vm1465_vm3, %v4706_v19, %v864_v39 }
 0x16f   :  { %1103 = vrot.lane.b32.xlu1 %v5238_v45, %s4059_s28  ;;  %v1912_v55 = vsel %vm1850_vm9, %v1828_v60, %v1444_v21  ;;  %v804_v20 = vshll.u32 %v5305_v50, 16  ;;  %v802_v57 = vshrl.u32 %v5305_v50, 16  ;;  %v1042_v60 = vrot.slane %v5257_v33, 1 }
 0x170   :  { %2304 = vmatmul.mubr.bf16.gmra.mrb[16].mxu1 %v1912_v55  ;;  %1169 = vrot.lane.b32.xlu0 %v5182_v2, %s4060_s29  ;;  %v811_v36 = vrot.slane %v809_v35, 1  ;;  %v400_v33 = vsel %vm146_vm0, %v235_v34, 0.0  ;;  %v79_v35 = vld [vmem:[%s6998_s0 + $0x1e8] sm:$0xff] }
 0x171   :  { %v1080_v31 = vpop.permute.xlu0 %1079  ;;  %3686 = vmatprep.mubr.msk.bf16.mxu1 %vm1465_vm3, %v5032_v11  ;;  %v806_v29 = vrot.slane %v804_v20, 1 }
 0x172   :  { %v878_v47 = vpop.permute.xlu1 %877 }
 0x173   :  { %v5309_v18 = vpop.f32.mrb[8].mxu0  ;;  %1257 = vrot.lane.b32.xlu1 %v5247_v8, %s4064_s15  ;;  %v807_v59 = vor.u32 %v806_v29, %v802_v57  ;;  %v78_v29 = vld [vmem:[%s6998_s0 + $0x1e0] sm:$0xff] }
 0x174   :  { %v2407_v3 = vsel %vm1465_vm3, %v5309_v18, 0.0  ;;  %v2537_v61 = vmul.f32 %v5309_v18, %v5309_v18  ;;  %1329 = vrot.lane.b32.xlu0 %v5303_v4, %s4062_s7  ;;  %v2163_v26 = vpop.f32.mrb[9].mxu0 }
 0x175   :  { %v2408_v9 = vadd.f32 %v2407_v3, %v2406_v1  ;;  %v1144_v11 = vpop.permute.xlu0 %1143  ;;  %v5320_v46 = vpop.f32.mrb[10].mxu0  ;;  %v1556_v3 = vsel %vm1528_vm4, %v1493_v63, %v1080_v31  ;;  %v1045_v31 = vrot.slane %v5331_v17, 1 }
 0x176   :  { %v2604_v14 = vsel %vm1465_vm3, %v2537_v61, 0.0  ;;  %v2409_v52 = vsel %vm1465_vm3, %v5320_v46, 0.0  ;;  %v2538_v28 = vmul.f32 %v5320_v46, %v5320_v46  ;;  %v1094_v13 = vpop.permute.xlu1 %1093  ;;  %v2166_v0 = vpop.f32.mrb[11].mxu0  ;;  %v1619_v61 = vsel %vm1591_vm5, %v1556_v3, %v1144_v11 }
 0x177   :  { %v2605_v44 = vadd.f32 %v2604_v14, %v2603_v32  ;;  %v2410_v24 = vadd.f32 %v2409_v52, %v2408_v9  ;;  %1393 = vrot.lane.b32.xlu1 %v5233_v25, %s4061_s6  ;;  %v234_v32 = vrot.slane %v76_v15, 7  ;;  %v5369_v9 = vsel %vm468_vm2, %v807_v59, %v811_v36 }
 0x178   :  { %v2606_v1 = vsel %vm1465_vm3, %v2538_v28, 0.0  ;;  %1455 = vrot.lane.b32.xlu0 %v5323_v30, %s4063_s14  ;;  %v1044_v52 = vrot.slane %v5305_v50, 1  ;;  %v5378_v28 = vpack.c.bf16 %v400_v33, %v400_v33  ;;  %v1507_v11 = vsel %vm1465_vm3, %v4724_v48, %v878_v47 }
 0x179   :  { %v2607_v38 = vadd.f32 %v2606_v1, %v2605_v44  ;;  %v1232_v22 = vpop.permute.xlu0 %1231  ;;  %v236_v6 = vsel %vm146_vm0, %v234_v32, %v235_v34  ;;  %v368_v5 = vsel %vm146_vm0, 0.0, %v234_v32  ;;  %v1570_v1 = vsel %vm1528_vm4, %v1507_v11, %v1094_v13 }
 0x17a   :  { %v1160_v51 = vpop.permute.xlu1 %1159  ;;  %v5365_v39 = vpack.c.bf16 %v236_v6, %v368_v5  ;;  %v1684_v20 = vsel %vm1656_vm6, %v1619_v61, %v1232_v22  ;;  %v237_v33 = vrot.slane %v78_v29, 7  ;;  %v238_v3 = vrot.slane %v79_v35, 7 }
 0x17b   :  { %889 = vrot.lane.b32.xlu1 %v5247_v8, %s4057_s23  ;;  %v5361_v8 = vsel %vm960_vm1, %v1041_v62, %v1042_v60 }
 0x17c   :  { %1105 = vrot.lane.b32.xlu0 %v5303_v4, %s4059_s28  ;;  %v816_v47 = vshll.u32 %v5365_v39, 16  ;;  %v814_v36 = vshrl.u32 %v5365_v39, 16 }
 0x17d   :  { %v1304_v21 = vpop.permute.xlu0 %1303 }
 0x17e   :  { %v1248_v55 = vpop.permute.xlu1 %1247  ;;  %v1749_v0 = vsel %vm1721_vm7, %v1684_v20, %v1304_v21  ;;  %v1635_v21 = vsel %vm1591_vm5, %v1570_v1, %v1160_v51  ;;  %v818_v61 = vrot.slane %v816_v47, 1  ;;  %v821_v20 = vshll.u32 %v5378_v28, 16 }
 0x17f   :  { %1171 = vrot.lane.b32.xlu1 %v5233_v25, %s4060_s29  ;;  %v1700_v6 = vsel %vm1656_vm6, %v1635_v21, %v1248_v55 }
 0x180   :  { %1259 = vrot.lane.b32.xlu0 %v5323_v30, %s4064_s15 }
 0x181   :  { %v1368_v19 = vpop.permute.xlu0 %1367 }
 0x182   :  { %v1320_v26 = vpop.permute.xlu1 %1319  ;;  %v1814_v17 = vsel %vm1786_vm8, %v1749_v0, %v1368_v19 }
 0x183   :  { %v5372_v14 = vpop.f32.mrb[12].mxu0  ;;  %1331 = vrot.lane.b32.xlu1 %v5361_v8, %s4062_s7 }
 0x184   :  { %v2411_v44 = vsel %vm1465_vm3, %v5372_v14, 0.0  ;;  %v2539_v15 = vmul.f32 %v5372_v14, %v5372_v14  ;;  %v2171_v42 = vpop.f32.mrb[13].mxu0  ;;  %1395 = vrot.lane.b32.xlu0 %v5305_v50, %s4061_s6 }
 0x185   :  { %v2412_v22 = vadd.f32 %v2411_v44, %v2410_v24  ;;  %v5391_v57 = vpop.f32.mrb[14].mxu0  ;;  %v1430_v48 = vpop.permute.xlu0 %1429  ;;  %v5427_v44 = vsel %vm960_vm1, %v1044_v52, %v1045_v31  ;;  %v823_v42 = vrot.slane %v821_v20, 1 }
 0x186   :  { %v2608_v32 = vsel %vm1465_vm3, %v2539_v15, 0.0  ;;  %v2413_v13 = vsel %vm1465_vm3, %v5391_v57, 0.0  ;;  %v2540_v24 = vmul.f32 %v5391_v57, %v5391_v57  ;;  %v2174_v34 = vpop.f32.mrb[15].mxu0  ;;  %v1384_v62 = vpop.permute.xlu1 %1383  ;;  %v1891_v60 = vsel %vm1850_vm9, %v1814_v17, %v1430_v48 }
 0x187   :  { %v2609_v59 = vadd.f32 %v2608_v32, %v2607_v38  ;;  %v2414_v63 = vadd.f32 %v2413_v13, %v2412_v22  ;;  %2248 = vmatmul.mubr.bf16.gmra.mrb[52].mxu0 %v1891_v60  ;;  %1457 = vrot.lane.b32.xlu1 %v5369_v9, %s4063_s14  ;;  %v1765_v38 = vsel %vm1721_vm7, %v1700_v6, %v1320_v26  ;;  %v369_v26 = vsel %vm146_vm0, 0.0, %v237_v33  ;;  %v80_v6 = vld [vmem:[%s6998_s0 + $0x1f0] sm:$0xff] }
 0x188   :  { %v2610_v5 = vsel %vm1465_vm3, %v2540_v24, 0.0  ;;  %891 = vrot.lane.b32.xlu0 %v5323_v30, %s4057_s23  ;;  %3679 = vmatprep.mubr.msk.bf16.mxu0 %vm1465_vm3, %v5096_v58  ;;  %v1830_v11 = vsel %vm1786_vm8, %v1765_v38, %v1384_v62  ;;  %v239_v58 = vsel %vm146_vm0, %v237_v33, %v238_v3  ;;  %v819_v15 = vor.u32 %v818_v61, %v814_v36 }
 0x189   :  { %v2611_v51 = vadd.f32 %v2610_v5, %v2609_v59  ;;  %v866_v19 = vpop.permute.xlu0 %865  ;;  %v5435_v22 = vpack.c.bf16 %v239_v58, %v369_v26  ;;  %v81_v5 = vld [vmem:[%s6998_s0 + $0x1f8] sm:$0xff]  ;;  %v240_v61 = vrot.slane %v80_v6, 7  ;;  %v1047_v58 = vrot.slane %v5365_v39, 1 }
 0x18a   :  { %v1446_v55 = vpop.permute.xlu1 %1445  ;;  %v5447_v32 = vsel %vm468_vm2, %v819_v15, %v823_v42  ;;  %v241_v20 = vrot.slane %v81_v5, 7  ;;  %v1048_v26 = vrot.slane %v5378_v28, 1  ;;  %v1495_v42 = vsel %vm1465_vm3, %v4802_v49, %v866_v19 }
 0x18b   :  { %1107 = vrot.lane.b32.xlu1 %v5361_v8, %s4059_s28  ;;  %v1915_v30 = vsel %vm1850_vm9, %v1830_v11, %v1446_v55  ;;  %v828_v36 = vshll.u32 %v5435_v22, 16  ;;  %v826_v11 = vshrl.u32 %v5435_v22, 16 }
 0x18c   :  { %2312 = vmatmul.mubr.bf16.gmra.mrb[20].mxu1 %v1915_v30  ;;  %1173 = vrot.lane.b32.xlu0 %v5305_v50, %s4060_s29  ;;  %v402_v28 = vsel %vm146_vm0, %v241_v20, 0.0 }
 0x18d   :  { %v1082_v0 = vpop.permute.xlu0 %1081  ;;  %3687 = vmatprep.mubr.msk.bf16.mxu1 %vm1465_vm3, %v5114_v54  ;;  %v401_v54 = vsel %vm146_vm0, %v238_v3, 0.0  ;;  %v830_v55 = vrot.slane %v828_v36, 1  ;;  %v5500_v6 = vpack.c.bf16 %v402_v28, %v402_v28 }
 0x18e   :  { %v880_v1 = vpop.permute.xlu1 %879  ;;  %v1558_v49 = vsel %vm1528_vm4, %v1495_v42, %v1082_v0 }
 0x18f   :  { %v5431_v17 = vpop.f32.mrb[16].mxu0  ;;  %1261 = vrot.lane.b32.xlu1 %v5369_v9, %s4064_s15  ;;  %v1509_v0 = vsel %vm1465_vm3, %v4818_v16, %v880_v1 }
 0x190   :  { %v2415_v48 = vsel %vm1465_vm3, %v5431_v17, 0.0  ;;  %v2541_v52 = vmul.f32 %v5431_v17, %v5431_v17  ;;  %1333 = vrot.lane.b32.xlu0 %v5427_v44, %s4062_s7  ;;  %v2179_v31 = vpop.f32.mrb[17].mxu0 }
 0x191   :  { %v2416_v47 = vadd.f32 %v2415_v48, %v2414_v63  ;;  %v1146_v29 = vpop.permute.xlu0 %1145  ;;  %v5444_v35 = vpop.f32.mrb[18].mxu0  ;;  %v5456_v63 = vpack.c.bf16 %v401_v54, %v401_v54  ;;  %v831_v31 = vor.u32 %v830_v55, %v826_v11 }
 0x192   :  { %v2612_v13 = vsel %vm1465_vm3, %v2541_v52, 0.0  ;;  %v2417_v24 = vsel %vm1465_vm3, %v5444_v35, 0.0  ;;  %v2542_v34 = vmul.f32 %v5444_v35, %v5444_v35  ;;  %v1096_v62 = vpop.permute.xlu1 %1095  ;;  %v2182_v60 = vpop.f32.mrb[19].mxu0  ;;  %v242_v52 = vsel %vm146_vm0, %v240_v61, %v241_v20 }
 0x193   :  { %v2613_v21 = vadd.f32 %v2612_v13, %v2611_v51  ;;  %v2418_v59 = vadd.f32 %v2417_v24, %v2416_v47  ;;  %1397 = vrot.lane.b32.xlu1 %v5365_v39, %s4061_s6  ;;  %v833_v30 = vshll.u32 %v5456_v63, 16  ;;  %v5485_v47 = vsel %vm960_vm1, %v1047_v58, %v1048_v26 }
 0x194   :  { %v2614_v33 = vsel %vm1465_vm3, %v2542_v34, 0.0  ;;  %1459 = vrot.lane.b32.xlu0 %v5447_v32, %s4063_s14  ;;  %v1621_v24 = vsel %vm1591_vm5, %v1558_v49, %v1146_v29  ;;  %v1051_v49 = vrot.slane %v5456_v63, 1 }
 0x195   :  { %v2615_v3 = vadd.f32 %v2614_v33, %v2613_v21  ;;  %v1234_v38 = vpop.permute.xlu0 %1233  ;;  %v835_v54 = vrot.slane %v833_v30, 1 }
 0x196   :  { %v1162_v51 = vpop.permute.xlu1 %1161  ;;  %v1686_v60 = vsel %vm1656_vm6, %v1621_v24, %v1234_v38 }
 0x197   :  { %893 = vrot.lane.b32.xlu1 %v5369_v9, %s4057_s23  ;;  %v370_v9 = vsel %vm146_vm0, 0.0, %v240_v61  ;;  %v5498_v36 = vsel %vm468_vm2, %v831_v31, %v835_v54  ;;  %v1572_v61 = vsel %vm1528_vm4, %v1509_v0, %v1096_v62  ;;  %v1050_v31 = vrot.slane %v5435_v22, 1 }
 0x198   :  { %1109 = vrot.lane.b32.xlu0 %v5427_v44, %s4059_s28  ;;  %v5489_v13 = vpack.c.bf16 %v242_v52, %v370_v9  ;;  %v1637_v52 = vsel %vm1591_vm5, %v1572_v61, %v1162_v51  ;;  %v1201_v0 = vshll.u32 %v5500_v6, 16 }
 0x199   :  { %v1306_v15 = vpop.permute.xlu0 %1305 }
 0x19a   :  { %v1250_v48 = vpop.permute.xlu1 %1249  ;;  %v1751_v5 = vsel %vm1721_vm7, %v1686_v60, %v1306_v15  ;;  %v1196_v1 = vshll.u32 %v5489_v13, 16 }
 0x19b   :  { %1175 = vrot.lane.b32.xlu1 %v5365_v39, %s4060_s29  ;;  %v1702_v54 = vsel %vm1656_vm6, %v1637_v52, %v1250_v48 }
 0x19c   :  { %1263 = vrot.lane.b32.xlu0 %v5447_v32, %s4064_s15  ;;  %v1198_v60 = vrot.slane %v1196_v1, 1 }
 0x19d   :  { %v1370_v19 = vpop.permute.xlu0 %1369 }
 0x19e   :  { %v1322_v34 = vpop.permute.xlu1 %1321  ;;  %v1816_v20 = vsel %vm1786_vm8, %v1751_v5, %v1370_v19  ;;  %v1194_v19 = vshrl.u32 %v5489_v13, 16 }
 0x19f   :  { %v5493_v21 = vpop.f32.mrb[20].mxu0  ;;  %1335 = vrot.lane.b32.xlu1 %v5485_v47, %s4062_s7 }
 0x1a0   :  { %v2419_v29 = vsel %vm1465_vm3, %v5493_v21, 0.0  ;;  %v2543_v33 = vmul.f32 %v5493_v21, %v5493_v21  ;;  %v2187_v38 = vpop.f32.mrb[21].mxu0  ;;  %1399 = vrot.lane.b32.xlu0 %v5435_v22, %s4061_s6 }
 0x1a1   :  { %v2420_v11 = vadd.f32 %v2419_v29, %v2418_v59  ;;  %v5513_v55 = vpop.f32.mrb[22].mxu0  ;;  %v1432_v16 = vpop.permute.xlu0 %1431  ;;  %v1199_v29 = vor.u32 %v1198_v60, %v1194_v19  ;;  %v1274_v19 = vrot.slane %v5489_v13, 1 }
 0x1a2   :  { %v2616_v30 = vsel %vm1465_vm3, %v2543_v33, 0.0  ;;  %v2421_v58 = vsel %vm1465_vm3, %v5513_v55, 0.0  ;;  %v2544_v26 = vmul.f32 %v5513_v55, %v5513_v55  ;;  %v2190_v15 = vpop.f32.mrb[23].mxu0  ;;  %v1386_v42 = vpop.permute.xlu1 %1385  ;;  %v1894_v62 = vsel %vm1850_vm9, %v1816_v20, %v1432_v16 }
 0x1a3   :  { %v2617_v59 = vadd.f32 %v2616_v30, %v2615_v3  ;;  %v2422_v9 = vadd.f32 %v2421_v58, %v2420_v11  ;;  %2256 = vmatmul.mubr.bf16.gmra.mrb[56].mxu0 %v1894_v62  ;;  %1461 = vrot.lane.b32.xlu1 %v5498_v36, %s4063_s14  ;;  %v1767_v3 = vsel %vm1721_vm7, %v1702_v54, %v1322_v34  ;;  %v1203_v33 = vrot.slane %v1201_v0, 1 }
 0x1a4   :  { %v2618_v28 = vsel %vm1465_vm3, %v2544_v26, 0.0  ;;  %895 = vrot.lane.b32.xlu0 %v5447_v32, %s4057_s23  ;;  %3680 = vmatprep.mubr.msk.bf16.mxu0 %vm1465_vm3, %v4111_v10  ;;  %v1832_v48 = vsel %vm1786_vm8, %v1767_v3, %v1386_v42  ;;  %v5543_v34 = vsel %vm960_vm1, %v1050_v31, %v1051_v49  ;;  %v1275_v3 = vrot.slane %v5500_v6, 1 }
 0x1a5   :  { %v2619_v51 = vadd.f32 %v2618_v28, %v2617_v59  ;;  %v868_v24 = vpop.permute.xlu0 %867 }
 0x1a6   :  { %v1448_v5 = vpop.permute.xlu1 %1447  ;;  %v1497_v60 = vsel %vm1465_vm3, %v4898_v37, %v868_v24 }
 0x1a7   :  { %1111 = vrot.lane.b32.xlu1 %v5485_v47, %s4059_s28  ;;  %v1918_v32 = vsel %vm1850_vm9, %v1832_v48, %v1448_v5  ;;  %v5581_v48 = vsel %vm960_vm1, %v1274_v19, %v1275_v3 }
 0x1a8   :  { %2320 = vmatmul.mubr.bf16.gmra.mrb[24].mxu1 %v1918_v32  ;;  %1177 = vrot.lane.b32.xlu0 %v5435_v22, %s4060_s29 }
 0x1a9   :  { %v1084_v63 = vpop.permute.xlu0 %1083  ;;  %3688 = vmatprep.mubr.msk.bf16.mxu1 %vm1465_vm3, %v5180_v56  ;;  %v1204_v56 = vsel %vm468_vm2, %v1199_v29, %v1203_v33 }
 0x1aa   :  { %v882_v38 = vpop.permute.xlu1 %881 }
 0x1ab   :  { %v5547_v61 = vpop.f32.mrb[24].mxu0  ;;  %1265 = vrot.lane.b32.xlu1 %v5498_v36, %s4064_s15  ;;  %v1511_v37 = vsel %vm1465_vm3, %v4911_v41, %v882_v38 }
 0x1ac   :  { %v2423_v20 = vsel %vm1465_vm3, %v5547_v61, 0.0  ;;  %v2545_v11 = vmul.f32 %v5547_v61, %v5547_v61  ;;  %1337 = vrot.lane.b32.xlu0 %v5543_v34, %s4062_s7  ;;  %v2195_v16 = vpop.f32.mrb[25].mxu0 }
 0x1ad   :  { %v2424_v1 = vadd.f32 %v2423_v20, %v2422_v9  ;;  %v1148_v30 = vpop.permute.xlu0 %1147  ;;  %v5557_v58 = vpop.f32.mrb[26].mxu0 }
 0x1ae   :  { %v2620_v26 = vsel %vm1465_vm3, %v2545_v11, 0.0  ;;  %v2425_v15 = vsel %vm1465_vm3, %v5557_v58, 0.0  ;;  %v2546_v42 = vmul.f32 %v5557_v58, %v5557_v58  ;;  %v1098_v62 = vpop.permute.xlu1 %1097  ;;  %v2198_v52 = vpop.f32.mrb[27].mxu0 }
 0x1af   :  { %v2621_v59 = vadd.f32 %v2620_v26, %v2619_v51  ;;  %v2426_v31 = vadd.f32 %v2425_v15, %v2424_v1  ;;  %1401 = vrot.lane.b32.xlu1 %v5489_v13, %s4061_s6  ;;  %v1574_v11 = vsel %vm1528_vm4, %v1511_v37, %v1098_v62 }
 0x1b0   :  { %v2622_v9 = vsel %vm1465_vm3, %v2546_v42, 0.0  ;;  %1463 = vrot.lane.b32.xlu0 %v1204_v56, %s4063_s14 }
 0x1b1   :  { %v2623_v54 = vadd.f32 %v2622_v9, %v2621_v59  ;;  %v1236_v28 = vpop.permute.xlu0 %1235 }
 0x1b2   :  { %v1164_v49 = vpop.permute.xlu1 %1163 }
 0x1b3   :  { %897 = vrot.lane.b32.xlu1 %v5498_v36, %s4057_s23  ;;  %v1560_v36 = vsel %vm1528_vm4, %v1497_v60, %v1084_v63  ;;  %v1639_v52 = vsel %vm1591_vm5, %v1574_v11, %v1164_v49 }
 0x1b4   :  { %1113 = vrot.lane.b32.xlu0 %v5543_v34, %s4059_s28  ;;  %v1623_v32 = vsel %vm1591_vm5, %v1560_v36, %v1148_v30 }
 0x1b5   :  { %v1308_v51 = vpop.permute.xlu0 %1307  ;;  %v1688_v29 = vsel %vm1656_vm6, %v1623_v32, %v1236_v28 }
 0x1b6   :  { %v1252_v0 = vpop.permute.xlu1 %1251 }
 0x1b7   :  { %1179 = vrot.lane.b32.xlu1 %v5489_v13, %s4060_s29  ;;  %v1753_v13 = vsel %vm1721_vm7, %v1688_v29, %v1308_v51  ;;  %v1704_v9 = vsel %vm1656_vm6, %v1639_v52, %v1252_v0 }
 0x1b8   :  { %1267 = vrot.lane.b32.xlu0 %v1204_v56, %s4064_s15 }
 0x1b9   :  { %v5584_v5 = vpop.permute.xlu0 %1371 }
 0x1ba   :  { %v1324_v6 = vpop.permute.xlu1 %1323  ;;  %v1818_v16 = vsel %vm1786_vm8, %v1753_v13, %v5584_v5 }
 0x1bb   :  { %v5588_v33 = vpop.f32.mrb[28].mxu0  ;;  %1339 = vrot.lane.b32.xlu1 %v5581_v48, %s4062_s7  ;;  %v1769_v19 = vsel %vm1721_vm7, %v1704_v9, %v1324_v6 }
 0x1bc   :  { %v2427_v24 = vsel %vm1465_vm3, %v5588_v33, 0.0  ;;  %v2547_v63 = vmul.f32 %v5588_v33, %v5588_v33  ;;  %v2203_v20 = vpop.f32.mrb[29].mxu0 }
 0x1bd   :  { %v2428_v1 = vadd.f32 %v2427_v24, %v2426_v31  ;;  %v5602_v30 = vpop.f32.mrb[30].mxu0  ;;  %v5604_v56 = vpop.permute.xlu0 %1433 }
 0x1be   :  { %v2624_v41 = vsel %vm1465_vm3, %v2547_v63, 0.0  ;;  %v2429_v38 = vsel %vm1465_vm3, %v5602_v30, 0.0  ;;  %v2548_v26 = vmul.f32 %v5602_v30, %v5602_v30  ;;  %v2206_v15 = vpop.f32.mrb[31].mxu0  ;;  %v1388_v42 = vpop.permute.xlu1 %1387  ;;  %v1897_v62 = vsel %vm1850_vm9, %v1818_v16, %v5604_v56 }
 0x1bf   :  { %v2625_v59 = vadd.f32 %v2624_v41, %v2623_v54  ;;  %v2430_v31 = vadd.f32 %v2429_v38, %v2428_v1  ;;  %2264 = vmatmul.mubr.bf16.gmra.mrb[60].mxu0 %v1897_v62  ;;  %v1834_v51 = vsel %vm1786_vm8, %v1769_v19, %v1388_v42 }
 0x1c0   :  { %v2626_v28 = vsel %vm1465_vm3, %v2548_v26, 0.0 }
 0x1c1   :  { %v2627_v3 = vadd.f32 %v2626_v28, %v2625_v59 }
 0x1c2   :  { %v1450_v60 = vpop.permute.xlu1 %1449  ;;  %v884_v36 = vpop.permute.xlu0 %883 }
 0x1c3   :  { %v1921_v32 = vsel %vm1850_vm9, %v1834_v51, %v1450_v60  ;;  %v1513_v29 = vsel %vm1465_vm3, %v5010_v23, %v884_v36 }
 0x1c4   :  { %2328 = vmatmul.mubr.bf16.gmra.mrb[28].mxu1 %v1921_v32 }
 0x1c5   :  { %3689 = vmatprep.mubr.msk.bf16.mxu1 %vm1465_vm3, %v5238_v45 }
 0x1c6   :  { %v1100_v54 = vpop.permute.xlu1 %1099  ;;  %v1166_v49 = vpop.permute.xlu0 %1165 }
 0x1c7   :  { %v1576_v0 = vsel %vm1528_vm4, %v1513_v29, %v1100_v54 }
 0x1c8   :  { %v1641_v6 = vsel %vm1591_vm5, %v1576_v0, %v1166_v49 }
 0x1ca   :  { %v1254_v37 = vpop.permute.xlu1 %1253  ;;  %v1326_v13 = vpop.permute.xlu0 %1325 }
 0x1cb   :  { %v1706_v24 = vsel %vm1656_vm6, %v1641_v6, %v1254_v37 }
 0x1cc   :  { %v1771_v63 = vsel %vm1721_vm7, %v1706_v24, %v1326_v13 }
 0x1ce   :  { %v1390_v20 = vpop.permute.xlu1 %1389  ;;  %v1452_v11 = vpop.permute.xlu0 %1451 }
 0x1cf   :  { %v1836_v23 = vsel %vm1786_vm8, %v1771_v63, %v1390_v20  ;;  %v5628_v16 = vpop.f32.mrb[32].mxu0 }
 0x1d0   :  { %v2431_v45 = vsel %vm1465_vm3, %v5628_v16, 0.0  ;;  %v2549_v1 = vmul.f32 %v5628_v16, %v5628_v16  ;;  %v2211_v41 = vpop.f32.mrb[33].mxu0  ;;  %v1924_v38 = vsel %vm1850_vm9, %v1836_v23, %v1452_v11 }
 0x1d1   :  { %v2432_v26 = vadd.f32 %v2431_v45, %v2430_v31  ;;  %v5635_v15 = vpop.f32.mrb[34].mxu0  ;;  %2336 = vmatmul.mubr.bf16.gmra.mrb[32].mxu1 %v1924_v38 }
 0x1d2   :  { %v2628_v42 = vsel %vm1465_vm3, %v2549_v1, 0.0  ;;  %v2433_v62 = vsel %vm1465_vm3, %v5635_v15, 0.0  ;;  %v2550_v52 = vmul.f32 %v5635_v15, %v5635_v15  ;;  %v2214_v59 = vpop.f32.mrb[35].mxu0  ;;  %v886_v9 = vpop.permute.xlu1 %885  ;;  %3690 = vmatprep.mubr.msk.bf16.mxu1 %vm1465_vm3, %v5303_v4 }
 0x1d3   :  { %v2629_v28 = vadd.f32 %v2628_v42, %v2627_v3  ;;  %v2434_v19 = vadd.f32 %v2433_v62, %v2432_v26  ;;  %v1515_v31 = vsel %vm1465_vm3, %v5089_v40, %v886_v9  ;;  %v1102_v51 = vpop.permute.xlu0 %1101  ;;  %v5646_v60 = vpop.f32.mrb[0].mxu1 }
 0x1d4   :  { %v2630_v36 = vsel %vm1465_vm3, %v2550_v52, 0.0  ;;  %v2275_v32 = vpop.f32.mrb[1].mxu1  ;;  %v1578_v49 = vsel %vm1528_vm4, %v1515_v31, %v1102_v51 }
 0x1d5   :  { %v2631_v29 = vadd.f32 %v2630_v36, %v2629_v28  ;;  %v5649_v54 = vpop.f32.mrb[2].mxu1 }
 0x1d6   :  { %v2278_v0 = vpop.f32.mrb[3].mxu1  ;;  %v1168_v6 = vpop.permute.xlu1 %1167 }
 0x1d7   :  { %v1643_v4 = vsel %vm1591_vm5, %v1578_v49, %v1168_v6  ;;  %v1256_v3 = vpop.permute.xlu0 %1255 }
 0x1d8   :  { %v1708_v37 = vsel %vm1656_vm6, %v1643_v4, %v1256_v3 }
 0x1da   :  { %v1328_v13 = vpop.permute.xlu1 %1327 }
 0x1db   :  { %v1773_v40 = vsel %vm1721_vm7, %v1708_v37, %v1328_v13  ;;  %v1392_v24 = vpop.permute.xlu0 %1391 }
 0x1dc   :  { %v1838_v63 = vsel %vm1786_vm8, %v1773_v40, %v1392_v24 }
 0x1de   :  { %v1454_v20 = vpop.permute.xlu1 %1453 }
 0x1df   :  { %v888_v11 = vpop.permute.xlu0 %887  ;;  %v1927_v23 = vsel %vm1850_vm9, %v1838_v63, %v1454_v20 }
 0x1e0   :  { %v1517_v45 = vsel %vm1465_vm3, %v5127_v12, %v888_v11  ;;  %2344 = vmatmul.mubr.bf16.gmra.mrb[36].mxu1 %v1927_v23 }
 0x1e1   :  { %3691 = vmatprep.mubr.msk.bf16.mxu1 %vm1465_vm3, %v5361_v8 }
 0x1e2   :  { %v1104_v1 = vpop.permute.xlu1 %1103 }
 0x1e3   :  { %v1580_v41 = vsel %vm1528_vm4, %v1517_v45, %v1104_v1  ;;  %v1170_v38 = vpop.permute.xlu0 %1169 }
 0x1e4   :  { %v1645_v26 = vsel %vm1591_vm5, %v1580_v41, %v1170_v38 }
 0x1e6   :  { %v1258_v42 = vpop.permute.xlu1 %1257 }
 0x1e7   :  { %v1710_v62 = vsel %vm1656_vm6, %v1645_v26, %v1258_v42  ;;  %v1330_v52 = vpop.permute.xlu0 %1329 }
 0x1e8   :  { %v1775_v59 = vsel %vm1721_vm7, %v1710_v62, %v1330_v52 }
 0x1ea   :  { %v1394_v9 = vpop.permute.xlu1 %1393 }
 0x1eb   :  { %v1840_v28 = vsel %vm1786_vm8, %v1775_v59, %v1394_v9  ;;  %v1456_v12 = vpop.permute.xlu0 %1455  ;;  %v5666_v31 = vpop.f32.mrb[36].mxu0 }
 0x1ec   :  { %v2435_v8 = vsel %vm1465_vm3, %v5666_v31, 0.0  ;;  %v2551_v51 = vmul.f32 %v5666_v31, %v5666_v31  ;;  %v2219_v36 = vpop.f32.mrb[37].mxu0  ;;  %v1930_v32 = vsel %vm1850_vm9, %v1840_v28, %v1456_v12 }
 0x1ed   :  { %v2436_v49 = vadd.f32 %v2435_v8, %v2434_v19  ;;  %v5673_v0 = vpop.f32.mrb[38].mxu0  ;;  %2352 = vmatmul.mubr.bf16.gmra.mrb[40].mxu1 %v1930_v32 }
 0x1ee   :  { %v2632_v6 = vsel %vm1465_vm3, %v2551_v51, 0.0  ;;  %v2437_v4 = vsel %vm1465_vm3, %v5673_v0, 0.0  ;;  %v2552_v3 = vmul.f32 %v5673_v0, %v5673_v0  ;;  %v2222_v37 = vpop.f32.mrb[39].mxu0  ;;  %v890_v13 = vpop.permute.xlu1 %889  ;;  %3692 = vmatprep.mubr.msk.bf16.mxu1 %vm1465_vm3, %v5427_v44 }
 0x1ef   :  { %v2633_v40 = vadd.f32 %v2632_v6, %v2631_v29  ;;  %v2438_v24 = vadd.f32 %v2437_v4, %v2436_v49  ;;  %v1519_v19 = vsel %vm1465_vm3, %v5182_v2, %v890_v13  ;;  %v1106_v63 = vpop.permute.xlu0 %1105  ;;  %v5684_v20 = vpop.f32.mrb[4].mxu1 }
 0x1f0   :  { %v2634_v11 = vsel %vm1465_vm3, %v2552_v3, 0.0  ;;  %v2283_v23 = vpop.f32.mrb[5].mxu1  ;;  %v1582_v41 = vsel %vm1528_vm4, %v1519_v19, %v1106_v63 }
 0x1f1   :  { %v2635_v45 = vadd.f32 %v2634_v11, %v2633_v40  ;;  %v5687_v1 = vpop.f32.mrb[6].mxu1 }
 0x1f2   :  { %v2286_v38 = vpop.f32.mrb[7].mxu1  ;;  %v1172_v26 = vpop.permute.xlu1 %1171 }
 0x1f3   :  { %v1647_v44 = vsel %vm1591_vm5, %v1582_v41, %v1172_v26  ;;  %v1260_v29 = vpop.permute.xlu0 %1259 }
 0x1f4   :  { %v1712_v42 = vsel %vm1656_vm6, %v1647_v44, %v1260_v29 }
 0x1f6   :  { %v1332_v62 = vpop.permute.xlu1 %1331 }
 0x1f7   :  { %v1777_v2 = vsel %vm1721_vm7, %v1712_v42, %v1332_v62  ;;  %v1396_v52 = vpop.permute.xlu0 %1395 }
 0x1f8   :  { %v1842_v59 = vsel %vm1786_vm8, %v1777_v2, %v1396_v52 }
 0x1fa   :  { %v1458_v9 = vpop.permute.xlu1 %1457 }
 0x1fb   :  { %v892_v28 = vpop.permute.xlu0 %891  ;;  %v1933_v12 = vsel %vm1850_vm9, %v1842_v59, %v1458_v9 }
 0x1fc   :  { %v1521_v8 = vsel %vm1465_vm3, %v5233_v25, %v892_v28  ;;  %2360 = vmatmul.mubr.bf16.gmra.mrb[44].mxu1 %v1933_v12 }
 0x1fd   :  { %3693 = vmatprep.mubr.msk.bf16.mxu1 %vm1465_vm3, %v5485_v47 }
 0x1fe   :  { %v1108_v51 = vpop.permute.xlu1 %1107 }
 0x1ff   :  { %v1584_v36 = vsel %vm1528_vm4, %v1521_v8, %v1108_v51  ;;  %v1174_v32 = vpop.permute.xlu0 %1173 }
 0x200   :  { %v1649_v49 = vsel %vm1591_vm5, %v1584_v36, %v1174_v32 }
 0x202   :  { %v1262_v6 = vpop.permute.xlu1 %1261 }
 0x203   :  { %v1714_v4 = vsel %vm1656_vm6, %v1649_v49, %v1262_v6  ;;  %v1334_v3 = vpop.permute.xlu0 %1333 }
 0x204   :  { %v1779_v37 = vsel %vm1721_vm7, %v1714_v4, %v1334_v3 }
 0x206   :  { %v1398_v13 = vpop.permute.xlu1 %1397 }
 0x207   :  { %v1844_v40 = vsel %vm1786_vm8, %v1779_v37, %v1398_v13  ;;  %v1460_v25 = vpop.permute.xlu0 %1459  ;;  %v5704_v19 = vpop.f32.mrb[40].mxu0 }
 0x208   :  { %v2439_v47 = vsel %vm1465_vm3, %v5704_v19, 0.0  ;;  %v2553_v63 = vmul.f32 %v5704_v19, %v5704_v19  ;;  %v2227_v11 = vpop.f32.mrb[41].mxu0  ;;  %v1936_v23 = vsel %vm1850_vm9, %v1844_v40, %v1460_v25 }
 0x209   :  { %v2440_v41 = vadd.f32 %v2439_v47, %v2438_v24  ;;  %v5711_v38 = vpop.f32.mrb[42].mxu0  ;;  %2368 = vmatmul.mubr.bf16.gmra.mrb[48].mxu1 %v1936_v23 }
 0x20a   :  { %v2636_v26 = vsel %vm1465_vm3, %v2553_v63, 0.0  ;;  %v2441_v44 = vsel %vm1465_vm3, %v5711_v38, 0.0  ;;  %v2554_v29 = vmul.f32 %v5711_v38, %v5711_v38  ;;  %v2230_v42 = vpop.f32.mrb[43].mxu0  ;;  %v894_v62 = vpop.permute.xlu1 %893  ;;  %3694 = vmatprep.mubr.msk.bf16.mxu1 %vm1465_vm3, %v5543_v34 }
 0x20b   :  { %v2637_v2 = vadd.f32 %v2636_v26, %v2635_v45  ;;  %v2442_v52 = vadd.f32 %v2441_v44, %v2440_v41  ;;  %v1523_v24 = vsel %vm1465_vm3, %v5305_v50, %v894_v62  ;;  %v1110_v59 = vpop.permute.xlu0 %1109  ;;  %v5722_v9 = vpop.f32.mrb[8].mxu1 }
 0x20c   :  { %v2638_v28 = vsel %vm1465_vm3, %v2554_v29, 0.0  ;;  %v2291_v12 = vpop.f32.mrb[9].mxu1  ;;  %v1586_v36 = vsel %vm1528_vm4, %v1523_v24, %v1110_v59 }
 0x20d   :  { %v2639_v8 = vadd.f32 %v2638_v28, %v2637_v2  ;;  %v5725_v51 = vpop.f32.mrb[10].mxu1 }
 0x20e   :  { %v2294_v32 = vpop.f32.mrb[11].mxu1  ;;  %v1176_v49 = vpop.permute.xlu1 %1175 }
 0x20f   :  { %v1651_v34 = vsel %vm1591_vm5, %v1586_v36, %v1176_v49  ;;  %v1264_v45 = vpop.permute.xlu0 %1263 }
 0x210   :  { %v1716_v6 = vsel %vm1656_vm6, %v1651_v34, %v1264_v45 }
 0x212   :  { %v1336_v4 = vpop.permute.xlu1 %1335 }
 0x213   :  { %v1781_v50 = vsel %vm1721_vm7, %v1716_v6, %v1336_v4  ;;  %v1400_v3 = vpop.permute.xlu0 %1399 }
 0x214   :  { %v1846_v37 = vsel %vm1786_vm8, %v1781_v50, %v1400_v3 }
 0x216   :  { %v1462_v13 = vpop.permute.xlu1 %1461 }
 0x217   :  { %v896_v40 = vpop.permute.xlu0 %895  ;;  %v1939_v25 = vsel %vm1850_vm9, %v1846_v37, %v1462_v13 }
 0x218   :  { %v1525_v47 = vsel %vm1465_vm3, %v5365_v39, %v896_v40  ;;  %2376 = vmatmul.mubr.bf16.gmra.mrb[52].mxu1 %v1939_v25 }
 0x219   :  { %3695 = vmatprep.mubr.msk.bf16.mxu1 %vm1465_vm3, %v5581_v48 }
 0x21a   :  { %v1112_v63 = vpop.permute.xlu1 %1111 }
 0x21b   :  { %v1588_v11 = vsel %vm1528_vm4, %v1525_v47, %v1112_v63  ;;  %v1178_v23 = vpop.permute.xlu0 %1177 }
 0x21c   :  { %v1653_v41 = vsel %vm1591_vm5, %v1588_v11, %v1178_v23 }
 0x21e   :  { %v1266_v26 = vpop.permute.xlu1 %1265 }
 0x21f   :  { %v1718_v44 = vsel %vm1656_vm6, %v1653_v41, %v1266_v26  ;;  %v1338_v29 = vpop.permute.xlu0 %1337 }
 0x220   :  { %v1783_v42 = vsel %vm1721_vm7, %v1718_v44, %v1338_v29 }
 0x222   :  { %v1402_v62 = vpop.permute.xlu1 %1401  ;;  %v5741_v2 = vpop.f32.mrb[44].mxu0 }
 0x223   :  { %v1848_v39 = vsel %vm1786_vm8, %v1783_v42, %v1402_v62  ;;  %v1464_v24 = vpop.permute.xlu0 %1463  ;;  %v2443_v48 = vsel %vm1465_vm3, %v5741_v2, 0.0  ;;  %v2555_v59 = vmul.f32 %v5741_v2, %v5741_v2  ;;  %v2235_v28 = vpop.f32.mrb[45].mxu0 }
 0x224   :  { %v2444_v12 = vadd.f32 %v2443_v48, %v2442_v52  ;;  %v5748_v36 = vpop.f32.mrb[46].mxu0  ;;  %v1942_v32 = vsel %vm1850_vm9, %v1848_v39, %v1464_v24 }
 0x225   :  { %v2640_v49 = vsel %vm1465_vm3, %v2555_v59, 0.0  ;;  %v2445_v34 = vsel %vm1465_vm3, %v5748_v36, 0.0  ;;  %v2556_v45 = vmul.f32 %v5748_v36, %v5748_v36  ;;  %2384 = vmatmul.mubr.bf16.gmra.mrb[56].mxu1 %v1942_v32  ;;  %v2238_v6 = vpop.f32.mrb[47].mxu0 }
 0x226   :  { %v2641_v4 = vadd.f32 %v2640_v49, %v2639_v8  ;;  %v2446_v50 = vadd.f32 %v2445_v34, %v2444_v12  ;;  %v898_v3 = vpop.permute.xlu1 %897  ;;  %v5756_v37 = vpop.f32.mrb[12].mxu1  ;;  %3696 = vmatprep.mubr.msk.bf16.mxu1 %vm1465_vm3, %v4111_v10 }
 0x227   :  { %7047 = vst [vmem:[#allocation2_spill] sm:$0xff] %v5756_v37  ;;  %v2642_v52 = vsel %vm1465_vm3, %v2556_v45, 0.0  ;;  %v1527_v13 = vsel %vm1465_vm3, %v5435_v22, %v898_v3  ;;  %v1114_v40 = vpop.permute.xlu0 %1113  ;;  %v2299_v25 = vpop.f32.mrb[13].mxu1 }
 0x228   :  { %v2643_v47 = vadd.f32 %v2642_v52, %v2641_v4  ;;  %v5763_v63 = vpop.f32.mrb[14].mxu1  ;;  %v1590_v8 = vsel %vm1528_vm4, %v1527_v13, %v1114_v40 }
 0x229   :  { %7048 = vst [vmem:[#allocation3_spill] sm:$0xff] %v5763_v63  ;;  %v2302_v11 = vpop.f32.mrb[15].mxu1 }
 0x22a   :  { %v1180_v23 = vpop.permute.xlu1 %1179 }
 0x22b   :  { %v1655_v41 = vsel %vm1591_vm5, %v1590_v8, %v1180_v23  ;;  %v1268_v26 = vpop.permute.xlu0 %1267 }
 0x22c   :  { %v1720_v44 = vsel %vm1656_vm6, %v1655_v41, %v1268_v26 }
 0x22e   :  { %v1340_v10 = vpop.permute.xlu1 %1339 }
 0x22f   :  { %v1785_v29 = vsel %vm1721_vm7, %v1720_v44, %v1340_v10 }
 0x230   :  { %v1849_v22 = vsel %vm1786_vm8, %v1785_v29, %v5584_v5 }
 0x231   :  { %v1944_v42 = vsel %vm1850_vm9, %v1849_v22, %v5604_v56 }
 0x232   :  { %2392 = vmatmul.mubr.bf16.gmra.mrb[60].mxu1 %v1944_v42 }
 0x23e   :  { %v5773_v62 = vpop.f32.mrb[48].mxu0 }
 0x23f   :  { %v2447_v39 = vsel %vm1465_vm3, %v5773_v62, 0.0  ;;  %v2557_v24 = vmul.f32 %v5773_v62, %v5773_v62  ;;  %v2243_v48 = vpop.f32.mrb[49].mxu0 }
 0x240   :  { %v2448_v59 = vadd.f32 %v2447_v39, %v2446_v50  ;;  %v5779_v28 = vpop.f32.mrb[50].mxu0 }
 0x241   :  { %v2644_v12 = vsel %vm1465_vm3, %v2557_v24, 0.0  ;;  %v2449_v5 = vsel %vm1465_vm3, %v5779_v28, 0.0  ;;  %v2558_v56 = vmul.f32 %v5779_v28, %v5779_v28  ;;  %v2246_v32 = vpop.f32.mrb[51].mxu0 }
 0x242   :  { %v2645_v49 = vadd.f32 %v2644_v12, %v2643_v47  ;;  %v2450_v34 = vadd.f32 %v2449_v5, %v2448_v59 }
 0x243   :  { %v2646_v45 = vsel %vm1465_vm3, %v2558_v56, 0.0  ;;  %v5787_v6 = vpop.f32.mrb[16].mxu1 }
 0x244   :  { %v2647_v4 = vadd.f32 %v2646_v45, %v2645_v49  ;;  %v2307_v3 = vpop.f32.mrb[17].mxu1 }
 0x245   :  { %v5789_v50 = vpop.f32.mrb[18].mxu1 }
 0x246   :  { %7049 = vst [vmem:[#allocation4_spill] sm:$0xff] %v5789_v50  ;;  %v2310_v52 = vpop.f32.mrb[19].mxu1 }
 0x25a   :  { %v5791_v13 = vpop.f32.mrb[52].mxu0 }
 0x25b   :  { %v2451_v40 = vsel %vm1465_vm3, %v5791_v13, 0.0  ;;  %v2559_v25 = vmul.f32 %v5791_v13, %v5791_v13  ;;  %v2251_v11 = vpop.f32.mrb[53].mxu0 }
 0x25c   :  { %v2452_v47 = vadd.f32 %v2451_v40, %v2450_v34  ;;  %v5797_v8 = vpop.f32.mrb[54].mxu0 }
 0x25d   :  { %v2648_v23 = vsel %vm1465_vm3, %v2559_v25, 0.0  ;;  %v2453_v41 = vsel %vm1465_vm3, %v5797_v8, 0.0  ;;  %v2560_v26 = vmul.f32 %v5797_v8, %v5797_v8  ;;  %v2254_v44 = vpop.f32.mrb[55].mxu0 }
 0x25e   :  { %v2649_v10 = vadd.f32 %v2648_v23, %v2647_v4  ;;  %v2454_v29 = vadd.f32 %v2453_v41, %v2452_v47 }
 0x25f   :  { %v2650_v22 = vsel %vm1465_vm3, %v2560_v26, 0.0  ;;  %v5805_v42 = vpop.f32.mrb[20].mxu1 }
 0x260   :  { %7050 = vst [vmem:[#allocation5_spill] sm:$0xff] %v5805_v42  ;;  %v2651_v39 = vadd.f32 %v2650_v22, %v2649_v10  ;;  %v2315_v24 = vpop.f32.mrb[21].mxu1 }
 0x261   :  { %v5807_v48 = vpop.f32.mrb[22].mxu1 }
 0x262   :  { %7051 = vst [vmem:[#allocation6_spill] sm:$0xff] %v5807_v48  ;;  %v2318_v59 = vpop.f32.mrb[23].mxu1 }
 0x276   :  { %v5809_v12 = vpop.f32.mrb[56].mxu0 }
 0x277   :  { %v2455_v5 = vsel %vm1465_vm3, %v5809_v12, 0.0  ;;  %v2561_v56 = vmul.f32 %v5809_v12, %v5809_v12  ;;  %v2259_v32 = vpop.f32.mrb[57].mxu0 }
 0x278   :  { %v2456_v49 = vadd.f32 %v2455_v5, %v2454_v29  ;;  %v5815_v34 = vpop.f32.mrb[58].mxu0  ;;  %v2565_v5 = vmul.f32 %v5646_v60, %v5646_v60 }
 0x279   :  { %v2652_v45 = vsel %vm1465_vm3, %v2561_v56, 0.0  ;;  %v2457_v4 = vsel %vm1465_vm3, %v5815_v34, 0.0  ;;  %v2562_v3 = vmul.f32 %v5815_v34, %v5815_v34  ;;  %v2262_v52 = vpop.f32.mrb[59].mxu0 }
 0x27a   :  { %v2653_v40 = vadd.f32 %v2652_v45, %v2651_v39  ;;  %v2458_v25 = vadd.f32 %v2457_v4, %v2456_v49  ;;  %v2463_v52 = vsel %vm1465_vm3, %v5646_v60, 0.0 }
 0x27b   :  { %v2654_v11 = vsel %vm1465_vm3, %v2562_v3, 0.0  ;;  %v5823_v47 = vpop.f32.mrb[24].mxu1 }
 0x27c   :  { %7052 = vst [vmem:[#allocation7_spill] sm:$0xff] %v5823_v47  ;;  %v2655_v23 = vadd.f32 %v2654_v11, %v2653_v40  ;;  %v2323_v41 = vpop.f32.mrb[25].mxu1  ;;  %v2566_v40 = vmul.f32 %v5649_v54, %v5649_v54 }
 0x27d   :  { %v5825_v26 = vpop.f32.mrb[26].mxu1 }
 0x27e   :  { %7053 = vst [vmem:[#allocation8_spill] sm:$0xff] %v5825_v26  ;;  %v2326_v44 = vpop.f32.mrb[27].mxu1 }
 0x292   :  { %v5827_v10 = vpop.f32.mrb[60].mxu0 }
 0x293   :  { %v2459_v29 = vsel %vm1465_vm3, %v5827_v10, 0.0  ;;  %v2563_v22 = vmul.f32 %v5827_v10, %v5827_v10  ;;  %v2267_v24 = vpop.f32.mrb[61].mxu0 }
 0x294   :  { %v2460_v39 = vadd.f32 %v2459_v29, %v2458_v25  ;;  %v5833_v59 = vpop.f32.mrb[62].mxu0  ;;  %v2465_v24 = vsel %vm1465_vm3, %v5649_v54, 0.0 }
 0x295   :  { %v2656_v56 = vsel %vm1465_vm3, %v2563_v22, 0.0  ;;  %v2461_v32 = vsel %vm1465_vm3, %v5833_v59, 0.0  ;;  %v2564_v49 = vmul.f32 %v5833_v59, %v5833_v59  ;;  %v2270_v45 = vpop.f32.mrb[63].mxu0  ;;  %v2660_v22 = vsel %vm1465_vm3, %v2565_v5, 0.0 }
 0x296   :  { %v2657_v4 = vadd.f32 %v2656_v56, %v2655_v23  ;;  %v2462_v3 = vadd.f32 %v2461_v32, %v2460_v39  ;;  %v2567_v23 = vmul.f32 %v5684_v20, %v5684_v20 }
 0x297   :  { %v2658_v25 = vsel %vm1465_vm3, %v2564_v49, 0.0  ;;  %v5847_v11 = vpop.f32.mrb[28].mxu1  ;;  %v2662_v49 = vsel %vm1465_vm3, %v2566_v40, 0.0 }
 0x298   :  { %7054 = vst [vmem:[#allocation9_spill] sm:$0xff] %v5847_v11  ;;  %v2464_v41 = vadd.f32 %v2463_v52, %v2462_v3  ;;  %v2659_v44 = vadd.f32 %v2658_v25, %v2657_v4  ;;  %v2331_v29 = vpop.f32.mrb[29].mxu1  ;;  %v2467_v3 = vsel %vm1465_vm3, %v5684_v20, 0.0  ;;  %v2568_v4 = vmul.f32 %v5687_v1, %v5687_v1 }
 0x299   :  { %v5854_v39 = vpop.f32.mrb[30].mxu1  ;;  %v2664_v25 = vsel %vm1465_vm3, %v2567_v23, 0.0  ;;  %v2469_v29 = vsel %vm1465_vm3, %v5687_v1, 0.0 }
 0x29a   :  { %7055 = vst [vmem:[#allocation10_spill] sm:$0xff] %v5854_v39  ;;  %v2466_v56 = vadd.f32 %v2465_v24, %v2464_v41  ;;  %v2661_v32 = vadd.f32 %v2660_v22, %v2659_v44  ;;  %v2334_v45 = vpop.f32.mrb[31].mxu1  ;;  %v2569_v41 = vmul.f32 %v5722_v9, %v5722_v9  ;;  %v2666_v40 = vsel %vm1465_vm3, %v2568_v4, 0.0 }
 0x29b   :  { %v2471_v24 = vsel %vm1465_vm3, %v5722_v9, 0.0  ;;  %v2570_v45 = vmul.f32 %v5725_v51, %v5725_v51 }
 0x29c   :  { %v2468_v5 = vadd.f32 %v2467_v3, %v2466_v56  ;;  %v2663_v52 = vadd.f32 %v2662_v49, %v2661_v32  ;;  %v2668_v23 = vsel %vm1465_vm3, %v2569_v41, 0.0  ;;  %v2473_v49 = vsel %vm1465_vm3, %v5725_v51, 0.0 }
 0x29d   :  { %v2571_v3 = vmul.f32 %v5756_v37, %v5756_v37  ;;  %v2670_v4 = vsel %vm1465_vm3, %v2570_v45, 0.0 }
 0x29e   :  { %v2470_v44 = vadd.f32 %v2469_v29, %v2468_v5  ;;  %v2665_v22 = vadd.f32 %v2664_v25, %v2663_v52  ;;  %v2475_v25 = vsel %vm1465_vm3, %v5756_v37, 0.0  ;;  %v2572_v29 = vmul.f32 %v5763_v63, %v5763_v63 }
 0x29f   :  { %v2672_v41 = vsel %vm1465_vm3, %v2571_v3, 0.0 }
 0x2a0   :  { %v2472_v56 = vadd.f32 %v2471_v24, %v2470_v44  ;;  %v2667_v32 = vadd.f32 %v2666_v40, %v2665_v22  ;;  %v2477_v24 = vsel %vm1465_vm3, %v5763_v63, 0.0  ;;  %v2674_v37 = vsel %vm1465_vm3, %v2572_v29, 0.0 }
 0x2a2   :  { %v2474_v5 = vadd.f32 %v2473_v49, %v2472_v56  ;;  %v2669_v52 = vadd.f32 %v2668_v23, %v2667_v32  ;;  %v2573_v56 = vmul.f32 %v5787_v6, %v5787_v6 }
 0x2a4   :  { %v2476_v44 = vadd.f32 %v2475_v25, %v2474_v5  ;;  %v2671_v22 = vadd.f32 %v2670_v4, %v2669_v52  ;;  %v5881_v40 = vpop.f32.mrb[32].mxu1  ;;  %v2479_v5 = vsel %vm1465_vm3, %v5787_v6, 0.0  ;;  %v2574_v52 = vmul.f32 %v5789_v50, %v5789_v50 }
 0x2a5   :  { %7056 = vst [vmem:[#allocation11_spill] sm:$0xff] %v5881_v40  ;;  %v2339_v32 = vpop.f32.mrb[33].mxu1  ;;  %v2676_v63 = vsel %vm1465_vm3, %v2573_v56, 0.0 }
 0x2a6   :  { %v2673_v45 = vadd.f32 %v2672_v41, %v2671_v22  ;;  %v2478_v23 = vadd.f32 %v2477_v24, %v2476_v44  ;;  %v5888_v49 = vpop.f32.mrb[34].mxu1  ;;  %v2481_v32 = vsel %vm1465_vm3, %v5789_v50, 0.0  ;;  %v2575_v44 = vmul.f32 %v5805_v42, %v5805_v42 }
 0x2a7   :  { %7057 = vst [vmem:[#allocation12_spill] sm:$0xff] %v5888_v49  ;;  %v2342_v3 = vpop.f32.mrb[35].mxu1  ;;  %v2678_v29 = vsel %vm1465_vm3, %v2574_v52, 0.0  ;;  %v2483_v24 = vsel %vm1465_vm3, %v5805_v42, 0.0 }
 0x2a8   :  { %v2480_v4 = vadd.f32 %v2479_v5, %v2478_v23  ;;  %v2675_v25 = vadd.f32 %v2674_v37, %v2673_v45  ;;  %v2576_v3 = vmul.f32 %v5807_v48, %v5807_v48  ;;  %v2680_v56 = vsel %vm1465_vm3, %v2575_v44, 0.0 }
 0x2a9   :  { %v2485_v45 = vsel %vm1465_vm3, %v5807_v48, 0.0  ;;  %v2577_v5 = vmul.f32 %v5823_v47, %v5823_v47 }
 0x2aa   :  { %v2482_v22 = vadd.f32 %v2481_v32, %v2480_v4  ;;  %v2677_v41 = vadd.f32 %v2676_v63, %v2675_v25  ;;  %v2682_v52 = vsel %vm1465_vm3, %v2576_v3, 0.0  ;;  %v2487_v25 = vsel %vm1465_vm3, %v5823_v47, 0.0 }
 0x2ab   :  { %v2578_v32 = vmul.f32 %v5825_v26, %v5825_v26  ;;  %v2684_v44 = vsel %vm1465_vm3, %v2577_v5, 0.0 }
 0x2ac   :  { %v2484_v23 = vadd.f32 %v2483_v24, %v2482_v22  ;;  %v2679_v37 = vadd.f32 %v2678_v29, %v2677_v41  ;;  %v2489_v29 = vsel %vm1465_vm3, %v5825_v26, 0.0  ;;  %v2579_v24 = vmul.f32 %v5847_v11, %v5847_v11 }
 0x2ad   :  { %v2686_v3 = vsel %vm1465_vm3, %v2578_v32, 0.0  ;;  %v2493_v26 = vsel %vm1465_vm3, %v5854_v39, 0.0 }
 0x2ae   :  { %v2486_v4 = vadd.f32 %v2485_v45, %v2484_v23  ;;  %v2681_v63 = vadd.f32 %v2680_v56, %v2679_v37  ;;  %v2491_v56 = vsel %vm1465_vm3, %v5847_v11, 0.0  ;;  %v2580_v45 = vmul.f32 %v5854_v39, %v5854_v39 }
 0x2b0   :  { %v2488_v22 = vadd.f32 %v2487_v25, %v2486_v4  ;;  %v2683_v41 = vadd.f32 %v2682_v52, %v2681_v63  ;;  %v2688_v25 = vsel %vm1465_vm3, %v2579_v24, 0.0  ;;  %v2690_v11 = vsel %vm1465_vm3, %v2580_v45, 0.0 }
 0x2b2   :  { %v2490_v23 = vadd.f32 %v2489_v29, %v2488_v22  ;;  %v2685_v37 = vadd.f32 %v2684_v44, %v2683_v41  ;;  %v2581_v22 = vmul.f32 %v5881_v40, %v5881_v40 }
 0x2b3   :  { %v5925_v4 = vpop.f32.mrb[36].mxu1 }
 0x2b4   :  { %7058 = vst [vmem:[#allocation13_spill] sm:$0xff] %v5925_v4  ;;  %v2492_v63 = vadd.f32 %v2491_v56, %v2490_v23  ;;  %v2687_v5 = vadd.f32 %v2686_v3, %v2685_v37  ;;  %v2347_v52 = vpop.f32.mrb[37].mxu1  ;;  %v2495_v23 = vsel %vm1465_vm3, %v5881_v40, 0.0  ;;  %v2582_v37 = vmul.f32 %v5888_v49, %v5888_v49 }
 0x2b5   :  { %v5932_v32 = vpop.f32.mrb[38].mxu1  ;;  %v2692_v56 = vsel %vm1465_vm3, %v2581_v22, 0.0  ;;  %v2497_v52 = vsel %vm1465_vm3, %v5888_v49, 0.0 }
 0x2b6   :  { %7059 = vst [vmem:[#allocation14_spill] sm:$0xff] %v5932_v32  ;;  %v2689_v41 = vadd.f32 %v2688_v25, %v2687_v5  ;;  %v2494_v44 = vadd.f32 %v2493_v26, %v2492_v63  ;;  %v2350_v29 = vpop.f32.mrb[39].mxu1  ;;  %v2583_v5 = vmul.f32 %v5925_v4, %v5925_v4  ;;  %v2694_v45 = vsel %vm1465_vm3, %v2582_v37, 0.0 }
 0x2b7   :  { %v2499_v25 = vsel %vm1465_vm3, %v5925_v4, 0.0  ;;  %v2584_v29 = vmul.f32 %v5932_v32, %v5932_v32 }
 0x2b8   :  { %v2691_v24 = vadd.f32 %v2690_v11, %v2689_v41  ;;  %v2496_v3 = vadd.f32 %v2495_v23, %v2494_v44  ;;  %v2696_v22 = vsel %vm1465_vm3, %v2583_v5, 0.0  ;;  %v2501_v44 = vsel %vm1465_vm3, %v5932_v32, 0.0 }
 0x2ba   :  { %v2693_v26 = vadd.f32 %v2692_v56, %v2691_v24  ;;  %v2498_v63 = vadd.f32 %v2497_v52, %v2496_v3  ;;  %v2698_v24 = vsel %vm1465_vm3, %v2584_v29, 0.0 }
 0x2bc   :  { %v2695_v11 = vadd.f32 %v2694_v45, %v2693_v26  ;;  %v2500_v41 = vadd.f32 %v2499_v25, %v2498_v63 }
 0x2be   :  { %v2697_v23 = vadd.f32 %v2696_v22, %v2695_v11  ;;  %v2502_v49 = vadd.f32 %v2501_v44, %v2500_v41 }
 0x2c0   :  { %v2699_v3 = vadd.f32 %v2698_v24, %v2697_v23  ;;  %v5953_v56 = vpop.f32.mrb[40].mxu1 }
 0x2c1   :  { %7060 = vst [vmem:[#allocation15_spill] sm:$0xff] %v5953_v56  ;;  %v2503_v37 = vsel %vm1465_vm3, %v5953_v56, 0.0  ;;  %v2585_v52 = vmul.f32 %v5953_v56, %v5953_v56  ;;  %v2355_v26 = vpop.f32.mrb[41].mxu1 }
 0x2c2   :  { %v2504_v63 = vadd.f32 %v2503_v37, %v2502_v49  ;;  %v5959_v45 = vpop.f32.mrb[42].mxu1 }
 0x2c3   :  { %7061 = vst [vmem:[#allocation16_spill] sm:$0xff] %v5959_v45  ;;  %v2700_v5 = vsel %vm1465_vm3, %v2585_v52, 0.0  ;;  %v2505_v25 = vsel %vm1465_vm3, %v5959_v45, 0.0  ;;  %v2586_v29 = vmul.f32 %v5959_v45, %v5959_v45  ;;  %v2358_v11 = vpop.f32.mrb[43].mxu1 }
 0x2c4   :  { %v2701_v41 = vadd.f32 %v2700_v5, %v2699_v3  ;;  %v2506_v22 = vadd.f32 %v2505_v25, %v2504_v63 }
 0x2c5   :  { %v2702_v44 = vsel %vm1465_vm3, %v2586_v29, 0.0 }
 0x2c6   :  { %v2703_v23 = vadd.f32 %v2702_v44, %v2701_v41 }
 0x2cf   :  { %v5967_v24 = vpop.f32.mrb[44].mxu1 }
 0x2d0   :  { %7062 = vst [vmem:[#allocation17_spill] sm:$0xff] %v5967_v24  ;;  %v2507_v49 = vsel %vm1465_vm3, %v5967_v24, 0.0  ;;  %v2587_v37 = vmul.f32 %v5967_v24, %v5967_v24  ;;  %v2363_v52 = vpop.f32.mrb[45].mxu1 }
 0x2d1   :  { %v2508_v26 = vadd.f32 %v2507_v49, %v2506_v22  ;;  %v5973_v56 = vpop.f32.mrb[46].mxu1 }
 0x2d2   :  { %7063 = vst [vmem:[#allocation18_spill] sm:$0xff] %v5973_v56  ;;  %v2704_v45 = vsel %vm1465_vm3, %v2587_v37, 0.0  ;;  %v2509_v3 = vsel %vm1465_vm3, %v5973_v56, 0.0  ;;  %v2588_v63 = vmul.f32 %v5973_v56, %v5973_v56  ;;  %v2366_v5 = vpop.f32.mrb[47].mxu1 }
 0x2d3   :  { %v2705_v25 = vadd.f32 %v2704_v45, %v2703_v23  ;;  %v2510_v29 = vadd.f32 %v2509_v3, %v2508_v26 }
 0x2d4   :  { %v2706_v11 = vsel %vm1465_vm3, %v2588_v63, 0.0 }
 0x2d5   :  { %v2707_v41 = vadd.f32 %v2706_v11, %v2705_v25 }
 0x2dc   :  { %v5981_v44 = vpop.f32.mrb[48].mxu1 }
 0x2dd   :  { %7064 = vst [vmem:[#allocation19_spill] sm:$0xff] %v5981_v44  ;;  %v2511_v22 = vsel %vm1465_vm3, %v5981_v44, 0.0  ;;  %v2589_v49 = vmul.f32 %v5981_v44, %v5981_v44  ;;  %v2371_v37 = vpop.f32.mrb[49].mxu1 }
 0x2de   :  { %v2512_v52 = vadd.f32 %v2511_v22, %v2510_v29  ;;  %v5987_v24 = vpop.f32.mrb[50].mxu1 }
 0x2df   :  { %7065 = vst [vmem:[#allocation20_spill] sm:$0xff] %v5987_v24  ;;  %v2708_v56 = vsel %vm1465_vm3, %v2589_v49, 0.0  ;;  %v2513_v45 = vsel %vm1465_vm3, %v5987_v24, 0.0  ;;  %v2590_v23 = vmul.f32 %v5987_v24, %v5987_v24  ;;  %v2374_v26 = vpop.f32.mrb[51].mxu1 }
 0x2e0   :  { %v2709_v3 = vadd.f32 %v2708_v56, %v2707_v41  ;;  %v2514_v63 = vadd.f32 %v2513_v45, %v2512_v52 }
 0x2e1   :  { %v2710_v5 = vsel %vm1465_vm3, %v2590_v23, 0.0 }
 0x2e2   :  { %v2711_v25 = vadd.f32 %v2710_v5, %v2709_v3 }
 0x2eb   :  { %v5995_v11 = vpop.f32.mrb[52].mxu1 }
 0x2ec   :  { %7066 = vst [vmem:[#allocation21_spill] sm:$0xff] %v5995_v11  ;;  %v2515_v29 = vsel %vm1465_vm3, %v5995_v11, 0.0  ;;  %v2591_v22 = vmul.f32 %v5995_v11, %v5995_v11  ;;  %v2379_v49 = vpop.f32.mrb[53].mxu1 }
 0x2ed   :  { %v2516_v37 = vadd.f32 %v2515_v29, %v2514_v63  ;;  %v6001_v44 = vpop.f32.mrb[54].mxu1 }
 0x2ee   :  { %7067 = vst [vmem:[#allocation22_spill] sm:$0xff] %v6001_v44  ;;  %v2712_v24 = vsel %vm1465_vm3, %v2591_v22, 0.0  ;;  %v2517_v56 = vsel %vm1465_vm3, %v6001_v44, 0.0  ;;  %v2592_v41 = vmul.f32 %v6001_v44, %v6001_v44  ;;  %v2382_v52 = vpop.f32.mrb[55].mxu1 }
 0x2ef   :  { %v2713_v45 = vadd.f32 %v2712_v24, %v2711_v25  ;;  %v2518_v23 = vadd.f32 %v2517_v56, %v2516_v37 }
 0x2f0   :  { %v2714_v26 = vsel %vm1465_vm3, %v2592_v41, 0.0 }
 0x2f1   :  { %v2715_v3 = vadd.f32 %v2714_v26, %v2713_v45 }
 0x2f8   :  { %v6009_v5 = vpop.f32.mrb[56].mxu1 }
 0x2f9   :  { %7068 = vst [vmem:[#allocation23_spill] sm:$0xff] %v6009_v5  ;;  %v2519_v63 = vsel %vm1465_vm3, %v6009_v5, 0.0  ;;  %v2593_v29 = vmul.f32 %v6009_v5, %v6009_v5  ;;  %v2387_v22 = vpop.f32.mrb[57].mxu1 }
 0x2fa   :  { %v2520_v49 = vadd.f32 %v2519_v63, %v2518_v23  ;;  %v6015_v11 = vpop.f32.mrb[58].mxu1 }
 0x2fb   :  { %7069 = vst [vmem:[#allocation24_spill] sm:$0xff] %v6015_v11  ;;  %v2716_v44 = vsel %vm1465_vm3, %v2593_v29, 0.0  ;;  %v2521_v24 = vsel %vm1465_vm3, %v6015_v11, 0.0  ;;  %v2594_v25 = vmul.f32 %v6015_v11, %v6015_v11  ;;  %v2390_v37 = vpop.f32.mrb[59].mxu1 }
 0x2fc   :  { %v2717_v56 = vadd.f32 %v2716_v44, %v2715_v3  ;;  %v2522_v41 = vadd.f32 %v2521_v24, %v2520_v49 }
 0x2fd   :  { %v2718_v52 = vsel %vm1465_vm3, %v2594_v25, 0.0 }
 0x2fe   :  { %v2719_v45 = vadd.f32 %v2718_v52, %v2717_v56 }
 0x305   :  { %v6023_v26 = vpop.f32.mrb[60].mxu1 }
 0x306   :  { %7070 = vst [vmem:[#allocation25_spill] sm:$0xff] %v6023_v26  ;;  %v2523_v23 = vsel %vm1465_vm3, %v6023_v26, 0.0  ;;  %v2595_v63 = vmul.f32 %v6023_v26, %v6023_v26  ;;  %v2395_v29 = vpop.f32.mrb[61].mxu1 }
 0x307   :  { %v2524_v22 = vadd.f32 %v2523_v23, %v2522_v41  ;;  %v2396_v5 = vpop.f32.mrb[62].mxu1 }
 0x308   :  { %v2720_v32 = vsel %vm1465_vm3, %v2595_v63, 0.0  ;;  %v2525_v37 = vsel %vm1465_vm3, %v2396_v5, 0.0  ;;  %v2596_v44 = vmul.f32 %v2396_v5, %v2396_v5  ;;  %v2398_v3 = vpop.f32.mrb[63].mxu1 }
 0x309   :  { %v2721_v49 = vadd.f32 %v2720_v32, %v2719_v45  ;;  %v2526_v24 = vadd.f32 %v2525_v37, %v2524_v22  ;;  %v2744_v37 = vlaneseq }
 0x30a   :  { %v2722_v25 = vsel %vm1465_vm3, %v2596_v44, 0.0 }
 0x30b   :  { %v2527_v56 = vrot.slane %v2526_v24, 4  ;;  %v2723_v52 = vadd.f32 %v2722_v25, %v2721_v49  ;;  %v2745_v44 = vshrl.u32 %v2744_v37, 7 }
 0x30d   :  { %v2528_v11 = vadd.f32 %v2527_v56, %v2526_v24  ;;  %v2724_v4 = vrot.slane %v2723_v52, 4 }
 0x30f   :  { %v2529_v40 = vrot.slane %v2528_v11, 2  ;;  %v2725_v39 = vadd.f32 %v2724_v4, %v2723_v52  ;;  %v2736_v4 = vld [vmem:[%s7000_s2] sm:$0x1]  ;;  %s4065_s2 = smov 120  }
 0x311   :  { %v2530_v26 = vadd.f32 %v2529_v40, %v2528_v11  ;;  %v2726_v29 = vrot.slane %v2725_v39, 2  ;;  %v2746_v40 = vsub.s32 0, %v2745_v44  ;;  %v7078_v44 = vld [vmem:[#allocation8_spill] sm:$0xff] }
 0x313   :  { %v2531_v41 = vrot.slane %v2530_v26, 1  ;;  %v2727_v23 = vadd.f32 %v2726_v29, %v2725_v39  ;;  %v2740_v39 = vld [vmem:[%s7001_s3] sm:$0x1] }
 0x315   :  { %v2532_v47 = vadd.f32 %v2531_v41, %v2530_v26  ;;  %v2728_v63 = vrot.slane %v2727_v23, 1  ;;  %v7072_v41 = vld [vmem:[#allocation2_spill] sm:$0xff] }
 0x317   :  { %v2729_v48 = vadd.f32 %v2728_v63, %v2727_v23  ;;  %v2731_v42 = vmul.f32 0.001953125, %v2532_v47  ;;  %v7073_v23 = vld [vmem:[#allocation3_spill] sm:$0xff]  ;;  %v7074_v63 = vld [vmem:[#allocation4_spill] sm:$0xff] }
 0x319   :  { %v2732_v50 = vmul.f32 0.001953125, %v2729_v48  ;;  %v2733_v3 = vmul.f32 %v2731_v42, %v2731_v42 }
 0x31b   :  { %v2734_v32 = vsub.f32 %v2732_v50, %v2733_v3  ;;  %v7075_v3 = vld [vmem:[#allocation5_spill] sm:$0xff] }
 0x31d   :  { %v2735_v45 = vmax.f32 %v2734_v32, 0.0  ;;  %v7076_v32 = vld [vmem:[#allocation6_spill] sm:$0xff] }
 0x31f   :  { %v2737_v22 = vadd.f32 1e-05, %v2735_v45 }
 0x321   :  { %3798 = vrsqrt.f32 %v2737_v22  ;;  %v7077_v22 = vld [vmem:[#allocation7_spill] sm:$0xff] }
 0x32b   :  { %v3799_v11 = vpop.eup %3798 }
 0x32c   :  { %v2739_v49 = vmul.f32 %v3799_v11, %v2736_v4  ;;  %v7079_v4 = vld [vmem:[#allocation9_spill] sm:$0xff]  ;;  %v7080_v11 = vld [vmem:[#allocation10_spill] sm:$0xff] }
 0x32e   :  { %v2741_v47 = vmul.f32 %v2739_v49, %v2731_v42  ;;  %v6038_v48 = vrot.slane %v2739_v49, %v2746_v40 }
 0x330   :  { %v2742_v50 = vsub.f32 %v2740_v39, %v2741_v47  ;;  %v2812_v26 = vmul.f32 %v6038_v48, %v2396_v5  ;;  %v6043_v24 = vmul.f32 %v6038_v48, %v5192_v53  ;;  %v6047_v25 = vmul.f32 %v6038_v48, %v5205_v43  ;;  %v7081_v39 = vld [vmem:[#allocation11_spill] sm:$0xff] }
 0x331   :  { %v6051_v56 = vmul.f32 %v6038_v48, %v5253_v7  ;;  %v6055_v42 = vmul.f32 %v6038_v48, %v5272_v27  ;;  %v6059_v52 = vmul.f32 %v6038_v48, %v5309_v18  ;;  %v6063_v53 = vmul.f32 %v6038_v48, %v5320_v46 }
 0x332   :  { %v6065_v5 = vrot.slane %v2742_v50, %v2746_v40  ;;  %v6069_v43 = vmul.f32 %v6038_v48, %v5372_v14  ;;  %v6073_v7 = vmul.f32 %v6038_v48, %v5391_v57  ;;  %v6077_v27 = vmul.f32 %v6038_v48, %v5431_v17  ;;  %v7082_v50 = vld [vmem:[#allocation12_spill] sm:$0xff] }
 0x333   :  { %v6081_v18 = vmul.f32 %v6038_v48, %v5444_v35  ;;  %v6085_v46 = vmul.f32 %v6038_v48, %v5493_v21  ;;  %v6089_v14 = vmul.f32 %v6038_v48, %v5513_v55  ;;  %v6093_v57 = vmul.f32 %v6038_v48, %v5547_v61 }
 0x334   :  { %v6096_v29 = vadd.f32 %v6065_v5, %v2812_v26  ;;  %v6100_v17 = vmul.f32 %v6038_v48, %v5557_v58  ;;  %v6104_v35 = vmul.f32 %v6038_v48, %v5588_v33  ;;  %v6108_v21 = vmul.f32 %v6038_v48, %v5602_v30 }
 0x335   :  { %v6112_v55 = vmul.f32 %v6038_v48, %v5628_v16  ;;  %v6116_v61 = vmul.f32 %v6038_v48, %v5635_v15  ;;  %v6120_v58 = vmul.f32 %v6038_v48, %v5666_v31  ;;  %v6124_v33 = vmul.f32 %v6038_v48, %v5673_v0 }
 0x336   :  { %7071 = vst [vmem:[#allocation26_spill] sm:$0xff] %v6096_v29  ;;  %v6128_v30 = vmul.f32 %v6038_v48, %v5704_v19  ;;  %v6132_v16 = vmul.f32 %v6038_v48, %v5711_v38  ;;  %v6136_v15 = vmul.f32 %v6038_v48, %v5741_v2  ;;  %v6140_v31 = vmul.f32 %v6038_v48, %v5748_v36  ;;  %v7094_v29 = vld [vmem:[#allocation19_spill] sm:$0xff] }
 0x337   :  { %v6144_v0 = vmul.f32 %v6038_v48, %v5773_v62  ;;  %v6148_v19 = vmul.f32 %v6038_v48, %v5779_v28  ;;  %v6152_v38 = vmul.f32 %v6038_v48, %v5791_v13  ;;  %v6156_v2 = vmul.f32 %v6038_v48, %v5797_v8 }
 0x338   :  { %v6160_v36 = vmul.f32 %v6038_v48, %v5809_v12  ;;  %v6164_v62 = vmul.f32 %v6038_v48, %v5815_v34  ;;  %v6168_v28 = vmul.f32 %v6038_v48, %v5827_v10  ;;  %v6172_v13 = vmul.f32 %v6038_v48, %v5833_v59 }
 0x339   :  { %v6176_v8 = vmul.f32 %v6038_v48, %v5646_v60  ;;  %v6180_v12 = vmul.f32 %v6038_v48, %v5649_v54  ;;  %v6184_v34 = vmul.f32 %v6038_v48, %v5684_v20  ;;  %v6188_v10 = vmul.f32 %v6038_v48, %v5687_v1 }
 0x33a   :  { %v6192_v59 = vmul.f32 %v6038_v48, %v5722_v9  ;;  %v6196_v60 = vmul.f32 %v6038_v48, %v5725_v51  ;;  %v6200_v54 = vmul.f32 %v6038_v48, %v7072_v41  ;;  %v6204_v20 = vmul.f32 %v6038_v48, %v7073_v23  ;;  %v7083_v41 = vld [vmem:[#allocation13_spill] sm:$0xff] }
 0x33b   :  { %v6208_v1 = vmul.f32 %v6038_v48, %v5787_v6  ;;  %v6212_v9 = vmul.f32 %v6038_v48, %v7074_v63  ;;  %v6216_v51 = vmul.f32 %v6038_v48, %v7075_v3  ;;  %v6220_v45 = vmul.f32 %v6038_v48, %v7076_v32  ;;  %v7084_v63 = vld [vmem:[#allocation14_spill] sm:$0xff]  ;;  %v7086_v32 = vld [vmem:[#allocation15_spill] sm:$0xff] }
 0x33c   :  { %v6224_v37 = vmul.f32 %v6038_v48, %v7077_v22  ;;  %v6228_v6 = vmul.f32 %v6038_v48, %v7078_v44  ;;  %v6232_v40 = vmul.f32 %v6038_v48, %v7079_v4  ;;  %v6236_v49 = vmul.f32 %v6038_v48, %v7080_v11  ;;  %v7088_v44 = vld [vmem:[#allocation16_spill] sm:$0xff]  ;;  %v7090_v11 = vld [vmem:[#allocation17_spill] sm:$0xff] }
 0x33d   :  { %v6240_v47 = vmul.f32 %v6038_v48, %v7081_v39  ;;  %v6244_v26 = vmul.f32 %v6038_v48, %v7082_v50  ;;  %v6248_v23 = vmul.f32 %v6038_v48, %v7083_v41  ;;  %v6252_v3 = vmul.f32 %v6038_v48, %v7084_v63  ;;  %v7092_v50 = vld [vmem:[#allocation18_spill] sm:$0xff] }
 0x33e   :  { %v6256_v22 = vmul.f32 %v6038_v48, %v7086_v32  ;;  %v6260_v4 = vmul.f32 %v6038_v48, %v7088_v44  ;;  %v6264_v39 = vmul.f32 %v6038_v48, %v7090_v11  ;;  %v6268_v41 = vmul.f32 %v6038_v48, %v7092_v50 }
 0x33f   :  { %7085 = vst [vmem:[#allocation2_spill] sm:$0xff] %v6252_v3  ;;  %v6272_v63 = vmul.f32 %v6038_v48, %v7094_v29  ;;  %v7096_v3 = vld [vmem:[#allocation20_spill] sm:$0xff] }
 0x340   :  { %7087 = vst [vmem:[#allocation3_spill] sm:$0xff] %v6256_v22  ;;  %7089 = vst [vmem:[#allocation4_spill] sm:$0xff] %v6260_v4  ;;  %v6276_v32 = vmul.f32 %v6038_v48, %v7096_v3  ;;  %v7097_v22 = vld [vmem:[#allocation21_spill] sm:$0xff]  ;;  %v7098_v4 = vld [vmem:[#allocation22_spill] sm:$0xff] }
 0x341   :  { %7091 = vst [vmem:[#allocation5_spill] sm:$0xff] %v6264_v39  ;;  %7093 = vst [vmem:[#allocation6_spill] sm:$0xff] %v6268_v41  ;;  %v6280_v44 = vmul.f32 %v6038_v48, %v7097_v22  ;;  %v6284_v11 = vmul.f32 %v6038_v48, %v7098_v4  ;;  %v7099_v39 = vld [vmem:[#allocation23_spill] sm:$0xff]  ;;  %v7100_v41 = vld [vmem:[#allocation24_spill] sm:$0xff]  ;;  %v6300_v22 = vadd.f32 %v6065_v5, %v6043_v24 }
 0x342   :  { %7095 = vst [vmem:[#allocation7_spill] sm:$0xff] %v6272_v63  ;;  %v6288_v50 = vmul.f32 %v6038_v48, %v7099_v39  ;;  %v6292_v29 = vmul.f32 %v6038_v48, %v7100_v41  ;;  %v7101_v63 = vld [vmem:[#allocation25_spill] sm:$0xff]  ;;  %v6304_v4 = vadd.f32 %v6065_v5, %v6047_v25  ;;  %v6308_v39 = vadd.f32 %v6065_v5, %v6051_v56 }
 0x343   :  { %v6296_v3 = vmul.f32 %v6038_v48, %v7101_v63  ;;  %v6312_v41 = vadd.f32 %v6065_v5, %v6055_v42  ;;  %v6316_v48 = vadd.f32 %v6065_v5, %v6059_v52  ;;  %v6320_v24 = vadd.f32 %v6065_v5, %v6063_v53 }
 0x344   :  { %v6324_v25 = vadd.f32 %v6065_v5, %v6069_v43  ;;  %v6328_v56 = vadd.f32 %v6065_v5, %v6073_v7  ;;  %v6332_v42 = vadd.f32 %v6065_v5, %v6077_v27  ;;  %v6336_v52 = vadd.f32 %v6065_v5, %v6081_v18 }
 0x345   :  { %7102 = vst [vmem:[#allocation8_spill] sm:$0xff] %v6316_v48  ;;  %7103 = vst [vmem:[#allocation9_spill] sm:$0xff] %v6320_v24  ;;  %v6340_v53 = vadd.f32 %v6065_v5, %v6085_v46  ;;  %v6344_v43 = vadd.f32 %v6065_v5, %v6089_v14  ;;  %v6348_v7 = vadd.f32 %v6065_v5, %v6093_v57 }
 0x346   :  { %7104 = vst [vmem:[#allocation10_spill] sm:$0xff] %v6328_v56  ;;  %7105 = vst [vmem:[#allocation11_spill] sm:$0xff] %v6332_v42  ;;  %v6352_v27 = vadd.f32 %v6065_v5, %v6100_v17  ;;  %v6356_v18 = vadd.f32 %v6065_v5, %v6104_v35  ;;  %v6360_v46 = vadd.f32 %v6065_v5, %v6108_v21  ;;  %v7117_v63 = vld [vmem:[#allocation2_spill] sm:$0xff] }
 0x347   :  { %7106 = vst [vmem:[#allocation12_spill] sm:$0xff] %v6336_v52  ;;  %7107 = vst [vmem:[#allocation13_spill] sm:$0xff] %v6340_v53  ;;  %v6364_v14 = vadd.f32 %v6065_v5, %v6112_v55  ;;  %v6368_v57 = vadd.f32 %v6065_v5, %v6116_v61  ;;  %v6372_v17 = vadd.f32 %v6065_v5, %v6120_v58 }
 0x348   :  { %7108 = vst [vmem:[#allocation14_spill] sm:$0xff] %v6344_v43  ;;  %7109 = vst [vmem:[#allocation15_spill] sm:$0xff] %v6356_v18  ;;  %v6376_v35 = vadd.f32 %v6065_v5, %v6124_v33  ;;  %v6380_v21 = vadd.f32 %v6065_v5, %v6128_v30  ;;  %v6384_v55 = vadd.f32 %v6065_v5, %v6132_v16 }
 0x349   :  { %v6388_v61 = vadd.f32 %v6065_v5, %v6136_v15  ;;  %v6392_v58 = vadd.f32 %v6065_v5, %v6140_v31  ;;  %v6396_v33 = vadd.f32 %v6065_v5, %v6144_v0  ;;  %v6400_v30 = vadd.f32 %v6065_v5, %v6148_v19 }
 0x34a   :  { %v6404_v16 = vadd.f32 %v6065_v5, %v6152_v38  ;;  %v6408_v15 = vadd.f32 %v6065_v5, %v6156_v2  ;;  %v6412_v31 = vadd.f32 %v6065_v5, %v6160_v36  ;;  %v6416_v0 = vadd.f32 %v6065_v5, %v6164_v62 }
 0x34b   :  { %v6420_v19 = vadd.f32 %v6065_v5, %v6168_v28  ;;  %v6424_v38 = vadd.f32 %v6065_v5, %v6172_v13  ;;  %v6428_v2 = vadd.f32 %v6065_v5, %v6176_v8  ;;  %v6432_v36 = vadd.f32 %v6065_v5, %v6180_v12 }
 0x34c   :  { %v6436_v62 = vadd.f32 %v6065_v5, %v6184_v34  ;;  %v6440_v28 = vadd.f32 %v6065_v5, %v6188_v10  ;;  %v6444_v13 = vadd.f32 %v6065_v5, %v6192_v59  ;;  %v6448_v8 = vadd.f32 %v6065_v5, %v6196_v60 }
 0x34d   :  { %v6452_v12 = vadd.f32 %v6065_v5, %v6200_v54  ;;  %v6456_v34 = vadd.f32 %v6065_v5, %v6204_v20  ;;  %v6460_v10 = vadd.f32 %v6065_v5, %v6208_v1  ;;  %v6464_v59 = vadd.f32 %v6065_v5, %v6212_v9 }
 0x34e   :  { %v6468_v60 = vadd.f32 %v6065_v5, %v6216_v51  ;;  %v6472_v54 = vadd.f32 %v6065_v5, %v6220_v45  ;;  %v6476_v20 = vadd.f32 %v6065_v5, %v6224_v37  ;;  %v6480_v1 = vadd.f32 %v6065_v5, %v6228_v6 }
 0x34f   :  { %v6484_v9 = vadd.f32 %v6065_v5, %v6232_v40  ;;  %v6488_v51 = vadd.f32 %v6065_v5, %v6236_v49  ;;  %v6492_v45 = vadd.f32 %v6065_v5, %v6240_v47  ;;  %v6496_v37 = vadd.f32 %v6065_v5, %v6244_v26 }
 0x350   :  { %7110 = vst [vmem:[#allocation16_spill] sm:$0xff] %v6476_v20  ;;  %7111 = vst [vmem:[#allocation17_spill] sm:$0xff] %v6480_v1  ;;  %v6500_v6 = vadd.f32 %v6065_v5, %v6248_v23  ;;  %v6504_v40 = vadd.f32 %v6065_v5, %v7117_v63 }
 0x351   :  { %7112 = vst [vmem:[#allocation18_spill] sm:$0xff] %v6484_v9  ;;  %7113 = vst [vmem:[#allocation19_spill] sm:$0xff] %v6488_v51  ;;  %v7118_v9 = vld [vmem:[#allocation3_spill] sm:$0xff]  ;;  %v7119_v51 = vld [vmem:[#allocation4_spill] sm:$0xff] }
 0x352   :  { %7114 = vst [vmem:[#allocation20_spill] sm:$0xff] %v6492_v45  ;;  %7115 = vst [vmem:[#allocation21_spill] sm:$0xff] %v6496_v37  ;;  %v6508_v49 = vadd.f32 %v6065_v5, %v7118_v9  ;;  %v6512_v47 = vadd.f32 %v6065_v5, %v7119_v51  ;;  %v7120_v45 = vld [vmem:[#allocation5_spill] sm:$0xff]  ;;  %v7121_v37 = vld [vmem:[#allocation6_spill] sm:$0xff]  ;;  %v6528_v9 = vadd.f32 %v6065_v5, %v6276_v32 }
 0x353   :  { %7116 = vst [vmem:[#allocation22_spill] sm:$0xff] %v6500_v6  ;;  %v6516_v26 = vadd.f32 %v6065_v5, %v7120_v45  ;;  %v6520_v23 = vadd.f32 %v6065_v5, %v7121_v37  ;;  %v7122_v6 = vld [vmem:[#allocation7_spill] sm:$0xff]  ;;  %v6532_v51 = vadd.f32 %v6065_v5, %v6280_v44  ;;  %v6536_v45 = vadd.f32 %v6065_v5, %v6284_v11 }
 0x354   :  { %v6524_v63 = vadd.f32 %v6065_v5, %v7122_v6  ;;  %7123 = vst [vmem:[#allocation23_spill] sm:$0xff] %v6528_v9  ;;  %v6540_v37 = vadd.f32 %v6065_v5, %v6288_v50  ;;  %v6544_v6 = vadd.f32 %v6065_v5, %v6292_v29  ;;  %v6548_v32 = vadd.f32 %v6065_v5, %v6296_v3 }
 0x355   :  { %7124 = vst [vmem:[#allocation24_spill] sm:$0xff] %v6532_v51  ;;  %7125 = vst [vmem:[#allocation25_spill] sm:$0xff] %v6536_v45  ;;  %v3698_v9 = vmul.f32 -1.442695, %v6304_v4  ;;  %v3697_v44 = vmul.f32 -1.442695, %v6300_v22 }
 0x356   :  { %7126 = vst [vmem:[#allocation2_spill] sm:$0xff] %v6540_v37  ;;  %v3700_v5 = vmul.f32 -1.442695, %v6312_v41  ;;  %v3699_v3 = vmul.f32 -1.442695, %v6308_v39 }
 0x357   :  { %3800 = vpow2.f32 %v3698_v9  ;;  %v3702_v9 = vmul.f32 -1.442695, %v6320_v24  ;;  %v3707_v24 = vmul.f32 -1.442695, %v6340_v53 }
 0x358   :  { %3802 = vpow2.f32 %v3697_v44  ;;  %v3701_v44 = vmul.f32 -1.442695, %v6316_v48 }
 0x361   :  { %v3801_v11 = vpop.eup %3800 }
 0x362   :  { %v3076_v45 = vadd.f32 1.0, %v3801_v11  ;;  %v3803_v51 = vpop.eup %3802  ;;  %v3705_v11 = vmul.f32 -1.442695, %v6332_v42 }
 0x363   :  { %v3075_v50 = vadd.f32 1.0, %v3803_v51  ;;  %v3704_v51 = vmul.f32 -1.442695, %v6328_v56 }
 0x364   :  { %3804 = vrcp.f32 %v3076_v45  ;;  %v3703_v45 = vmul.f32 -1.442695, %v6324_v25 }
 0x365   :  { %3806 = vrcp.f32 %v3075_v50 }
 0x366   :  { %3808 = vpow2.f32 %v3700_v5  ;;  %v3708_v5 = vmul.f32 -1.442695, %v6344_v43  ;;  %v3711_v43 = vmul.f32 -1.442695, %v6356_v18 }
 0x367   :  { %3810 = vpow2.f32 %v3699_v3 }
 0x368   :  { %3812 = vpow2.f32 %v3702_v9 }
 0x369   :  { %3814 = vpow2.f32 %v3701_v44  ;;  %v3709_v44 = vmul.f32 -1.442695, %v6348_v7 }
 0x36a   :  { %3816 = vpow2.f32 %v3704_v51  ;;  %v3710_v51 = vmul.f32 -1.442695, %v6352_v27 }
 0x36b   :  { %3818 = vpow2.f32 %v3703_v45 }
 0x36e   :  { %v3805_v37 = vpop.eup %3804 }
 0x36f   :  { %3333 = vrot.lane.b32.xlu1 %v3805_v37, %s4065_s2  ;;  %v3807_v29 = vpop.eup %3806  ;;  %v3706_v37 = vmul.f32 -1.442695, %v6336_v52 }
 0x370   :  { %3331 = vrot.lane.b32.xlu0 %v3807_v29, %s4065_s2  ;;  %v3809_v50 = vpop.eup %3808 }
 0x371   :  { %v3811_v29 = vpop.eup %3810  ;;  %3820 = vpow2.f32 %v3706_v37  ;;  %v3078_v3 = vadd.f32 1.0, %v3809_v50  ;;  %v3712_v37 = vmul.f32 -1.442695, %v6360_v46 }
 0x372   :  { %3822 = vpow2.f32 %v3705_v11  ;;  %v3813_v56 = vpop.eup %3812  ;;  %v3077_v9 = vadd.f32 1.0, %v3811_v29 }
 0x373   :  { %v3815_v48 = vpop.eup %3814  ;;  %3824 = vpow2.f32 %v3707_v24  ;;  %v3080_v45 = vadd.f32 1.0, %v3813_v56  ;;  %v3714_v56 = vmul.f32 -1.442695, %v6368_v57 }
 0x374   :  { %3826 = vpow2.f32 %v3708_v5  ;;  %v3817_v42 = vpop.eup %3816  ;;  %v3079_v52 = vadd.f32 1.0, %v3815_v48  ;;  %v3713_v5 = vmul.f32 -1.442695, %v6364_v14 }
 0x375   :  { %3828 = vrcp.f32 %v3078_v3  ;;  %v3819_v53 = vpop.eup %3818  ;;  %v3082_v11 = vadd.f32 1.0, %v3817_v42  ;;  %v3715_v42 = vmul.f32 -1.442695, %v6372_v17 }
 0x376   :  { %3830 = vrcp.f32 %v3077_v9  ;;  %v3081_v29 = vadd.f32 1.0, %v3819_v53 }
 0x377   :  { %3832 = vpow2.f32 %v3709_v44 }
 0x378   :  { %3834 = vpow2.f32 %v3710_v51 }
 0x379   :  { %3836 = vrcp.f32 %v3080_v45 }
 0x37a   :  { %3838 = vrcp.f32 %v3079_v52  ;;  %v3716_v52 = vmul.f32 -1.442695, %v6376_v35 }
 0x37b   :  { %v3821_v50 = vpop.eup %3820  ;;  %3840 = vpow2.f32 %v3711_v43 }
 0x37c   :  { %v3823_v24 = vpop.eup %3822  ;;  %3842 = vpow2.f32 %v3712_v37  ;;  %v3084_v3 = vadd.f32 1.0, %v3821_v50  ;;  %v3717_v50 = vmul.f32 -1.442695, %v6380_v21 }
 0x37d   :  { %v3825_v48 = vpop.eup %3824  ;;  %3844 = vrcp.f32 %v3082_v11  ;;  %v3083_v44 = vadd.f32 1.0, %v3823_v24  ;;  %v3718_v24 = vmul.f32 -1.442695, %v6384_v55 }
 0x37e   :  { %v3827_v9 = vpop.eup %3826  ;;  %3846 = vrcp.f32 %v3081_v29  ;;  %v3085_v37 = vadd.f32 1.0, %v3825_v48 }
 0x37f   :  { %v3829_v18 = vpop.eup %3828  ;;  %3848 = vpow2.f32 %v3713_v5  ;;  %v3086_v43 = vadd.f32 1.0, %v3827_v9  ;;  %v3719_v9 = vmul.f32 -1.442695, %v6388_v61 }
 0x380   :  { %v3831_v51 = vpop.eup %3830  ;;  %3850 = vpow2.f32 %v3714_v56  ;;  %3337 = vrot.lane.b32.xlu1 %v3829_v18, %s4065_s2 }
 0x381   :  { %v3833_v53 = vpop.eup %3832  ;;  %3335 = vrot.lane.b32.xlu0 %v3831_v51, %s4065_s2  ;;  %3852 = vrcp.f32 %v3084_v3 }
 0x382   :  { %v3835_v45 = vpop.eup %3834  ;;  %3854 = vrcp.f32 %v3083_v44  ;;  %v3087_v3 = vadd.f32 1.0, %v3833_v53 }
 0x383   :  { %v3837_v11 = vpop.eup %3836  ;;  %3856 = vpow2.f32 %v3715_v42  ;;  %v3088_v18 = vadd.f32 1.0, %v3835_v45  ;;  %v3720_v42 = vmul.f32 -1.442695, %v6392_v58 }
 0x384   :  { %v3839_v29 = vpop.eup %3838  ;;  %3858 = vpow2.f32 %v3716_v52  ;;  %3341 = vrot.lane.b32.xlu1 %v3837_v11, %s4065_s2 }
 0x385   :  { %v3841_v5 = vpop.eup %3840  ;;  %3860 = vrcp.f32 %v3086_v43  ;;  %3339 = vrot.lane.b32.xlu0 %v3839_v29, %s4065_s2 }
 0x386   :  { %v3843_v56 = vpop.eup %3842  ;;  %3862 = vrcp.f32 %v3085_v37  ;;  %v3089_v45 = vadd.f32 1.0, %v3841_v5  ;;  %v3721_v37 = vmul.f32 -1.442695, %v6396_v33 }
 0x387   :  { %v3845_v48 = vpop.eup %3844  ;;  %3864 = vpow2.f32 %v3717_v50  ;;  %v3090_v52 = vadd.f32 1.0, %v3843_v56  ;;  %v3722_v50 = vmul.f32 -1.442695, %v6400_v30 }
 0x388   :  { %v3847_v44 = vpop.eup %3846  ;;  %3866 = vpow2.f32 %v3718_v24  ;;  %3345 = vrot.lane.b32.xlu1 %v3845_v48, %s4065_s2 }
 0x389   :  { %v3849_v51 = vpop.eup %3848  ;;  %3868 = vrcp.f32 %v3088_v18  ;;  %3343 = vrot.lane.b32.xlu0 %v3847_v44, %s4065_s2 }
 0x38a   :  { %v3851_v43 = vpop.eup %3850  ;;  %3870 = vrcp.f32 %v3087_v3  ;;  %v3091_v56 = vadd.f32 1.0, %v3849_v51  ;;  %v3723_v3 = vmul.f32 -1.442695, %v6404_v16 }
 0x38b   :  { %v3853_v53 = vpop.eup %3852  ;;  %3872 = vpow2.f32 %v3719_v9  ;;  %v3092_v24 = vadd.f32 1.0, %v3851_v43  ;;  %v3724_v9 = vmul.f32 -1.442695, %v6408_v15 }
 0x38c   :  { %v3855_v11 = vpop.eup %3854  ;;  %3874 = vpow2.f32 %v3720_v42  ;;  %3349 = vrot.lane.b32.xlu1 %v3853_v53, %s4065_s2 }
 0x38d   :  { %v3857_v29 = vpop.eup %3856  ;;  %3876 = vrcp.f32 %v3090_v52  ;;  %3347 = vrot.lane.b32.xlu0 %v3855_v11, %s4065_s2 }
 0x38e   :  { %v3859_v18 = vpop.eup %3858  ;;  %3878 = vrcp.f32 %v3089_v45  ;;  %v3093_v43 = vadd.f32 1.0, %v3857_v29  ;;  %v3725_v45 = vmul.f32 -1.442695, %v6412_v31 }
 0x38f   :  { %v3861_v5 = vpop.eup %3860  ;;  %3880 = vpow2.f32 %v3721_v37  ;;  %v3094_v42 = vadd.f32 1.0, %v3859_v18  ;;  %v3726_v37 = vmul.f32 -1.442695, %v6416_v0 }
 0x390   :  { %v3863_v48 = vpop.eup %3862  ;;  %3882 = vpow2.f32 %v3722_v50  ;;  %3353 = vrot.lane.b32.xlu1 %v3861_v5, %s4065_s2 }
 0x391   :  { %v3865_v44 = vpop.eup %3864  ;;  %3884 = vrcp.f32 %v3092_v24  ;;  %3351 = vrot.lane.b32.xlu0 %v3863_v48, %s4065_s2 }
 0x392   :  { %v3867_v52 = vpop.eup %3866  ;;  %3886 = vrcp.f32 %v3091_v56  ;;  %v3095_v18 = vadd.f32 1.0, %v3865_v44  ;;  %v3727_v56 = vmul.f32 -1.442695, %v6420_v19 }
 0x393   :  { %v3869_v51 = vpop.eup %3868  ;;  %3888 = vpow2.f32 %v3723_v3  ;;  %v3096_v50 = vadd.f32 1.0, %v3867_v52  ;;  %v3728_v3 = vmul.f32 -1.442695, %v6424_v38 }
 0x394   :  { %v3871_v53 = vpop.eup %3870  ;;  %3890 = vpow2.f32 %v3724_v9  ;;  %3357 = vrot.lane.b32.xlu1 %v3869_v51, %s4065_s2 }
 0x395   :  { %v3873_v11 = vpop.eup %3872  ;;  %3892 = vrcp.f32 %v3094_v42  ;;  %3355 = vrot.lane.b32.xlu0 %v3871_v53, %s4065_s2 }
 0x396   :  { %v3875_v24 = vpop.eup %3874  ;;  %3894 = vrcp.f32 %v3093_v43  ;;  %v3097_v52 = vadd.f32 1.0, %v3873_v11  ;;  %v3729_v43 = vmul.f32 -1.442695, %v6428_v2 }
 0x397   :  { %v3877_v29 = vpop.eup %3876  ;;  %3896 = vpow2.f32 %v3725_v45  ;;  %v3098_v9 = vadd.f32 1.0, %v3875_v24  ;;  %v3730_v45 = vmul.f32 -1.442695, %v6432_v36 }
 0x398   :  { %v3879_v5 = vpop.eup %3878  ;;  %3898 = vpow2.f32 %v3726_v37  ;;  %3361 = vrot.lane.b32.xlu1 %v3877_v29, %s4065_s2 }
 0x399   :  { %v3881_v48 = vpop.eup %3880  ;;  %3900 = vrcp.f32 %v3096_v50  ;;  %3359 = vrot.lane.b32.xlu0 %v3879_v5, %s4065_s2 }
 0x39a   :  { %v3883_v42 = vpop.eup %3882  ;;  %3902 = vrcp.f32 %v3095_v18  ;;  %v3099_v24 = vadd.f32 1.0, %v3881_v48  ;;  %v3731_v18 = vmul.f32 -1.442695, %v6436_v62 }
 0x39b   :  { %v3885_v44 = vpop.eup %3884  ;;  %3904 = vpow2.f32 %v3727_v56  ;;  %v3100_v37 = vadd.f32 1.0, %v3883_v42  ;;  %v3732_v56 = vmul.f32 -1.442695, %v6440_v28 }
 0x39c   :  { %v3887_v51 = vpop.eup %3886  ;;  %3906 = vpow2.f32 %v3728_v3  ;;  %3365 = vrot.lane.b32.xlu1 %v3885_v44, %s4065_s2 }
 0x39d   :  { %v3889_v53 = vpop.eup %3888  ;;  %3908 = vrcp.f32 %v3098_v9  ;;  %3363 = vrot.lane.b32.xlu0 %v3887_v51, %s4065_s2 }
 0x39e   :  { %v3891_v50 = vpop.eup %3890  ;;  %3910 = vrcp.f32 %v3097_v52  ;;  %v3101_v42 = vadd.f32 1.0, %v3889_v53  ;;  %v3733_v52 = vmul.f32 -1.442695, %v6444_v13 }
 0x39f   :  { %v3893_v11 = vpop.eup %3892  ;;  %3912 = vpow2.f32 %v3729_v43  ;;  %v3102_v3 = vadd.f32 1.0, %v3891_v50  ;;  %v3734_v43 = vmul.f32 -1.442695, %v6448_v8 }
 0x3a0   :  { %v3895_v29 = vpop.eup %3894  ;;  %3914 = vpow2.f32 %v3730_v45  ;;  %3369 = vrot.lane.b32.xlu1 %v3893_v11, %s4065_s2 }
 0x3a1   :  { %v3897_v5 = vpop.eup %3896  ;;  %3916 = vrcp.f32 %v3100_v37  ;;  %3367 = vrot.lane.b32.xlu0 %v3895_v29, %s4065_s2 }
 0x3a2   :  { %v3899_v9 = vpop.eup %3898  ;;  %3918 = vrcp.f32 %v3099_v24  ;;  %v3103_v50 = vadd.f32 1.0, %v3897_v5  ;;  %v3735_v24 = vmul.f32 -1.442695, %v6452_v12 }
 0x3a3   :  { %v3901_v48 = vpop.eup %3900  ;;  %3920 = vpow2.f32 %v3731_v18  ;;  %v3104_v45 = vadd.f32 1.0, %v3899_v9  ;;  %v3736_v18 = vmul.f32 -1.442695, %v6456_v34 }
 0x3a4   :  { %v3903_v44 = vpop.eup %3902  ;;  %3922 = vpow2.f32 %v3732_v56  ;;  %3373 = vrot.lane.b32.xlu1 %v3901_v48, %s4065_s2 }
 0x3a5   :  { %v3905_v51 = vpop.eup %3904  ;;  %3924 = vrcp.f32 %v3102_v3  ;;  %3371 = vrot.lane.b32.xlu0 %v3903_v44, %s4065_s2 }
 0x3a6   :  { %v3907_v37 = vpop.eup %3906  ;;  %3926 = vrcp.f32 %v3101_v42  ;;  %v3105_v9 = vadd.f32 1.0, %v3905_v51  ;;  %v3737_v42 = vmul.f32 -1.442695, %v6460_v10 }
 0x3a7   :  { %v3909_v53 = vpop.eup %3908  ;;  %3928 = vpow2.f32 %v3733_v52  ;;  %v3106_v56 = vadd.f32 1.0, %v3907_v37  ;;  %v3738_v52 = vmul.f32 -1.442695, %v6464_v59 }
 0x3a8   :  { %v3911_v11 = vpop.eup %3910  ;;  %3930 = vpow2.f32 %v3734_v43  ;;  %3377 = vrot.lane.b32.xlu1 %v3909_v53, %s4065_s2 }
 0x3a9   :  { %v3913_v29 = vpop.eup %3912  ;;  %3932 = vrcp.f32 %v3104_v45  ;;  %3375 = vrot.lane.b32.xlu0 %v3911_v11, %s4065_s2 }
 0x3aa   :  { %v3915_v3 = vpop.eup %3914  ;;  %3934 = vrcp.f32 %v3103_v50  ;;  %v3107_v37 = vadd.f32 1.0, %v3913_v29  ;;  %v3739_v50 = vmul.f32 -1.442695, %v6468_v60 }
 0x3ab   :  { %v3917_v5 = vpop.eup %3916  ;;  %3936 = vpow2.f32 %v3735_v24  ;;  %v3108_v43 = vadd.f32 1.0, %v3915_v3  ;;  %v3740_v24 = vmul.f32 -1.442695, %v6472_v54 }
 0x3ac   :  { %v3919_v48 = vpop.eup %3918  ;;  %3938 = vpow2.f32 %v3736_v18  ;;  %3381 = vrot.lane.b32.xlu1 %v3917_v5, %s4065_s2 }
 0x3ad   :  { %v3921_v44 = vpop.eup %3920  ;;  %3940 = vrcp.f32 %v3106_v56  ;;  %3379 = vrot.lane.b32.xlu0 %v3919_v48, %s4065_s2 }
 0x3ae   :  { %v3923_v45 = vpop.eup %3922  ;;  %3942 = vrcp.f32 %v3105_v9  ;;  %v3109_v3 = vadd.f32 1.0, %v3921_v44  ;;  %v3741_v9 = vmul.f32 -1.442695, %v6476_v20 }
 0x3af   :  { %v3925_v51 = vpop.eup %3924  ;;  %3944 = vpow2.f32 %v3737_v42  ;;  %v3110_v18 = vadd.f32 1.0, %v3923_v45  ;;  %v3742_v42 = vmul.f32 -1.442695, %v6480_v1 }
 0x3b0   :  { %v3927_v53 = vpop.eup %3926  ;;  %3946 = vpow2.f32 %v3738_v52  ;;  %3385 = vrot.lane.b32.xlu1 %v3925_v51, %s4065_s2 }
 0x3b1   :  { %v3929_v11 = vpop.eup %3928  ;;  %3948 = vrcp.f32 %v3108_v43  ;;  %3383 = vrot.lane.b32.xlu0 %v3927_v53, %s4065_s2 }
 0x3b2   :  { %v3931_v56 = vpop.eup %3930  ;;  %3950 = vrcp.f32 %v3107_v37  ;;  %v3111_v45 = vadd.f32 1.0, %v3929_v11  ;;  %v7127_v37 = vld [vmem:[#allocation18_spill] sm:$0xff] }
 0x3b3   :  { %v3933_v29 = vpop.eup %3932  ;;  %3952 = vpow2.f32 %v3739_v50  ;;  %v3112_v52 = vadd.f32 1.0, %v3931_v56  ;;  %v3743_v51 = vmul.f32 -1.442695, %v7127_v37  ;;  %v7128_v50 = vld [vmem:[#allocation19_spill] sm:$0xff] }
 0x3b4   :  { %v3935_v5 = vpop.eup %3934  ;;  %3954 = vpow2.f32 %v3740_v24  ;;  %3389 = vrot.lane.b32.xlu1 %v3933_v29, %s4065_s2  ;;  %v3744_v20 = vmul.f32 -1.442695, %v7128_v50 }
 0x3b5   :  { %v3937_v48 = vpop.eup %3936  ;;  %3956 = vrcp.f32 %v3110_v18  ;;  %3387 = vrot.lane.b32.xlu0 %v3935_v5, %s4065_s2 }
 0x3b6   :  { %v3939_v43 = vpop.eup %3938  ;;  %3958 = vrcp.f32 %v3109_v3  ;;  %v3113_v56 = vadd.f32 1.0, %v3937_v48  ;;  %v7129_v3 = vld [vmem:[#allocation20_spill] sm:$0xff] }
 0x3b7   :  { %v3941_v44 = vpop.eup %3940  ;;  %3960 = vpow2.f32 %v3741_v9  ;;  %v3114_v29 = vadd.f32 1.0, %v3939_v43  ;;  %v3745_v5 = vmul.f32 -1.442695, %v7129_v3  ;;  %v7130_v9 = vld [vmem:[#allocation21_spill] sm:$0xff] }
 0x3b8   :  { %v3943_v53 = vpop.eup %3942  ;;  %3962 = vpow2.f32 %v3742_v42  ;;  %3393 = vrot.lane.b32.xlu1 %v3941_v44, %s4065_s2  ;;  %v3746_v1 = vmul.f32 -1.442695, %v7130_v9 }
 0x3b9   :  { %v3945_v24 = vpop.eup %3944  ;;  %3964 = vrcp.f32 %v3112_v52  ;;  %3391 = vrot.lane.b32.xlu0 %v3943_v53, %s4065_s2  ;;  %v7131_v53 = vld [vmem:[#allocation22_spill] sm:$0xff] }
 0x3ba   :  { %v3947_v18 = vpop.eup %3946  ;;  %3966 = vrcp.f32 %v3111_v45  ;;  %v3115_v43 = vadd.f32 1.0, %v3945_v24  ;;  %v3747_v3 = vmul.f32 -1.442695, %v7131_v53 }
 0x3bb   :  { %v3949_v11 = vpop.eup %3948  ;;  %3968 = vpow2.f32 %v3743_v51  ;;  %v3116_v44 = vadd.f32 1.0, %v3947_v18 }
 0x3bc   :  { %v3951_v37 = vpop.eup %3950  ;;  %3970 = vpow2.f32 %v3744_v20  ;;  %3397 = vrot.lane.b32.xlu1 %v3949_v11, %s4065_s2  ;;  %v3748_v20 = vmul.f32 -1.442695, %v6504_v40  ;;  %v3750_v11 = vmul.f32 -1.442695, %v6512_v47 }
 0x3bd   :  { %v3953_v42 = vpop.eup %3952  ;;  %3972 = vrcp.f32 %v3114_v29  ;;  %3395 = vrot.lane.b32.xlu0 %v3951_v37, %s4065_s2 }
 0x3be   :  { %v3955_v52 = vpop.eup %3954  ;;  %3974 = vrcp.f32 %v3113_v56  ;;  %v3117_v24 = vadd.f32 1.0, %v3953_v42  ;;  %v3749_v56 = vmul.f32 -1.442695, %v6508_v49 }
 0x3bf   :  { %v3957_v45 = vpop.eup %3956  ;;  %3976 = vpow2.f32 %v3745_v5  ;;  %v3118_v18 = vadd.f32 1.0, %v3955_v52 }
 0x3c0   :  { %v3959_v9 = vpop.eup %3958  ;;  %3978 = vpow2.f32 %v3746_v1  ;;  %3401 = vrot.lane.b32.xlu1 %v3957_v45, %s4065_s2 }
 0x3c1   :  { %v3961_v29 = vpop.eup %3960  ;;  %3980 = vrcp.f32 %v3116_v44  ;;  %3399 = vrot.lane.b32.xlu0 %v3959_v9, %s4065_s2 }
 0x3c2   :  { %v3963_v37 = vpop.eup %3962  ;;  %3982 = vrcp.f32 %v3115_v43  ;;  %v3119_v52 = vadd.f32 1.0, %v3961_v29 }
 0x3c3   :  { %3984 = vpow2.f32 %v3747_v3  ;;  %v3120_v9 = vadd.f32 1.0, %v3963_v37 }
 0x3c4   :  { %3986 = vpow2.f32 %v3748_v20 }
 0x3c5   :  { %3988 = vrcp.f32 %v3118_v18 }
 0x3c6   :  { %3990 = vrcp.f32 %v3117_v24  ;;  %v3753_v24 = vmul.f32 -1.442695, %v6524_v63 }
 0x3c7   :  { %3992 = vpow2.f32 %v3749_v56  ;;  %v7132_v56 = vld [vmem:[#allocation23_spill] sm:$0xff] }
 0x3c8   :  { %3994 = vpow2.f32 %v3750_v11 }
 0x3e1   :  { %v3334_v48 = vpop.permute.xlu1 %3333 }
 0x3e2   :  { %v3524_v51 = vmul.f32 %v3334_v48, %v6304_v4  ;;  %v3965_v4 = vpop.eup %3964  ;;  %v3332_v42 = vpop.permute.xlu0 %3331  ;;  %v3751_v48 = vmul.f32 -1.442695, %v6516_v26  ;;  %3996 = vrcp.f32 %v3120_v9 }
 0x3e3   :  { %v3967_v1 = vpop.eup %3966  ;;  %3405 = vrot.lane.b32.xlu1 %v3965_v4, %s4065_s2  ;;  %v3523_v3 = vmul.f32 %v3332_v42, %v6300_v22  ;;  %3998 = vrcp.f32 %v3119_v52  ;;  %v7133_v52 = vld [vmem:[#allocation24_spill] sm:$0xff] }
 0x3e4   :  { %3589 = vst.msk [vmem:[%s7002_s4 + $0x8] sm:$0xff] %vm3587_vm10, %v3524_v51  ;;  %v3969_v5 = vpop.eup %3968  ;;  %3403 = vrot.lane.b32.xlu0 %v3967_v1, %s4065_s2  ;;  %v3752_v51 = vmul.f32 -1.442695, %v6520_v23  ;;  %4000 = vpow2.f32 %v3751_v48  ;;  %v3754_v1 = vmul.f32 -1.442695, %v7132_v56  ;;  %v7134_v48 = vld [vmem:[#allocation25_spill] sm:$0xff] }
 0x3e5   :  { %v3971_v44 = vpop.eup %3970  ;;  %3588 = vst.msk [vmem:[%s7002_s4] sm:$0xff] %vm3587_vm10, %v3523_v3  ;;  %v3121_v37 = vadd.f32 1.0, %v3969_v5 }
 0x3e6   :  { %v3973_v43 = vpop.eup %3972  ;;  %v3122_v18 = vadd.f32 1.0, %v3971_v44  ;;  %4002 = vpow2.f32 %v3752_v51 }
 0x3e7   :  { %v3975_v45 = vpop.eup %3974  ;;  %3409 = vrot.lane.b32.xlu1 %v3973_v43, %s4065_s2  ;;  %v3755_v43 = vmul.f32 -1.442695, %v7133_v52 }
 0x3e8   :  { %v3977_v20 = vpop.eup %3976  ;;  %3407 = vrot.lane.b32.xlu0 %v3975_v45, %s4065_s2  ;;  %4004 = vrcp.f32 %v3122_v18  ;;  %v3756_v45 = vmul.f32 -1.442695, %v7134_v48 }
 0x3e9   :  { %v3979_v29 = vpop.eup %3978  ;;  %v3123_v42 = vadd.f32 1.0, %v3977_v20  ;;  %4006 = vrcp.f32 %v3121_v37  ;;  %v7135_v37 = vld [vmem:[#allocation2_spill] sm:$0xff] }
 0x3ea   :  { %v3981_v22 = vpop.eup %3980  ;;  %v3124_v9 = vadd.f32 1.0, %v3979_v29  ;;  %4008 = vpow2.f32 %v3753_v24  ;;  %v3758_v24 = vmul.f32 -1.442695, %v6544_v6 }
 0x3eb   :  { %v3983_v4 = vpop.eup %3982  ;;  %3413 = vrot.lane.b32.xlu1 %v3981_v22, %s4065_s2  ;;  %4010 = vpow2.f32 %v3754_v1 }
 0x3ec   :  { %v3985_v11 = vpop.eup %3984  ;;  %3411 = vrot.lane.b32.xlu0 %v3983_v4, %s4065_s2  ;;  %4012 = vrcp.f32 %v3124_v9  ;;  %v3757_v4 = vmul.f32 -1.442695, %v7135_v37 }
 0x3ed   :  { %v3987_v44 = vpop.eup %3986  ;;  %v3125_v29 = vadd.f32 1.0, %v3985_v11  ;;  %4014 = vrcp.f32 %v3123_v42  ;;  %v7136_v42 = vld [vmem:[#allocation26_spill] sm:$0xff] }
 0x3ee   :  { %v3989_v5 = vpop.eup %3988  ;;  %v3126_v22 = vadd.f32 1.0, %v3987_v44  ;;  %4016 = vpow2.f32 %v3755_v43  ;;  %v3759_v43 = vmul.f32 -1.442695, %v6548_v32 }
 0x3ef   :  { %v3991_v3 = vpop.eup %3990  ;;  %3417 = vrot.lane.b32.xlu1 %v3989_v5, %s4065_s2  ;;  %4018 = vpow2.f32 %v3756_v45 }
 0x3f0   :  { %v3993_v51 = vpop.eup %3992  ;;  %3415 = vrot.lane.b32.xlu0 %v3991_v3, %s4065_s2  ;;  %4020 = vrcp.f32 %v3126_v22  ;;  %v3760_v3 = vmul.f32 -1.442695, %v7136_v42 }
 0x3f1   :  { %v3995_v18 = vpop.eup %3994  ;;  %v3127_v44 = vadd.f32 1.0, %v3993_v51  ;;  %4022 = vrcp.f32 %v3125_v29 }
 0x3f2   :  { %v3997_v20 = vpop.eup %3996  ;;  %v3128_v5 = vadd.f32 1.0, %v3995_v18  ;;  %4024 = vpow2.f32 %v3757_v4 }
 0x3f3   :  { %v3999_v52 = vpop.eup %3998  ;;  %3421 = vrot.lane.b32.xlu1 %v3997_v20, %s4065_s2  ;;  %4026 = vpow2.f32 %v3758_v24 }
 0x3f4   :  { %v4001_v1 = vpop.eup %4000  ;;  %3419 = vrot.lane.b32.xlu0 %v3999_v52, %s4065_s2  ;;  %4028 = vrcp.f32 %v3128_v5 }
 0x3f5   :  { %v4003_v9 = vpop.eup %4002  ;;  %v3129_v52 = vadd.f32 1.0, %v4001_v1  ;;  %4030 = vrcp.f32 %v3127_v44 }
 0x3f6   :  { %v4005_v11 = vpop.eup %4004  ;;  %v3130_v20 = vadd.f32 1.0, %v4003_v9  ;;  %4032 = vpow2.f32 %v3760_v3 }
 0x3f7   :  { %v4007_v37 = vpop.eup %4006  ;;  %3425 = vrot.lane.b32.xlu1 %v4005_v11, %s4065_s2  ;;  %4034 = vpow2.f32 %v3759_v43 }
 0x3f8   :  { %v4009_v45 = vpop.eup %4008  ;;  %3423 = vrot.lane.b32.xlu0 %v4007_v37, %s4065_s2  ;;  %4036 = vrcp.f32 %v3130_v20 }
 0x3f9   :  { %v4011_v22 = vpop.eup %4010  ;;  %v3131_v11 = vadd.f32 1.0, %v4009_v45  ;;  %4038 = vrcp.f32 %v3129_v52 }
 0x3fa   :  { %v4013_v51 = vpop.eup %4012  ;;  %v3132_v4 = vadd.f32 1.0, %v4011_v22 }
 0x3fb   :  { %v4015_v18 = vpop.eup %4014  ;;  %3429 = vrot.lane.b32.xlu1 %v4013_v51, %s4065_s2 }
 0x3fc   :  { %v4017_v29 = vpop.eup %4016  ;;  %3427 = vrot.lane.b32.xlu0 %v4015_v18, %s4065_s2  ;;  %4040 = vrcp.f32 %v3132_v4 }
 0x3fd   :  { %v4019_v24 = vpop.eup %4018  ;;  %v3133_v3 = vadd.f32 1.0, %v4017_v29  ;;  %4042 = vrcp.f32 %v3131_v11 }
 0x3fe   :  { %v4021_v5 = vpop.eup %4020  ;;  %v3134_v1 = vadd.f32 1.0, %v4019_v24 }
 0x3ff   :  { %v4023_v9 = vpop.eup %4022  ;;  %3433 = vrot.lane.b32.xlu1 %v4021_v5, %s4065_s2 }
 0x400   :  { %v4025_v37 = vpop.eup %4024  ;;  %3431 = vrot.lane.b32.xlu0 %v4023_v9, %s4065_s2  ;;  %4044 = vrcp.f32 %v3134_v1  ;;  %v3338_v1 = vpop.permute.xlu1 %3337 }
 0x401   :  { %v4027_v44 = vpop.eup %4026  ;;  %v3135_v52 = vadd.f32 1.0, %v4025_v37  ;;  %4046 = vrcp.f32 %v3133_v3  ;;  %v3526_v3 = vmul.f32 %v3338_v1, %v6312_v41 }
 0x402   :  { %v4029_v43 = vpop.eup %4028  ;;  %v3136_v51 = vadd.f32 1.0, %v4027_v44 }
 0x403   :  { %v4031_v22 = vpop.eup %4030  ;;  %3437 = vrot.lane.b32.xlu1 %v4029_v43, %s4065_s2  ;;  %v3336_v43 = vpop.permute.xlu0 %3335  ;;  %3591 = vst.msk [vmem:[%s7002_s4 + $0x18] sm:$0xff] %vm3587_vm10, %v3526_v3 }
 0x404   :  { %v4033_v20 = vpop.eup %4032  ;;  %3435 = vrot.lane.b32.xlu0 %v4031_v22, %s4065_s2  ;;  %4048 = vrcp.f32 %v3136_v51  ;;  %v3342_v51 = vpop.permute.xlu1 %3341 }
 0x405   :  { %v4035_v45 = vpop.eup %4034  ;;  %v3138_v4 = vadd.f32 1.0, %v4033_v20  ;;  %4050 = vrcp.f32 %v3135_v52  ;;  %v3525_v20 = vmul.f32 %v3336_v43, %v6308_v39 }
 0x406   :  { %v4037_v18 = vpop.eup %4036  ;;  %v3137_v29 = vadd.f32 1.0, %v4035_v45  ;;  %v7137_v45 = vld [vmem:[#allocation9_spill] sm:$0xff] }
 0x407   :  { %v4039_v24 = vpop.eup %4038  ;;  %3441 = vrot.lane.b32.xlu1 %v4037_v18, %s4065_s2  ;;  %4052 = vrcp.f32 %v3138_v4  ;;  %3590 = vst.msk [vmem:[%s7002_s4 + $0x10] sm:$0xff] %vm3587_vm10, %v3525_v20  ;;  %v3528_v52 = vmul.f32 %v3342_v51, %v7137_v45  ;;  %v3340_v18 = vpop.permute.xlu0 %3339  ;;  %v7142_v51 = vld [vmem:[#allocation14_spill] sm:$0xff] }
 0x408   :  { %3439 = vrot.lane.b32.xlu0 %v4039_v24, %s4065_s2  ;;  %v4041_v11 = vpop.eup %4040  ;;  %4054 = vrcp.f32 %v3137_v29  ;;  %v7138_v24 = vld [vmem:[#allocation8_spill] sm:$0xff]  ;;  %v3346_v29 = vpop.permute.xlu1 %3345 }
 0x409   :  { %v4043_v5 = vpop.eup %4042  ;;  %v3527_v4 = vmul.f32 %v3340_v18, %v7138_v24  ;;  %3593 = vst.msk [vmem:[%s7002_s4 + $0x28] sm:$0xff] %vm3587_vm10, %v3528_v52  ;;  %v7143_v52 = vld [vmem:[#allocation13_spill] sm:$0xff] }
 0x40a   :  { %v4045_v9 = vpop.eup %4044 }
 0x40b   :  { %3445 = vrot.lane.b32.xlu1 %v4041_v11, %s4065_s2  ;;  %v4047_v37 = vpop.eup %4046  ;;  %3592 = vst.msk [vmem:[%s7002_s4 + $0x20] sm:$0xff] %vm3587_vm10, %v3527_v4  ;;  %v7139_v11 = vld [vmem:[#allocation10_spill] sm:$0xff] }
 0x40c   :  { %3443 = vrot.lane.b32.xlu0 %v4043_v5, %s4065_s2  ;;  %v3530_v5 = vmul.f32 %v3346_v29, %v7139_v11  ;;  %v3350_v1 = vpop.permute.xlu1 %3349 }
 0x40e   :  { %v4049_v44 = vpop.eup %4048  ;;  %3595 = vst.msk [vmem:[%s7002_s4 + $0x38] sm:$0xff] %vm3587_vm10, %v3530_v5 }
 0x40f   :  { %3449 = vrot.lane.b32.xlu1 %v4045_v9, %s4065_s2  ;;  %v4051_v22 = vpop.eup %4050  ;;  %v3344_v9 = vpop.permute.xlu0 %3343 }
 0x410   :  { %3447 = vrot.lane.b32.xlu0 %v4047_v37, %s4065_s2  ;;  %v3529_v37 = vmul.f32 %v3344_v9, %v6324_v25  ;;  %v3354_v25 = vpop.permute.xlu1 %3353 }
 0x411   :  { %v4053_v41 = vpop.eup %4052 }
 0x412   :  { %v4055_v39 = vpop.eup %4054  ;;  %3594 = vst.msk [vmem:[%s7002_s4 + $0x30] sm:$0xff] %vm3587_vm10, %v3529_v37  ;;  %v7144_v37 = vld [vmem:[#allocation15_spill] sm:$0xff] }
 0x413   :  { %3453 = vrot.lane.b32.xlu1 %v4049_v44, %s4065_s2  ;;  %v7140_v44 = vld [vmem:[#allocation12_spill] sm:$0xff]  ;;  %v3348_v43 = vpop.permute.xlu0 %3347 }
 0x414   :  { %3451 = vrot.lane.b32.xlu0 %v4051_v22, %s4065_s2  ;;  %v3532_v3 = vmul.f32 %v3350_v1, %v7140_v44  ;;  %v7141_v22 = vld [vmem:[#allocation11_spill] sm:$0xff] }
 0x415   :  { %v3531_v20 = vmul.f32 %v3348_v43, %v7141_v22 }
 0x416   :  { %3597 = vst.msk [vmem:[%s7002_s4 + $0x48] sm:$0xff] %vm3587_vm10, %v3532_v3 }
 0x417   :  { %3457 = vrot.lane.b32.xlu1 %v4053_v41, %s4065_s2  ;;  %3596 = vst.msk [vmem:[%s7002_s4 + $0x40] sm:$0xff] %vm3587_vm10, %v3531_v20  ;;  %v3534_v41 = vmul.f32 %v3354_v25, %v7142_v51  ;;  %v3352_v45 = vpop.permute.xlu0 %3351 }
 0x418   :  { %3455 = vrot.lane.b32.xlu0 %v4055_v39, %s4065_s2  ;;  %v3533_v18 = vmul.f32 %v3352_v45, %v7143_v52  ;;  %v3358_v39 = vpop.permute.xlu1 %3357 }
 0x419   :  { %3599 = vst.msk [vmem:[%s7002_s4 + $0x58] sm:$0xff] %vm3587_vm10, %v3534_v41  ;;  %v3536_v24 = vmul.f32 %v3358_v39, %v6352_v27 }
 0x41a   :  { %3598 = vst.msk [vmem:[%s7002_s4 + $0x50] sm:$0xff] %vm3587_vm10, %v3533_v18 }
 0x41b   :  { %v3356_v4 = vpop.permute.xlu0 %3355  ;;  %3601 = vst.msk [vmem:[%s7002_s4 + $0x68] sm:$0xff] %vm3587_vm10, %v3536_v24 }
 0x41c   :  { %v3535_v29 = vmul.f32 %v3356_v4, %v6348_v7  ;;  %v3362_v11 = vpop.permute.xlu1 %3361 }
 0x41d   :  { %v3538_v5 = vmul.f32 %v3362_v11, %v6360_v46 }
 0x41e   :  { %3600 = vst.msk [vmem:[%s7002_s4 + $0x60] sm:$0xff] %vm3587_vm10, %v3535_v29 }
 0x41f   :  { %v3360_v9 = vpop.permute.xlu0 %3359  ;;  %3603 = vst.msk [vmem:[%s7002_s4 + $0x78] sm:$0xff] %vm3587_vm10, %v3538_v5 }
 0x420   :  { %v3537_v1 = vmul.f32 %v3360_v9, %v7144_v37  ;;  %v3366_v7 = vpop.permute.xlu1 %3365 }
 0x421   :  { %v3540_v27 = vmul.f32 %v3366_v7, %v6368_v57 }
 0x422   :  { %3602 = vst.msk [vmem:[%s7002_s4 + $0x70] sm:$0xff] %vm3587_vm10, %v3537_v1 }
 0x423   :  { %v3364_v44 = vpop.permute.xlu0 %3363  ;;  %3605 = vst.msk [vmem:[%s7002_s4 + $0x88] sm:$0xff] %vm3587_vm10, %v3540_v27 }
 0x424   :  { %v3539_v3 = vmul.f32 %v3364_v44, %v6364_v14  ;;  %v3370_v46 = vpop.permute.xlu1 %3369 }
 0x425   :  { %v3542_v43 = vmul.f32 %v3370_v46, %v6376_v35 }
 0x426   :  { %3604 = vst.msk [vmem:[%s7002_s4 + $0x80] sm:$0xff] %vm3587_vm10, %v3539_v3 }
 0x427   :  { %v3368_v22 = vpop.permute.xlu0 %3367  ;;  %3607 = vst.msk [vmem:[%s7002_s4 + $0x98] sm:$0xff] %vm3587_vm10, %v3542_v43 }
 0x428   :  { %v3541_v20 = vmul.f32 %v3368_v22, %v6372_v17  ;;  %v3374_v14 = vpop.permute.xlu1 %3373 }
 0x429   :  { %v3544_v57 = vmul.f32 %v3374_v14, %v6384_v55 }
 0x42a   :  { %3606 = vst.msk [vmem:[%s7002_s4 + $0x90] sm:$0xff] %vm3587_vm10, %v3541_v20 }
 0x42b   :  { %v3372_v25 = vpop.permute.xlu0 %3371  ;;  %3609 = vst.msk [vmem:[%s7002_s4 + $0xa8] sm:$0xff] %vm3587_vm10, %v3544_v57 }
 0x42c   :  { %v3543_v51 = vmul.f32 %v3372_v25, %v6380_v21  ;;  %v3378_v17 = vpop.permute.xlu1 %3377 }
 0x42d   :  { %v3546_v35 = vmul.f32 %v3378_v17, %v6392_v58 }
 0x42e   :  { %3608 = vst.msk [vmem:[%s7002_s4 + $0xa0] sm:$0xff] %vm3587_vm10, %v3543_v51  ;;  %v7146_v51 = vld [vmem:[#allocation16_spill] sm:$0xff] }
 0x42f   :  { %v3376_v41 = vpop.permute.xlu0 %3375  ;;  %3611 = vst.msk [vmem:[%s7002_s4 + $0xb8] sm:$0xff] %vm3587_vm10, %v3546_v35 }
 0x430   :  { %v3545_v45 = vmul.f32 %v3376_v41, %v6388_v61  ;;  %v3382_v21 = vpop.permute.xlu1 %3381  ;;  %v7147_v41 = vld [vmem:[#allocation18_spill] sm:$0xff] }
 0x431   :  { %v3548_v55 = vmul.f32 %v3382_v21, %v6400_v30 }
 0x432   :  { %3610 = vst.msk [vmem:[%s7002_s4 + $0xb0] sm:$0xff] %vm3587_vm10, %v3545_v45 }
 0x433   :  { %v3380_v52 = vpop.permute.xlu0 %3379  ;;  %3613 = vst.msk [vmem:[%s7002_s4 + $0xc8] sm:$0xff] %vm3587_vm10, %v3548_v55  ;;  %v7148_v55 = vld [vmem:[#allocation21_spill] sm:$0xff] }
 0x434   :  { %v3547_v18 = vmul.f32 %v3380_v52, %v6396_v33  ;;  %v3386_v61 = vpop.permute.xlu1 %3385 }
 0x435   :  { %v3550_v58 = vmul.f32 %v3386_v61, %v6408_v15  ;;  %v7149_v61 = vld [vmem:[#allocation20_spill] sm:$0xff] }
 0x436   :  { %3612 = vst.msk [vmem:[%s7002_s4 + $0xc0] sm:$0xff] %vm3587_vm10, %v3547_v18 }
 0x437   :  { %v3384_v39 = vpop.permute.xlu0 %3383  ;;  %3615 = vst.msk [vmem:[%s7002_s4 + $0xd8] sm:$0xff] %vm3587_vm10, %v3550_v58 }
 0x438   :  { %v3549_v24 = vmul.f32 %v3384_v39, %v6404_v16  ;;  %v3390_v33 = vpop.permute.xlu1 %3389 }
 0x439   :  { %v3552_v30 = vmul.f32 %v3390_v33, %v6416_v0 }
 0x43a   :  { %3614 = vst.msk [vmem:[%s7002_s4 + $0xd0] sm:$0xff] %vm3587_vm10, %v3549_v24 }
 0x43b   :  { %v3388_v4 = vpop.permute.xlu0 %3387  ;;  %3617 = vst.msk [vmem:[%s7002_s4 + $0xe8] sm:$0xff] %vm3587_vm10, %v3552_v30 }
 0x43c   :  { %v3551_v29 = vmul.f32 %v3388_v4, %v6412_v31  ;;  %v3394_v16 = vpop.permute.xlu1 %3393 }
 0x43d   :  { %v3554_v15 = vmul.f32 %v3394_v16, %v6424_v38 }
 0x43e   :  { %3616 = vst.msk [vmem:[%s7002_s4 + $0xe0] sm:$0xff] %vm3587_vm10, %v3551_v29 }
 0x43f   :  { %v3392_v11 = vpop.permute.xlu0 %3391  ;;  %3619 = vst.msk [vmem:[%s7002_s4 + $0xf8] sm:$0xff] %vm3587_vm10, %v3554_v15 }
 0x440   :  { %v3553_v5 = vmul.f32 %v3392_v11, %v6420_v19  ;;  %v3398_v31 = vpop.permute.xlu1 %3397 }
 0x441   :  { %v3556_v0 = vmul.f32 %v3398_v31, %v6432_v36 }
 0x442   :  { %3618 = vst.msk [vmem:[%s7002_s4 + $0xf0] sm:$0xff] %vm3587_vm10, %v3553_v5 }
 0x443   :  { %v3396_v9 = vpop.permute.xlu0 %3395  ;;  %3621 = vst.msk [vmem:[%s7002_s4 + $0x108] sm:$0xff] %vm3587_vm10, %v3556_v0 }
 0x444   :  { %v3555_v37 = vmul.f32 %v3396_v9, %v6428_v2  ;;  %v3402_v19 = vpop.permute.xlu1 %3401  ;;  %v7150_v9 = vld [vmem:[#allocation24_spill] sm:$0xff] }
 0x445   :  { %v3558_v38 = vmul.f32 %v3402_v19, %v6440_v28 }
 0x446   :  { %3620 = vst.msk [vmem:[%s7002_s4 + $0x100] sm:$0xff] %vm3587_vm10, %v3555_v37 }
 0x447   :  { %v3400_v1 = vpop.permute.xlu0 %3399  ;;  %3623 = vst.msk [vmem:[%s7002_s4 + $0x118] sm:$0xff] %vm3587_vm10, %v3558_v38  ;;  %v7151_v38 = vld [vmem:[#allocation2_spill] sm:$0xff] }
 0x448   :  { %v3557_v7 = vmul.f32 %v3400_v1, %v6436_v62 }
 0x44a   :  { %3622 = vst.msk [vmem:[%s7002_s4 + $0x110] sm:$0xff] %vm3587_vm10, %v3557_v7 }
 0x455   :  { %v3406_v2 = vpop.permute.xlu1 %3405 }
 0x456   :  { %v3560_v36 = vmul.f32 %v3406_v2, %v6448_v8  ;;  %v3404_v27 = vpop.permute.xlu0 %3403 }
 0x457   :  { %v3559_v44 = vmul.f32 %v3404_v27, %v6444_v13 }
 0x458   :  { %3625 = vst.msk [vmem:[%s7002_s4 + $0x128] sm:$0xff] %vm3587_vm10, %v3560_v36 }
 0x459   :  { %3624 = vst.msk [vmem:[%s7002_s4 + $0x120] sm:$0xff] %vm3587_vm10, %v3559_v44  ;;  %v3410_v62 = vpop.permute.xlu1 %3409 }
 0x45a   :  { %v3562_v28 = vmul.f32 %v3410_v62, %v6456_v34  ;;  %v3408_v3 = vpop.permute.xlu0 %3407 }
 0x45b   :  { %v3561_v46 = vmul.f32 %v3408_v3, %v6452_v12 }
 0x45c   :  { %3627 = vst.msk [vmem:[%s7002_s4 + $0x138] sm:$0xff] %vm3587_vm10, %v3562_v28 }
 0x45d   :  { %3626 = vst.msk [vmem:[%s7002_s4 + $0x130] sm:$0xff] %vm3587_vm10, %v3561_v46  ;;  %v3414_v13 = vpop.permute.xlu1 %3413 }
 0x45e   :  { %v3564_v8 = vmul.f32 %v3414_v13, %v6464_v59  ;;  %v3412_v43 = vpop.permute.xlu0 %3411  ;;  %v7145_v59 = vld [vmem:[#allocation17_spill] sm:$0xff] }
 0x45f   :  { %v3563_v22 = vmul.f32 %v3412_v43, %v6460_v10 }
 0x460   :  { %3629 = vst.msk [vmem:[%s7002_s4 + $0x148] sm:$0xff] %vm3587_vm10, %v3564_v8 }
 0x461   :  { %3628 = vst.msk [vmem:[%s7002_s4 + $0x140] sm:$0xff] %vm3587_vm10, %v3563_v22  ;;  %v3418_v12 = vpop.permute.xlu1 %3417 }
 0x462   :  { %v3566_v34 = vmul.f32 %v3418_v12, %v6472_v54  ;;  %v3416_v20 = vpop.permute.xlu0 %3415 }
 0x463   :  { %v3565_v14 = vmul.f32 %v3416_v20, %v6468_v60 }
 0x464   :  { %3631 = vst.msk [vmem:[%s7002_s4 + $0x158] sm:$0xff] %vm3587_vm10, %v3566_v34 }
 0x465   :  { %3630 = vst.msk [vmem:[%s7002_s4 + $0x150] sm:$0xff] %vm3587_vm10, %v3565_v14  ;;  %v3422_v10 = vpop.permute.xlu1 %3421 }
 0x466   :  { %v3568_v57 = vmul.f32 %v3422_v10, %v7145_v59  ;;  %v3420_v25 = vpop.permute.xlu0 %3419 }
 0x467   :  { %v3567_v17 = vmul.f32 %v3420_v25, %v7146_v51 }
 0x468   :  { %3633 = vst.msk [vmem:[%s7002_s4 + $0x168] sm:$0xff] %vm3587_vm10, %v3568_v57 }
 0x469   :  { %3632 = vst.msk [vmem:[%s7002_s4 + $0x160] sm:$0xff] %vm3587_vm10, %v3567_v17  ;;  %v3426_v60 = vpop.permute.xlu1 %3425 }
 0x46a   :  { %v3570_v54 = vmul.f32 %v3426_v60, %v7128_v50  ;;  %v3424_v35 = vpop.permute.xlu0 %3423 }
 0x46b   :  { %v3569_v45 = vmul.f32 %v3424_v35, %v7147_v41 }
 0x46c   :  { %3635 = vst.msk [vmem:[%s7002_s4 + $0x178] sm:$0xff] %vm3587_vm10, %v3570_v54 }
 0x46d   :  { %3634 = vst.msk [vmem:[%s7002_s4 + $0x170] sm:$0xff] %vm3587_vm10, %v3569_v45  ;;  %v3430_v21 = vpop.permute.xlu1 %3429 }
 0x46e   :  { %v3572_v52 = vmul.f32 %v3430_v21, %v7148_v55  ;;  %v3428_v18 = vpop.permute.xlu0 %3427 }
 0x46f   :  { %v3571_v58 = vmul.f32 %v3428_v18, %v7149_v61 }
 0x470   :  { %3637 = vst.msk [vmem:[%s7002_s4 + $0x188] sm:$0xff] %vm3587_vm10, %v3572_v52 }
 0x471   :  { %3636 = vst.msk [vmem:[%s7002_s4 + $0x180] sm:$0xff] %vm3587_vm10, %v3571_v58  ;;  %v3434_v50 = vpop.permute.xlu1 %3433 }
 0x472   :  { %v3574_v39 = vmul.f32 %v3434_v50, %v6504_v40  ;;  %v3432_v24 = vpop.permute.xlu0 %3431 }
 0x473   :  { %v3573_v33 = vmul.f32 %v3432_v24, %v7131_v53 }
 0x474   :  { %3639 = vst.msk [vmem:[%s7002_s4 + $0x198] sm:$0xff] %vm3587_vm10, %v3574_v39 }
 0x475   :  { %3638 = vst.msk [vmem:[%s7002_s4 + $0x190] sm:$0xff] %vm3587_vm10, %v3573_v33  ;;  %v3438_v30 = vpop.permute.xlu1 %3437 }
 0x476   :  { %v3576_v4 = vmul.f32 %v3438_v30, %v6512_v47  ;;  %v3436_v29 = vpop.permute.xlu0 %3435 }
 0x477   :  { %v3575_v16 = vmul.f32 %v3436_v29, %v6508_v49 }
 0x478   :  { %3641 = vst.msk [vmem:[%s7002_s4 + $0x1a8] sm:$0xff] %vm3587_vm10, %v3576_v4 }
 0x479   :  { %3640 = vst.msk [vmem:[%s7002_s4 + $0x1a0] sm:$0xff] %vm3587_vm10, %v3575_v16  ;;  %v3442_v40 = vpop.permute.xlu1 %3441 }
 0x47a   :  { %v3578_v53 = vmul.f32 %v3442_v40, %v6520_v23  ;;  %v3440_v15 = vpop.permute.xlu0 %3439 }
 0x47b   :  { %v3577_v11 = vmul.f32 %v3440_v15, %v6516_v26 }
 0x47c   :  { %3643 = vst.msk [vmem:[%s7002_s4 + $0x1b8] sm:$0xff] %vm3587_vm10, %v3578_v53 }
 0x47d   :  { %3642 = vst.msk [vmem:[%s7002_s4 + $0x1b0] sm:$0xff] %vm3587_vm10, %v3577_v11  ;;  %v3446_v49 = vpop.permute.xlu1 %3445 }
 0x47e   :  { %v3580_v47 = vmul.f32 %v3446_v49, %v7132_v56  ;;  %v3444_v5 = vpop.permute.xlu0 %3443 }
 0x47f   :  { %v3579_v31 = vmul.f32 %v3444_v5, %v6524_v63 }
 0x480   :  { %3645 = vst.msk [vmem:[%s7002_s4 + $0x1c8] sm:$0xff] %vm3587_vm10, %v3580_v47 }
 0x481   :  { %3644 = vst.msk [vmem:[%s7002_s4 + $0x1c0] sm:$0xff] %vm3587_vm10, %v3579_v31  ;;  %v3450_v26 = vpop.permute.xlu1 %3449 }
 0x482   :  { %v3582_v23 = vmul.f32 %v3450_v26, %v7134_v48  ;;  %v3448_v0 = vpop.permute.xlu0 %3447 }
 0x483   :  { %v3581_v37 = vmul.f32 %v3448_v0, %v7150_v9 }
 0x484   :  { %3647 = vst.msk [vmem:[%s7002_s4 + $0x1d8] sm:$0xff] %vm3587_vm10, %v3582_v23 }
 0x485   :  { %3646 = vst.msk [vmem:[%s7002_s4 + $0x1d0] sm:$0xff] %vm3587_vm10, %v3581_v37  ;;  %v3454_v63 = vpop.permute.xlu1 %3453 }
 0x486   :  { %v3584_v56 = vmul.f32 %v3454_v63, %v6544_v6  ;;  %v3452_v19 = vpop.permute.xlu0 %3451 }
 0x487   :  { %v3583_v1 = vmul.f32 %v3452_v19, %v7151_v38 }
 0x488   :  { %3649 = vst.msk [vmem:[%s7002_s4 + $0x1e8] sm:$0xff] %vm3587_vm10, %v3584_v56 }
 0x489   :  { %3648 = vst.msk [vmem:[%s7002_s4 + $0x1e0] sm:$0xff] %vm3587_vm10, %v3583_v1  ;;  %v3458_v48 = vpop.permute.xlu1 %3457 }
 0x48a   :  { %v3586_v7 = vmul.f32 %v3458_v48, %v7136_v42  ;;  %v3456_v2 = vpop.permute.xlu0 %3455 }
 0x48b   :  { %v3585_v36 = vmul.f32 %v3456_v2, %v6548_v32 }
 0x48c   :  { %3651 = vst.msk [vmem:[%s7002_s4 + $0x1f8] sm:$0xff] %vm3587_vm10, %v3586_v7 }
 0x48d   :  { %3650 = vst.msk [vmem:[%s7002_s4 + $0x1f0] sm:$0xff] %vm3587_vm10, %v3585_v36 }

</bundles_post_ra>
